<compile_context>
chip_gen: v6e
topology: v6e:2x2x1
jax: 0.10.0
libtpu: 0.0.40
codegen_flags: <defaults>
</compile_context>

<pallas_src>
import functools

import jax
import jax.numpy as jnp
import numpy as np
from jax.experimental import pallas as pl
from jax.experimental.pallas import tpu as pltpu

N_EMB = 128
N_HEAD = 16
HEAD_SIZE = N_EMB // N_HEAD          # 8
CONTEXT_LEN = 16
FF_HIDDEN = N_EMB * N_HEAD           # 2048
LN_EPS = 1e-5

# ----------------- host-side constant packing masks (built once) -----------------
_T = CONTEXT_LEN
_NT = N_HEAD * _T
_c_idx = np.arange(N_EMB)
_j_idx = np.arange(_NT)
# channel/head packing masks (0/1 -> exact in bf16)
_HM = (_c_idx[:, None] // HEAD_SIZE == _j_idx[None, :] // _T).astype(np.float32)   # (C, NT)
_VM = np.ascontiguousarray(_HM.T)                                                  # (NT, C)
# one-hot replication matrices (replace the 16-way concats with tiny matmuls)
_R = (np.arange(_T)[:, None] == (_j_idx[None, :] % _T)).astype(np.float32)         # (T, NT)
_R2 = np.ascontiguousarray(_R.T)                                                   # (NT, T)
# per-head column-sum + head->channel expansion (softmax denominators)
_HSUM = (_j_idx[:, None] // _T == np.arange(N_HEAD)[None, :]).astype(np.float32)   # (NT, H)
_HEXP = (np.arange(N_HEAD)[:, None] == _c_idx[None, :] // HEAD_SIZE).astype(np.float32)  # (H, C)
# additive causal bias, precomputed (0 where allowed, -1e30 where masked)
_CBIAS = np.where(np.arange(_T)[:, None] >= (_j_idx[None, :] % _T),
                  0.0, -1e30).astype(np.float32)                                   # (T, NT)


def _layernorm(x, gamma, beta):
    mu = jnp.mean(x, axis=-1, keepdims=True)
    var = jnp.mean((x - mu) ** 2, axis=-1, keepdims=True)
    return (x - mu) * jax.lax.rsqrt(var + LN_EPS) * gamma + beta


def block_kernel(bblk, t,
                 x_ref,
                 hm_ref, vm_ref, r_ref, r2_ref, hsum_ref, hexp_ref, bias_ref,
                 ln1g_ref, ln1b_ref,
                 wqkv_ref, wproj_ref, bproj_ref,
                 ln2g_ref, ln2b_ref,
                 w1_ref, b1_ref, w2_ref, b2_ref,
                 out_ref,
                 attn_scr):
    # x_ref holds bblk batch elements folded into rows: (bblk*t, C)
    x = x_ref[...]
    M, C = x.shape

    # ---- LayerNorm 1 (f32) -> bf16 operand for the MXU ----
    xln1 = _layernorm(x, ln1g_ref[...], ln1b_ref[...]).astype(jnp.bfloat16)

    # ---- fused QKV projection: one (M, 3C) matmul, lane-aligned slices ----
    qkv = jnp.dot(xln1, wqkv_ref[...], preferred_element_type=jnp.float32)  # (M, 3C)
    q = qkv[:, :C].astype(jnp.bfloat16)            # scale C**-0.5 already folded into Wq
    k = qkv[:, C:2 * C].astype(jnp.bfloat16)
    v = qkv[:, 2 * C:].astype(jnp.bfloat16)

    kT = k.T                                        # (C, M) bf16, one transpose per step

    hm = hm_ref[...]                                # (C, NT)  bf16 head-channel mask
    vm = vm_ref[...]                                # (NT, C)  bf16 transpose of hm
    r = r_ref[...]                                  # (T, NT)  bf16 one-hot tiler
    r2 = r2_ref[...]                                # (NT, T)  bf16 = r.T
    bias = bias_ref[...]                            # (T, NT)  f32 additive causal bias

    for b in range(bblk):                           # attention stays per batch element
        r0 = b * t
        qb = q[r0:r0 + t, :]                        # (t, C)  bf16
        kbt = kT[:, r0:r0 + t]                      # (C, t)  bf16
        vb = v[r0:r0 + t, :]                        # (t, C)  bf16

        # Block-diagonal K' / V' built with replication matmuls (MXU) + mask (VPU).
        kp = (jnp.dot(kbt, r, preferred_element_type=jnp.float32)
              .astype(jnp.bfloat16) * hm)           # (C, NT)
        vp = (jnp.dot(r2, vb, preferred_element_type=jnp.float32)
              .astype(jnp.bfloat16) * vm)           # (NT, C)

        s = jnp.dot(qb, kp, preferred_element_type=jnp.float32) + bias   # (t, NT)
        smax = jnp.max(s, axis=-1, keepdims=True)   # global row max; shift cancels per head
        e = jnp.exp(s - smax)                       # f32; causally-masked cols -> exactly 0

        # per-head denominators, broadcast back to channels (two tiny f32 matmuls)
        den_h = jnp.dot(e, hsum_ref[...], preferred_element_type=jnp.float32)    # (t, H)
        den = jnp.dot(den_h, hexp_ref[...], preferred_element_type=jnp.float32)  # (t, C)

        # unnormalized head-concat output, then one exact f32 divide on (t, C)
        o_un = jnp.dot(e.astype(jnp.bfloat16), vp,
                       preferred_element_type=jnp.float32)                        # (t, C)
        attn_scr[r0:r0 + t, :] = (o_un / den).astype(jnp.bfloat16)

    # ---- output projection + residual 1 ----
    sa = jnp.dot(attn_scr[...], wproj_ref[...],
                 preferred_element_type=jnp.float32) + bproj_ref[...]
    x1 = x + sa

    # ---- LayerNorm 2 + FeedForward (bf16 matmul operands, f32 accumulate) ----
    xln2 = _layernorm(x1, ln2g_ref[...], ln2b_ref[...]).astype(jnp.bfloat16)
    h1 = jnp.dot(xln2, w1_ref[...],
                 preferred_element_type=jnp.float32) + b1_ref[...]
    h1 = jnp.maximum(h1, 0.0).astype(jnp.bfloat16)                     # ReLU
    ff = jnp.dot(h1, w2_ref[...],
                 preferred_element_type=jnp.float32) + b2_ref[...]

    out_ref[...] = (x1 + ff).astype(out_ref.dtype)                     # residual 2


@functools.partial(jax.jit, static_argnames=("block_b",))
def block_forward(x, params, block_b=8):
    """block_b*T rows per grid step.

    block_b=8 -> M=128 (fills the v5e 128x128 MXU, even grid of 2 at B=16 so
    both v7x TensorCores get work). Use block_b=16 (M=256) on v6e.
    """
    B, T, C = x.shape
    assert C == N_EMB and T <= CONTEXT_LEN
    assert (block_b * T) % 16 == 0      # bf16 scratch sublane tiling

    bblk = min(block_b, B)
    b_pad = -(-B // bblk) * bblk
    if b_pad != B:
        x = jnp.pad(x, ((0, b_pad - B), (0, 0), (0, 0)))

    M = bblk * T
    NT = N_HEAD * T

    # Fold batch into rows outside the kernel (free XLA reshape).
    x2 = x.reshape(b_pad * T, C)

    # Weights to bf16 (halves DMA; MXU-native on v5e/v6e/v7x); fold score scale into Wq.
    wqkv = jnp.concatenate(
        [params["wq"] * (C ** -0.5), params["wk"], params["wv"]],
        axis=1).astype(jnp.bfloat16)                                   # (C, 3C)
    wproj = params["wproj"].astype(jnp.bfloat16)
    w1 = params["w1"].astype(jnp.bfloat16)
    w2 = params["w2"].astype(jnp.bfloat16)

    # Constant masks (0/1 exact in bf16; causal bias stays f32 since it adds to f32 scores).
    hm = jnp.asarray(_HM[:, :NT], jnp.bfloat16)
    vm = jnp.asarray(_VM[:NT, :], jnp.bfloat16)
    rr = jnp.asarray(_R[:T, :NT], jnp.bfloat16)
    rr2 = jnp.asarray(_R2[:NT, :T], jnp.bfloat16)
    hsum = jnp.asarray(_HSUM[:NT, :], jnp.float32)
    hexp = jnp.asarray(_HEXP, jnp.float32)
    cbias = jnp.asarray(_CBIAS[:T, :NT], jnp.float32)

    const = lambda shape: pl.BlockSpec(shape, lambda i: (0, 0))

    in_specs = [
        pl.BlockSpec((M, C), lambda i: (i, 0)),            # x (folded rows)
        const((C, NT)), const((NT, C)),                    # hm, vm
        const((T, NT)), const((NT, T)),                    # R, R^T
        const((NT, N_HEAD)), const((N_HEAD, C)),           # hsum, hexp
        const((T, NT)),                                    # causal bias
        const((1, C)), const((1, C)),                      # ln1 gamma, beta
        const((C, 3 * C)),                                 # fused Wqkv
        const((C, C)), const((1, C)),                      # Wproj, bproj
        const((1, C)), const((1, C)),                      # ln2 gamma, beta
        const((C, FF_HIDDEN)), const((1, FF_HIDDEN)),      # W1, b1
        const((FF_HIDDEN, C)), const((1, C)),              # W2, b2
    ]

    kernel = functools.partial(block_kernel, bblk, T)

    out2 = pl.pallas_call(
        kernel,
        out_shape=jax.ShapeDtypeStruct((b_pad * T, C), jnp.float32),
        grid=(b_pad // bblk,),
        in_specs=in_specs,
        out_specs=pl.BlockSpec((M, C), lambda i: (i, 0)),
        scratch_shapes=[pltpu.VMEM((M, C), jnp.bfloat16)],   # attention slab (bf16)
        compiler_params=pltpu.CompilerParams(
            dimension_semantics=("parallel",),
            vmem_limit_bytes=32 << 20,      # working set ~6 MiB; v7x-safe, v5e raise
        ),
    )(x2,
      hm, vm, rr, rr2, hsum, hexp, cbias,
      params["ln1_g"], params["ln1_b"],
      wqkv, wproj, params["bproj"],
      params["ln2_g"], params["ln2_b"],
      w1, params["b1"], w2, params["b2"])

    return out2.reshape(b_pad, T, C)[:B]


# ----------------- plain-JAX f32 reference (for correctness check) -----------------
def block_reference(x, p):
    def ln(v, g, b):
        mu = jnp.mean(v, -1, keepdims=True)
        var = jnp.mean((v - mu) ** 2, -1, keepdims=True)
        return (v - mu) * jax.lax.rsqrt(var + LN_EPS) * g + b

    B, T, C = x.shape
    xln1 = ln(x, p["ln1_g"], p["ln1_b"])
    q = xln1 @ p["wq"]
    k = xln1 @ p["wk"]
    v = xln1 @ p["wv"]
    q = q.reshape(B, T, N_HEAD, HEAD_SIZE).transpose(0, 2, 1, 3)
    k = k.reshape(B, T, N_HEAD, HEAD_SIZE).transpose(0, 2, 1, 3)
    v = v.reshape(B, T, N_HEAD, HEAD_SIZE).transpose(0, 2, 1, 3)
    wei = (q @ k.transpose(0, 1, 3, 2)) * (C ** -0.5)
    mask = jnp.tril(jnp.ones((T, T), bool))
    wei = jnp.where(mask, wei, -jnp.inf)
    wei = jax.nn.softmax(wei, axis=-1)
    attn = (wei @ v).transpose(0, 2, 1, 3).reshape(B, T, C)
    x1 = x + attn @ p["wproj"] + p["bproj"]
    xln2 = ln(x1, p["ln2_g"], p["ln2_b"])
    ff = jnp.maximum(xln2 @ p["w1"] + p["b1"], 0.0) @ p["w2"] + p["b2"]
    return x1 + ff


def init_params(key):
    ks = jax.random.split(key, 10)

    def lin(k, fan_in, shape):
        bound = 1.0 / jnp.sqrt(fan_in)
        return jax.random.uniform(k, shape, jnp.float32, -bound, bound)

    C, H = N_EMB, FF_HIDDEN
    return {
        "ln1_g": jnp.ones((1, C), jnp.float32),
        "ln1_b": jnp.zeros((1, C), jnp.float32),
        "wq": lin(ks[0], C, (C, C)),
        "wk": lin(ks[1], C, (C, C)),
        "wv": lin(ks[2], C, (C, C)),
        "wproj": lin(ks[3], C, (C, C)),
        "bproj": lin(ks[4], C, (1, C)),
        "ln2_g": jnp.ones((1, C), jnp.float32),
        "ln2_b": jnp.zeros((1, C), jnp.float32),
        "w1": lin(ks[5], C, (C, H)),
        "b1": lin(ks[6], C, (1, H)),
        "w2": lin(ks[7], H, (H, C)),
        "b2": lin(ks[8], H, (1, C)),
    }


if __name__ == "__main__":
    key = jax.random.PRNGKey(0)
    pkey, xkey = jax.random.split(key)
    params = init_params(pkey)

    # B=16 exercises batch folding: bblk=8 -> grid=(2,), M=128 rows per step.
    B, T, C = 16, CONTEXT_LEN, N_EMB
    x = jax.random.normal(xkey, (B, T, C), jnp.float32)

    out = jax.block_until_ready(block_forward(x, params))
    ref = jax.block_until_ready(block_reference(x, params))

    assert out.shape == (B, T, C)
    err = float(jnp.max(jnp.abs(out - ref)))
    # Matmul operands are bf16 (MXU-native) with f32 accumulation, so parity vs.
    # the full-f32 reference is ~1e-2 max-abs at these shapes; the softmax
    # normalization itself is an exact f32 divide (no approx reciprocal).
    assert jnp.allclose(out, ref, atol=3e-2, rtol=3e-2), err
    print("KERNEL_OK")
</pallas_src>

<mosaic_0001>
module attributes {stable_mosaic.version = 11 : i64} {
  func.func @block_kernel(%arg0: i32, %arg1: memref<128x128xf32, #tpu.memory_space<vmem>>, %arg2: memref<128x256xbf16, #tpu.memory_space<vmem>>, %arg3: memref<256x128xbf16, #tpu.memory_space<vmem>>, %arg4: memref<16x256xbf16, #tpu.memory_space<vmem>>, %arg5: memref<256x16xbf16, #tpu.memory_space<vmem>>, %arg6: memref<256x16xf32, #tpu.memory_space<vmem>>, %arg7: memref<16x128xf32, #tpu.memory_space<vmem>>, %arg8: memref<16x256xf32, #tpu.memory_space<vmem>>, %arg9: memref<1x128xf32, #tpu.memory_space<vmem>>, %arg10: memref<1x128xf32, #tpu.memory_space<vmem>>, %arg11: memref<128x384xbf16, #tpu.memory_space<vmem>>, %arg12: memref<128x128xbf16, #tpu.memory_space<vmem>>, %arg13: memref<1x128xf32, #tpu.memory_space<vmem>>, %arg14: memref<1x128xf32, #tpu.memory_space<vmem>>, %arg15: memref<1x128xf32, #tpu.memory_space<vmem>>, %arg16: memref<128x2048xbf16, #tpu.memory_space<vmem>>, %arg17: memref<1x2048xf32, #tpu.memory_space<vmem>>, %arg18: memref<2048x128xbf16, #tpu.memory_space<vmem>>, %arg19: memref<1x128xf32, #tpu.memory_space<vmem>>, %arg20: memref<128x128xf32, #tpu.memory_space<vmem>>, %arg21: memref<128x128xbf16, #tpu.memory_space<vmem>>) attributes {dimension_semantics = [#tpu.dimension_semantics<parallel>], iteration_bounds = array<i64: 2>, scalar_prefetch = 0 : i64, scratch_operands = 1 : i64, tpu.core_type = #tpu.core_type<tc>, window_params = [{transform_indices = @transform_0, window_bounds = array<i64: 128, 128>}, {pipeline_mode = #tpu.pipeline_mode<synchronous>, transform_indices = @transform_1, window_bounds = array<i64: 128, 256>}, {pipeline_mode = #tpu.pipeline_mode<synchronous>, transform_indices = @transform_2, window_bounds = array<i64: 256, 128>}, {pipeline_mode = #tpu.pipeline_mode<synchronous>, transform_indices = @transform_3, window_bounds = array<i64: 16, 256>}, {pipeline_mode = #tpu.pipeline_mode<synchronous>, transform_indices = @transform_4, window_bounds = array<i64: 256, 16>}, {pipeline_mode = #tpu.pipeline_mode<synchronous>, transform_indices = @transform_5, window_bounds = array<i64: 256, 16>}, {pipeline_mode = #tpu.pipeline_mode<synchronous>, transform_indices = @transform_6, window_bounds = array<i64: 16, 128>}, {pipeline_mode = #tpu.pipeline_mode<synchronous>, transform_indices = @transform_7, window_bounds = array<i64: 16, 256>}, {pipeline_mode = #tpu.pipeline_mode<synchronous>, transform_indices = @transform_8, window_bounds = array<i64: 1, 128>}, {pipeline_mode = #tpu.pipeline_mode<synchronous>, transform_indices = @transform_9, window_bounds = array<i64: 1, 128>}, {pipeline_mode = #tpu.pipeline_mode<synchronous>, transform_indices = @transform_10, window_bounds = array<i64: 128, 384>}, {pipeline_mode = #tpu.pipeline_mode<synchronous>, transform_indices = @transform_11, window_bounds = array<i64: 128, 128>}, {pipeline_mode = #tpu.pipeline_mode<synchronous>, transform_indices = @transform_12, window_bounds = array<i64: 1, 128>}, {pipeline_mode = #tpu.pipeline_mode<synchronous>, transform_indices = @transform_13, window_bounds = array<i64: 1, 128>}, {pipeline_mode = #tpu.pipeline_mode<synchronous>, transform_indices = @transform_14, window_bounds = array<i64: 1, 128>}, {pipeline_mode = #tpu.pipeline_mode<synchronous>, transform_indices = @transform_15, window_bounds = array<i64: 128, 2048>}, {pipeline_mode = #tpu.pipeline_mode<synchronous>, transform_indices = @transform_16, window_bounds = array<i64: 1, 2048>}, {pipeline_mode = #tpu.pipeline_mode<synchronous>, transform_indices = @transform_17, window_bounds = array<i64: 2048, 128>}, {pipeline_mode = #tpu.pipeline_mode<synchronous>, transform_indices = @transform_18, window_bounds = array<i64: 1, 128>}, {transform_indices = @transform_19, window_bounds = array<i64: 128, 128>}]} {
    %c0 = arith.constant 0 : index
    %c0_0 = arith.constant 0 : index
    %0 = vector.load %arg1[%c0, %c0_0] : memref<128x128xf32, #tpu.memory_space<vmem>>, vector<128x128xf32>
    %c0_1 = arith.constant 0 : index
    %c0_2 = arith.constant 0 : index
    %1 = vector.load %arg9[%c0_1, %c0_2] : memref<1x128xf32, #tpu.memory_space<vmem>>, vector<1x128xf32>
    %c0_3 = arith.constant 0 : index
    %c0_4 = arith.constant 0 : index
    %2 = vector.load %arg10[%c0_3, %c0_4] : memref<1x128xf32, #tpu.memory_space<vmem>>, vector<1x128xf32>
    %cst = arith.constant dense<0.000000e+00> : vector<128xf32>
    %3 = vector.multi_reduction <add>, %0, %cst [1] : vector<128x128xf32> to vector<128xf32>
    %4 = vector.shape_cast %3 : vector<128xf32> to vector<128x1xf32>
    %cst_5 = arith.constant 1.280000e+02 : f32
    %5 = vector.broadcast %cst_5 : f32 to vector<128x1xf32>
    %6 = arith.divf %4, %5 : vector<128x1xf32>
    %7 = vector.broadcast %6 : vector<128x1xf32> to vector<128x128xf32>
    %8 = arith.subf %0, %7 : vector<128x128xf32>
    %9 = arith.mulf %8, %8 : vector<128x128xf32>
    %cst_6 = arith.constant dense<0.000000e+00> : vector<128xf32>
    %10 = vector.multi_reduction <add>, %9, %cst_6 [1] : vector<128x128xf32> to vector<128xf32>
    %11 = vector.shape_cast %10 : vector<128xf32> to vector<128x1xf32>
    %cst_7 = arith.constant 1.280000e+02 : f32
    %12 = vector.broadcast %cst_7 : f32 to vector<128x1xf32>
    %13 = arith.divf %11, %12 : vector<128x1xf32>
    %14 = vector.broadcast %6 : vector<128x1xf32> to vector<128x128xf32>
    %15 = arith.subf %0, %14 : vector<128x128xf32>
    %cst_8 = arith.constant 9.99999974E-6 : f32
    %16 = vector.broadcast %cst_8 : f32 to vector<128x1xf32>
    %17 = arith.addf %13, %16 : vector<128x1xf32>
    %18 = math.rsqrt %17 : vector<128x1xf32>
    %19 = vector.broadcast %18 : vector<128x1xf32> to vector<128x128xf32>
    %20 = arith.mulf %15, %19 : vector<128x128xf32>
    %21 = vector.broadcast %1 : vector<1x128xf32> to vector<128x128xf32>
    %22 = arith.mulf %20, %21 : vector<128x128xf32>
    %23 = vector.broadcast %2 : vector<1x128xf32> to vector<128x128xf32>
    %24 = arith.addf %22, %23 : vector<128x128xf32>
    %25 = arith.truncf %24 : vector<128x128xf32> to vector<128x128xbf16>
    %c0_9 = arith.constant 0 : index
    %c0_10 = arith.constant 0 : index
    %26 = vector.load %arg11[%c0_9, %c0_10] : memref<128x384xbf16, #tpu.memory_space<vmem>>, vector<128x384xbf16>
    %cst_11 = arith.constant dense<0.000000e+00> : vector<128x384xf32>
    %27 = tpu.matmul %25, %26, %cst_11 {dimension_numbers = #tpu.dot_dimension_numbers<[1], [0], [0], [1], [0, 0, 1, 1], [], []>} : vector<128x128xbf16>, vector<128x384xbf16>, vector<128x384xf32> -> vector<128x384xf32>
    %28 = vector.extract_strided_slice %27 {offsets = [0, 0], sizes = [128, 128], strides = [1, 1]} : vector<128x384xf32> to vector<128x128xf32>
    %29 = arith.truncf %28 : vector<128x128xf32> to vector<128x128xbf16>
    %30 = vector.extract_strided_slice %27 {offsets = [0, 128], sizes = [128, 128], strides = [1, 1]} : vector<128x384xf32> to vector<128x128xf32>
    %31 = arith.truncf %30 : vector<128x128xf32> to vector<128x128xbf16>
    %32 = vector.extract_strided_slice %27 {offsets = [0, 256], sizes = [128, 128], strides = [1, 1]} : vector<128x384xf32> to vector<128x128xf32>
    %33 = arith.truncf %32 : vector<128x128xf32> to vector<128x128xbf16>
    %34 = tpu.transpose %31, [1, 0] : vector<128x128xbf16> -> vector<128x128xbf16>
    %c0_12 = arith.constant 0 : index
    %c0_13 = arith.constant 0 : index
    %35 = vector.load %arg2[%c0_12, %c0_13] : memref<128x256xbf16, #tpu.memory_space<vmem>>, vector<128x256xbf16>
    %c0_14 = arith.constant 0 : index
    %c0_15 = arith.constant 0 : index
    %36 = vector.load %arg3[%c0_14, %c0_15] : memref<256x128xbf16, #tpu.memory_space<vmem>>, vector<256x128xbf16>
    %c0_16 = arith.constant 0 : index
    %c0_17 = arith.constant 0 : index
    %37 = vector.load %arg4[%c0_16, %c0_17] : memref<16x256xbf16, #tpu.memory_space<vmem>>, vector<16x256xbf16>
    %c0_18 = arith.constant 0 : index
    %c0_19 = arith.constant 0 : index
    %38 = vector.load %arg5[%c0_18, %c0_19] : memref<256x16xbf16, #tpu.memory_space<vmem>>, vector<256x16xbf16>
    %c0_20 = arith.constant 0 : index
    %c0_21 = arith.constant 0 : index
    %39 = vector.load %arg8[%c0_20, %c0_21] : memref<16x256xf32, #tpu.memory_space<vmem>>, vector<16x256xf32>
    %40 = vector.extract_strided_slice %29 {offsets = [0, 0], sizes = [16, 128], strides = [1, 1]} : vector<128x128xbf16> to vector<16x128xbf16>
    %41 = vector.extract_strided_slice %34 {offsets = [0, 0], sizes = [128, 16], strides = [1, 1]} : vector<128x128xbf16> to vector<128x16xbf16>
    %42 = vector.extract_strided_slice %33 {offsets = [0, 0], sizes = [16, 128], strides = [1, 1]} : vector<128x128xbf16> to vector<16x128xbf16>
    %cst_22 = arith.constant dense<0.000000e+00> : vector<128x256xf32>
    %43 = tpu.matmul %41, %37, %cst_22 {dimension_numbers = #tpu.dot_dimension_numbers<[1], [0], [0], [1], [0, 0, 1, 1], [], []>} : vector<128x16xbf16>, vector<16x256xbf16>, vector<128x256xf32> -> vector<128x256xf32>
    %44 = arith.truncf %43 : vector<128x256xf32> to vector<128x256xbf16>
    %45 = arith.mulf %44, %35 : vector<128x256xbf16>
    %cst_23 = arith.constant dense<0.000000e+00> : vector<256x128xf32>
    %46 = tpu.matmul %38, %42, %cst_23 {dimension_numbers = #tpu.dot_dimension_numbers<[1], [0], [0], [1], [0, 0, 1, 1], [], []>} : vector<256x16xbf16>, vector<16x128xbf16>, vector<256x128xf32> -> vector<256x128xf32>
    %47 = arith.truncf %46 : vector<256x128xf32> to vector<256x128xbf16>
    %48 = arith.mulf %47, %36 : vector<256x128xbf16>
    %cst_24 = arith.constant dense<0.000000e+00> : vector<16x256xf32>
    %49 = tpu.matmul %40, %45, %cst_24 {dimension_numbers = #tpu.dot_dimension_numbers<[1], [0], [0], [1], [0, 0, 1, 1], [], []>} : vector<16x128xbf16>, vector<128x256xbf16>, vector<16x256xf32> -> vector<16x256xf32>
    %50 = arith.addf %49, %39 : vector<16x256xf32>
    %cst_25 = arith.constant dense<0xFF800000> : vector<16xf32>
    %51 = vector.multi_reduction <maximumf>, %50, %cst_25 [1] : vector<16x256xf32> to vector<16xf32>
    %52 = vector.shape_cast %51 : vector<16xf32> to vector<16x1xf32>
    %53 = vector.broadcast %52 : vector<16x1xf32> to vector<16x256xf32>
    %54 = arith.subf %50, %53 : vector<16x256xf32>
    %55 = math.exp %54 : vector<16x256xf32>
    %c0_26 = arith.constant 0 : index
    %c0_27 = arith.constant 0 : index
    %56 = vector.load %arg6[%c0_26, %c0_27] : memref<256x16xf32, #tpu.memory_space<vmem>>, vector<256x16xf32>
    %cst_28 = arith.constant dense<0.000000e+00> : vector<16x16xf32>
    %57 = tpu.matmul %55, %56, %cst_28 {dimension_numbers = #tpu.dot_dimension_numbers<[1], [0], [0], [1], [0, 0, 1, 1], [], []>} : vector<16x256xf32>, vector<256x16xf32>, vector<16x16xf32> -> vector<16x16xf32>
    %c0_29 = arith.constant 0 : index
    %c0_30 = arith.constant 0 : index
    %58 = vector.load %arg7[%c0_29, %c0_30] : memref<16x128xf32, #tpu.memory_space<vmem>>, vector<16x128xf32>
    %cst_31 = arith.constant dense<0.000000e+00> : vector<16x128xf32>
    %59 = tpu.matmul %57, %58, %cst_31 {dimension_numbers = #tpu.dot_dimension_numbers<[1], [0], [0], [1], [0, 0, 1, 1], [], []>} : vector<16x16xf32>, vector<16x128xf32>, vector<16x128xf32> -> vector<16x128xf32>
    %60 = arith.truncf %55 : vector<16x256xf32> to vector<16x256xbf16>
    %cst_32 = arith.constant dense<0.000000e+00> : vector<16x128xf32>
    %61 = tpu.matmul %60, %48, %cst_32 {dimension_numbers = #tpu.dot_dimension_numbers<[1], [0], [0], [1], [0, 0, 1, 1], [], []>} : vector<16x256xbf16>, vector<256x128xbf16>, vector<16x128xf32> -> vector<16x128xf32>
    %62 = arith.divf %61, %59 : vector<16x128xf32>
    %63 = arith.truncf %62 : vector<16x128xf32> to vector<16x128xbf16>
    %c0_33 = arith.constant 0 : index
    %c0_34 = arith.constant 0 : index
    %64 = vector.load %arg21[%c0_33, %c0_34] : memref<128x128xbf16, #tpu.memory_space<vmem>>, vector<16x128xbf16>
    tpu.vector_store %arg21[%c0_33, %c0_34], %63 {strides = array<i32>} : memref<128x128xbf16, #tpu.memory_space<vmem>>, vector<16x128xbf16>,
    %65 = vector.extract_strided_slice %29 {offsets = [16, 0], sizes = [16, 128], strides = [1, 1]} : vector<128x128xbf16> to vector<16x128xbf16>
    %66 = vector.extract_strided_slice %34 {offsets = [0, 16], sizes = [128, 16], strides = [1, 1]} : vector<128x128xbf16> to vector<128x16xbf16>
    %67 = vector.extract_strided_slice %33 {offsets = [16, 0], sizes = [16, 128], strides = [1, 1]} : vector<128x128xbf16> to vector<16x128xbf16>
    %cst_35 = arith.constant dense<0.000000e+00> : vector<128x256xf32>
    %68 = tpu.matmul %66, %37, %cst_35 {dimension_numbers = #tpu.dot_dimension_numbers<[1], [0], [0], [1], [0, 0, 1, 1], [], []>} : vector<128x16xbf16>, vector<16x256xbf16>, vector<128x256xf32> -> vector<128x256xf32>
    %69 = arith.truncf %68 : vector<128x256xf32> to vector<128x256xbf16>
    %70 = arith.mulf %69, %35 : vector<128x256xbf16>
    %cst_36 = arith.constant dense<0.000000e+00> : vector<256x128xf32>
    %71 = tpu.matmul %38, %67, %cst_36 {dimension_numbers = #tpu.dot_dimension_numbers<[1], [0], [0], [1], [0, 0, 1, 1], [], []>} : vector<256x16xbf16>, vector<16x128xbf16>, vector<256x128xf32> -> vector<256x128xf32>
    %72 = arith.truncf %71 : vector<256x128xf32> to vector<256x128xbf16>
    %73 = arith.mulf %72, %36 : vector<256x128xbf16>
    %cst_37 = arith.constant dense<0.000000e+00> : vector<16x256xf32>
    %74 = tpu.matmul %65, %70, %cst_37 {dimension_numbers = #tpu.dot_dimension_numbers<[1], [0], [0], [1], [0, 0, 1, 1], [], []>} : vector<16x128xbf16>, vector<128x256xbf16>, vector<16x256xf32> -> vector<16x256xf32>
    %75 = arith.addf %74, %39 : vector<16x256xf32>
    %cst_38 = arith.constant dense<0xFF800000> : vector<16xf32>
    %76 = vector.multi_reduction <maximumf>, %75, %cst_38 [1] : vector<16x256xf32> to vector<16xf32>
    %77 = vector.shape_cast %76 : vector<16xf32> to vector<16x1xf32>
    %78 = vector.broadcast %77 : vector<16x1xf32> to vector<16x256xf32>
    %79 = arith.subf %75, %78 : vector<16x256xf32>
    %80 = math.exp %79 : vector<16x256xf32>
    %c0_39 = arith.constant 0 : index
    %c0_40 = arith.constant 0 : index
    %81 = vector.load %arg6[%c0_39, %c0_40] : memref<256x16xf32, #tpu.memory_space<vmem>>, vector<256x16xf32>
    %cst_41 = arith.constant dense<0.000000e+00> : vector<16x16xf32>
    %82 = tpu.matmul %80, %81, %cst_41 {dimension_numbers = #tpu.dot_dimension_numbers<[1], [0], [0], [1], [0, 0, 1, 1], [], []>} : vector<16x256xf32>, vector<256x16xf32>, vector<16x16xf32> -> vector<16x16xf32>
    %c0_42 = arith.constant 0 : index
    %c0_43 = arith.constant 0 : index
    %83 = vector.load %arg7[%c0_42, %c0_43] : memref<16x128xf32, #tpu.memory_space<vmem>>, vector<16x128xf32>
    %cst_44 = arith.constant dense<0.000000e+00> : vector<16x128xf32>
    %84 = tpu.matmul %82, %83, %cst_44 {dimension_numbers = #tpu.dot_dimension_numbers<[1], [0], [0], [1], [0, 0, 1, 1], [], []>} : vector<16x16xf32>, vector<16x128xf32>, vector<16x128xf32> -> vector<16x128xf32>
    %85 = arith.truncf %80 : vector<16x256xf32> to vector<16x256xbf16>
    %cst_45 = arith.constant dense<0.000000e+00> : vector<16x128xf32>
    %86 = tpu.matmul %85, %73, %cst_45 {dimension_numbers = #tpu.dot_dimension_numbers<[1], [0], [0], [1], [0, 0, 1, 1], [], []>} : vector<16x256xbf16>, vector<256x128xbf16>, vector<16x128xf32> -> vector<16x128xf32>
    %87 = arith.divf %86, %84 : vector<16x128xf32>
    %88 = arith.truncf %87 : vector<16x128xf32> to vector<16x128xbf16>
    %c16 = arith.constant 16 : index
    %c0_46 = arith.constant 0 : index
    %89 = vector.load %arg21[%c16, %c0_46] : memref<128x128xbf16, #tpu.memory_space<vmem>>, vector<16x128xbf16>
    tpu.vector_store %arg21[%c16, %c0_46], %88 {strides = array<i32>} : memref<128x128xbf16, #tpu.memory_space<vmem>>, vector<16x128xbf16>,
    %90 = vector.extract_strided_slice %29 {offsets = [32, 0], sizes = [16, 128], strides = [1, 1]} : vector<128x128xbf16> to vector<16x128xbf16>
    %91 = vector.extract_strided_slice %34 {offsets = [0, 32], sizes = [128, 16], strides = [1, 1]} : vector<128x128xbf16> to vector<128x16xbf16>
    %92 = vector.extract_strided_slice %33 {offsets = [32, 0], sizes = [16, 128], strides = [1, 1]} : vector<128x128xbf16> to vector<16x128xbf16>
    %cst_47 = arith.constant dense<0.000000e+00> : vector<128x256xf32>
    %93 = tpu.matmul %91, %37, %cst_47 {dimension_numbers = #tpu.dot_dimension_numbers<[1], [0], [0], [1], [0, 0, 1, 1], [], []>} : vector<128x16xbf16>, vector<16x256xbf16>, vector<128x256xf32> -> vector<128x256xf32>
    %94 = arith.truncf %93 : vector<128x256xf32> to vector<128x256xbf16>
    %95 = arith.mulf %94, %35 : vector<128x256xbf16>
    %cst_48 = arith.constant dense<0.000000e+00> : vector<256x128xf32>
    %96 = tpu.matmul %38, %92, %cst_48 {dimension_numbers = #tpu.dot_dimension_numbers<[1], [0], [0], [1], [0, 0, 1, 1], [], []>} : vector<256x16xbf16>, vector<16x128xbf16>, vector<256x128xf32> -> vector<256x128xf32>
    %97 = arith.truncf %96 : vector<256x128xf32> to vector<256x128xbf16>
    %98 = arith.mulf %97, %36 : vector<256x128xbf16>
    %cst_49 = arith.constant dense<0.000000e+00> : vector<16x256xf32>
    %99 = tpu.matmul %90, %95, %cst_49 {dimension_numbers = #tpu.dot_dimension_numbers<[1], [0], [0], [1], [0, 0, 1, 1], [], []>} : vector<16x128xbf16>, vector<128x256xbf16>, vector<16x256xf32> -> vector<16x256xf32>
    %100 = arith.addf %99, %39 : vector<16x256xf32>
    %cst_50 = arith.constant dense<0xFF800000> : vector<16xf32>
    %101 = vector.multi_reduction <maximumf>, %100, %cst_50 [1] : vector<16x256xf32> to vector<16xf32>
    %102 = vector.shape_cast %101 : vector<16xf32> to vector<16x1xf32>
    %103 = vector.broadcast %102 : vector<16x1xf32> to vector<16x256xf32>
    %104 = arith.subf %100, %103 : vector<16x256xf32>
    %105 = math.exp %104 : vector<16x256xf32>
    %c0_51 = arith.constant 0 : index
    %c0_52 = arith.constant 0 : index
    %106 = vector.load %arg6[%c0_51, %c0_52] : memref<256x16xf32, #tpu.memory_space<vmem>>, vector<256x16xf32>
    %cst_53 = arith.constant dense<0.000000e+00> : vector<16x16xf32>
    %107 = tpu.matmul %105, %106, %cst_53 {dimension_numbers = #tpu.dot_dimension_numbers<[1], [0], [0], [1], [0, 0, 1, 1], [], []>} : vector<16x256xf32>, vector<256x16xf32>, vector<16x16xf32> -> vector<16x16xf32>
    %c0_54 = arith.constant 0 : index
    %c0_55 = arith.constant 0 : index
    %108 = vector.load %arg7[%c0_54, %c0_55] : memref<16x128xf32, #tpu.memory_space<vmem>>, vector<16x128xf32>
    %cst_56 = arith.constant dense<0.000000e+00> : vector<16x128xf32>
    %109 = tpu.matmul %107, %108, %cst_56 {dimension_numbers = #tpu.dot_dimension_numbers<[1], [0], [0], [1], [0, 0, 1, 1], [], []>} : vector<16x16xf32>, vector<16x128xf32>, vector<16x128xf32> -> vector<16x128xf32>
    %110 = arith.truncf %105 : vector<16x256xf32> to vector<16x256xbf16>
    %cst_57 = arith.constant dense<0.000000e+00> : vector<16x128xf32>
    %111 = tpu.matmul %110, %98, %cst_57 {dimension_numbers = #tpu.dot_dimension_numbers<[1], [0], [0], [1], [0, 0, 1, 1], [], []>} : vector<16x256xbf16>, vector<256x128xbf16>, vector<16x128xf32> -> vector<16x128xf32>
    %112 = arith.divf %111, %109 : vector<16x128xf32>
    %113 = arith.truncf %112 : vector<16x128xf32> to vector<16x128xbf16>
    %c32 = arith.constant 32 : index
    %c0_58 = arith.constant 0 : index
    %114 = vector.load %arg21[%c32, %c0_58] : memref<128x128xbf16, #tpu.memory_space<vmem>>, vector<16x128xbf16>
    tpu.vector_store %arg21[%c32, %c0_58], %113 {strides = array<i32>} : memref<128x128xbf16, #tpu.memory_space<vmem>>, vector<16x128xbf16>,
    %115 = vector.extract_strided_slice %29 {offsets = [48, 0], sizes = [16, 128], strides = [1, 1]} : vector<128x128xbf16> to vector<16x128xbf16>
    %116 = vector.extract_strided_slice %34 {offsets = [0, 48], sizes = [128, 16], strides = [1, 1]} : vector<128x128xbf16> to vector<128x16xbf16>
    %117 = vector.extract_strided_slice %33 {offsets = [48, 0], sizes = [16, 128], strides = [1, 1]} : vector<128x128xbf16> to vector<16x128xbf16>
    %cst_59 = arith.constant dense<0.000000e+00> : vector<128x256xf32>
    %118 = tpu.matmul %116, %37, %cst_59 {dimension_numbers = #tpu.dot_dimension_numbers<[1], [0], [0], [1], [0, 0, 1, 1], [], []>} : vector<128x16xbf16>, vector<16x256xbf16>, vector<128x256xf32> -> vector<128x256xf32>
    %119 = arith.truncf %118 : vector<128x256xf32> to vector<128x256xbf16>
    %120 = arith.mulf %119, %35 : vector<128x256xbf16>
    %cst_60 = arith.constant dense<0.000000e+00> : vector<256x128xf32>
    %121 = tpu.matmul %38, %117, %cst_60 {dimension_numbers = #tpu.dot_dimension_numbers<[1], [0], [0], [1], [0, 0, 1, 1], [], []>} : vector<256x16xbf16>, vector<16x128xbf16>, vector<256x128xf32> -> vector<256x128xf32>
    %122 = arith.truncf %121 : vector<256x128xf32> to vector<256x128xbf16>
    %123 = arith.mulf %122, %36 : vector<256x128xbf16>
    %cst_61 = arith.constant dense<0.000000e+00> : vector<16x256xf32>
    %124 = tpu.matmul %115, %120, %cst_61 {dimension_numbers = #tpu.dot_dimension_numbers<[1], [0], [0], [1], [0, 0, 1, 1], [], []>} : vector<16x128xbf16>, vector<128x256xbf16>, vector<16x256xf32> -> vector<16x256xf32>
    %125 = arith.addf %124, %39 : vector<16x256xf32>
    %cst_62 = arith.constant dense<0xFF800000> : vector<16xf32>
    %126 = vector.multi_reduction <maximumf>, %125, %cst_62 [1] : vector<16x256xf32> to vector<16xf32>
    %127 = vector.shape_cast %126 : vector<16xf32> to vector<16x1xf32>
    %128 = vector.broadcast %127 : vector<16x1xf32> to vector<16x256xf32>
    %129 = arith.subf %125, %128 : vector<16x256xf32>
    %130 = math.exp %129 : vector<16x256xf32>
    %c0_63 = arith.constant 0 : index
    %c0_64 = arith.constant 0 : index
    %131 = vector.load %arg6[%c0_63, %c0_64] : memref<256x16xf32, #tpu.memory_space<vmem>>, vector<256x16xf32>
    %cst_65 = arith.constant dense<0.000000e+00> : vector<16x16xf32>
    %132 = tpu.matmul %130, %131, %cst_65 {dimension_numbers = #tpu.dot_dimension_numbers<[1], [0], [0], [1], [0, 0, 1, 1], [], []>} : vector<16x256xf32>, vector<256x16xf32>, vector<16x16xf32> -> vector<16x16xf32>
    %c0_66 = arith.constant 0 : index
    %c0_67 = arith.constant 0 : index
    %133 = vector.load %arg7[%c0_66, %c0_67] : memref<16x128xf32, #tpu.memory_space<vmem>>, vector<16x128xf32>
    %cst_68 = arith.constant dense<0.000000e+00> : vector<16x128xf32>
    %134 = tpu.matmul %132, %133, %cst_68 {dimension_numbers = #tpu.dot_dimension_numbers<[1], [0], [0], [1], [0, 0, 1, 1], [], []>} : vector<16x16xf32>, vector<16x128xf32>, vector<16x128xf32> -> vector<16x128xf32>
    %135 = arith.truncf %130 : vector<16x256xf32> to vector<16x256xbf16>
    %cst_69 = arith.constant dense<0.000000e+00> : vector<16x128xf32>
    %136 = tpu.matmul %135, %123, %cst_69 {dimension_numbers = #tpu.dot_dimension_numbers<[1], [0], [0], [1], [0, 0, 1, 1], [], []>} : vector<16x256xbf16>, vector<256x128xbf16>, vector<16x128xf32> -> vector<16x128xf32>
    %137 = arith.divf %136, %134 : vector<16x128xf32>
    %138 = arith.truncf %137 : vector<16x128xf32> to vector<16x128xbf16>
    %c48 = arith.constant 48 : index
    %c0_70 = arith.constant 0 : index
    %139 = vector.load %arg21[%c48, %c0_70] : memref<128x128xbf16, #tpu.memory_space<vmem>>, vector<16x128xbf16>
    tpu.vector_store %arg21[%c48, %c0_70], %138 {strides = array<i32>} : memref<128x128xbf16, #tpu.memory_space<vmem>>, vector<16x128xbf16>,
    %140 = vector.extract_strided_slice %29 {offsets = [64, 0], sizes = [16, 128], strides = [1, 1]} : vector<128x128xbf16> to vector<16x128xbf16>
    %141 = vector.extract_strided_slice %34 {offsets = [0, 64], sizes = [128, 16], strides = [1, 1]} : vector<128x128xbf16> to vector<128x16xbf16>
    %142 = vector.extract_strided_slice %33 {offsets = [64, 0], sizes = [16, 128], strides = [1, 1]} : vector<128x128xbf16> to vector<16x128xbf16>
    %cst_71 = arith.constant dense<0.000000e+00> : vector<128x256xf32>
    %143 = tpu.matmul %141, %37, %cst_71 {dimension_numbers = #tpu.dot_dimension_numbers<[1], [0], [0], [1], [0, 0, 1, 1], [], []>} : vector<128x16xbf16>, vector<16x256xbf16>, vector<128x256xf32> -> vector<128x256xf32>
    %144 = arith.truncf %143 : vector<128x256xf32> to vector<128x256xbf16>
    %145 = arith.mulf %144, %35 : vector<128x256xbf16>
    %cst_72 = arith.constant dense<0.000000e+00> : vector<256x128xf32>
    %146 = tpu.matmul %38, %142, %cst_72 {dimension_numbers = #tpu.dot_dimension_numbers<[1], [0], [0], [1], [0, 0, 1, 1], [], []>} : vector<256x16xbf16>, vector<16x128xbf16>, vector<256x128xf32> -> vector<256x128xf32>
    %147 = arith.truncf %146 : vector<256x128xf32> to vector<256x128xbf16>
    %148 = arith.mulf %147, %36 : vector<256x128xbf16>
    %cst_73 = arith.constant dense<0.000000e+00> : vector<16x256xf32>
    %149 = tpu.matmul %140, %145, %cst_73 {dimension_numbers = #tpu.dot_dimension_numbers<[1], [0], [0], [1], [0, 0, 1, 1], [], []>} : vector<16x128xbf16>, vector<128x256xbf16>, vector<16x256xf32> -> vector<16x256xf32>
    %150 = arith.addf %149, %39 : vector<16x256xf32>
    %cst_74 = arith.constant dense<0xFF800000> : vector<16xf32>
    %151 = vector.multi_reduction <maximumf>, %150, %cst_74 [1] : vector<16x256xf32> to vector<16xf32>
    %152 = vector.shape_cast %151 : vector<16xf32> to vector<16x1xf32>
    %153 = vector.broadcast %152 : vector<16x1xf32> to vector<16x256xf32>
    %154 = arith.subf %150, %153 : vector<16x256xf32>
    %155 = math.exp %154 : vector<16x256xf32>
    %c0_75 = arith.constant 0 : index
    %c0_76 = arith.constant 0 : index
    %156 = vector.load %arg6[%c0_75, %c0_76] : memref<256x16xf32, #tpu.memory_space<vmem>>, vector<256x16xf32>
    %cst_77 = arith.constant dense<0.000000e+00> : vector<16x16xf32>
    %157 = tpu.matmul %155, %156, %cst_77 {dimension_numbers = #tpu.dot_dimension_numbers<[1], [0], [0], [1], [0, 0, 1, 1], [], []>} : vector<16x256xf32>, vector<256x16xf32>, vector<16x16xf32> -> vector<16x16xf32>
    %c0_78 = arith.constant 0 : index
    %c0_79 = arith.constant 0 : index
    %158 = vector.load %arg7[%c0_78, %c0_79] : memref<16x128xf32, #tpu.memory_space<vmem>>, vector<16x128xf32>
    %cst_80 = arith.constant dense<0.000000e+00> : vector<16x128xf32>
    %159 = tpu.matmul %157, %158, %cst_80 {dimension_numbers = #tpu.dot_dimension_numbers<[1], [0], [0], [1], [0, 0, 1, 1], [], []>} : vector<16x16xf32>, vector<16x128xf32>, vector<16x128xf32> -> vector<16x128xf32>
    %160 = arith.truncf %155 : vector<16x256xf32> to vector<16x256xbf16>
    %cst_81 = arith.constant dense<0.000000e+00> : vector<16x128xf32>
    %161 = tpu.matmul %160, %148, %cst_81 {dimension_numbers = #tpu.dot_dimension_numbers<[1], [0], [0], [1], [0, 0, 1, 1], [], []>} : vector<16x256xbf16>, vector<256x128xbf16>, vector<16x128xf32> -> vector<16x128xf32>
    %162 = arith.divf %161, %159 : vector<16x128xf32>
    %163 = arith.truncf %162 : vector<16x128xf32> to vector<16x128xbf16>
    %c64 = arith.constant 64 : index
    %c0_82 = arith.constant 0 : index
    %164 = vector.load %arg21[%c64, %c0_82] : memref<128x128xbf16, #tpu.memory_space<vmem>>, vector<16x128xbf16>
    tpu.vector_store %arg21[%c64, %c0_82], %163 {strides = array<i32>} : memref<128x128xbf16, #tpu.memory_space<vmem>>, vector<16x128xbf16>,
    %165 = vector.extract_strided_slice %29 {offsets = [80, 0], sizes = [16, 128], strides = [1, 1]} : vector<128x128xbf16> to vector<16x128xbf16>
    %166 = vector.extract_strided_slice %34 {offsets = [0, 80], sizes = [128, 16], strides = [1, 1]} : vector<128x128xbf16> to vector<128x16xbf16>
    %167 = vector.extract_strided_slice %33 {offsets = [80, 0], sizes = [16, 128], strides = [1, 1]} : vector<128x128xbf16> to vector<16x128xbf16>
    %cst_83 = arith.constant dense<0.000000e+00> : vector<128x256xf32>
    %168 = tpu.matmul %166, %37, %cst_83 {dimension_numbers = #tpu.dot_dimension_numbers<[1], [0], [0], [1], [0, 0, 1, 1], [], []>} : vector<128x16xbf16>, vector<16x256xbf16>, vector<128x256xf32> -> vector<128x256xf32>
    %169 = arith.truncf %168 : vector<128x256xf32> to vector<128x256xbf16>
    %170 = arith.mulf %169, %35 : vector<128x256xbf16>
    %cst_84 = arith.constant dense<0.000000e+00> : vector<256x128xf32>
    %171 = tpu.matmul %38, %167, %cst_84 {dimension_numbers = #tpu.dot_dimension_numbers<[1], [0], [0], [1], [0, 0, 1, 1], [], []>} : vector<256x16xbf16>, vector<16x128xbf16>, vector<256x128xf32> -> vector<256x128xf32>
    %172 = arith.truncf %171 : vector<256x128xf32> to vector<256x128xbf16>
    %173 = arith.mulf %172, %36 : vector<256x128xbf16>
    %cst_85 = arith.constant dense<0.000000e+00> : vector<16x256xf32>
    %174 = tpu.matmul %165, %170, %cst_85 {dimension_numbers = #tpu.dot_dimension_numbers<[1], [0], [0], [1], [0, 0, 1, 1], [], []>} : vector<16x128xbf16>, vector<128x256xbf16>, vector<16x256xf32> -> vector<16x256xf32>
    %175 = arith.addf %174, %39 : vector<16x256xf32>
    %cst_86 = arith.constant dense<0xFF800000> : vector<16xf32>
    %176 = vector.multi_reduction <maximumf>, %175, %cst_86 [1] : vector<16x256xf32> to vector<16xf32>
    %177 = vector.shape_cast %176 : vector<16xf32> to vector<16x1xf32>
    %178 = vector.broadcast %177 : vector<16x1xf32> to vector<16x256xf32>
    %179 = arith.subf %175, %178 : vector<16x256xf32>
    %180 = math.exp %179 : vector<16x256xf32>
    %c0_87 = arith.constant 0 : index
    %c0_88 = arith.constant 0 : index
    %181 = vector.load %arg6[%c0_87, %c0_88] : memref<256x16xf32, #tpu.memory_space<vmem>>, vector<256x16xf32>
    %cst_89 = arith.constant dense<0.000000e+00> : vector<16x16xf32>
    %182 = tpu.matmul %180, %181, %cst_89 {dimension_numbers = #tpu.dot_dimension_numbers<[1], [0], [0], [1], [0, 0, 1, 1], [], []>} : vector<16x256xf32>, vector<256x16xf32>, vector<16x16xf32> -> vector<16x16xf32>
    %c0_90 = arith.constant 0 : index
    %c0_91 = arith.constant 0 : index
    %183 = vector.load %arg7[%c0_90, %c0_91] : memref<16x128xf32, #tpu.memory_space<vmem>>, vector<16x128xf32>
    %cst_92 = arith.constant dense<0.000000e+00> : vector<16x128xf32>
    %184 = tpu.matmul %182, %183, %cst_92 {dimension_numbers = #tpu.dot_dimension_numbers<[1], [0], [0], [1], [0, 0, 1, 1], [], []>} : vector<16x16xf32>, vector<16x128xf32>, vector<16x128xf32> -> vector<16x128xf32>
    %185 = arith.truncf %180 : vector<16x256xf32> to vector<16x256xbf16>
    %cst_93 = arith.constant dense<0.000000e+00> : vector<16x128xf32>
    %186 = tpu.matmul %185, %173, %cst_93 {dimension_numbers = #tpu.dot_dimension_numbers<[1], [0], [0], [1], [0, 0, 1, 1], [], []>} : vector<16x256xbf16>, vector<256x128xbf16>, vector<16x128xf32> -> vector<16x128xf32>
    %187 = arith.divf %186, %184 : vector<16x128xf32>
    %188 = arith.truncf %187 : vector<16x128xf32> to vector<16x128xbf16>
    %c80 = arith.constant 80 : index
    %c0_94 = arith.constant 0 : index
    %189 = vector.load %arg21[%c80, %c0_94] : memref<128x128xbf16, #tpu.memory_space<vmem>>, vector<16x128xbf16>
    tpu.vector_store %arg21[%c80, %c0_94], %188 {strides = array<i32>} : memref<128x128xbf16, #tpu.memory_space<vmem>>, vector<16x128xbf16>,
    %190 = vector.extract_strided_slice %29 {offsets = [96, 0], sizes = [16, 128], strides = [1, 1]} : vector<128x128xbf16> to vector<16x128xbf16>
    %191 = vector.extract_strided_slice %34 {offsets = [0, 96], sizes = [128, 16], strides = [1, 1]} : vector<128x128xbf16> to vector<128x16xbf16>
    %192 = vector.extract_strided_slice %33 {offsets = [96, 0], sizes = [16, 128], strides = [1, 1]} : vector<128x128xbf16> to vector<16x128xbf16>
    %cst_95 = arith.constant dense<0.000000e+00> : vector<128x256xf32>
    %193 = tpu.matmul %191, %37, %cst_95 {dimension_numbers = #tpu.dot_dimension_numbers<[1], [0], [0], [1], [0, 0, 1, 1], [], []>} : vector<128x16xbf16>, vector<16x256xbf16>, vector<128x256xf32> -> vector<128x256xf32>
    %194 = arith.truncf %193 : vector<128x256xf32> to vector<128x256xbf16>
    %195 = arith.mulf %194, %35 : vector<128x256xbf16>
    %cst_96 = arith.constant dense<0.000000e+00> : vector<256x128xf32>
    %196 = tpu.matmul %38, %192, %cst_96 {dimension_numbers = #tpu.dot_dimension_numbers<[1], [0], [0], [1], [0, 0, 1, 1], [], []>} : vector<256x16xbf16>, vector<16x128xbf16>, vector<256x128xf32> -> vector<256x128xf32>
    %197 = arith.truncf %196 : vector<256x128xf32> to vector<256x128xbf16>
    %198 = arith.mulf %197, %36 : vector<256x128xbf16>
    %cst_97 = arith.constant dense<0.000000e+00> : vector<16x256xf32>
    %199 = tpu.matmul %190, %195, %cst_97 {dimension_numbers = #tpu.dot_dimension_numbers<[1], [0], [0], [1], [0, 0, 1, 1], [], []>} : vector<16x128xbf16>, vector<128x256xbf16>, vector<16x256xf32> -> vector<16x256xf32>
    %200 = arith.addf %199, %39 : vector<16x256xf32>
    %cst_98 = arith.constant dense<0xFF800000> : vector<16xf32>
    %201 = vector.multi_reduction <maximumf>, %200, %cst_98 [1] : vector<16x256xf32> to vector<16xf32>
    %202 = vector.shape_cast %201 : vector<16xf32> to vector<16x1xf32>
    %203 = vector.broadcast %202 : vector<16x1xf32> to vector<16x256xf32>
    %204 = arith.subf %200, %203 : vector<16x256xf32>
    %205 = math.exp %204 : vector<16x256xf32>
    %c0_99 = arith.constant 0 : index
    %c0_100 = arith.constant 0 : index
    %206 = vector.load %arg6[%c0_99, %c0_100] : memref<256x16xf32, #tpu.memory_space<vmem>>, vector<256x16xf32>
    %cst_101 = arith.constant dense<0.000000e+00> : vector<16x16xf32>
    %207 = tpu.matmul %205, %206, %cst_101 {dimension_numbers = #tpu.dot_dimension_numbers<[1], [0], [0], [1], [0, 0, 1, 1], [], []>} : vector<16x256xf32>, vector<256x16xf32>, vector<16x16xf32> -> vector<16x16xf32>
    %c0_102 = arith.constant 0 : index
    %c0_103 = arith.constant 0 : index
    %208 = vector.load %arg7[%c0_102, %c0_103] : memref<16x128xf32, #tpu.memory_space<vmem>>, vector<16x128xf32>
    %cst_104 = arith.constant dense<0.000000e+00> : vector<16x128xf32>
    %209 = tpu.matmul %207, %208, %cst_104 {dimension_numbers = #tpu.dot_dimension_numbers<[1], [0], [0], [1], [0, 0, 1, 1], [], []>} : vector<16x16xf32>, vector<16x128xf32>, vector<16x128xf32> -> vector<16x128xf32>
    %210 = arith.truncf %205 : vector<16x256xf32> to vector<16x256xbf16>
    %cst_105 = arith.constant dense<0.000000e+00> : vector<16x128xf32>
    %211 = tpu.matmul %210, %198, %cst_105 {dimension_numbers = #tpu.dot_dimension_numbers<[1], [0], [0], [1], [0, 0, 1, 1], [], []>} : vector<16x256xbf16>, vector<256x128xbf16>, vector<16x128xf32> -> vector<16x128xf32>
    %212 = arith.divf %211, %209 : vector<16x128xf32>
    %213 = arith.truncf %212 : vector<16x128xf32> to vector<16x128xbf16>
    %c96 = arith.constant 96 : index
    %c0_106 = arith.constant 0 : index
    %214 = vector.load %arg21[%c96, %c0_106] : memref<128x128xbf16, #tpu.memory_space<vmem>>, vector<16x128xbf16>
    tpu.vector_store %arg21[%c96, %c0_106], %213 {strides = array<i32>} : memref<128x128xbf16, #tpu.memory_space<vmem>>, vector<16x128xbf16>,
    %215 = vector.extract_strided_slice %29 {offsets = [112, 0], sizes = [16, 128], strides = [1, 1]} : vector<128x128xbf16> to vector<16x128xbf16>
    %216 = vector.extract_strided_slice %34 {offsets = [0, 112], sizes = [128, 16], strides = [1, 1]} : vector<128x128xbf16> to vector<128x16xbf16>
    %217 = vector.extract_strided_slice %33 {offsets = [112, 0], sizes = [16, 128], strides = [1, 1]} : vector<128x128xbf16> to vector<16x128xbf16>
    %cst_107 = arith.constant dense<0.000000e+00> : vector<128x256xf32>
    %218 = tpu.matmul %216, %37, %cst_107 {dimension_numbers = #tpu.dot_dimension_numbers<[1], [0], [0], [1], [0, 0, 1, 1], [], []>} : vector<128x16xbf16>, vector<16x256xbf16>, vector<128x256xf32> -> vector<128x256xf32>
    %219 = arith.truncf %218 : vector<128x256xf32> to vector<128x256xbf16>
    %220 = arith.mulf %219, %35 : vector<128x256xbf16>
    %cst_108 = arith.constant dense<0.000000e+00> : vector<256x128xf32>
    %221 = tpu.matmul %38, %217, %cst_108 {dimension_numbers = #tpu.dot_dimension_numbers<[1], [0], [0], [1], [0, 0, 1, 1], [], []>} : vector<256x16xbf16>, vector<16x128xbf16>, vector<256x128xf32> -> vector<256x128xf32>
    %222 = arith.truncf %221 : vector<256x128xf32> to vector<256x128xbf16>
    %223 = arith.mulf %222, %36 : vector<256x128xbf16>
    %cst_109 = arith.constant dense<0.000000e+00> : vector<16x256xf32>
    %224 = tpu.matmul %215, %220, %cst_109 {dimension_numbers = #tpu.dot_dimension_numbers<[1], [0], [0], [1], [0, 0, 1, 1], [], []>} : vector<16x128xbf16>, vector<128x256xbf16>, vector<16x256xf32> -> vector<16x256xf32>
    %225 = arith.addf %224, %39 : vector<16x256xf32>
    %cst_110 = arith.constant dense<0xFF800000> : vector<16xf32>
    %226 = vector.multi_reduction <maximumf>, %225, %cst_110 [1] : vector<16x256xf32> to vector<16xf32>
    %227 = vector.shape_cast %226 : vector<16xf32> to vector<16x1xf32>
    %228 = vector.broadcast %227 : vector<16x1xf32> to vector<16x256xf32>
    %229 = arith.subf %225, %228 : vector<16x256xf32>
    %230 = math.exp %229 : vector<16x256xf32>
    %c0_111 = arith.constant 0 : index
    %c0_112 = arith.constant 0 : index
    %231 = vector.load %arg6[%c0_111, %c0_112] : memref<256x16xf32, #tpu.memory_space<vmem>>, vector<256x16xf32>
    %cst_113 = arith.constant dense<0.000000e+00> : vector<16x16xf32>
    %232 = tpu.matmul %230, %231, %cst_113 {dimension_numbers = #tpu.dot_dimension_numbers<[1], [0], [0], [1], [0, 0, 1, 1], [], []>} : vector<16x256xf32>, vector<256x16xf32>, vector<16x16xf32> -> vector<16x16xf32>
    %c0_114 = arith.constant 0 : index
    %c0_115 = arith.constant 0 : index
    %233 = vector.load %arg7[%c0_114, %c0_115] : memref<16x128xf32, #tpu.memory_space<vmem>>, vector<16x128xf32>
    %cst_116 = arith.constant dense<0.000000e+00> : vector<16x128xf32>
    %234 = tpu.matmul %232, %233, %cst_116 {dimension_numbers = #tpu.dot_dimension_numbers<[1], [0], [0], [1], [0, 0, 1, 1], [], []>} : vector<16x16xf32>, vector<16x128xf32>, vector<16x128xf32> -> vector<16x128xf32>
    %235 = arith.truncf %230 : vector<16x256xf32> to vector<16x256xbf16>
    %cst_117 = arith.constant dense<0.000000e+00> : vector<16x128xf32>
    %236 = tpu.matmul %235, %223, %cst_117 {dimension_numbers = #tpu.dot_dimension_numbers<[1], [0], [0], [1], [0, 0, 1, 1], [], []>} : vector<16x256xbf16>, vector<256x128xbf16>, vector<16x128xf32> -> vector<16x128xf32>
    %237 = arith.divf %236, %234 : vector<16x128xf32>
    %238 = arith.truncf %237 : vector<16x128xf32> to vector<16x128xbf16>
    %c112 = arith.constant 112 : index
    %c0_118 = arith.constant 0 : index
    %239 = vector.load %arg21[%c112, %c0_118] : memref<128x128xbf16, #tpu.memory_space<vmem>>, vector<16x128xbf16>
    tpu.vector_store %arg21[%c112, %c0_118], %238 {strides = array<i32>} : memref<128x128xbf16, #tpu.memory_space<vmem>>, vector<16x128xbf16>,
    %c0_119 = arith.constant 0 : index
    %c0_120 = arith.constant 0 : index
    %240 = vector.load %arg21[%c0_119, %c0_120] : memref<128x128xbf16, #tpu.memory_space<vmem>>, vector<128x128xbf16>
    %c0_121 = arith.constant 0 : index
    %c0_122 = arith.constant 0 : index
    %241 = vector.load %arg12[%c0_121, %c0_122] : memref<128x128xbf16, #tpu.memory_space<vmem>>, vector<128x128xbf16>
    %cst_123 = arith.constant dense<0.000000e+00> : vector<128x128xf32>
    %242 = tpu.matmul %240, %241, %cst_123 {dimension_numbers = #tpu.dot_dimension_numbers<[1], [0], [0], [1], [0, 0, 1, 1], [], []>} : vector<128x128xbf16>, vector<128x128xbf16>, vector<128x128xf32> -> vector<128x128xf32>
    %c0_124 = arith.constant 0 : index
    %c0_125 = arith.constant 0 : index
    %243 = vector.load %arg13[%c0_124, %c0_125] : memref<1x128xf32, #tpu.memory_space<vmem>>, vector<1x128xf32>
    %244 = vector.broadcast %243 : vector<1x128xf32> to vector<128x128xf32>
    %245 = arith.addf %242, %244 : vector<128x128xf32>
    %246 = arith.addf %0, %245 : vector<128x128xf32>
    %c0_126 = arith.constant 0 : index
    %c0_127 = arith.constant 0 : index
    %247 = vector.load %arg14[%c0_126, %c0_127] : memref<1x128xf32, #tpu.memory_space<vmem>>, vector<1x128xf32>
    %c0_128 = arith.constant 0 : index
    %c0_129 = arith.constant 0 : index
    %248 = vector.load %arg15[%c0_128, %c0_129] : memref<1x128xf32, #tpu.memory_space<vmem>>, vector<1x128xf32>
    %cst_130 = arith.constant dense<0.000000e+00> : vector<128xf32>
    %249 = vector.multi_reduction <add>, %246, %cst_130 [1] : vector<128x128xf32> to vector<128xf32>
    %250 = vector.shape_cast %249 : vector<128xf32> to vector<128x1xf32>
    %cst_131 = arith.constant 1.280000e+02 : f32
    %251 = vector.broadcast %cst_131 : f32 to vector<128x1xf32>
    %252 = arith.divf %250, %251 : vector<128x1xf32>
    %253 = vector.broadcast %252 : vector<128x1xf32> to vector<128x128xf32>
    %254 = arith.subf %246, %253 : vector<128x128xf32>
    %255 = arith.mulf %254, %254 : vector<128x128xf32>
    %cst_132 = arith.constant dense<0.000000e+00> : vector<128xf32>
    %256 = vector.multi_reduction <add>, %255, %cst_132 [1] : vector<128x128xf32> to vector<128xf32>
    %257 = vector.shape_cast %256 : vector<128xf32> to vector<128x1xf32>
    %cst_133 = arith.constant 1.280000e+02 : f32
    %258 = vector.broadcast %cst_133 : f32 to vector<128x1xf32>
    %259 = arith.divf %257, %258 : vector<128x1xf32>
    %260 = vector.broadcast %252 : vector<128x1xf32> to vector<128x128xf32>
    %261 = arith.subf %246, %260 : vector<128x128xf32>
    %cst_134 = arith.constant 9.99999974E-6 : f32
    %262 = vector.broadcast %cst_134 : f32 to vector<128x1xf32>
    %263 = arith.addf %259, %262 : vector<128x1xf32>
    %264 = math.rsqrt %263 : vector<128x1xf32>
    %265 = vector.broadcast %264 : vector<128x1xf32> to vector<128x128xf32>
    %266 = arith.mulf %261, %265 : vector<128x128xf32>
    %267 = vector.broadcast %247 : vector<1x128xf32> to vector<128x128xf32>
    %268 = arith.mulf %266, %267 : vector<128x128xf32>
    %269 = vector.broadcast %248 : vector<1x128xf32> to vector<128x128xf32>
    %270 = arith.addf %268, %269 : vector<128x128xf32>
    %271 = arith.truncf %270 : vector<128x128xf32> to vector<128x128xbf16>
    %c0_135 = arith.constant 0 : index
    %c0_136 = arith.constant 0 : index
    %272 = vector.load %arg16[%c0_135, %c0_136] : memref<128x2048xbf16, #tpu.memory_space<vmem>>, vector<128x2048xbf16>
    %cst_137 = arith.constant dense<0.000000e+00> : vector<128x2048xf32>
    %273 = tpu.matmul %271, %272, %cst_137 {dimension_numbers = #tpu.dot_dimension_numbers<[1], [0], [0], [1], [0, 0, 1, 1], [], []>} : vector<128x128xbf16>, vector<128x2048xbf16>, vector<128x2048xf32> -> vector<128x2048xf32>
    %c0_138 = arith.constant 0 : index
    %c0_139 = arith.constant 0 : index
    %274 = vector.load %arg17[%c0_138, %c0_139] : memref<1x2048xf32, #tpu.memory_space<vmem>>, vector<1x2048xf32>
    %275 = vector.broadcast %274 : vector<1x2048xf32> to vector<128x2048xf32>
    %276 = arith.addf %273, %275 : vector<128x2048xf32>
    %cst_140 = arith.constant 0.000000e+00 : f32
    %277 = vector.broadcast %cst_140 : f32 to vector<128x2048xf32>
    %278 = arith.maximumf %276, %277 : vector<128x2048xf32>
    %279 = arith.truncf %278 : vector<128x2048xf32> to vector<128x2048xbf16>
    %c0_141 = arith.constant 0 : index
    %c0_142 = arith.constant 0 : index
    %280 = vector.load %arg18[%c0_141, %c0_142] : memref<2048x128xbf16, #tpu.memory_space<vmem>>, vector<2048x128xbf16>
    %cst_143 = arith.constant dense<0.000000e+00> : vector<128x128xf32>
    %281 = tpu.matmul %279, %280, %cst_143 {dimension_numbers = #tpu.dot_dimension_numbers<[1], [0], [0], [1], [0, 0, 1, 1], [], []>} : vector<128x2048xbf16>, vector<2048x128xbf16>, vector<128x128xf32> -> vector<128x128xf32>
    %c0_144 = arith.constant 0 : index
    %c0_145 = arith.constant 0 : index
    %282 = vector.load %arg19[%c0_144, %c0_145] : memref<1x128xf32, #tpu.memory_space<vmem>>, vector<1x128xf32>
    %283 = vector.broadcast %282 : vector<1x128xf32> to vector<128x128xf32>
    %284 = arith.addf %281, %283 : vector<128x128xf32>
    %285 = arith.addf %246, %284 : vector<128x128xf32>
    %c0_146 = arith.constant 0 : index
    %c0_147 = arith.constant 0 : index
    %286 = vector.load %arg20[%c0_146, %c0_147] : memref<128x128xf32, #tpu.memory_space<vmem>>, vector<128x128xf32>
    tpu.vector_store %arg20[%c0_146, %c0_147], %285 {strides = array<i32>} : memref<128x128xf32, #tpu.memory_space<vmem>>, vector<128x128xf32>,
    return
  }
  func.func @transform_0(%arg0: i32) -> (i32, i32) {
    %c0_i32 = arith.constant 0 : i32
    %c0_i32_0 = arith.constant 0 : i32
    return %arg0, %c0_i32 : i32, i32
  }
  func.func @transform_1(%arg0: i32) -> (i32, i32) {
    %c0_i32 = arith.constant 0 : i32
    %c0_i32_0 = arith.constant 0 : i32
    %c0_i32_1 = arith.constant 0 : i32
    return %c0_i32, %c0_i32_0 : i32, i32
  }
  func.func @transform_2(%arg0: i32) -> (i32, i32) {
    %c0_i32 = arith.constant 0 : i32
    %c0_i32_0 = arith.constant 0 : i32
    %c0_i32_1 = arith.constant 0 : i32
    return %c0_i32, %c0_i32_0 : i32, i32
  }
  func.func @transform_3(%arg0: i32) -> (i32, i32) {
    %c0_i32 = arith.constant 0 : i32
    %c0_i32_0 = arith.constant 0 : i32
    %c0_i32_1 = arith.constant 0 : i32
    return %c0_i32, %c0_i32_0 : i32, i32
  }
  func.func @transform_4(%arg0: i32) -> (i32, i32) {
    %c0_i32 = arith.constant 0 : i32
    %c0_i32_0 = arith.constant 0 : i32
    %c0_i32_1 = arith.constant 0 : i32
    return %c0_i32, %c0_i32_0 : i32, i32
  }
  func.func @transform_5(%arg0: i32) -> (i32, i32) {
    %c0_i32 = arith.constant 0 : i32
    %c0_i32_0 = arith.constant 0 : i32
    %c0_i32_1 = arith.constant 0 : i32
    return %c0_i32, %c0_i32_0 : i32, i32
  }
  func.func @transform_6(%arg0: i32) -> (i32, i32) {
    %c0_i32 = arith.constant 0 : i32
    %c0_i32_0 = arith.constant 0 : i32
    %c0_i32_1 = arith.constant 0 : i32
    return %c0_i32, %c0_i32_0 : i32, i32
  }
  func.func @transform_7(%arg0: i32) -> (i32, i32) {
    %c0_i32 = arith.constant 0 : i32
    %c0_i32_0 = arith.constant 0 : i32
    %c0_i32_1 = arith.constant 0 : i32
    return %c0_i32, %c0_i32_0 : i32, i32
  }
  func.func @transform_8(%arg0: i32) -> (i32, i32) {
    %c0_i32 = arith.constant 0 : i32
    %c0_i32_0 = arith.constant 0 : i32
    %c0_i32_1 = arith.constant 0 : i32
    return %c0_i32, %c0_i32_0 : i32, i32
  }
  func.func @transform_9(%arg0: i32) -> (i32, i32) {
    %c0_i32 = arith.constant 0 : i32
    %c0_i32_0 = arith.constant 0 : i32
    %c0_i32_1 = arith.constant 0 : i32
    return %c0_i32, %c0_i32_0 : i32, i32
  }
  func.func @transform_10(%arg0: i32) -> (i32, i32) {
    %c0_i32 = arith.constant 0 : i32
    %c0_i32_0 = arith.constant 0 : i32
    %c0_i32_1 = arith.constant 0 : i32
    return %c0_i32, %c0_i32_0 : i32, i32
  }
  func.func @transform_11(%arg0: i32) -> (i32, i32) {
    %c0_i32 = arith.constant 0 : i32
    %c0_i32_0 = arith.constant 0 : i32
    %c0_i32_1 = arith.constant 0 : i32
    return %c0_i32, %c0_i32_0 : i32, i32
  }
  func.func @transform_12(%arg0: i32) -> (i32, i32) {
    %c0_i32 = arith.constant 0 : i32
    %c0_i32_0 = arith.constant 0 : i32
    %c0_i32_1 = arith.constant 0 : i32
    return %c0_i32, %c0_i32_0 : i32, i32
  }
  func.func @transform_13(%arg0: i32) -> (i32, i32) {
    %c0_i32 = arith.constant 0 : i32
    %c0_i32_0 = arith.constant 0 : i32
    %c0_i32_1 = arith.constant 0 : i32
    return %c0_i32, %c0_i32_0 : i32, i32
  }
  func.func @transform_14(%arg0: i32) -> (i32, i32) {
    %c0_i32 = arith.constant 0 : i32
    %c0_i32_0 = arith.constant 0 : i32
    %c0_i32_1 = arith.constant 0 : i32
    return %c0_i32, %c0_i32_0 : i32, i32
  }
  func.func @transform_15(%arg0: i32) -> (i32, i32) {
    %c0_i32 = arith.constant 0 : i32
    %c0_i32_0 = arith.constant 0 : i32
    %c0_i32_1 = arith.constant 0 : i32
    return %c0_i32, %c0_i32_0 : i32, i32
  }
  func.func @transform_16(%arg0: i32) -> (i32, i32) {
    %c0_i32 = arith.constant 0 : i32
    %c0_i32_0 = arith.constant 0 : i32
    %c0_i32_1 = arith.constant 0 : i32
    return %c0_i32, %c0_i32_0 : i32, i32
  }
  func.func @transform_17(%arg0: i32) -> (i32, i32) {
    %c0_i32 = arith.constant 0 : i32
    %c0_i32_0 = arith.constant 0 : i32
    %c0_i32_1 = arith.constant 0 : i32
    return %c0_i32, %c0_i32_0 : i32, i32
  }
  func.func @transform_18(%arg0: i32) -> (i32, i32) {
    %c0_i32 = arith.constant 0 : i32
    %c0_i32_0 = arith.constant 0 : i32
    %c0_i32_1 = arith.constant 0 : i32
    return %c0_i32, %c0_i32_0 : i32, i32
  }
  func.func @transform_19(%arg0: i32) -> (i32, i32) {
    %c0_i32 = arith.constant 0 : i32
    %c0_i32_0 = arith.constant 0 : i32
    return %arg0, %c0_i32 : i32, i32
  }
}

</mosaic_0001>

<bundles_post_ra>
// kernel: block_forward.1
= control target key start
LH: loop header
LB: loop body
LE: loop exit
PB: predicated region body
PF: predicated region fallthrough
CT: control target
= control target key end

     0   :  { %s22178_s0 = inlined_call_operand.vmem [shape: f32[256,128], index: 0, kind: input, shape index: {}]   ;;  %s22179_s1 = inlined_call_operand.vmem [shape: bf16[128,256], index: 1, kind: input, shape index: {}]   ;;  %s22180_s2 = inlined_call_operand.vmem [shape: bf16[256,128], index: 2, kind: input, shape index: {}]   ;;  %s22181_s3 = inlined_call_operand.vmem [shape: bf16[16,256], index: 3, kind: input, shape index: {}]   ;;  %s22182_s4 = inlined_call_operand.vmem [shape: bf16[256,16], index: 4, kind: input, shape index: {}]   ;;  %s22183_s5 = inlined_call_operand.vmem [shape: f32[256,16], index: 5, kind: input, shape index: {}]   ;;  %s22184_s6 = inlined_call_operand.vmem [shape: f32[16,128], index: 6, kind: input, shape index: {}]   ;;  %s22185_s7 = inlined_call_operand.vmem [shape: f32[16,256], index: 7, kind: input, shape index: {}]   ;;  %s22186_s8 = inlined_call_operand.vmem [shape: f32[1,128], index: 8, kind: input, shape index: {}]   ;;  %s22187_s9 = inlined_call_operand.vmem [shape: f32[1,128], index: 9, kind: input, shape index: {}]   ;;  %s22188_s10 = inlined_call_operand.vmem [shape: bf16[128,384], index: 10, kind: input, shape index: {}]   ;;  %s22189_s11 = inlined_call_operand.vmem [shape: bf16[128,128], index: 11, kind: input, shape index: {}]   ;;  %s22190_s12 = inlined_call_operand.vmem [shape: f32[1,128], index: 12, kind: input, shape index: {}]   ;;  %s22191_s13 = inlined_call_operand.vmem [shape: f32[1,128], index: 13, kind: input, shape index: {}]   ;;  %s22192_s14 = inlined_call_operand.vmem [shape: f32[1,128], index: 14, kind: input, shape index: {}]   ;;  %s22193_s15 = inlined_call_operand.vmem [shape: bf16[128,2048], index: 15, kind: input, shape index: {}]   ;;  %s22194_s16 = inlined_call_operand.vmem [shape: f32[1,2048], index: 16, kind: input, shape index: {}]   ;;  %s22195_s17 = inlined_call_operand.vmem [shape: bf16[2048,128], index: 17, kind: input, shape index: {}]   ;;  %s22196_s18 = inlined_call_operand.vmem [shape: f32[1,128], index: 18, kind: input, shape index: {}]   ;;  %s22197_s19 = inlined_call_operand.hbm [shape: f32[256,128], index: 19, kind: output, shape index: {}]  }
   0x1   :  { %22503 = sst [smem:[#allocation91_spill]] %s22178_s0 }
   0x2   :  { %22504 = sst [smem:[#allocation92_spill]] %s22179_s1 }
   0x3   :  { %22505 = sst [smem:[#allocation93_spill]] %s22180_s2 }
   0x4   :  { %22506 = sst [smem:[#allocation94_spill]] %s22181_s3 }
   0x5   :  { %22507 = sst [smem:[#allocation95_spill]] %s22182_s4 }
   0x6   :  { %22508 = sst [smem:[#allocation96_spill]] %s22186_s8 }
   0x7   :  { %22509 = sst [smem:[#allocation97_spill]] %s22187_s9 }
   0x8   :  { %22510 = sst [smem:[#allocation98_spill]] %s22188_s10 }
   0x9   :  { %24 = vsyncpa [#allocation4], 0 }
   0xa   :  { %26 = vsyncpa [#allocation4 + $0x1], 0  ;;  %s14707_s0 = smov 0   ;;  %s14709_s30 = smov 0  }
   0xb   :  { %s14711_s20 = smov 0   ;;  %s14713_s21 = smov 0  }
   0xc LB: > { %22511 = sst [smem:[#allocation6_spill]] %s14590_s20  ;;  %s14728_s1 = sadd.s32 4294967295, %s14594_s21   ;;  %s14594_s21 = sphi %s14713_s21, %s23323_s21   ;;  %s14590_s20 = sphi %s14711_s20, %s23325_s20   ;;  %s14586_s30 = sphi %s14709_s30, %s23327_s30   ;;  %s14582_s0 = sphi %s14707_s0, %s23326_s0  }
   0xd   : > { %s11676_s22 = sadd.s32 4294967294, %s14594_s21   ;;  %s14732_s2 = sadd.s32 1, %s14594_s21  }
   0xe   : > { %22512 = sst [smem:[#allocation7_spill]] %s14732_s2  ;;  %s443_s23 = sadd.s32 1, %s14590_s20 }
   0xf   : > { %s440_s24 = ssub.s32 %s14594_s21, %s14732_s2  ;;  %p453_p0 = scmp.ne.s32.totalorder %s14590_s20, %s14586_s30 }
  0x10   : > { %p441_p1 = scmp.eq.s32.totalorder %s440_s24, 0  ;;  %p454_p2 = scmp.eq.s32.totalorder %s14728_s1, 1 }
  0x11   : > { %p459_p3 = scmp.ne.s32.totalorder %s14586_s30, %s14582_s0  ;;  %p460_p4 = scmp.eq.s32.totalorder %s11676_s22, 1 }
  0x12   : > { %s14743_s25 = scalar_select %p441_p1, %s14590_s20, %s443_s23  }
  0x13   : > { %p14745_p5 = por %p454_p2, %p453_p0  ;;  %p14749_p6 = por %p460_p4, %p459_p3 }
  0x14   : > { %22513 = sst [smem:[#allocation8_spill]] %s14743_s25  ;;  %p11679_p7 = scmp.ge.s32.totalorder %s14594_s21, 1 }
  0x15   : > { %s22515_s26 = scalar_select %p14749_p6, 1, 0 }
  0x16   : > { %p541_p8 = scmp.lt.s32.totalorder %s14594_s21, 3 }
  0x17   : > { %22516 = sst [smem:[#allocation9_spill]] %s22515_s26 }
  0x18   : > { %p542_p9 = pnand %p11679_p7, %p541_p8 }
  0x1a   : > { %545 = sbr.rel (%p542_p9) target bundleno = 7553 (0x1d81), region = 96 }
  0x1f   : > { %s11681_s27 = sshll.u32 %s14728_s1, 4  ;;  %s22517_s23 = sld [smem:[#allocation91_spill]]  ;;  %vm1358_vm0 = vcmask 130048  }
  0x20   : > { %p598_p10 = scmp.lt.s32.totalorder %s11681_s27, 31  ;;  %s22518_s10 = sld [smem:[#allocation98_spill]] }
  0x21   : > { %s22519_s8 = sld [smem:[#allocation96_spill]]  ;;  %s14597_s26 = smov 112  }
  0x22   : > { %s23329_s27 = smov (!%p598_p10, %s11681_s27), 31  ;;  %s22520_s9 = sld [smem:[#allocation97_spill]] }
  0x23   : > { %s11682_s28 = sshll.u32 %s23329_s27, 3  ;;  %s22553_s29 = sld [smem:[#allocation92_spill]] }
  0x24   : > { %s22573_s4 = sld [smem:[#allocation95_spill]]  ;;  %s22299_s27 = smov 80  }
  0x25   : > { %s14759_s24 = scalar_lea.vmem %s22517_s23, %s11682_s28  ;;  %s22521_s23 = sld [smem:[#allocation94_spill]] }
  0x26   : > { %v605_v0 = vld [vmem:[%s14759_s24] sm:$0xff]  ;;  %v607_v1 = vld [vmem:[%s14759_s24 + $0x10] sm:$0xff]  ;;  %v606_v2 = vld [vmem:[%s14759_s24 + $0x8] sm:$0xff]  ;;  %s14600_s20 = smov 64   ;;  %s14601_s28 = smov 48  }
  0x27   : > { %623 = vadd.xlane.f32.xlu0 %v605_v0  ;;  %627 = vadd.xlane.f32.xlu1 %v607_v1  ;;  %v608_v3 = vld [vmem:[%s14759_s24 + $0x18] sm:$0xff]  ;;  %v609_v4 = vld [vmem:[%s14759_s24 + $0x20] sm:$0xff]  ;;  %v610_v5 = vld [vmem:[%s14759_s24 + $0x28] sm:$0xff]  ;;  %s14603_s22 = smov 16  }
  0x28   : > { %v611_v6 = vld [vmem:[%s14759_s24 + $0x30] sm:$0xff]  ;;  %v612_v7 = vld [vmem:[%s14759_s24 + $0x38] sm:$0xff]  ;;  %v14770_v8 = vld [vmem:[%s14759_s24 + $0x40] sm:$0xff] }
  0x29   : > { %v14773_v9 = vld [vmem:[%s14759_s24 + $0x48] sm:$0xff]  ;;  %v14776_v10 = vld [vmem:[%s14759_s24 + $0x50] sm:$0xff]  ;;  %v14779_v11 = vld [vmem:[%s14759_s24 + $0x58] sm:$0xff] }
  0x2a   : > { %v14784_v12 = vld [vmem:[%s14759_s24 + $0x60] sm:$0xff]  ;;  %v14787_v13 = vld [vmem:[%s14759_s24 + $0x68] sm:$0xff]  ;;  %v14792_v14 = vld [vmem:[%s14759_s24 + $0x70] sm:$0xff] }
  0x2b   : > { %625 = vadd.xlane.f32.xlu0 %v606_v2  ;;  %629 = vadd.xlane.f32.xlu1 %v608_v3  ;;  %v14795_v15 = vld [vmem:[%s14759_s24 + $0x78] sm:$0xff]  ;;  %v13963_v17 = vld [vmem:[%s22518_s10 + $0xa8] ss:$12 sps:$4 sm:$0xff]  }
  0x2c   : > { %v13961_v16 = vld [vmem:[%s22518_s10 + $0xac] ss:$12 sps:$4 sm:$0xff]   ;;  %v13964_v53 = vld [vmem:[%s22518_s10 + $0x94] ss:$12 sps:$4 sm:$0xff]   ;;  %v13966_v54 = vld [vmem:[%s22518_s10 + $0xb0] ss:$12 sps:$4 sm:$0xff]  }
  0x2d   : > { %1012 = vmatprep.subr.bf16.mxu0 %v13961_v16  ;;  %v13967_v55 = vld [vmem:[%s22518_s10 + $0x90] ss:$12 sps:$4 sm:$0xff]   ;;  %13520 = vmatprep.subr.bf16.mxu1 %v13966_v54 }
  0x2e   : > { %1013 = vmatpush1.bf16.msra.mxu0 %v13963_v17  ;;  %13521 = vmatpush3.bf16.msra.mxu1 %v13966_v54 }
  0x2f   : > { %631 = vadd.xlane.f32.xlu0 %v609_v4  ;;  %633 = vadd.xlane.f32.xlu1 %v610_v5 }
  0x30   : > { %1014 = vmatprep.subr.bf16.mxu0 %v13964_v53 }
  0x32   : > { %1015 = vmatpush1.bf16.msra.mxu0 %v13967_v55 }
  0x33   : > { %635 = vadd.xlane.f32.xlu0 %v611_v6  ;;  %637 = vadd.xlane.f32.xlu1 %v612_v7 }
  0x37   : > { %639 = vadd.xlane.f32.xlu0 %v14770_v8  ;;  %641 = vadd.xlane.f32.xlu1 %v14773_v9 }
  0x3b   : > { %643 = vadd.xlane.f32.xlu0 %v14776_v10  ;;  %645 = vadd.xlane.f32.xlu1 %v14779_v11 }
  0x3f   : > { %647 = vadd.xlane.f32.xlu0 %v14784_v12  ;;  %649 = vadd.xlane.f32.xlu1 %v14787_v13 }
  0x43   : > { %651 = vadd.xlane.f32.xlu0 %v14792_v14  ;;  %653 = vadd.xlane.f32.xlu1 %v14795_v15 }
  0xb0   : > { %v624_v18 = vpop.xlane.xlu0 %623  ;;  %v628_v19 = vpop.xlane.xlu1 %627 }
  0xb1   : > { %v656_v20 = vmul.f32 0.0078125, %v624_v18  ;;  %v658_v21 = vmul.f32 0.0078125, %v628_v19 }
  0xb3   : > { %v14807_v22 = vsub.f32 %v605_v0, %v656_v20  ;;  %v14809_v23 = vsub.f32 %v607_v1, %v658_v21  ;;  %v13968_v0 = vld [vmem:[%s22518_s10 + $0x7c] ss:$12 sps:$4 sm:$0xff]   ;;  %v13970_v1 = vld [vmem:[%s22518_s10 + $0x98] ss:$12 sps:$4 sm:$0xff]   ;;  %v13975_v20 = vld [vmem:[%s22518_s10 + $0x60] ss:$12 sps:$4 sm:$0xff]  }
  0xb4   : > { %v626_v24 = vpop.xlane.xlu0 %625  ;;  %v630_v25 = vpop.xlane.xlu1 %629  ;;  %1016 = vmatprep.subr.bf16.mxu0 %v13968_v0  ;;  %13522 = vmatprep.subr.bf16.mxu1 %v13970_v1 }
  0xb5   : > { %v657_v26 = vmul.f32 0.0078125, %v626_v24  ;;  %v688_v27 = vmul.f32 %v14807_v22, %v14807_v22  ;;  %v659_v28 = vmul.f32 0.0078125, %v630_v25  ;;  %v690_v29 = vmul.f32 %v14809_v23, %v14809_v23  ;;  %13523 = vmatpush3.bf16.msra.mxu1 %v13970_v1 }
  0xb7   : > { %704 = vadd.xlane.f32.xlu0 %v688_v27  ;;  %v14815_v30 = vsub.f32 %v606_v2, %v657_v26  ;;  %v14817_v31 = vsub.f32 %v608_v3, %v659_v28 }
  0xb8   : > { %v632_v32 = vpop.xlane.xlu0 %631  ;;  %v634_v33 = vpop.xlane.xlu1 %633 }
  0xb9   : > { %v660_v34 = vmul.f32 0.0078125, %v632_v32  ;;  %v689_v35 = vmul.f32 %v14815_v30, %v14815_v30  ;;  %v661_v36 = vmul.f32 0.0078125, %v634_v33  ;;  %v691_v37 = vmul.f32 %v14817_v31, %v14817_v31  ;;  %v13979_v33 = vld [vmem:[%s22518_s10 + $0x48] ss:$12 sps:$4 sm:$0xff]  }
  0xbb   : > { %708 = vadd.xlane.f32.xlu0 %v690_v29  ;;  %706 = vadd.xlane.f32.xlu1 %v689_v35  ;;  %v14823_v38 = vsub.f32 %v609_v4, %v660_v34  ;;  %v14825_v39 = vsub.f32 %v610_v5, %v661_v36  ;;  %v13971_v5 = vld [vmem:[%s22518_s10 + $0x78] ss:$12 sps:$4 sm:$0xff]   ;;  %v13980_v35 = vld [vmem:[%s22518_s10 + $0x34] ss:$12 sps:$4 sm:$0xff]   ;;  %v13983_v36 = vld [vmem:[%s22518_s10 + $0x30] ss:$12 sps:$4 sm:$0xff]  }
  0xbc   : > { %v636_v40 = vpop.xlane.xlu0 %635  ;;  %v638_v41 = vpop.xlane.xlu1 %637  ;;  %1017 = vmatpush1.bf16.msra.mxu0 %v13971_v5 }
  0xbd   : > { %v662_v42 = vmul.f32 0.0078125, %v636_v40  ;;  %v692_v43 = vmul.f32 %v14823_v38, %v14823_v38  ;;  %v663_v44 = vmul.f32 0.0078125, %v638_v41  ;;  %v693_v45 = vmul.f32 %v14825_v39, %v14825_v39  ;;  %v13986_v40 = vld [vmem:[%s22518_s10 + $0x38] ss:$12 sps:$4 sm:$0xff]  }
  0xbe   : > { %v13987_v41 = vld [vmem:[%s22518_s10 + $0x18] ss:$12 sps:$4 sm:$0xff]  }
  0xbf   : > { %710 = vadd.xlane.f32.xlu1 %v691_v37  ;;  %712 = vadd.xlane.f32.xlu0 %v692_v43  ;;  %v14831_v46 = vsub.f32 %v611_v6, %v662_v42  ;;  %v14833_v47 = vsub.f32 %v612_v7, %v663_v44  ;;  %v13984_v37 = vld [vmem:[%s22518_s10 + $0x1c] ss:$12 sps:$4 sm:$0xff]   ;;  %v13988_v42 = vld [vmem:[%s22518_s10 + $0x4] ss:$12 sps:$4 sm:$0xff]   ;;  %v13990_v43 = vld [vmem:[%s22518_s10 + $0x20] ss:$12 sps:$4 sm:$0xff]  }
  0xc0   : > { %v640_v48 = vpop.xlane.xlu0 %639  ;;  %v642_v49 = vpop.xlane.xlu1 %641  ;;  %v13991_v44 = vld [vmem:[%s22518_s10] ss:$12 sps:$4 sm:$0xff]  }
  0xc1   : > { %v664_v50 = vmul.f32 0.0078125, %v640_v48  ;;  %v694_v51 = vmul.f32 %v14831_v46, %v14831_v46  ;;  %v665_v52 = vmul.f32 0.0078125, %v642_v49  ;;  %v695_v56 = vmul.f32 %v14833_v47, %v14833_v47 }
  0xc2   : > { %v22205_v48 = vmov 0  }
  0xc3   : > { %714 = vadd.xlane.f32.xlu1 %v693_v45  ;;  %716 = vadd.xlane.f32.xlu0 %v694_v51  ;;  %v14849_v57 = vsub.f32 %v14770_v8, %v664_v50  ;;  %v14852_v58 = vsub.f32 %v14773_v9, %v665_v52  ;;  %v13992_v45 = vld [vmem:[%s22518_s10 + $0x8] ss:$12 sps:$4 sm:$0xff]  }
  0xc4   : > { %v644_v59 = vpop.xlane.xlu0 %643  ;;  %v646_v60 = vpop.xlane.xlu1 %645  ;;  %1044 = vmatprep.mubr.bf16.mxu0 %v22205_v48 }
  0xc5   : > { %v666_v61 = vmul.f32 0.0078125, %v644_v59  ;;  %v696_v62 = vmul.f32 %v14849_v57, %v14849_v57  ;;  %v667_v63 = vmul.f32 0.0078125, %v646_v60  ;;  %v697_v2 = vmul.f32 %v14852_v58, %v14852_v58 }
  0xc7   : > { %718 = vadd.xlane.f32.xlu1 %v695_v56  ;;  %720 = vadd.xlane.f32.xlu0 %v696_v62  ;;  %v14865_v3 = vsub.f32 %v14776_v10, %v666_v61  ;;  %v14868_v4 = vsub.f32 %v14779_v11, %v667_v63  ;;  %v13972_v10 = vld [vmem:[%s22518_s10 + $0x64] ss:$12 sps:$4 sm:$0xff]   ;;  %v13974_v11 = vld [vmem:[%s22518_s10 + $0x80] ss:$12 sps:$4 sm:$0xff]  }
  0xc8   : > { %v648_v6 = vpop.xlane.xlu0 %647  ;;  %v650_v7 = vpop.xlane.xlu1 %649  ;;  %1018 = vmatprep.subr.bf16.mxu0 %v13972_v10  ;;  %13524 = vmatprep.subr.bf16.mxu1 %v13974_v11 }
  0xc9   : > { %v668_v8 = vmul.f32 0.0078125, %v648_v6  ;;  %v698_v9 = vmul.f32 %v14865_v3, %v14865_v3  ;;  %v669_v16 = vmul.f32 0.0078125, %v650_v7  ;;  %v699_v17 = vmul.f32 %v14868_v4, %v14868_v4  ;;  %1019 = vmatpush1.bf16.msra.mxu0 %v13975_v20  ;;  %13525 = vmatpush3.bf16.msra.mxu1 %v13974_v11 }
  0xcb   : > { %722 = vadd.xlane.f32.xlu1 %v697_v2  ;;  %724 = vadd.xlane.f32.xlu0 %v698_v9  ;;  %v14884_v18 = vsub.f32 %v14784_v12, %v668_v8  ;;  %v14887_v19 = vsub.f32 %v14787_v13, %v669_v16  ;;  %v13976_v12 = vld [vmem:[%s22518_s10 + $0x4c] ss:$12 sps:$4 sm:$0xff]   ;;  %v13978_v13 = vld [vmem:[%s22518_s10 + $0x68] ss:$12 sps:$4 sm:$0xff]  }
  0xcc   : > { %v652_v21 = vpop.xlane.xlu0 %651  ;;  %v654_v24 = vpop.xlane.xlu1 %653  ;;  %1020 = vmatprep.subr.bf16.mxu0 %v13976_v12  ;;  %13526 = vmatprep.subr.bf16.mxu1 %v13978_v13 }
  0xcd   : > { %v670_v25 = vmul.f32 0.0078125, %v652_v21  ;;  %v700_v26 = vmul.f32 %v14884_v18, %v14884_v18  ;;  %v671_v27 = vmul.f32 0.0078125, %v654_v24  ;;  %v701_v28 = vmul.f32 %v14887_v19, %v14887_v19  ;;  %1021 = vmatpush1.bf16.msra.mxu0 %v13979_v33  ;;  %13527 = vmatpush3.bf16.msra.mxu1 %v13978_v13 }
  0xce   : > { %1022 = vmatprep.subr.bf16.mxu0 %v13980_v35 }
  0xcf   : > { %726 = vadd.xlane.f32.xlu1 %v699_v17  ;;  %728 = vadd.xlane.f32.xlu0 %v700_v26  ;;  %v14903_v29 = vsub.f32 %v14792_v14, %v670_v25  ;;  %v14906_v32 = vsub.f32 %v14795_v15, %v671_v27  ;;  %v13982_v14 = vld [vmem:[%s22518_s10 + $0x50] ss:$12 sps:$4 sm:$0xff]   ;;  %v14949_v25 = vld [vmem:[%s22519_s8] ss:$0 sm:$0xff]  ;;  %s22609_s8 = sld [smem:[#allocation93_spill]] }
  0xd0   : > { %13528 = vmatprep.subr.bf16.mxu1 %v13982_v14 }
  0xd1   : > { %v702_v34 = vmul.f32 %v14903_v29, %v14903_v29  ;;  %v703_v15 = vmul.f32 %v14906_v32, %v14906_v32  ;;  %1023 = vmatpush1.bf16.msra.mxu0 %v13983_v36  ;;  %13529 = vmatpush3.bf16.msra.mxu1 %v13982_v14  ;;  %v14956_v36 = vld [vmem:[%s22520_s9] ss:$0 sm:$0xff]  ;;  %s14598_s9 = smov 96  }
  0xd2   : > { %1024 = vmatprep.subr.bf16.mxu0 %v13984_v37  ;;  %13530 = vmatprep.subr.bf16.mxu1 %v13986_v40 }
  0xd3   : > { %730 = vadd.xlane.f32.xlu1 %v701_v28  ;;  %732 = vadd.xlane.f32.xlu0 %v702_v34 }
  0xd5   : > { %1025 = vmatpush1.bf16.msra.mxu0 %v13987_v41  ;;  %13531 = vmatpush3.bf16.msra.mxu1 %v13986_v40 }
  0xd6   : > { %1026 = vmatprep.subr.bf16.mxu0 %v13988_v42  ;;  %13532 = vmatprep.subr.bf16.mxu1 %v13990_v43 }
  0xd7   : > { %734 = vadd.xlane.f32.xlu1 %v703_v15 }
  0xd9   : > { %1027 = vmatpush1.bf16.msra.mxu0 %v13991_v44  ;;  %13533 = vmatpush3.bf16.msra.mxu1 %v13990_v43 }
  0xda   : > { %13534 = vmatprep.subr.bf16.mxu1 %v13992_v45 }
  0xdd   : > { %13535 = vmatpush3.bf16.msra.mxu1 %v13992_v45 }
 0x140   : > { %v705_v49 = vpop.xlane.xlu0 %704 }
 0x141   : > { %v736_v50 = vmul.f32 0.0078125, %v705_v49 }
 0x143   : > { %v752_v51 = vadd.f32 1e-05, %v736_v50 }
 0x144   : > { %v707_v52 = vpop.xlane.xlu1 %706  ;;  %v709_v53 = vpop.xlane.xlu0 %708 }
 0x145   : > { %14196 = vrsqrt.f32 %v752_v51  ;;  %v737_v54 = vmul.f32 0.0078125, %v707_v52  ;;  %v738_v55 = vmul.f32 0.0078125, %v709_v53 }
 0x147   : > { %v753_v56 = vadd.f32 1e-05, %v737_v54  ;;  %v754_v59 = vadd.f32 1e-05, %v738_v55 }
 0x148   : > { %v711_v60 = vpop.xlane.xlu1 %710  ;;  %v713_v61 = vpop.xlane.xlu0 %712 }
 0x149   : > { %14198 = vrsqrt.f32 %v753_v56  ;;  %v739_v62 = vmul.f32 0.0078125, %v711_v60  ;;  %v740_v63 = vmul.f32 0.0078125, %v713_v61 }
 0x14a   : > { %14200 = vrsqrt.f32 %v754_v59 }
 0x14b   : > { %v755_v0 = vadd.f32 1e-05, %v739_v62  ;;  %v756_v1 = vadd.f32 1e-05, %v740_v63 }
 0x14c   : > { %v715_v2 = vpop.xlane.xlu1 %714  ;;  %v717_v5 = vpop.xlane.xlu0 %716 }
 0x14d   : > { %14202 = vrsqrt.f32 %v755_v0  ;;  %v741_v6 = vmul.f32 0.0078125, %v715_v2  ;;  %v742_v7 = vmul.f32 0.0078125, %v717_v5 }
 0x14e   : > { %14204 = vrsqrt.f32 %v756_v1 }
 0x14f   : > { %v757_v8 = vadd.f32 1e-05, %v741_v6  ;;  %v758_v9 = vadd.f32 1e-05, %v742_v7 }
 0x150   : > { %v719_v16 = vpop.xlane.xlu1 %718  ;;  %v721_v10 = vpop.xlane.xlu0 %720 }
 0x151   : > { %14206 = vrsqrt.f32 %v757_v8  ;;  %v743_v11 = vmul.f32 0.0078125, %v719_v16  ;;  %v744_v17 = vmul.f32 0.0078125, %v721_v10 }
 0x152   : > { %v14197_v20 = vpop.eup %14196  ;;  %14208 = vrsqrt.f32 %v758_v9 }
 0x153   : > { %v759_v21 = vadd.f32 1e-05, %v743_v11  ;;  %v760_v24 = vadd.f32 1e-05, %v744_v17  ;;  %v784_v26 = vmul.f32 %v14197_v20, %v14807_v22 }
 0x154   : > { %v723_v27 = vpop.xlane.xlu1 %722  ;;  %v725_v12 = vpop.xlane.xlu0 %724 }
 0x155   : > { %14210 = vrsqrt.f32 %v759_v21  ;;  %v745_v13 = vmul.f32 0.0078125, %v723_v27  ;;  %v746_v28 = vmul.f32 0.0078125, %v725_v12  ;;  %v806_v34 = vmul.f32 %v14949_v25, %v784_v26 }
 0x156   : > { %v14199_v33 = vpop.eup %14198  ;;  %14212 = vrsqrt.f32 %v760_v24 }
 0x157   : > { %v14201_v35 = vpop.eup %14200  ;;  %v761_v14 = vadd.f32 1e-05, %v745_v13  ;;  %v762_v15 = vadd.f32 1e-05, %v746_v28  ;;  %v785_v37 = vmul.f32 %v14199_v33, %v14815_v30  ;;  %v828_v49 = vadd.f32 %v14956_v36, %v806_v34 }
 0x158   : > { %v727_v22 = vpop.xlane.xlu1 %726  ;;  %v729_v40 = vpop.xlane.xlu0 %728  ;;  %v786_v41 = vmul.f32 %v14201_v35, %v14809_v23 }
 0x159   : > { %14214 = vrsqrt.f32 %v761_v14  ;;  %v747_v42 = vmul.f32 0.0078125, %v727_v22  ;;  %v748_v43 = vmul.f32 0.0078125, %v729_v40  ;;  %v807_v44 = vmul.f32 %v14949_v25, %v785_v37 }
 0x15a   : > { %v14203_v45 = vpop.eup %14202  ;;  %14216 = vrsqrt.f32 %v762_v15  ;;  %v808_v23 = vmul.f32 %v14949_v25, %v786_v41 }
 0x15b   : > { %v14205_v50 = vpop.eup %14204  ;;  %v763_v51 = vadd.f32 1e-05, %v747_v42  ;;  %v764_v52 = vadd.f32 1e-05, %v748_v43  ;;  %v829_v53 = vadd.f32 %v14956_v36, %v807_v44  ;;  %v787_v30 = vmul.f32 %v14203_v45, %v14817_v31 }
 0x15c   : > { %v731_v54 = vpop.xlane.xlu1 %730  ;;  %v733_v55 = vpop.xlane.xlu0 %732  ;;  %v788_v56 = vmul.f32 %v14205_v50, %v14823_v38  ;;  %v830_v38 = vadd.f32 %v14956_v36, %v808_v23 }
 0x15d   : > { %14218 = vrsqrt.f32 %v763_v51  ;;  %v749_v59 = vmul.f32 0.0078125, %v731_v54  ;;  %v750_v60 = vmul.f32 0.0078125, %v733_v55  ;;  %v844_v61 = vpack.c.bf16 %v829_v53, %v828_v49 }
 0x15e   : > { %v14207_v62 = vpop.eup %14206  ;;  %14220 = vrsqrt.f32 %v764_v52  ;;  %v809_v63 = vmul.f32 %v14949_v25, %v787_v30  ;;  %v810_v5 = vmul.f32 %v14949_v25, %v788_v56 }
 0x15f   : > { %v14209_v0 = vpop.eup %14208  ;;  %v765_v1 = vadd.f32 1e-05, %v749_v59  ;;  %v766_v2 = vadd.f32 1e-05, %v750_v60  ;;  %1045 = vmatmul.mubr.bf16.vlgmr.msra.gmra.mxu0 %v844_v61  ;;  %13536 = vmatprep.mubr.bf16.mxu1 %v844_v61  ;;  %v789_v31 = vmul.f32 %v14207_v62, %v14825_v39 }
 0x160   : > { %v735_v6 = vpop.xlane.xlu1 %734  ;;  %v831_v7 = vadd.f32 %v14956_v36, %v809_v63  ;;  %1054 = vmatprep.mubr.bf16.mxu0 %v22205_v48  ;;  %v790_v8 = vmul.f32 %v14209_v0, %v14831_v46  ;;  %v832_v21 = vadd.f32 %v14956_v36, %v810_v5 }
 0x161   : > { %14222 = vrsqrt.f32 %v765_v1  ;;  %v751_v9 = vmul.f32 0.0078125, %v735_v6  ;;  %v811_v16 = vmul.f32 %v14949_v25, %v789_v31 }
 0x162   : > { %v14211_v10 = vpop.eup %14210  ;;  %14224 = vrsqrt.f32 %v766_v2  ;;  %v845_v11 = vpack.c.bf16 %v831_v7, %v830_v38  ;;  %v812_v39 = vmul.f32 %v14949_v25, %v790_v8 }
 0x163   : > { %v14213_v17 = vpop.eup %14212  ;;  %v767_v20 = vadd.f32 1e-05, %v751_v9  ;;  %v833_v24 = vadd.f32 %v14956_v36, %v811_v16  ;;  %v791_v26 = vmul.f32 %v14211_v10, %v14833_v47 }
 0x164   : > { %13537 = vmatmul.mubr.bf16.vlgmr.msra.gmra.mxu1 %v845_v11  ;;  %v792_v46 = vmul.f32 %v14213_v17, %v14849_v57  ;;  %v834_v28 = vadd.f32 %v14956_v36, %v812_v39 }
 0x165   : > { %14226 = vrsqrt.f32 %v767_v20  ;;  %v846_v27 = vpack.c.bf16 %v833_v24, %v832_v21  ;;  %v813_v12 = vmul.f32 %v14949_v25, %v791_v26 }
 0x166   : > { %v14215_v13 = vpop.eup %14214  ;;  %v814_v14 = vmul.f32 %v14949_v25, %v792_v46 }
 0x167   : > { %v14217_v33 = vpop.eup %14216  ;;  %1055 = vmatmul.mubr.bf16.gmra.mxu0 %v845_v11  ;;  %13540 = vmatprep.mubr.bf16.mxu1 %v846_v27  ;;  %v835_v34 = vadd.f32 %v14956_v36, %v813_v12  ;;  %v793_v35 = vmul.f32 %v14215_v13, %v14852_v58 }
 0x168   : > { %1064 = vmatprep.mubr.bf16.mxu0 %v22205_v48  ;;  %v794_v47 = vmul.f32 %v14217_v33, %v14865_v3  ;;  %v836_v41 = vadd.f32 %v14956_v36, %v814_v14 }
 0x169   : > { %v847_v57 = vpack.c.bf16 %v835_v34, %v834_v28  ;;  %v815_v15 = vmul.f32 %v14949_v25, %v793_v35 }
 0x16a   : > { %v14219_v37 = vpop.eup %14218  ;;  %v816_v22 = vmul.f32 %v14949_v25, %v794_v47 }
 0x16b   : > { %v14221_v40 = vpop.eup %14220  ;;  %v837_v42 = vadd.f32 %v14956_v36, %v815_v15  ;;  %v795_v43 = vmul.f32 %v14219_v37, %v14868_v4 }
 0x16c   : > { %13541 = vmatmul.mubr.bf16.gmra.mxu1 %v847_v57  ;;  %v796_v58 = vmul.f32 %v14221_v40, %v14884_v18  ;;  %v838_v49 = vadd.f32 %v14956_v36, %v816_v22 }
 0x16d   : > { %v848_v44 = vpack.c.bf16 %v837_v42, %v836_v41  ;;  %v817_v45 = vmul.f32 %v14949_v25, %v795_v43 }
 0x16e   : > { %v14223_v3 = vpop.eup %14222  ;;  %v818_v53 = vmul.f32 %v14949_v25, %v796_v58 }
 0x16f   : > { %v14225_v50 = vpop.eup %14224  ;;  %1065 = vmatmul.mubr.bf16.gmra.mxu0 %v846_v27  ;;  %13544 = vmatprep.mubr.bf16.mxu1 %v848_v44  ;;  %v839_v51 = vadd.f32 %v14956_v36, %v817_v45  ;;  %v797_v52 = vmul.f32 %v14223_v3, %v14887_v19 }
 0x170   : > { %1074 = vmatprep.mubr.bf16.mxu0 %v22205_v48  ;;  %v798_v4 = vmul.f32 %v14225_v50, %v14903_v29  ;;  %v840_v55 = vadd.f32 %v14956_v36, %v818_v53 }
 0x171   : > { %v849_v18 = vpack.c.bf16 %v839_v51, %v838_v49  ;;  %v819_v30 = vmul.f32 %v14949_v25, %v797_v52 }
 0x172   : > { %v14227_v54 = vpop.eup %14226  ;;  %v820_v59 = vmul.f32 %v14949_v25, %v798_v4 }
 0x173   : > { %v841_v23 = vadd.f32 %v14956_v36, %v819_v30  ;;  %v799_v56 = vmul.f32 %v14227_v54, %v14906_v32  ;;  %v15015_v32 = vld [vmem:[%s22521_s23 + $0x4] ss:$8 sps:$4 sm:$0xff]  }
 0x174   : > { %13545 = vmatmul.mubr.bf16.gmra.mxu1 %v849_v18  ;;  %v842_v29 = vadd.f32 %v14956_v36, %v820_v59  ;;  %1397 = vmatprep.subr.bf16.mxu1 %v15015_v32 }
 0x175   : > { %v850_v19 = vpack.c.bf16 %v841_v23, %v840_v55  ;;  %v821_v60 = vmul.f32 %v14949_v25, %v799_v56  ;;  %v15020_v25 = vld [vmem:[%s22521_s23] ss:$8 sps:$4 sm:$0xff]  }
 0x176   : > { %1398 = vmatpush1.bf16.msra.mxu1 %v15020_v25 }
 0x177   : > { %1075 = vmatmul.mubr.bf16.gmra.mxu0 %v847_v57  ;;  %13548 = vmatprep.mubr.bf16.mxu1 %v850_v19  ;;  %v843_v61 = vadd.f32 %v14956_v36, %v821_v60 }
 0x178   : > { %1084 = vmatprep.mubr.bf16.mxu0 %v22205_v48 }
 0x179   : > { %v851_v62 = vpack.c.bf16 %v843_v61, %v842_v29 }
 0x17c   : > { %13549 = vmatmul.mubr.bf16.gmra.mxu1 %v851_v62 }
 0x17d   : > { %1415 = vmatprep.mubr.bf16.mxu1 %v22205_v48 }
 0x17f   : > { %1085 = vmatmul.mubr.bf16.gmra.mxu0 %v848_v44 }
 0x180   : > { %1094 = vmatprep.mubr.bf16.mxu0 %v22205_v48 }
 0x187   : > { %1095 = vmatmul.mubr.bf16.gmra.mxu0 %v849_v18 }
 0x188   : > { %1104 = vmatprep.mubr.bf16.mxu0 %v22205_v48 }
 0x18f   : > { %1105 = vmatmul.mubr.bf16.gmra.mxu0 %v850_v19 }
 0x190   : > { %1114 = vmatprep.mubr.bf16.mxu0 %v22205_v48 }
 0x197   : > { %1115 = vmatmul.mubr.bf16.gmra.mxu0 %v851_v62 }
 0x21f   : > { %v15024_v36 = vpop.f32.mrf.mxu0 }
 0x221   : > { %v1048_v63 = vpop.f32.mrf.mxu0 }
 0x223   : > { %v15026_v0 = vpop.f32.mrf.mxu0 }
 0x224   : > { %v13538_v2 = vpop.f32.mrf.mxu1 }
 0x225   : > { %v1052_v31 = vpop.f32.mrf.mxu0 }
 0x226   : > { %v1230_v5 = vpack.c.bf16 %v1052_v31, %v1048_v63  ;;  %v1159_v6 = vpop.f32.mrf.mxu1 }
 0x227   : > { %v15030_v38 = vpop.f32.mrf.mxu0 }
 0x228   : > { %22522 = vst [vmem:[#allocation10_spill] sm:$0xff] %v15030_v38  ;;  %v13539_v7 = vpop.f32.mrf.mxu1  ;;  %1246 = vxpose.xlu0.c.b16.start [1/8] %v1230_v5, 128  ;;  %v15476_v38 = vld [vmem:[%s22185_s7 + $0x18] sm:$0xff] }
 0x229   : > { %v15032_v8 = vpack.c.bf16 %v13539_v7, %v13538_v2  ;;  %v1058_v9 = vpop.f32.mrf.mxu0  ;;  %22586 = vst [vmem:[#allocation69_spill] sm:$0xff] %v15476_v38 }
 0x22a   : > { %v1162_v16 = vpop.f32.mrf.mxu1 }
 0x22b   : > { %v1238_v10 = vpack.c.bf16 %v1162_v16, %v1159_v6  ;;  %v15034_v11 = vpop.f32.mrf.mxu0 }
 0x22c   : > { %22523 = vst [vmem:[#allocation11_spill] sm:$0xff] %v15034_v11  ;;  %v13542_v17 = vpop.f32.mrf.mxu1 }
 0x22d   : > { %13552 = vmatprep.subr.bf16.mxu0 %v1238_v10  ;;  %v1062_v20 = vpop.f32.mrf.mxu0 }
 0x22e   : > { %v1231_v21 = vpack.c.bf16 %v1062_v20, %v1058_v9  ;;  %v15038_v24 = vpop.f32.mrf.mxu1  ;;  %13553 = vmatpush3.bf16.msra.mxu0 %v1238_v10 }
 0x22f   : > { %22524 = vst [vmem:[#allocation12_spill] sm:$0xff] %v15038_v24  ;;  %v15040_v26 = vpop.f32.mrf.mxu0 }
 0x230   : > { %22525 = vst [vmem:[#allocation13_spill] sm:$0xff] %v15040_v26  ;;  %v13543_v46 = vpop.f32.mrf.mxu1  ;;  %1247 = vxpose.xlu0.c.b16.cont [2/8] %v1231_v21, 128 }
 0x231   : > { %v15042_v27 = vpack.c.bf16 %v13543_v46, %v13542_v17  ;;  %v1068_v12 = vpop.f32.mrf.mxu0 }
 0x232   : > { %v15044_v13 = vpop.f32.mrf.mxu1 }
 0x233   : > { %22526 = vst [vmem:[#allocation14_spill] sm:$0xff] %v15042_v27  ;;  %22527 = vst [vmem:[#allocation15_spill] sm:$0xff] %v15044_v13  ;;  %v15046_v28 = vpop.f32.mrf.mxu0  ;;  %v15471_v13 = vld [vmem:[%s22185_s7 + $0x10] sm:$0xff] }
 0x234   : > { %22528 = vst [vmem:[#allocation16_spill] sm:$0xff] %v15046_v28  ;;  %v13546_v34 = vpop.f32.mrf.mxu1  ;;  %22585 = vst [vmem:[#allocation68_spill] sm:$0xff] %v15471_v13 }
 0x235   : > { %v1072_v35 = vpop.f32.mrf.mxu0 }
 0x236   : > { %v1232_v14 = vpack.c.bf16 %v1072_v35, %v1068_v12  ;;  %v15050_v47 = vpop.f32.mrf.mxu1 }
 0x237   : > { %22529 = vst [vmem:[#allocation17_spill] sm:$0xff] %v15050_v47  ;;  %v15052_v57 = vpop.f32.mrf.mxu0  ;;  %v15455_v47 = vld [vmem:[%s22185_s7] sm:$0xff] }
 0x238   : > { %22530 = vst [vmem:[#allocation18_spill] sm:$0xff] %v15052_v57  ;;  %v13547_v15 = vpop.f32.mrf.mxu1  ;;  %1248 = vxpose.xlu0.c.b16.cont [3/8] %v1232_v14, 128  ;;  %22583 = vst [vmem:[#allocation66_spill] sm:$0xff] %v15455_v47 }
 0x239   : > { %v15054_v37 = vpack.c.bf16 %v13547_v15, %v13546_v34  ;;  %v1078_v22 = vpop.f32.mrf.mxu0 }
 0x23a   : > { %v15056_v40 = vpop.f32.mrf.mxu1 }
 0x23b   : > { %22531 = vst [vmem:[#allocation19_spill] sm:$0xff] %v15054_v37  ;;  %22532 = vst [vmem:[#allocation20_spill] sm:$0xff] %v15056_v40  ;;  %v15058_v41 = vpop.f32.mrf.mxu0 }
 0x23c   : > { %22533 = vst [vmem:[#allocation21_spill] sm:$0xff] %v15058_v41  ;;  %v13550_v43 = vpop.f32.mrf.mxu1  ;;  %v15460_v41 = vld [vmem:[%s22185_s7 + $0x8] sm:$0xff] }
 0x23d   : > { %v1082_v58 = vpop.f32.mrf.mxu0  ;;  %22584 = vst [vmem:[#allocation67_spill] sm:$0xff] %v15460_v41 }
 0x23e   : > { %v1233_v44 = vpack.c.bf16 %v1082_v58, %v1078_v22  ;;  %v15062_v45 = vpop.f32.mrf.mxu1 }
 0x23f   : > { %22534 = vst [vmem:[#allocation22_spill] sm:$0xff] %v15062_v45  ;;  %v15064_v3 = vpop.f32.mrf.mxu0 }
 0x240   : > { %22535 = vst [vmem:[#allocation23_spill] sm:$0xff] %v15064_v3  ;;  %v13551_v49 = vpop.f32.mrf.mxu1  ;;  %1249 = vxpose.xlu0.c.b16.cont [4/8] %v1233_v44, 128 }
 0x241   : > { %v15066_v50 = vpack.c.bf16 %v13551_v49, %v13550_v43  ;;  %v1088_v51 = vpop.f32.mrf.mxu0 }
 0x242   : > { %v15130_v35 = vpop.f32.mrf.mxu1 }
 0x243   : > { %22536 = vst [vmem:[#allocation24_spill] sm:$0xff] %v15066_v50  ;;  %v15068_v52 = vpop.f32.mrf.mxu0  ;;  %22552 = vst [vmem:[#allocation40_spill] sm:$0xff] %v15130_v35  ;;  %v15170_v35 = vld [vmem:[%s22553_s29 + $0x70] ss:$8 sps:$4 sm:$0xff]  }
 0x244   : > { %22537 = vst [vmem:[#allocation25_spill] sm:$0xff] %v15068_v52  ;;  %22555 = vst [vmem:[#allocation42_spill] sm:$0xff] %v15170_v35 }
 0x245   : > { %v1092_v4 = vpop.f32.mrf.mxu0 }
 0x246   : > { %v1234_v18 = vpack.c.bf16 %v1092_v4, %v1088_v51 }
 0x247   : > { %v15072_v30 = vpop.f32.mrf.mxu0 }
 0x248   : > { %22538 = vst [vmem:[#allocation26_spill] sm:$0xff] %v15072_v30  ;;  %1250 = vxpose.xlu0.c.b16.cont [5/8] %v1234_v18, 128 }
 0x249   : > { %v1098_v54 = vpop.f32.mrf.mxu0 }
 0x24b   : > { %v15074_v55 = vpop.f32.mrf.mxu0 }
 0x24c   : > { %22539 = vst [vmem:[#allocation27_spill] sm:$0xff] %v15074_v55  ;;  %v15175_v55 = vld [vmem:[%s22553_s29 + $0x64] ss:$8 sps:$4 sm:$0xff]  }
 0x24d   : > { %v1102_v56 = vpop.f32.mrf.mxu0  ;;  %22556 = vst [vmem:[#allocation43_spill] sm:$0xff] %v15175_v55 }
 0x24e   : > { %v1235_v59 = vpack.c.bf16 %v1102_v56, %v1098_v54 }
 0x24f   : > { %v15078_v19 = vpop.f32.mrf.mxu0 }
 0x250   : > { %22540 = vst [vmem:[#allocation28_spill] sm:$0xff] %v15078_v19  ;;  %1251 = vxpose.xlu0.c.b16.cont [6/8] %v1235_v59, 128  ;;  %v15165_v19 = vld [vmem:[%s22553_s29 + $0x74] ss:$8 sps:$4 sm:$0xff]  }
 0x251   : > { %v1108_v60 = vpop.f32.mrf.mxu0  ;;  %22554 = vst [vmem:[#allocation41_spill] sm:$0xff] %v15165_v19 }
 0x253   : > { %v15080_v29 = vpop.f32.mrf.mxu0 }
 0x254   : > { %22541 = vst [vmem:[#allocation29_spill] sm:$0xff] %v15080_v29 }
 0x255   : > { %v1112_v62 = vpop.f32.mrf.mxu0 }
 0x256   : > { %v1236_v63 = vpack.c.bf16 %v1112_v62, %v1108_v60 }
 0x257   : > { %v15084_v2 = vpop.f32.mrf.mxu0 }
 0x258   : > { %22542 = vst [vmem:[#allocation30_spill] sm:$0xff] %v15084_v2  ;;  %1252 = vxpose.xlu0.c.b16.cont [7/8] %v1236_v63, 128 }
 0x259   : > { %v1118_v31 = vpop.f32.mrf.mxu0 }
 0x25b   : > { %v15086_v5 = vpop.f32.mrf.mxu0 }
 0x25c   : > { %22543 = vst [vmem:[#allocation31_spill] sm:$0xff] %v15086_v5 }
 0x25d   : > { %v1122_v7 = vpop.f32.mrf.mxu0 }
 0x25e   : > { %v1237_v9 = vpack.c.bf16 %v1122_v7, %v1118_v31 }
 0x260   : > { %1253 = vxpose.xlu0.c.b16.end [8/8] %v1237_v9, 128 }
 0x2a6   : > { %v15090_v16 = vpop.trf.xlu0 }
 0x2a7   : > { %22544 = vst [vmem:[#allocation32_spill] sm:$0xff] %v15090_v16  ;;  %11711 = vmatmul.mubr.msk.bf16.vlgmr.msra.gmra.mxu1 %vm1358_vm0, %v15090_v16 }
 0x2a8   : > { %1425 = vmatprep.mubr.bf16.mxu1 %v22205_v48 }
 0x2aa   : > { %v15095_v10 = vpop.trf.xlu0 }
 0x2ab   : > { %22545 = vst [vmem:[#allocation33_spill] sm:$0xff] %v15095_v10 }
 0x2ae   : > { %v15100_v17 = vpop.trf.xlu0 }
 0x2af   : > { %11712 = vmatmul.mubr.msk.bf16.gmra.mxu1 %vm1358_vm0, %v15095_v10  ;;  %22546 = vst [vmem:[#allocation34_spill] sm:$0xff] %v15100_v17 }
 0x2b0   : > { %1435 = vmatprep.mubr.bf16.mxu1 %v22205_v48 }
 0x2b2   : > { %v15105_v20 = vpop.trf.xlu0 }
 0x2b3   : > { %22547 = vst [vmem:[#allocation35_spill] sm:$0xff] %v15105_v20 }
 0x2b6   : > { %v15110_v21 = vpop.trf.xlu0 }
 0x2b7   : > { %11713 = vmatmul.mubr.msk.bf16.gmra.mxu1 %vm1358_vm0, %v15100_v17  ;;  %22548 = vst [vmem:[#allocation36_spill] sm:$0xff] %v15110_v21 }
 0x2b8   : > { %1445 = vmatprep.mubr.bf16.mxu1 %v22205_v48 }
 0x2ba   : > { %v15115_v46 = vpop.trf.xlu0 }
 0x2bb   : > { %22549 = vst [vmem:[#allocation37_spill] sm:$0xff] %v15115_v46 }
 0x2be   : > { %v15120_v12 = vpop.trf.xlu0 }
 0x2bf   : > { %11714 = vmatmul.mubr.msk.bf16.gmra.mxu1 %vm1358_vm0, %v15105_v20  ;;  %22550 = vst [vmem:[#allocation38_spill] sm:$0xff] %v15120_v12 }
 0x2c0   : > { %1455 = vmatprep.mubr.bf16.mxu1 %v22205_v48 }
 0x2c2   : > { %v15125_v34 = vpop.trf.xlu0 }
 0x2c3   : > { %22551 = vst [vmem:[#allocation39_spill] sm:$0xff] %v15125_v34 }
 0x2c7   : > { %11715 = vmatmul.mubr.msk.bf16.gmra.mxu1 %vm1358_vm0, %v15110_v21 }
 0x2c8   : > { %1465 = vmatprep.mubr.bf16.mxu1 %v22205_v48 }
 0x2cf   : > { %11716 = vmatmul.mubr.msk.bf16.gmra.mxu1 %vm1358_vm0, %v15115_v46 }
 0x2d0   : > { %1475 = vmatprep.mubr.bf16.mxu1 %v22205_v48 }
 0x2d7   : > { %11717 = vmatmul.mubr.msk.bf16.gmra.mxu1 %vm1358_vm0, %v15120_v12 }
 0x2d8   : > { %1485 = vmatprep.mubr.bf16.mxu1 %v22205_v48 }
 0x2df   : > { %11718 = vmatmul.mubr.msk.bf16.gmra.mxu1 %vm1358_vm0, %v15125_v34 }
 0x2e0   : > { %2057 = vmatprep.mubr.bf16.mxu1 %v22205_v48 }
 0x367   : > { %v15132_v14 = vpop.f32.mrf.mxu1 }
 0x369   : > { %v15134_v15 = vpop.f32.mrf.mxu1 }
 0x36b   : > { %v15136_v22 = vpop.f32.mrf.mxu1 }
 0x36d   : > { %v15140_v58 = vpop.f32.mrf.mxu1 }
 0x36f   : > { %v15142_v44 = vpop.f32.mrf.mxu1 }
 0x371   : > { %v15144_v49 = vpop.f32.mrf.mxu1 }
 0x373   : > { %v15146_v51 = vpop.f32.mrf.mxu1 }
 0x375   : > { %v15150_v18 = vpop.f32.mrf.mxu1 }
 0x377   : > { %v15152_v54 = vpop.f32.mrf.mxu1 }
 0x379   : > { %v15154_v56 = vpop.f32.mrf.mxu1 }
 0x37b   : > { %v15156_v59 = vpop.f32.mrf.mxu1 }
 0x37d   : > { %v15158_v60 = vpop.f32.mrf.mxu1 }
 0x37f   : > { %v15160_v62 = vpop.f32.mrf.mxu1 }
 0x381   : > { %v1449_v63 = vpop.f32.mrf.mxu1 }
 0x383   : > { %v1451_v31 = vpop.f32.mrf.mxu1 }
 0x385   : > { %v1453_v7 = vpop.f32.mrf.mxu1 }
 0x387   : > { %v1457_v9 = vpop.f32.mrf.mxu1 }
 0x389   : > { %v1459_v6 = vpop.f32.mrf.mxu1 }
 0x38b   : > { %v1461_v61 = vpop.f32.mrf.mxu1 }
 0x38d   : > { %v1463_v23 = vpop.f32.mrf.mxu1 }
 0x38f   : > { %v1467_v53 = vpop.f32.mrf.mxu1 }
 0x391   : > { %v1469_v42 = vpop.f32.mrf.mxu1 }
 0x393   : > { %v1471_v33 = vpop.f32.mrf.mxu1 }
 0x395   : > { %v1473_v39 = vpop.f32.mrf.mxu1 }
 0x396   : > { %v1507_v40 = vpack.c.bf16 %v1473_v39, %v1469_v42  ;;  %v15199_v39 = vld [vmem:[%s22553_s29 + $0x44] ss:$8 sps:$4 sm:$0xff]  }
 0x397   : > { %v1477_v48 = vpop.f32.mrf.mxu1  ;;  %22560 = vst [vmem:[#allocation47_spill] sm:$0xff] %v15199_v39 }
 0x399   : > { %v1479_v1 = vpop.f32.mrf.mxu1 }
 0x39b   : > { %v1481_v43 = vpop.f32.mrf.mxu1 }
 0x39c   : > { %v1508_v52 = vpack.c.bf16 %v1481_v43, %v1477_v48  ;;  %v15193_v48 = vld [vmem:[%s22553_s29 + $0x50] ss:$8 sps:$4 sm:$0xff]   ;;  %v15226_v43 = vld [vmem:[%s22553_s29 + $0x24] ss:$8 sps:$4 sm:$0xff]  }
 0x39d   : > { %v1483_v4 = vpop.f32.mrf.mxu1  ;;  %22559 = vst [vmem:[#allocation46_spill] sm:$0xff] %v15193_v48  ;;  %22564 = vst [vmem:[#allocation51_spill] sm:$0xff] %v15226_v43 }
 0x39e   : > { %v1509_v30 = vpack.c.bf16 %v1483_v4, %v1479_v1  ;;  %v15187_v1 = vld [vmem:[%s22553_s29 + $0x54] ss:$8 sps:$4 sm:$0xff]  }
 0x39f   : > { %v1487_v2 = vpop.f32.mrf.mxu1  ;;  %22558 = vst [vmem:[#allocation45_spill] sm:$0xff] %v15187_v1  ;;  %v1603_v42 = vmul.bf16 %v15187_v1, %v1507_v40  ;;  %v1502_v40 = vpack.c.bf16 %v1451_v31, %v15160_v62  ;;  %v1500_v62 = vpack.c.bf16 %v15156_v59, %v15152_v54  ;;  %v15234_v31 = vld [vmem:[%s22553_s29 + $0x20] ss:$8 sps:$4 sm:$0xff]   ;;  %v15248_v54 = vld [vmem:[%s22553_s29 + $0x10] ss:$8 sps:$4 sm:$0xff]  }
 0x3a0   : > { %v1605_v4 = vmul.bf16 %v15175_v55, %v1509_v30  ;;  %v1503_v30 = vpack.c.bf16 %v1453_v7, %v1449_v63  ;;  %22565 = vst [vmem:[#allocation52_spill] sm:$0xff] %v15234_v31  ;;  %22567 = vst [vmem:[#allocation54_spill] sm:$0xff] %v15248_v54 }
 0x3a1   : > { %v1489_v5 = vpop.f32.mrf.mxu1  ;;  %v1596_v59 = vmul.bf16 %v15234_v31, %v1500_v62  ;;  %v15364_v62 = vld [vmem:[%s22183_s5 + $0x58] sm:$0xff] }
 0x3a2   : > { %v15569_v31 = vld [vmem:[%s22183_s5 + $0x98] sm:$0xff] }
 0x3a3   : > { %v1491_v50 = vpop.f32.mrf.mxu1  ;;  %22598 = vst [vmem:[#allocation81_spill] sm:$0xff] %v15569_v31 }
 0x3a4   : > { %v1510_v29 = vpack.c.bf16 %v1491_v50, %v1487_v2  ;;  %v15181_v50 = vld [vmem:[%s22553_s29 + $0x60] ss:$8 sps:$4 sm:$0xff]  }
 0x3a5   : > { %v1493_v45 = vpop.f32.mrf.mxu1  ;;  %22557 = vst [vmem:[#allocation44_spill] sm:$0xff] %v15181_v50 }
 0x3a6   : > { %v1511_v37 = vpack.c.bf16 %v1493_v45, %v1489_v5  ;;  %v1606_v2 = vmul.bf16 %v15170_v35, %v1510_v29  ;;  %v1604_v45 = vmul.bf16 %v15181_v50, %v1508_v52  ;;  %v1505_v29 = vpack.c.bf16 %v1463_v23, %v1459_v6  ;;  %v15211_v52 = vld [vmem:[%s22553_s29 + $0x34] ss:$8 sps:$4 sm:$0xff]  }
 0x3a7   : > { %22562 = vst [vmem:[#allocation49_spill] sm:$0xff] %v15211_v52  ;;  %v1501_v6 = vpack.c.bf16 %v15158_v60, %v15154_v56  ;;  %v1599_v63 = vmul.bf16 %v15211_v52, %v1503_v30  ;;  %v1499_v56 = vpack.c.bf16 %v15150_v18, %v15144_v49  ;;  %v15242_v60 = vld [vmem:[%s22553_s29 + $0x14] ss:$8 sps:$4 sm:$0xff]   ;;  %v15256_v49 = vld [vmem:[%s22553_s29 + $0x4] ss:$8 sps:$4 sm:$0xff]  }
 0x3a8   : > { %v1607_v3 = vmul.bf16 %v15165_v19, %v1511_v37  ;;  %v1506_v37 = vpack.c.bf16 %v1471_v33, %v1467_v53  ;;  %v15205_v33 = vld [vmem:[%s22553_s29 + $0x40] ss:$8 sps:$4 sm:$0xff]   ;;  %v1601_v23 = vmul.bf16 %v15199_v39, %v1505_v29  ;;  %22566 = vst [vmem:[#allocation53_spill] sm:$0xff] %v15242_v60  ;;  %22568 = vst [vmem:[#allocation55_spill] sm:$0xff] %v15256_v49 }
 0x3a9   : > { %22561 = vst [vmem:[#allocation48_spill] sm:$0xff] %v15205_v33  ;;  %v1595_v18 = vmul.bf16 %v15242_v60, %v1499_v56  ;;  %v15328_v30 = vld [vmem:[%s22183_s5 + $0x68] sm:$0xff]  ;;  %v15378_v56 = vld [vmem:[%s22183_s5 + $0x50] sm:$0xff]  ;;  %v15564_v60 = vld [vmem:[%s22183_s5 + $0x20] sm:$0xff] }
 0x3aa   : > { %2025 = vmatprep.subr.bf16.mxu1 %v1607_v3  ;;  %v1504_v3 = vpack.c.bf16 %v1461_v61, %v1457_v9  ;;  %v1602_v53 = vmul.bf16 %v15193_v48, %v1506_v37  ;;  %v15218_v61 = vld [vmem:[%s22553_s29 + $0x30] ss:$8 sps:$4 sm:$0xff]   ;;  %v1597_v9 = vmul.bf16 %v15226_v43, %v1501_v6  ;;  %v22570_v37 = vpack.c.bf16 %v15146_v51, %v15142_v44  ;;  %v15279_v44 = vld [vmem:[%s22573_s4] sm:$0xff]   ;;  %v15284_v51 = vld [vmem:[%s22573_s4 + $0x8] sm:$0xff]  }
 0x3ab   : > { %2026 = vmatpush1.bf16.msra.mxu1 %v1606_v2  ;;  %22563 = vst [vmem:[#allocation50_spill] sm:$0xff] %v15218_v61  ;;  %v1598_v7 = vmul.bf16 %v15218_v61, %v1502_v40  ;;  %v1497_v2 = vpack.c.bf16 %v15140_v58, %v15134_v15  ;;  %v22571_v58 = vpack.c.bf16 %v15136_v22, %v15132_v14  ;;  %v15289_v14 = vld [vmem:[%s22573_s4 + $0x10] sm:$0xff]   ;;  %v15339_v40 = vld [vmem:[%s22183_s5 + $0xe0] sm:$0xff]  ;;  %22597 = vst [vmem:[#allocation80_spill] sm:$0xff] %v15564_v60 }
 0x3ac   : > { %2027 = vmatprep.subr.bf16.mxu1 %v1605_v4  ;;  %v1600_v5 = vmul.bf16 %v15205_v33, %v1504_v3  ;;  %v15262_v4 = vld [vmem:[%s22553_s29] ss:$8 sps:$4 sm:$0xff]   ;;  %13554 = vmatprep.mubr.msk.bf16.mxu0 %vm1358_vm0, %v15279_v44  ;;  %v15311_v22 = vld [vmem:[%s22183_s5 + $0xf0] sm:$0xff]  ;;  %v15577_v43 = vld [vmem:[%s22183_s5 + $0x18] sm:$0xff] }
 0x3ad   : > { %22569 = vst [vmem:[#allocation56_spill] sm:$0xff] %v15262_v4  ;;  %v1593_v15 = vmul.bf16 %v15256_v49, %v1497_v2  ;;  %v1592_v29 = vmul.bf16 %v15262_v4, %v22571_v58  ;;  %13555 = vmatmul.mubr.msk.bf16.vlgmr.msra.gmra.mxu0 %vm1358_vm0, %v15284_v51  ;;  %v15317_v3 = vld [vmem:[%s22183_s5 + $0x70] sm:$0xff]  ;;  %v15351_v6 = vld [vmem:[%s22183_s5 + $0x60] sm:$0xff]  ;;  %v15434_v58 = vld [vmem:[%s22573_s4 + $0x58] sm:$0xff]  }
 0x3ae   : > { %13558 = vmatprep.mubr.msk.bf16.mxu0 %vm1358_vm0, %v15289_v14  ;;  %v15395_v2 = vld [vmem:[%s22573_s4 + $0x30] sm:$0xff]   ;;  %22580 = vst [vmem:[#allocation63_spill] sm:$0xff] %v15434_v58  ;;  %22599 = vst [vmem:[#allocation82_spill] sm:$0xff] %v15577_v43  ;;  %v15607_v52 = vld [vmem:[%s22183_s5 + $0x80] sm:$0xff] }
 0x3af   : > { %2028 = vmatpush1.bf16.msra.mxu1 %v1604_v45  ;;  %v1594_v45 = vmul.bf16 %v15248_v54, %v22570_v37  ;;  %22575 = vst [vmem:[#allocation58_spill] sm:$0xff] %v15395_v2  ;;  %v15411_v37 = vld [vmem:[%s22573_s4 + $0x40] sm:$0xff]   ;;  %v15533_v49 = vld [vmem:[%s22183_s5 + $0xb0] sm:$0xff]  ;;  %22604 = vst [vmem:[#allocation87_spill] sm:$0xff] %v15607_v52 }
 0x3b0   : > { %2029 = vmatprep.subr.bf16.mxu1 %v1603_v42  ;;  %v22572_v42 = vpack.c.bf16 %v15026_v0, %v15024_v36  ;;  %v15298_v36 = vld [vmem:[%s22183_s5 + $0xf8] sm:$0xff]  ;;  %22577 = vst [vmem:[#allocation60_spill] sm:$0xff] %v15411_v37  ;;  %22592 = vst [vmem:[#allocation75_spill] sm:$0xff] %v15533_v49  ;;  %v15541_v54 = vld [vmem:[%s22183_s5 + $0x30] sm:$0xff] }
 0x3b1   : > { %12361 = vmatprep.subr.mxu0 %v15298_v36  ;;  %v15306_v0 = vld [vmem:[%s22183_s5 + $0x78] sm:$0xff]  ;;  %22593 = vst [vmem:[#allocation76_spill] sm:$0xff] %v15541_v54  ;;  %v15588_v61 = vld [vmem:[%s22183_s5 + $0x10] sm:$0xff]  ;;  %v15613_v33 = vld [vmem:[%s22183_s5] sm:$0xff] }
 0x3b2   : > { %12362 = vmatpush3.msra.mxu0 %v15306_v0  ;;  %22601 = vst [vmem:[#allocation84_spill] sm:$0xff] %v15588_v61  ;;  %22605 = vst [vmem:[#allocation88_spill] sm:$0xff] %v15613_v33 }
 0x3b3   : > { %2030 = vmatpush1.bf16.msra.mxu1 %v1602_v53  ;;  %v15322_v53 = vld [vmem:[%s22183_s5 + $0xe8] sm:$0xff]  ;;  %12363 = vmatprep.subr.mxu0 %v15311_v22 }
 0x3b4   : > { %2031 = vmatprep.subr.bf16.mxu1 %v1601_v23  ;;  %v15333_v23 = vld [vmem:[%s22573_s4 + $0x18] sm:$0xff]   ;;  %12364 = vmatpush3.msra.mxu0 %v15317_v3 }
 0x3b5   : > { %12365 = vmatprep.subr.mxu0 %v15322_v53  ;;  %13559 = vmatmul.mubr.msk.bf16.gmra.mxu0 %vm1358_vm0, %v15333_v23 }
 0x3b6   : > { %12366 = vmatpush3.msra.mxu0 %v15328_v30 }
 0x3b7   : > { %2032 = vmatpush1.bf16.msra.mxu1 %v1600_v5  ;;  %v15344_v5 = vld [vmem:[%s22573_s4 + $0x20] sm:$0xff]   ;;  %12367 = vmatprep.subr.mxu0 %v15339_v40 }
 0x3b8   : > { %2033 = vmatprep.subr.bf16.mxu1 %v1599_v63  ;;  %v15357_v63 = vld [vmem:[%s22183_s5 + $0xd8] sm:$0xff]  ;;  %13562 = vmatprep.mubr.msk.bf16.mxu0 %vm1358_vm0, %v15344_v5 }
 0x3b9   : > { %12368 = vmatpush3.msra.mxu0 %v15351_v6 }
 0x3ba   : > { %12369 = vmatprep.subr.mxu0 %v15357_v63 }
 0x3bb   : > { %2034 = vmatpush1.bf16.msra.mxu1 %v1598_v7  ;;  %v15372_v7 = vld [vmem:[%s22183_s5 + $0xd0] sm:$0xff]  ;;  %12370 = vmatpush3.msra.mxu0 %v15364_v62 }
 0x3bc   : > { %2035 = vmatprep.subr.bf16.mxu1 %v1597_v9  ;;  %v15384_v9 = vld [vmem:[%s22183_s5 + $0xc8] sm:$0xff]  ;;  %12371 = vmatprep.subr.mxu0 %v15372_v7 }
 0x3bd   : > { %12372 = vmatpush3.msra.mxu0 %v15378_v56 }
 0x3be   : > { %12373 = vmatprep.subr.mxu0 %v15384_v9 }
 0x3bf   : > { %2036 = vmatpush1.bf16.msra.mxu1 %v1596_v59  ;;  %v15389_v59 = vld [vmem:[%s22573_s4 + $0x28] sm:$0xff]  }
 0x3c0   : > { %2037 = vmatprep.subr.bf16.mxu1 %v1595_v18  ;;  %22574 = vst [vmem:[#allocation57_spill] sm:$0xff] %v15389_v59  ;;  %13563 = vmatmul.mubr.msk.bf16.gmra.mxu0 %vm1358_vm0, %v15389_v59  ;;  %v15406_v18 = vld [vmem:[%s22573_s4 + $0x38] sm:$0xff]  }
 0x3c1   : > { %13566 = vmatprep.mubr.msk.bf16.mxu0 %vm1358_vm0, %v15395_v2  ;;  %22576 = vst [vmem:[#allocation59_spill] sm:$0xff] %v15406_v18 }
 0x3c3   : > { %2038 = vmatpush1.bf16.msra.mxu1 %v1594_v45  ;;  %v15420_v45 = vld [vmem:[%s22573_s4 + $0x48] sm:$0xff]  }
 0x3c4   : > { %2039 = vmatprep.subr.bf16.mxu1 %v1593_v15  ;;  %22578 = vst [vmem:[#allocation61_spill] sm:$0xff] %v15420_v45  ;;  %v15425_v15 = vld [vmem:[%s22573_s4 + $0x50] sm:$0xff]  }
 0x3c5   : > { %22579 = vst [vmem:[#allocation62_spill] sm:$0xff] %v15425_v15 }
 0x3c7   : > { %2040 = vmatpush1.bf16.msra.mxu1 %v1592_v29  ;;  %v15439_v29 = vld [vmem:[%s22573_s4 + $0x60] sm:$0xff]  }
 0x3c8   : > { %13567 = vmatmul.mubr.msk.bf16.gmra.mxu0 %vm1358_vm0, %v15406_v18  ;;  %22581 = vst [vmem:[#allocation64_spill] sm:$0xff] %v15439_v29 }
 0x3c9   : > { %13570 = vmatprep.mubr.msk.bf16.mxu0 %vm1358_vm0, %v15411_v37 }
 0x3ca   : > { %2058 = vmatmul.mubr.bf16.vlgmr.msra.gmra.mxu1 %v22572_v42  ;;  %v15448_v42 = vld [vmem:[%s22573_s4 + $0x68] sm:$0xff]  }
 0x3cb   : > { %22582 = vst [vmem:[#allocation65_spill] sm:$0xff] %v15448_v42 }
 0x3d0   : > { %13571 = vmatmul.mubr.msk.bf16.gmra.mxu0 %vm1358_vm0, %v15420_v45 }
 0x3d1   : > { %13574 = vmatprep.mubr.msk.bf16.mxu0 %vm1358_vm0, %v15425_v15 }
 0x3d8   : > { %13575 = vmatmul.mubr.msk.bf16.gmra.mxu0 %vm1358_vm0, %v15434_v58  ;;  %v15602_v58 = vld [vmem:[%s22183_s5 + $0x8] sm:$0xff] }
 0x3d9   : > { %13578 = vmatprep.mubr.msk.bf16.mxu0 %vm1358_vm0, %v15439_v29  ;;  %v15582_v29 = vld [vmem:[%s22183_s5 + $0x90] sm:$0xff]  ;;  %22603 = vst [vmem:[#allocation86_spill] sm:$0xff] %v15602_v58 }
 0x3da   : > { %22600 = vst [vmem:[#allocation83_spill] sm:$0xff] %v15582_v29 }
 0x3e0   : > { %13579 = vmatmul.mubr.msk.bf16.gmra.mxu0 %vm1358_vm0, %v15448_v42  ;;  %v15559_v42 = vld [vmem:[%s22183_s5 + $0xa0] sm:$0xff] }
 0x3e1   : > { %22596 = vst [vmem:[#allocation79_spill] sm:$0xff] %v15559_v42 }
 0x48a   : > { %v2059_v57 = vpop.f32.mrf.mxu1 }
 0x48b   : > { %v15463_v26 = vadd.f32 %v2059_v57, %v15455_v47  ;;  %v15491_v47 = vld [vmem:[%s22183_s5 + $0x48] sm:$0xff] }
 0x48c   : > { %v2061_v27 = vpop.f32.mrf.mxu1  ;;  %12374 = vmatpush3.msra.mxu0 %v15491_v47 }
 0x48d   : > { %v15466_v28 = vadd.f32 %v2061_v27, %v15460_v41 }
 0x48e   : > { %v2063_v24 = vpop.f32.mrf.mxu1 }
 0x48f   : > { %v2068_v11 = vmax.f32 %v15463_v26, %v15466_v28  ;;  %v15481_v57 = vadd.f32 %v2063_v24, %v15471_v13  ;;  %v15497_v24 = vld [vmem:[%s22183_s5 + $0xc0] sm:$0xff]  ;;  %v15525_v13 = vld [vmem:[%s22573_s4 + $0x78] sm:$0xff]  }
 0x490   : > { %v2065_v4 = vpop.f32.mrf.mxu1  ;;  %12375 = vmatprep.subr.mxu0 %v15497_v24  ;;  %22591 = vst [vmem:[#allocation74_spill] sm:$0xff] %v15525_v13 }
 0x491   : > { %v15484_v27 = vadd.f32 %v2065_v4, %v15476_v38  ;;  %2069 = vmax.xlane.f32.xlu1 %v2068_v11  ;;  %v15503_v11 = vld [vmem:[%s22183_s5 + $0x40] sm:$0xff]  ;;  %v15514_v4 = vld [vmem:[%s22573_s4 + $0x70] sm:$0xff]   ;;  %v15520_v38 = vld [vmem:[%s22183_s5 + $0x38] sm:$0xff] }
 0x492   : > { %22587 = vst [vmem:[#allocation70_spill] sm:$0xff] %v15503_v11  ;;  %12376 = vmatpush3.msra.mxu0 %v15503_v11  ;;  %22589 = vst [vmem:[#allocation72_spill] sm:$0xff] %v15514_v4  ;;  %13582 = vmatprep.mubr.msk.bf16.mxu0 %vm1358_vm0, %v15514_v4  ;;  %v15547_v4 = vld [vmem:[%s22183_s5 + $0xa8] sm:$0xff] }
 0x493   : > { %v2071_v41 = vmax.f32 %v15481_v57, %v15484_v27  ;;  %22590 = vst [vmem:[#allocation73_spill] sm:$0xff] %v15520_v38  ;;  %13583 = vmatmul.mubr.msk.bf16.gmra.mxu0 %vm1358_vm0, %v15525_v13  ;;  %22594 = vst [vmem:[#allocation77_spill] sm:$0xff] %v15547_v4  ;;  %v15553_v13 = vld [vmem:[%s22183_s5 + $0x28] sm:$0xff] }
 0x494   : > { %22595 = vst [vmem:[#allocation78_spill] sm:$0xff] %v15553_v13 }
 0x495   : > { %2072 = vmax.xlane.f32.xlu1 %v2071_v41  ;;  %v15509_v41 = vld [vmem:[%s22183_s5 + $0xb8] sm:$0xff] }
 0x496   : > { %22588 = vst [vmem:[#allocation71_spill] sm:$0xff] %v15509_v41  ;;  %12377 = vmatprep.subr.mxu0 %v15509_v41 }
 0x497   : > { %12378 = vmatpush3.msra.mxu0 %v15520_v38 }
 0x498   : > { %12379 = vmatprep.subr.mxu0 %v15533_v49 }
 0x499   : > { %12380 = vmatpush3.msra.mxu0 %v15541_v54  ;;  %v15738_v54 = vld [vmem:[%s22609_s8 + $0x78] sm:$0xff]  }
 0x49a   : > { %12381 = vmatprep.subr.mxu0 %v15547_v4 }
 0x49b   : > { %12382 = vmatpush3.msra.mxu0 %v15553_v13 }
 0x49c   : > { %12383 = vmatprep.subr.mxu0 %v15559_v42 }
 0x49d   : > { %12384 = vmatpush3.msra.mxu0 %v15564_v60 }
 0x49e   : > { %12385 = vmatprep.subr.mxu0 %v15569_v31 }
 0x49f   : > { %12386 = vmatpush3.msra.mxu0 %v15577_v43 }
 0x4a0   : > { %12387 = vmatprep.subr.mxu0 %v15582_v29 }
 0x4a1   : > { %12388 = vmatpush3.msra.mxu0 %v15588_v61 }
 0x4a6   : > { %2341 = vrot.lane.b32.xlu1 %v15090_v16, %s14597_s26  ;;  %v15594_v16 = vld [vmem:[%s22183_s5 + $0x88] sm:$0xff] }
 0x4a7   : > { %22602 = vst [vmem:[#allocation85_spill] sm:$0xff] %v15594_v16  ;;  %12389 = vmatprep.subr.mxu0 %v15594_v16 }
 0x4a8   : > { %12390 = vmatpush3.msra.mxu0 %v15602_v58 }
 0x4a9   : > { %12391 = vmatprep.subr.mxu0 %v15607_v52 }
 0x4aa   : > { %2343 = vrot.lane.b32.xlu1 %v15095_v10, %s14597_s26  ;;  %12392 = vmatpush3.msra.mxu0 %v15613_v33  ;;  %v15628_v10 = vld [vmem:[%s22184_s6 + $0x8] sm:$0xff] }
 0x4ab   : > { %2395 = vmatprep.subr.bf16.mxu0 %v15015_v32  ;;  %22606 = vst [vmem:[#allocation89_spill] sm:$0xff] %v15628_v10  ;;  %13586 = vmatprep.subr.mxu1 %v15628_v10  ;;  %v15639_v32 = vpop.f32.mrf.mxu0 }
 0x4ac   : > { %13587 = vmatpush3.msra.mxu1 %v15628_v10 }
 0x4ae   : > { %2345 = vrot.lane.b32.xlu1 %v15100_v17, %s14597_s26  ;;  %v15633_v17 = vld [vmem:[%s22184_s6] sm:$0xff] }
 0x4af   : > { %22607 = vst [vmem:[#allocation90_spill] sm:$0xff] %v15633_v17  ;;  %13588 = vmatprep.subr.mxu1 %v15633_v17 }
 0x4b0   : > { %13589 = vmatpush3.msra.mxu1 %v15633_v17 }
 0x4b2   : > { %2347 = vrot.lane.b32.xlu1 %v15105_v20, %s14597_s26 }
 0x4b6   : > { %2349 = vrot.lane.b32.xlu1 %v15110_v21, %s14597_s26 }
 0x4ba   : > { %2351 = vrot.lane.b32.xlu1 %v15115_v46, %s14597_s26 }
 0x4be   : > { %2353 = vrot.lane.b32.xlu1 %v15120_v12, %s14597_s26 }
 0x4c2   : > { %2355 = vrot.lane.b32.xlu1 %v15125_v34, %s14597_s26  ;;  %v15641_v34 = vpop.f32.mrf.mxu0  ;;  %s22737_s26 = smov 80  }
 0x4c4   : > { %v15643_v46 = vpop.f32.mrf.mxu0 }
 0x4c6   : > { %v15647_v12 = vpop.f32.mrf.mxu0 }
 0x4c8   : > { %v15649_v21 = vpop.f32.mrf.mxu0 }
 0x4ca   : > { %v15651_v39 = vpop.f32.mrf.mxu0 }
 0x4cc   : > { %v15653_v10 = vpop.f32.mrf.mxu0 }
 0x4ce   : > { %v15657_v15 = vpop.f32.mrf.mxu0 }
 0x4d0   : > { %v15659_v48 = vpop.f32.mrf.mxu0 }
 0x4d2   : > { %v15661_v45 = vpop.f32.mrf.mxu0 }
 0x4d4   : > { %v15663_v33 = vpop.f32.mrf.mxu0 }
 0x4d6   : > { %v15669_v50 = vpop.f32.mrf.mxu0 }
 0x4d8   : > { %v15671_v61 = vpop.f32.mrf.mxu0 }
 0x4da   : > { %v15675_v37 = vpop.f32.mrf.mxu0 }
 0x51a   : > { %v2070_v20 = vpop.xlane.xlu1 %2069 }
 0x51b   : > { %v2074_v1 = vsub.f32 %v15463_v26, %v2070_v20  ;;  %v2075_v58 = vsub.f32 %v15466_v28, %v2070_v20  ;;  %v15677_v26 = vpop.f32.mrf.mxu0 }
 0x51d   : > { %v2078_v16 = vmul.f32 1.442695, %v2074_v1  ;;  %v2080_v17 = vmul.f32 1.442695, %v2075_v58  ;;  %v15681_v20 = vpop.f32.mrf.mxu0 }
 0x51e   : > { %v2073_v29 = vpop.xlane.xlu1 %2072 }
 0x51f   : > { %14228 = vpow2.f32 %v2078_v16  ;;  %v2076_v55 = vsub.f32 %v15481_v57, %v2073_v29  ;;  %v2077_v43 = vsub.f32 %v15484_v27, %v2073_v29  ;;  %v15683_v1 = vpop.f32.mrf.mxu0 }
 0x520   : > { %14230 = vpow2.f32 %v2080_v17 }
 0x521   : > { %v2082_v52 = vmul.f32 1.442695, %v2076_v55  ;;  %v2084_v35 = vmul.f32 1.442695, %v2077_v43  ;;  %v15685_v16 = vpop.f32.mrf.mxu0 }
 0x522   : > { %v2342_v42 = vpop.permute.xlu1 %2341 }
 0x523   : > { %14232 = vpow2.f32 %v2082_v52  ;;  %v15687_v58 = vpop.f32.mrf.mxu0 }
 0x524   : > { %14234 = vpow2.f32 %v2084_v35 }
 0x525   : > { %v15691_v55 = vpop.f32.mrf.mxu0 }
 0x526   : > { %v2344_v31 = vpop.permute.xlu1 %2343 }
 0x527   : > { %v15697_v57 = vpop.f32.mrf.mxu0 }
 0x529   : > { %v15701_v35 = vpop.f32.mrf.mxu0 }
 0x52b   : > { %v15708_v17 = vpop.f32.mrf.mxu0 }
 0x52c   : > { %v15693_v43 = vpop.eup %14228 }
 0x52d   : > { %v15695_v29 = vpop.eup %14230  ;;  %v15718_v19 = vpop.f32.mrf.mxu0 }
 0x52e   : > { %2182 = vmatprep.mubr.f32.mxu0 %v15695_v29 }
 0x52f   : > { %2183 = vmatmul.mubr.f32.vlgmr.msra.gmra.mxu0 %v15693_v43  ;;  %v13580_v60 = vpop.f32.mrf.mxu0 }
 0x530   : > { %v15703_v52 = vpop.eup %14232  ;;  %2396 = vmatpush1.bf16.msra.mxu0 %v15020_v25  ;;  %v22608_v25 = vmov 0  }
 0x531   : > { %v15706_v27 = vpop.eup %14234  ;;  %v15722_v13 = vpop.f32.mrf.mxu0 }
 0x532   : > { %2187 = vmatprep.mubr.f32.mxu0 %v15706_v27  ;;  %v2277_v18 = vpack.c.bf16 %v15706_v27, %v15695_v29  ;;  %v2346_v29 = vpop.permute.xlu1 %2345 }
 0x533   : > { %2188 = vmatmul.mubr.f32.gmra.mxu0 %v15703_v52  ;;  %v13581_v28 = vpop.f32.mrf.mxu0 }
 0x534   : > { %2413 = vmatprep.mubr.bf16.mxu0 %v22608_v25  ;;  %v1910_v4 = vpack.c.bf16 %v13581_v28, %v13580_v60 }
 0x535   : > { %v1869_v60 = vpop.f32.mrf.mxu0 }
 0x536   : > { %v2348_v27 = vpop.permute.xlu1 %2347 }
 0x537   : > { %11787 = vmatmul.mubr.msk.bf16.vlgmr.msra.gmra.mxu0 %vm1358_vm0, %v2342_v42 }
 0x538   : > { %2423 = vmatprep.mubr.bf16.mxu0 %v22608_v25 }
 0x53a   : > { %v2350_v42 = vpop.permute.xlu1 %2349 }
 0x53e   : > { %v2352_v28 = vpop.permute.xlu1 %2351 }
 0x53f   : > { %11788 = vmatmul.mubr.msk.bf16.gmra.mxu0 %vm1358_vm0, %v2344_v31 }
 0x540   : > { %2433 = vmatprep.mubr.bf16.mxu0 %v22608_v25 }
 0x542   : > { %v2354_v49 = vpop.permute.xlu1 %2353 }
 0x547   : > { %11789 = vmatmul.mubr.msk.bf16.gmra.mxu0 %vm1358_vm0, %v2346_v29 }
 0x548   : > { %2443 = vmatprep.mubr.bf16.mxu0 %v22608_v25 }
 0x54f   : > { %11790 = vmatmul.mubr.msk.bf16.gmra.mxu0 %vm1358_vm0, %v2348_v27 }
 0x550   : > { %2453 = vmatprep.mubr.bf16.mxu0 %v22608_v25 }
 0x553   : > { %v13584_v31 = vpop.f32.mrf.mxu0 }
 0x555   : > { %v1882_v29 = vpop.f32.mrf.mxu0 }
 0x557   : > { %11791 = vmatmul.mubr.msk.bf16.gmra.mxu0 %vm1358_vm0, %v2350_v42  ;;  %v13585_v27 = vpop.f32.mrf.mxu0 }
 0x558   : > { %2463 = vmatprep.mubr.bf16.mxu0 %v22608_v25  ;;  %v1912_v38 = vpack.c.bf16 %v13585_v27, %v13584_v31  ;;  %v15748_v31 = vld [vmem:[%s22609_s8 + $0x38] sm:$0xff]  }
 0x559   : > { %v1885_v2 = vpop.f32.mrf.mxu0 }
 0x55a   : > { %v2024_v42 = vmul.bf16 %v15738_v54, %v1912_v38  ;;  %v1911_v27 = vpack.c.bf16 %v1885_v2, %v1882_v29  ;;  %v15753_v38 = vld [vmem:[%s22609_s8 + $0x70] sm:$0xff]  }
 0x55b   : > { %v15765_v2 = vld [vmem:[%s22609_s8 + $0x30] sm:$0xff]  }
 0x55c   : > { %12403 = vmatprep.subr.bf16.mxu1 %v2024_v42 }
 0x55f   : > { %11792 = vmatmul.mubr.msk.bf16.gmra.mxu0 %vm1358_vm0, %v2352_v28  ;;  %v2356_v28 = vpop.permute.xlu1 %2355 }
 0x560   : > { %2473 = vmatprep.mubr.bf16.mxu0 %v22608_v25 }
 0x567   : > { %11793 = vmatmul.mubr.msk.bf16.gmra.mxu0 %vm1358_vm0, %v2354_v49 }
 0x568   : > { %2483 = vmatprep.mubr.bf16.mxu0 %v22608_v25 }
 0x56f   : > { %11794 = vmatmul.mubr.msk.bf16.gmra.mxu0 %vm1358_vm0, %v2356_v28 }
 0x570   : > { %2751 = vmatprep.mubr.bf16.mxu0 %v22608_v25  ;;  %v22610_v25 = vpack.c.bf16 %v15677_v26, %v15671_v61 }
 0x5ef   : > { %v12393_v41 = vpop.f32.mrf.mxu0 }
 0x5f1   : > { %v12394_v59 = vpop.f32.mrf.mxu0 }
 0x5f2   : > { %v12395_v11 = vadd.f32 %v12394_v59, %v12393_v41  ;;  %v2016_v59 = vmul.bf16 %v15748_v31, %v22610_v25  ;;  %v1903_v41 = vpack.c.bf16 %v15681_v20, %v15675_v37  ;;  %v15781_v37 = vld [vmem:[%s22609_s8 + $0x28] sm:$0xff]  }
 0x5f3   : > { %v12396_v49 = vpop.f32.mrf.mxu0 }
 0x5f4   : > { %13590 = vmatprep.mubr.msk.f32.mxu1 %vm1358_vm0, %v12395_v11  ;;  %v15772_v11 = vld [vmem:[%s22609_s8 + $0x68] sm:$0xff]   ;;  %v2015_v26 = vmul.bf16 %v15765_v2, %v1903_v41 }
 0x5f5   : > { %v12397_v42 = vpop.f32.mrf.mxu0  ;;  %v2022_v25 = vmul.bf16 %v15772_v11, %v1910_v4  ;;  %v15806_v4 = vld [vmem:[%s22609_s8 + $0x20] sm:$0xff]  }
 0x5f6   : > { %v12398_v28 = vadd.f32 %v12397_v42, %v12396_v49  ;;  %v2023_v49 = vmul.bf16 %v15753_v38, %v1911_v27  ;;  %v1909_v27 = vpack.c.bf16 %v1869_v60, %v15722_v13  ;;  %v1901_v13 = vpack.c.bf16 %v15669_v50, %v15661_v45  ;;  %v15821_v50 = vld [vmem:[%s22609_s8 + $0x18] sm:$0xff]  }
 0x5f7   : > { %v15767_v29 = vpop.f32.mrf.mxu0 }
 0x5f8   : > { %13591 = vmatmul.mubr.msk.f32.vlgmr.msra.gmra.mxu1 %vm1358_vm0, %v12398_v28 }
 0x5f9   : > { %12404 = vmatpush3.bf16.msra.mxu1 %v2016_v59  ;;  %2310 = vmatprep.mubr.bf16.mxu1 %v2277_v18  ;;  %v15776_v61 = vpop.f32.mrf.mxu0  ;;  %v15791_v18 = vld [vmem:[%s22609_s8 + $0x60] sm:$0xff]   ;;  %v22611_v59 = vpack.c.bf16 %v15663_v33, %v15659_v48  ;;  %v2013_v33 = vmul.bf16 %v15806_v4, %v1901_v13 }
 0x5fa   : > { %12405 = vmatprep.subr.bf16.mxu1 %v2023_v49  ;;  %v15813_v49 = vld [vmem:[%s22609_s8 + $0x58] sm:$0xff]  }
 0x5fb   : > { %v15784_v20 = vpop.f32.mrf.mxu0  ;;  %v2014_v41 = vmul.bf16 %v15781_v37, %v22611_v59 }
 0x5fd   : > { %12406 = vmatpush3.bf16.msra.mxu1 %v2015_v26  ;;  %v15795_v28 = vpop.f32.mrf.mxu0  ;;  %v2021_v26 = vmul.bf16 %v15791_v18, %v1909_v27  ;;  %v1907_v27 = vpack.c.bf16 %v15718_v19, %v15701_v35  ;;  %v1899_v19 = vpack.c.bf16 %v15657_v15, %v15651_v39  ;;  %v15850_v35 = vld [vmem:[%s22609_s8 + $0x10] sm:$0xff]  }
 0x5fe   : > { %12407 = vmatprep.subr.bf16.mxu1 %v2022_v25  ;;  %v22612_v25 = vpack.c.bf16 %v15708_v17, %v15697_v57  ;;  %v22613_v17 = vpack.c.bf16 %v15653_v10, %v15649_v21  ;;  %v15865_v21 = vld [vmem:[%s22609_s8 + $0x8] sm:$0xff]  }
 0x5ff   : > { %v15808_v60 = vpop.f32.mrf.mxu0  ;;  %v2011_v39 = vmul.bf16 %v15850_v35, %v1899_v19  ;;  %v22615_v19 = vpack.c.bf16 %v15643_v46, %v15639_v32 }
 0x600   : > { %v2020_v59 = vmul.bf16 %v15813_v49, %v22612_v25  ;;  %v2012_v57 = vmul.bf16 %v15821_v50, %v22613_v17  ;;  %v22614_v17 = vpack.c.bf16 %v15687_v58, %v15683_v1  ;;  %v1897_v1 = vpack.c.bf16 %v15647_v12, %v15641_v34 }
 0x601   : > { %12408 = vmatpush3.bf16.msra.mxu1 %v2014_v41  ;;  %v15816_v48 = vpop.f32.mrf.mxu0  ;;  %v15835_v41 = vld [vmem:[%s22609_s8 + $0x50] sm:$0xff]   ;;  %v22616_v34 = vpack.c.bf16 %v15703_v52, %v15693_v43 }
 0x602   : > { %12409 = vmatprep.subr.bf16.mxu1 %v2021_v26  ;;  %v2010_v26 = vmul.bf16 %v15865_v21, %v22615_v19 }
 0x603   : > { %v15824_v45 = vpop.f32.mrf.mxu0 }
 0x605   : > { %12410 = vmatpush3.bf16.msra.mxu1 %v2013_v33  ;;  %v15839_v13 = vpop.f32.mrf.mxu0  ;;  %v15857_v33 = vld [vmem:[%s22609_s8 + $0x48] sm:$0xff]  }
 0x606   : > { %12411 = vmatprep.subr.bf16.mxu1 %v2020_v59  ;;  %v2019_v59 = vmul.bf16 %v15835_v41, %v1907_v27  ;;  %v2018_v42 = vmul.bf16 %v15857_v33, %v22614_v17  ;;  %v1905_v27 = vpack.c.bf16 %v15691_v55, %v15685_v16  ;;  %v15892_v16 = vld [vmem:[%s22609_s8] sm:$0xff]  }
 0x607   : > { %v15852_v25 = vpop.f32.mrf.mxu0  ;;  %v2009_v46 = vmul.bf16 %v15892_v16, %v1897_v1  ;;  %v22626_v1 = vld [vmem:[#allocation79_spill] sm:$0xff] }
 0x609   : > { %12412 = vmatpush3.bf16.msra.mxu1 %v2012_v57  ;;  %v15860_v10 = vpop.f32.mrf.mxu0  ;;  %v15879_v57 = vld [vmem:[%s22609_s8 + $0x40] sm:$0xff]  }
 0x60a   : > { %12413 = vmatprep.subr.bf16.mxu1 %v2019_v59  ;;  %v2017_v55 = vmul.bf16 %v15879_v57, %v1905_v27 }
 0x60b   : > { %v15868_v15 = vpop.f32.mrf.mxu0 }
 0x60d   : > { %12414 = vmatpush3.bf16.msra.mxu1 %v2011_v39  ;;  %v15881_v59 = vpop.f32.mrf.mxu0 }
 0x60e   : > { %12415 = vmatprep.subr.bf16.mxu1 %v2018_v42 }
 0x60f   : > { %v15894_v58 = vpop.f32.mrf.mxu0 }
 0x611   : > { %12416 = vmatpush3.bf16.msra.mxu1 %v2010_v26  ;;  %v15897_v39 = vpop.f32.mrf.mxu0 }
 0x612   : > { %12417 = vmatprep.subr.bf16.mxu1 %v2017_v55  ;;  %v22627_v55 = vld [vmem:[#allocation80_spill] sm:$0xff] }
 0x613   : > { %v15900_v32 = vpop.f32.mrf.mxu0 }
 0x615   : > { %12418 = vmatpush3.bf16.msra.mxu1 %v2009_v46  ;;  %v15902_v42 = vpop.f32.mrf.mxu0  ;;  %v22628_v46 = vld [vmem:[#allocation41_spill] sm:$0xff] }
 0x616   : > { %13593 = vmatprep.subr.bf16.mxu1 %v15032_v8 }
 0x617   : > { %v15905_v12 = vpop.f32.mrf.mxu0 }
 0x618   : > { %2311 = vmatmul.mubr.bf16.vlgmr.msra.gmra.mxu1 %v22616_v34 }
 0x619   : > { %13594 = vmatpush3.bf16.msra.mxu1 %v15032_v8  ;;  %v15911_v26 = vpop.f32.mrf.mxu0  ;;  %13595 = vmatprep.mubr.msk.bf16.mxu1 %vm1358_vm0, %v15279_v44 }
 0x61a   : > { %12442 = vmatprep.subr.mxu1 %v15298_v36 }
 0x61b   : > { %v15916_v17 = vpop.f32.mrf.mxu0 }
 0x61d   : > { %v15918_v27 = vpop.f32.mrf.mxu0 }
 0x61f   : > { %v15920_v19 = vpop.f32.mrf.mxu0 }
 0x620   : > { %13596 = vmatmul.mubr.msk.bf16.vlgmr.msra.gmra.mxu1 %vm1358_vm0, %v15284_v51 }
 0x621   : > { %v2467_v43 = vpop.f32.mrf.mxu0  ;;  %13599 = vmatprep.mubr.msk.bf16.mxu1 %vm1358_vm0, %v15289_v14  ;;  %12443 = vmatpush3.msra.mxu1 %v15306_v0 }
 0x622   : > { %12444 = vmatprep.subr.mxu1 %v15311_v22 }
 0x623   : > { %v15928_v8 = vpop.f32.mrf.mxu0  ;;  %12445 = vmatpush3.msra.mxu1 %v15317_v3  ;;  %v22617_v3 = vld [vmem:[#allocation70_spill] sm:$0xff] }
 0x624   : > { %12446 = vmatprep.subr.mxu1 %v15322_v53  ;;  %v22618_v53 = vld [vmem:[#allocation57_spill] sm:$0xff] }
 0x625   : > { %v2471_v44 = vpop.f32.mrf.mxu0  ;;  %12447 = vmatpush3.msra.mxu1 %v15328_v30  ;;  %v22619_v30 = vld [vmem:[#allocation71_spill] sm:$0xff] }
 0x626   : > { %12448 = vmatprep.subr.mxu1 %v15339_v40  ;;  %v22620_v40 = vld [vmem:[#allocation58_spill] sm:$0xff] }
 0x627   : > { %v2475_v51 = vpop.f32.mrf.mxu0  ;;  %12449 = vmatpush3.msra.mxu1 %v15351_v6  ;;  %v22622_v6 = vld [vmem:[#allocation75_spill] sm:$0xff] }
 0x628   : > { %13600 = vmatmul.mubr.msk.bf16.gmra.mxu1 %vm1358_vm0, %v15333_v23  ;;  %12450 = vmatprep.subr.mxu1 %v15357_v63 }
 0x629   : > { %v2477_v14 = vpop.f32.mrf.mxu0  ;;  %13603 = vmatprep.mubr.msk.bf16.mxu1 %vm1358_vm0, %v15344_v5  ;;  %12451 = vmatpush3.msra.mxu1 %v15364_v62  ;;  %v22621_v5 = vld [vmem:[#allocation73_spill] sm:$0xff] }
 0x62a   : > { %12452 = vmatprep.subr.mxu1 %v15372_v7  ;;  %v22624_v62 = vld [vmem:[#allocation77_spill] sm:$0xff] }
 0x62b   : > { %v2479_v36 = vpop.f32.mrf.mxu0  ;;  %12453 = vmatpush3.msra.mxu1 %v15378_v56 }
 0x62c   : > { %12454 = vmatprep.subr.mxu1 %v15384_v9  ;;  %v22625_v9 = vld [vmem:[#allocation78_spill] sm:$0xff] }
 0x62d   : > { %v2481_v0 = vpop.f32.mrf.mxu0  ;;  %12455 = vmatpush3.msra.mxu1 %v15491_v47  ;;  %v22623_v47 = vld [vmem:[#allocation76_spill] sm:$0xff] }
 0x62e   : > { %12456 = vmatprep.subr.mxu1 %v15497_v24  ;;  %v2507_v24 = vpack.c.bf16 %v2481_v0, %v2477_v14  ;;  %v2505_v14 = vpack.c.bf16 %v2471_v44, %v2467_v43  ;;  %v22634_v0 = vld [vmem:[#allocation43_spill] sm:$0xff]  ;;  %v2503_v43 = vpack.c.bf16 %v15918_v27, %v15911_v26  ;;  %v22640_v44 = vld [vmem:[#allocation45_spill] sm:$0xff]  ;;  %v2501_v27 = vpack.c.bf16 %v15902_v42, %v15897_v39  ;;  %v22651_v42 = vld [vmem:[#allocation50_spill] sm:$0xff] }
 0x62f   : > { %v2485_v22 = vpop.f32.mrf.mxu0  ;;  %12457 = vmatpush3.msra.mxu1 %v22617_v3  ;;  %v22629_v3 = vld [vmem:[#allocation59_spill] sm:$0xff]  ;;  %v2498_v39 = vpack.c.bf16 %v15868_v15, %v15852_v25  ;;  %v22656_v25 = vld [vmem:[#allocation65_spill] sm:$0xff]  ;;  %v22657_v15 = vpack.c.bf16 %v15824_v45, %v15808_v60  ;;  %v22666_v45 = vld [vmem:[#allocation10_spill] sm:$0xff] }
 0x630   : > { %13604 = vmatmul.mubr.msk.bf16.gmra.mxu1 %vm1358_vm0, %v22618_v53  ;;  %12458 = vmatprep.subr.mxu1 %v22619_v30  ;;  %v22630_v53 = vld [vmem:[#allocation81_spill] sm:$0xff]  ;;  %v2506_v30 = vpack.c.bf16 %v2479_v36, %v2475_v51  ;;  %v2504_v51 = vpack.c.bf16 %v15928_v8, %v15920_v19  ;;  %v22638_v36 = vld [vmem:[#allocation44_spill] sm:$0xff]  ;;  %v2502_v19 = vpack.c.bf16 %v15916_v17, %v15905_v12  ;;  %v22644_v8 = vld [vmem:[#allocation46_spill] sm:$0xff] }
 0x631   : > { %v2487_v23 = vpop.f32.mrf.mxu0  ;;  %13607 = vmatprep.mubr.msk.bf16.mxu1 %vm1358_vm0, %v22620_v40  ;;  %12459 = vmatpush3.msra.mxu1 %v22621_v5  ;;  %v22631_v40 = vld [vmem:[#allocation42_spill] sm:$0xff]  ;;  %v2500_v12 = vpack.c.bf16 %v15900_v32, %v15894_v58  ;;  %v22648_v17 = vld [vmem:[#allocation48_spill] sm:$0xff]  ;;  %v2497_v58 = vpack.c.bf16 %v15839_v13, %v15816_v48  ;;  %v22653_v32 = vld [vmem:[#allocation51_spill] sm:$0xff] }
 0x632   : > { %12460 = vmatprep.subr.mxu1 %v22622_v6  ;;  %v22633_v6 = vld [vmem:[#allocation82_spill] sm:$0xff]  ;;  %v22665_v60 = vld [vmem:[#allocation11_spill] sm:$0xff] }
 0x633   : > { %v2489_v63 = vpop.f32.mrf.mxu0  ;;  %12461 = vmatpush3.msra.mxu1 %v22623_v47  ;;  %v22636_v47 = vld [vmem:[#allocation84_spill] sm:$0xff]  ;;  %v15990_v26 = vld [vmem:[%s22521_s23 + $0x4] ss:$8 sps:$4 sm:$0xff]  }
 0x634   : > { %12462 = vmatprep.subr.mxu1 %v22624_v62  ;;  %v2508_v7 = vpack.c.bf16 %v2489_v63, %v2485_v22  ;;  %v22632_v22 = vld [vmem:[#allocation60_spill] sm:$0xff]  ;;  %v22635_v63 = vld [vmem:[#allocation83_spill] sm:$0xff]  ;;  %v22637_v62 = vld [vmem:[#allocation85_spill] sm:$0xff]  ;;  %22646 = vst [vmem:[#allocation70_spill] sm:$0xff] %v15990_v26 }
 0x635   : > { %v2491_v56 = vpop.f32.mrf.mxu0  ;;  %12463 = vmatpush3.msra.mxu1 %v22625_v9  ;;  %v2521_v9 = vmul.bf16 %v22640_v44, %v2505_v14  ;;  %v22652_v14 = vld [vmem:[#allocation64_spill] sm:$0xff]  ;;  %v22658_v48 = vld [vmem:[#allocation54_spill] sm:$0xff]  ;;  %v22667_v44 = vpack.c.bf16 %v22665_v60, %v22666_v45 }
 0x636   : > { %v2509_v52 = vpack.c.bf16 %v2491_v56, %v2487_v23  ;;  %12464 = vmatprep.subr.mxu1 %v22626_v1  ;;  %v2524_v5 = vmul.bf16 %v22631_v40, %v2508_v7  ;;  %v2523_v23 = vmul.bf16 %v22634_v0, %v2507_v24  ;;  %v2522_v7 = vmul.bf16 %v22638_v36, %v2506_v30  ;;  %v22639_v56 = vld [vmem:[#allocation86_spill] sm:$0xff]  ;;  %v22641_v24 = vld [vmem:[#allocation87_spill] sm:$0xff]  ;;  %v22643_v1 = vld [vmem:[#allocation61_spill] sm:$0xff] }
 0x637   : > { %12465 = vmatpush3.msra.mxu1 %v22627_v55  ;;  %v2520_v55 = vmul.bf16 %v22644_v8, %v2504_v51  ;;  %v2499_v30 = vpack.c.bf16 %v15881_v59, %v15860_v10  ;;  %v22649_v40 = vld [vmem:[#allocation49_spill] sm:$0xff]  ;;  %v22654_v59 = vld [vmem:[#allocation52_spill] sm:$0xff]  ;;  %v2512_v13 = vmul.bf16 %v22658_v48, %v22657_v15  ;;  %v22660_v51 = vld [vmem:[#allocation55_spill] sm:$0xff] }
 0x638   : > { %v2525_v34 = vmul.bf16 %v22628_v46, %v2509_v52  ;;  %13608 = vmatmul.mubr.msk.bf16.gmra.mxu1 %vm1358_vm0, %v22629_v3  ;;  %12466 = vmatprep.subr.mxu1 %v22630_v53  ;;  %v22642_v52 = vld [vmem:[#allocation88_spill] sm:$0xff]  ;;  %v22645_v46 = vld [vmem:[#allocation62_spill] sm:$0xff]  ;;  %v2518_v53 = vmul.bf16 %v22648_v17, %v2502_v19  ;;  %v2514_v0 = vmul.bf16 %v22654_v59, %v2498_v39  ;;  %v22678_v15 = vld [vmem:[#allocation35_spill] sm:$0xff] }
 0x639   : > { %13611 = vmatprep.mubr.msk.bf16.mxu1 %vm1358_vm0, %v22632_v22  ;;  %12467 = vmatpush3.msra.mxu1 %v22633_v6  ;;  %v22650_v22 = vld [vmem:[#allocation63_spill] sm:$0xff]  ;;  %v2516_v6 = vmul.bf16 %v22651_v42, %v2500_v12  ;;  %v2515_v10 = vmul.bf16 %v22653_v32, %v2499_v30  ;;  %v22669_v30 = vld [vmem:[#allocation66_spill] sm:$0xff]  ;;  %v22672_v32 = vld [vmem:[#allocation69_spill] sm:$0xff] }
 0x63a   : > { %2719 = vmatprep.subr.bf16.mxu0 %v2525_v34  ;;  %12468 = vmatprep.subr.mxu1 %v22635_v63  ;;  %v22647_v34 = vld [vmem:[#allocation47_spill] sm:$0xff]  ;;  %v22655_v63 = vld [vmem:[#allocation53_spill] sm:$0xff] }
 0x63b   : > { %2720 = vmatpush1.bf16.msra.mxu0 %v2524_v5  ;;  %12469 = vmatpush3.msra.mxu1 %v22636_v47  ;;  %v2519_v3 = vmul.bf16 %v22647_v34, %v2503_v43  ;;  %v2517_v5 = vmul.bf16 %v22649_v40, %v2501_v27  ;;  %v2513_v47 = vmul.bf16 %v22655_v63, %v2497_v58  ;;  %v22664_v43 = vld [vmem:[#allocation89_spill] sm:$0xff]  ;;  %v22675_v63 = vld [vmem:[#allocation36_spill] sm:$0xff] }
 0x63c   : > { %2721 = vmatprep.subr.bf16.mxu0 %v2523_v23  ;;  %12470 = vmatprep.subr.mxu1 %v22637_v62  ;;  %v2495_v23 = vpack.c.bf16 %v15795_v28, %v15776_v61  ;;  %v22659_v62 = vld [vmem:[#allocation72_spill] sm:$0xff]  ;;  %v22661_v61 = vpack.c.bf16 %v15784_v20, %v15767_v29  ;;  %v22679_v48 = vld [vmem:[#allocation37_spill] sm:$0xff] }
 0x63d   : > { %12471 = vmatpush3.msra.mxu1 %v22639_v56  ;;  %v22662_v28 = vld [vmem:[#allocation56_spill] sm:$0xff]  ;;  %v22663_v56 = vld [vmem:[#allocation74_spill] sm:$0xff] }
 0x63e   : > { %12472 = vmatprep.subr.mxu1 %v22641_v24  ;;  %v2511_v36 = vmul.bf16 %v22660_v51, %v2495_v23  ;;  %v22674_v23 = vld [vmem:[#allocation34_spill] sm:$0xff] }
 0x63f   : > { %2722 = vmatpush1.bf16.msra.mxu0 %v2522_v7  ;;  %12473 = vmatpush3.msra.mxu1 %v22642_v52  ;;  %v2510_v7 = vmul.bf16 %v22662_v28, %v22661_v61 }
 0x640   : > { %2723 = vmatprep.subr.bf16.mxu0 %v2521_v9  ;;  %13612 = vmatmul.mubr.msk.bf16.gmra.mxu1 %vm1358_vm0, %v22643_v1  ;;  %v22668_v9 = vld [vmem:[#allocation90_spill] sm:$0xff] }
 0x641   : > { %13615 = vmatprep.mubr.msk.bf16.mxu1 %vm1358_vm0, %v22645_v46  ;;  %3081 = vmatprep.subr.bf16.mxu1 %v15990_v26 }
 0x643   : > { %2724 = vmatpush1.bf16.msra.mxu0 %v2520_v55 }
 0x644   : > { %2725 = vmatprep.subr.bf16.mxu0 %v2519_v3 }
 0x647   : > { %2726 = vmatpush1.bf16.msra.mxu0 %v2518_v53 }
 0x648   : > { %2727 = vmatprep.subr.bf16.mxu0 %v2517_v5  ;;  %13616 = vmatmul.mubr.msk.bf16.gmra.mxu1 %vm1358_vm0, %v22650_v22  ;;  %v22670_v5 = vld [vmem:[#allocation67_spill] sm:$0xff] }
 0x649   : > { %13619 = vmatprep.mubr.msk.bf16.mxu1 %vm1358_vm0, %v22652_v14  ;;  %v22671_v14 = vld [vmem:[#allocation68_spill] sm:$0xff] }
 0x64b   : > { %2728 = vmatpush1.bf16.msra.mxu0 %v2516_v6 }
 0x64c   : > { %2729 = vmatprep.subr.bf16.mxu0 %v2515_v10 }
 0x64f   : > { %2730 = vmatpush1.bf16.msra.mxu0 %v2514_v0  ;;  %v22673_v0 = vld [vmem:[#allocation33_spill] sm:$0xff] }
 0x650   : > { %2731 = vmatprep.subr.bf16.mxu0 %v2513_v47  ;;  %13620 = vmatmul.mubr.msk.bf16.gmra.mxu1 %vm1358_vm0, %v22656_v25  ;;  %v22676_v47 = vld [vmem:[#allocation32_spill] sm:$0xff]  ;;  %v22677_v25 = vld [vmem:[#allocation38_spill] sm:$0xff] }
 0x651   : > { %13623 = vmatprep.mubr.msk.bf16.mxu1 %vm1358_vm0, %v22659_v62 }
 0x653   : > { %2732 = vmatpush1.bf16.msra.mxu0 %v2512_v13  ;;  %v22680_v13 = vld [vmem:[#allocation39_spill] sm:$0xff] }
 0x654   : > { %2733 = vmatprep.subr.bf16.mxu0 %v2511_v36 }
 0x657   : > { %2734 = vmatpush1.bf16.msra.mxu0 %v2510_v7 }
 0x658   : > { %13624 = vmatmul.mubr.msk.bf16.gmra.mxu1 %vm1358_vm0, %v22663_v56  ;;  %13627 = vmatprep.subr.mxu0 %v22664_v43 }
 0x65a   : > { %2752 = vmatmul.mubr.bf16.vlgmr.msra.gmra.mxu0 %v22667_v44 }
 0x65b   : > { %13628 = vmatpush3.msra.mxu0 %v22664_v43 }
 0x65c   : > { %13629 = vmatprep.subr.mxu0 %v22668_v9 }
 0x65d   : > { %13630 = vmatpush3.msra.mxu0 %v22668_v9 }
 0x6b8   : > { %v13592_v24 = vpop.f32.mrf.mxu1 }
 0x6b9   : > { %14236 = vrcp.f32 %v13592_v24 }
 0x6ba   : > { %v2267_v29 = vpop.f32.mrf.mxu1 }
 0x6bb   : > { %14238 = vrcp.f32 %v2267_v29 }
 0x6c6   : > { %v14237_v55 = vpop.eup %14236 }
 0x6c8   : > { %v14239_v27 = vpop.eup %14238 }
 0x6d8   : > { %v12419_v20 = vpop.f32.mrf.mxu1 }
 0x6da   : > { %v12420_v52 = vpop.f32.mrf.mxu1 }
 0x6db   : > { %v12421_v19 = vadd.f32 %v12420_v52, %v12419_v20 }
 0x6dc   : > { %v12422_v1 = vpop.f32.mrf.mxu1 }
 0x6dd   : > { %v2320_v34 = vmul.f32 %v14239_v27, %v12421_v19 }
 0x6de   : > { %v12423_v8 = vpop.f32.mrf.mxu1 }
 0x6df   : > { %v12424_v46 = vadd.f32 %v12423_v8, %v12422_v1 }
 0x6e0   : > { %v16050_v62 = vpop.f32.mrf.mxu1 }
 0x6e1   : > { %v2322_v3 = vmul.f32 %v14237_v55, %v12424_v46 }
 0x6e2   : > { %v16052_v51 = vpop.f32.mrf.mxu1 }
 0x6e3   : > { %v12284_v12 = vpack.c.bf16 %v2322_v3, %v2320_v34 }
 0x6e4   : > { %v16054_v36 = vpop.f32.mrf.mxu1 }
 0x6e5   : > { %12285 = vst [vmem:[#allocation2] sm:$0xff] %v12284_v12  }
 0x6e6   : > { %v16058_v28 = vpop.f32.mrf.mxu1 }
 0x6e8   : > { %v16060_v7 = vpop.f32.mrf.mxu1 }
 0x6ea   : > { %v16062_v56 = vpop.f32.mrf.mxu1 }
 0x6ec   : > { %v16064_v43 = vpop.f32.mrf.mxu1 }
 0x6ee   : > { %v16068_v45 = vpop.f32.mrf.mxu1 }
 0x6f0   : > { %v16070_v44 = vpop.f32.mrf.mxu1 }
 0x6f2   : > { %v16072_v9 = vpop.f32.mrf.mxu1 }
 0x6f4   : > { %v16074_v24 = vpop.f32.mrf.mxu1 }
 0x6f6   : > { %v16078_v20 = vpop.f32.mrf.mxu1 }
 0x6f8   : > { %v16080_v52 = vpop.f32.mrf.mxu1 }
 0x6fa   : > { %v16082_v1 = vpop.f32.mrf.mxu1 }
 0x6fc   : > { %v16084_v19 = vpop.f32.mrf.mxu1 }
 0x6fe   : > { %v16088_v55 = vpop.f32.mrf.mxu1 }
 0x700   : > { %v16090_v46 = vpop.f32.mrf.mxu1 }
 0x702   : > { %v16092_v27 = vpop.f32.mrf.mxu1 }
 0x704   : > { %v16094_v34 = vpop.f32.mrf.mxu1 }
 0x706   : > { %v16098_v12 = vpop.f32.mrf.mxu1 }
 0x71a   : > { %v2753_v17 = vpop.f32.mrf.mxu0 }
 0x71b   : > { %v2754_v40 = vadd.f32 %v2753_v17, %v22669_v30  ;;  %v16100_v17 = vpop.f32.mrf.mxu1 }
 0x71c   : > { %v2755_v53 = vpop.f32.mrf.mxu0 }
 0x71d   : > { %v2756_v22 = vadd.f32 %v2755_v53, %v22670_v5  ;;  %v16102_v53 = vpop.f32.mrf.mxu1 }
 0x71e   : > { %v2757_v39 = vpop.f32.mrf.mxu0 }
 0x71f   : > { %v2762_v42 = vmax.f32 %v2754_v40, %v2756_v22  ;;  %v2758_v58 = vadd.f32 %v2757_v39, %v22671_v14 }
 0x720   : > { %v2759_v6 = vpop.f32.mrf.mxu0 }
 0x721   : > { %v2760_v10 = vadd.f32 %v2759_v6, %v22672_v32  ;;  %2763 = vmax.xlane.f32.xlu1 %v2762_v42  ;;  %v16104_v42 = vpop.f32.mrf.mxu1 }
 0x723   : > { %v2765_v59 = vmax.f32 %v2758_v58, %v2760_v10 }
 0x725   : > { %2766 = vmax.xlane.f32.xlu0 %v2765_v59  ;;  %v16108_v59 = vpop.f32.mrf.mxu1 }
 0x727   : > { %v16110_v29 = vpop.f32.mrf.mxu1 }
 0x732   : > { %3029 = vrot.lane.b32.xlu1 %v22673_v0, %s14598_s9 }
 0x736   : > { %3031 = vrot.lane.b32.xlu1 %v22674_v23, %s14598_s9 }
 0x73a   : > { %3035 = vrot.lane.b32.xlu1 %v22675_v63, %s14598_s9 }
 0x73b   : > { %3027 = vrot.lane.b32.xlu0 %v22676_v47, %s14598_s9 }
 0x73e   : > { %3039 = vrot.lane.b32.xlu1 %v22677_v25, %s14598_s9 }
 0x73f   : > { %3033 = vrot.lane.b32.xlu0 %v22678_v15, %s14598_s9 }
 0x743   : > { %3037 = vrot.lane.b32.xlu0 %v22679_v48, %s14598_s9 }
 0x747   : > { %3041 = vrot.lane.b32.xlu0 %v22680_v13, %s14598_s9  ;;  %s14602_s9 = smov 32  }
 0x7aa   : > { %v2764_v30 = vpop.xlane.xlu1 %2763 }
 0x7ab   : > { %v2768_v5 = vsub.f32 %v2754_v40, %v2764_v30  ;;  %v2769_v39 = vsub.f32 %v2756_v22, %v2764_v30  ;;  %v16112_v40 = vpop.f32.mrf.mxu1 }
 0x7ad   : > { %v2772_v14 = vmul.f32 1.442695, %v2768_v5  ;;  %v2774_v32 = vmul.f32 1.442695, %v2769_v39  ;;  %v16114_v22 = vpop.f32.mrf.mxu1 }
 0x7ae   : > { %v2767_v61 = vpop.xlane.xlu0 %2766  ;;  %v3030_v6 = vpop.permute.xlu1 %3029 }
 0x7af   : > { %14240 = vpow2.f32 %v2772_v14  ;;  %v2770_v3 = vsub.f32 %v2758_v58, %v2767_v61  ;;  %v2771_v60 = vsub.f32 %v2760_v10, %v2767_v61  ;;  %v16118_v5 = vpop.f32.mrf.mxu1 }
 0x7b0   : > { %14242 = vpow2.f32 %v2774_v32 }
 0x7b1   : > { %v2776_v8 = vmul.f32 1.442695, %v2770_v3  ;;  %v2778_v13 = vmul.f32 1.442695, %v2771_v60  ;;  %v13625_v39 = vpop.f32.mrf.mxu1 }
 0x7b3   : > { %14244 = vpow2.f32 %v2776_v8  ;;  %v2672_v14 = vpop.f32.mrf.mxu1 }
 0x7b4   : > { %14246 = vpow2.f32 %v2778_v13  ;;  %v16129_v13 = vld [vmem:[%s22521_s23] ss:$8 sps:$4 sm:$0xff]  }
 0x7b5   : > { %v13626_v58 = vpop.f32.mrf.mxu1  ;;  %22681 = vst [vmem:[#allocation57_spill] sm:$0xff] %v16129_v13 }
 0x7b6   : > { %v2702_v61 = vpack.c.bf16 %v13626_v58, %v13625_v39 }
 0x7b8   : > { %v2718_v60 = vmul.bf16 %v15738_v54, %v2702_v61  ;;  %v22682_v54 = vmov 0   ;;  %v3028_v61 = vpop.permute.xlu0 %3027 }
 0x7ba   : > { %12484 = vmatprep.subr.bf16.mxu0 %v2718_v60  ;;  %v3032_v60 = vpop.permute.xlu1 %3031 }
 0x7bc   : > { %v16120_v10 = vpop.eup %14240 }
 0x7bd   : > { %v14243_v32 = vpop.eup %14242 }
 0x7be   : > { %2876 = vmatprep.mubr.f32.mxu1 %v14243_v32 }
 0x7bf   : > { %2877 = vmatmul.mubr.f32.vlgmr.msra.gmra.mxu1 %v16120_v10 }
 0x7c0   : > { %v16124_v8 = vpop.eup %14244  ;;  %3082 = vmatpush1.bf16.msra.mxu1 %v16129_v13 }
 0x7c1   : > { %v14247_v3 = vpop.eup %14246 }
 0x7c2   : > { %2881 = vmatprep.mubr.f32.mxu1 %v14247_v3  ;;  %v2971_v58 = vpack.c.bf16 %v14247_v3, %v14243_v32  ;;  %v3034_v32 = vpop.permute.xlu0 %3033  ;;  %v3036_v3 = vpop.permute.xlu1 %3035 }
 0x7c3   : > { %2882 = vmatmul.mubr.f32.gmra.mxu1 %v16124_v8 }
 0x7c4   : > { %3099 = vmatprep.mubr.bf16.mxu1 %v22682_v54 }
 0x7c7   : > { %11815 = vmatmul.mubr.msk.bf16.vlgmr.msra.gmra.mxu1 %vm1358_vm0, %v3028_v61  ;;  %v3038_v61 = vpop.permute.xlu0 %3037 }
 0x7c8   : > { %3109 = vmatprep.mubr.bf16.mxu1 %v22682_v54 }
 0x7cf   : > { %11816 = vmatmul.mubr.msk.bf16.gmra.mxu1 %vm1358_vm0, %v3030_v6  ;;  %v3040_v6 = vpop.permute.xlu1 %3039 }
 0x7d0   : > { %3119 = vmatprep.mubr.bf16.mxu1 %v22682_v54 }
 0x7d7   : > { %11817 = vmatmul.mubr.msk.bf16.gmra.mxu1 %vm1358_vm0, %v3032_v60  ;;  %v3042_v60 = vpop.permute.xlu0 %3041 }
 0x7d8   : > { %3129 = vmatprep.mubr.bf16.mxu1 %v22682_v54 }
 0x7df   : > { %11818 = vmatmul.mubr.msk.bf16.gmra.mxu1 %vm1358_vm0, %v3034_v32  ;;  %v2675_v32 = vpop.f32.mrf.mxu1 }
 0x7e0   : > { %3139 = vmatprep.mubr.bf16.mxu1 %v22682_v54  ;;  %v2701_v48 = vpack.c.bf16 %v2675_v32, %v2672_v14  ;;  %v16268_v32 = vld [vmem:[%s22573_s4 + $0x10] sm:$0xff]  }
 0x7e7   : > { %11819 = vmatmul.mubr.msk.bf16.gmra.mxu1 %vm1358_vm0, %v3036_v3 }
 0x7e8   : > { %3149 = vmatprep.mubr.bf16.mxu1 %v22682_v54 }
 0x7ef   : > { %11820 = vmatmul.mubr.msk.bf16.gmra.mxu1 %vm1358_vm0, %v3038_v61 }
 0x7f0   : > { %3159 = vmatprep.mubr.bf16.mxu1 %v22682_v54 }
 0x7f7   : > { %11821 = vmatmul.mubr.msk.bf16.gmra.mxu1 %vm1358_vm0, %v3040_v6  ;;  %v22683_v6 = vpack.c.bf16 %v16084_v19, %v16080_v52 }
 0x7f8   : > { %3169 = vmatprep.mubr.bf16.mxu1 %v22682_v54 }
 0x7f9   : > { %v2710_v15 = vmul.bf16 %v15748_v31, %v22683_v6  ;;  %v22684_v31 = vpack.c.bf16 %v16114_v22, %v16110_v29 }
 0x7fb   : > { %v2716_v52 = vmul.bf16 %v15772_v11, %v22684_v31  ;;  %v16282_v31 = vld [vmem:[%s22573_s4 + $0x20] sm:$0xff]  }
 0x7ff   : > { %11822 = vmatmul.mubr.msk.bf16.gmra.mxu1 %vm1358_vm0, %v3042_v60  ;;  %v2693_v60 = vpack.c.bf16 %v16088_v55, %v16082_v1  ;;  %v2699_v1 = vpack.c.bf16 %v16118_v5, %v16112_v40 }
 0x800   : > { %3437 = vmatprep.mubr.bf16.mxu1 %v22682_v54  ;;  %v2717_v54 = vmul.bf16 %v15753_v38, %v2701_v48  ;;  %v2691_v48 = vpack.c.bf16 %v16078_v20, %v16072_v9  ;;  %v2697_v9 = vpack.c.bf16 %v16108_v59, %v16102_v53 }
 0x801   : > { %v2715_v11 = vmul.bf16 %v15791_v18, %v2699_v1 }
 0x802   : > { %v2707_v55 = vmul.bf16 %v15806_v4, %v2691_v48  ;;  %v22687_v4 = vpack.c.bf16 %v16064_v43, %v16060_v7  ;;  %v22688_v7 = vpack.c.bf16 %v16094_v34, %v16090_v46 }
 0x804   : > { %v2706_v20 = vmul.bf16 %v15821_v50, %v22687_v4  ;;  %v2712_v50 = vmul.bf16 %v15857_v33, %v22688_v7  ;;  %v16316_v7 = vld [vmem:[%s22553_s29 + $0x70] ss:$8 sps:$4 sm:$0xff]  }
 0x805   : > { %22697 = vst [vmem:[#allocation76_spill] sm:$0xff] %v16316_v7 }
 0x87f   : > { %v12474_v39 = vpop.f32.mrf.mxu1 }
 0x881   : > { %v12475_v3 = vpop.f32.mrf.mxu1 }
 0x882   : > { %v12476_v30 = vadd.f32 %v12475_v3, %v12474_v39  ;;  %v22691_v39 = vld [vmem:[#allocation15_spill] sm:$0xff] }
 0x883   : > { %v12477_v13 = vpop.f32.mrf.mxu1 }
 0x884   : > { %13631 = vmatprep.mubr.msk.f32.mxu0 %vm1358_vm0, %v12476_v30  ;;  %v2709_v30 = vmul.bf16 %v15765_v2, %v2693_v60  ;;  %v22685_v2 = vpack.c.bf16 %v16074_v24, %v16070_v44  ;;  %v22686_v44 = vpack.c.bf16 %v16104_v42, %v16100_v17  ;;  %v2689_v17 = vpack.c.bf16 %v16068_v45, %v16062_v56  ;;  %v16275_v60 = vld [vmem:[%s22573_s4 + $0x18] sm:$0xff]  }
 0x885   : > { %v12478_v61 = vpop.f32.mrf.mxu1  ;;  %v2695_v56 = vpack.c.bf16 %v16098_v12, %v16092_v27  ;;  %v22690_v12 = vld [vmem:[#allocation12_spill] sm:$0xff] }
 0x886   : > { %v12479_v26 = vadd.f32 %v12478_v61, %v12477_v13  ;;  %v2705_v59 = vmul.bf16 %v15850_v35, %v2689_v17  ;;  %v2687_v35 = vpack.c.bf16 %v16058_v28, %v16052_v51 }
 0x887   : > { %v16159_v25 = vpop.f32.mrf.mxu1  ;;  %v2711_v46 = vmul.bf16 %v15879_v57, %v2695_v56  ;;  %v22692_v57 = vpack.c.bf16 %v16124_v8, %v16120_v10  ;;  %v16261_v10 = vld [vmem:[%s22573_s4 + $0x8] sm:$0xff]   ;;  %v16322_v56 = vld [vmem:[%s22573_s4 + $0x40] sm:$0xff]  }
 0x888   : > { %13632 = vmatmul.mubr.msk.f32.vlgmr.msra.gmra.mxu0 %vm1358_vm0, %v12479_v26  ;;  %v2703_v27 = vmul.bf16 %v15892_v16, %v2687_v35  ;;  %v16252_v16 = vld [vmem:[%s22573_s4] sm:$0xff]   ;;  %22698 = vst [vmem:[#allocation77_spill] sm:$0xff] %v16322_v56 }
 0x889   : > { %12485 = vmatpush3.bf16.msra.mxu0 %v2710_v15  ;;  %3004 = vmatprep.mubr.bf16.mxu0 %v2971_v58  ;;  %v16163_v14 = vpop.f32.mrf.mxu1  ;;  %v2708_v15 = vmul.bf16 %v15781_v37, %v22685_v2  ;;  %v2714_v37 = vmul.bf16 %v15813_v49, %v22686_v44  ;;  %v2713_v49 = vmul.bf16 %v15835_v41, %v2697_v9 }
 0x88a   : > { %12486 = vmatprep.subr.bf16.mxu0 %v2717_v54  ;;  %v22689_v41 = vpack.c.bf16 %v16054_v36, %v16050_v62  ;;  %v1240_v62 = vpack.c.bf16 %v22691_v39, %v22690_v12 }
 0x88b   : > { %v16166_v13 = vpop.f32.mrf.mxu1 }
 0x88c   : > { %v3180_v38 = vpack.c.bf16 %v16166_v13, %v16159_v25  ;;  %v2704_v45 = vmul.bf16 %v15865_v21, %v22689_v41  ;;  %v16491_v25 = vld [vmem:[%s22183_s5 + $0x78] sm:$0xff]  ;;  %v16496_v13 = vld [vmem:[%s22183_s5 + $0xf0] sm:$0xff] }
 0x88d   : > { %12487 = vmatpush3.bf16.msra.mxu0 %v2709_v30  ;;  %v16176_v26 = vpop.f32.mrf.mxu1 }
 0x88e   : > { %12488 = vmatprep.subr.bf16.mxu0 %v2716_v52 }
 0x88f   : > { %v16184_v29 = vpop.f32.mrf.mxu1 }
 0x891   : > { %12489 = vmatpush3.bf16.msra.mxu0 %v2708_v15  ;;  %v16187_v19 = vpop.f32.mrf.mxu1  ;;  %v16289_v15 = vld [vmem:[%s22573_s4 + $0x28] sm:$0xff]  }
 0x892   : > { %12490 = vmatprep.subr.bf16.mxu0 %v2715_v11  ;;  %22693 = vst [vmem:[#allocation71_spill] sm:$0xff] %v16289_v15  ;;  %v16296_v11 = vld [vmem:[%s22573_s4 + $0x30] sm:$0xff]  }
 0x893   : > { %v16190_v40 = vpop.f32.mrf.mxu1  ;;  %22694 = vst [vmem:[#allocation58_spill] sm:$0xff] %v16296_v11 }
 0x894   : > { %v3182_v24 = vpack.c.bf16 %v16190_v40, %v16184_v29  ;;  %v16467_v29 = vld [vmem:[%s22553_s29] ss:$8 sps:$4 sm:$0xff]  }
 0x895   : > { %12491 = vmatpush3.bf16.msra.mxu0 %v2707_v55  ;;  %v16200_v18 = vpop.f32.mrf.mxu1  ;;  %22718 = vst [vmem:[#allocation46_spill] sm:$0xff] %v16467_v29  ;;  %v3196_v40 = vmul.bf16 %v16467_v29, %v3180_v38  ;;  %v16502_v38 = vld [vmem:[%s22183_s5 + $0x70] sm:$0xff] }
 0x896   : > { %12492 = vmatprep.subr.bf16.mxu0 %v2714_v37  ;;  %v16680_v29 = vld [vmem:[%s22183_s5 + $0x90] sm:$0xff] }
 0x897   : > { %v16208_v42 = vpop.f32.mrf.mxu1  ;;  %22739 = vst [vmem:[#allocation89_spill] sm:$0xff] %v16680_v29 }
 0x899   : > { %12493 = vmatpush3.bf16.msra.mxu0 %v2706_v20  ;;  %v16211_v53 = vpop.f32.mrf.mxu1  ;;  %v16303_v20 = vld [vmem:[%s22553_s29 + $0x74] ss:$8 sps:$4 sm:$0xff]  }
 0x89a   : > { %12494 = vmatprep.subr.bf16.mxu0 %v2713_v49  ;;  %22695 = vst [vmem:[#allocation73_spill] sm:$0xff] %v16303_v20  ;;  %v16309_v49 = vld [vmem:[%s22573_s4 + $0x38] sm:$0xff]  }
 0x89b   : > { %v16214_v22 = vpop.f32.mrf.mxu1  ;;  %22696 = vst [vmem:[#allocation75_spill] sm:$0xff] %v16309_v49 }
 0x89d   : > { %12495 = vmatpush3.bf16.msra.mxu0 %v2705_v59  ;;  %v16222_v43 = vpop.f32.mrf.mxu1 }
 0x89e   : > { %12496 = vmatprep.subr.bf16.mxu0 %v2712_v50 }
 0x89f   : > { %v16230_v5 = vpop.f32.mrf.mxu1 }
 0x8a1   : > { %12497 = vmatpush3.bf16.msra.mxu0 %v2704_v45  ;;  %v16233_v33 = vpop.f32.mrf.mxu1  ;;  %v16329_v45 = vld [vmem:[%s22553_s29 + $0x64] ss:$8 sps:$4 sm:$0xff]  }
 0x8a2   : > { %12498 = vmatprep.subr.bf16.mxu0 %v2711_v46  ;;  %22699 = vst [vmem:[#allocation78_spill] sm:$0xff] %v16329_v45 }
 0x8a3   : > { %v16236_v34 = vpop.f32.mrf.mxu1 }
 0x8a5   : > { %12499 = vmatpush3.bf16.msra.mxu0 %v2703_v27  ;;  %v16240_v21 = vpop.f32.mrf.mxu1  ;;  %v16335_v27 = vld [vmem:[%s22553_s29 + $0x60] ss:$8 sps:$4 sm:$0xff]  }
 0x8a6   : > { %13634 = vmatprep.subr.bf16.mxu0 %v1240_v62  ;;  %22700 = vst [vmem:[#allocation79_spill] sm:$0xff] %v16335_v27 }
 0x8a7   : > { %v16242_v51 = vpop.f32.mrf.mxu1 }
 0x8a8   : > { %3005 = vmatmul.mubr.bf16.vlgmr.msra.gmra.mxu0 %v22692_v57 }
 0x8a9   : > { %13635 = vmatpush3.bf16.msra.mxu0 %v1240_v62  ;;  %v16247_v36 = vpop.f32.mrf.mxu1  ;;  %13636 = vmatprep.mubr.msk.bf16.mxu0 %vm1358_vm0, %v16252_v16  ;;  %v16342_v62 = vld [vmem:[%s22553_s29 + $0x54] ss:$8 sps:$4 sm:$0xff]  }
 0x8aa   : > { %22701 = vst [vmem:[#allocation80_spill] sm:$0xff] %v16342_v62 }
 0x8ab   : > { %v16256_v28 = vpop.f32.mrf.mxu1 }
 0x8ad   : > { %v3147_v58 = vpop.f32.mrf.mxu1 }
 0x8ae   : > { %v3189_v39 = vpack.c.bf16 %v3147_v58, %v16247_v36  ;;  %v3188_v36 = vpack.c.bf16 %v16256_v28, %v16242_v51  ;;  %v16357_v58 = vld [vmem:[%s22553_s29 + $0x50] ss:$8 sps:$4 sm:$0xff]   ;;  %v16372_v51 = vld [vmem:[%s22553_s29 + $0x44] ss:$8 sps:$4 sm:$0xff]  }
 0x8af   : > { %v3151_v54 = vpop.f32.mrf.mxu1  ;;  %22703 = vst [vmem:[#allocation59_spill] sm:$0xff] %v16357_v58  ;;  %22705 = vst [vmem:[#allocation42_spill] sm:$0xff] %v16372_v51 }
 0x8b0   : > { %13637 = vmatmul.mubr.msk.bf16.vlgmr.msra.gmra.mxu0 %vm1358_vm0, %v16261_v10  ;;  %v3205_v28 = vmul.bf16 %v16372_v51, %v3189_v39  ;;  %v16514_v39 = vld [vmem:[%s22183_s5 + $0x68] sm:$0xff] }
 0x8b1   : > { %v3153_v8 = vpop.f32.mrf.mxu1  ;;  %13640 = vmatprep.mubr.msk.bf16.mxu0 %vm1358_vm0, %v16268_v32 }
 0x8b3   : > { %v3155_v3 = vpop.f32.mrf.mxu1 }
 0x8b4   : > { %v3190_v46 = vpack.c.bf16 %v3155_v3, %v3151_v54  ;;  %v16348_v54 = vld [vmem:[%s22573_s4 + $0x48] sm:$0xff]   ;;  %v16363_v3 = vld [vmem:[%s22573_s4 + $0x50] sm:$0xff]  }
 0x8b5   : > { %v3157_v61 = vpop.f32.mrf.mxu1  ;;  %22702 = vst [vmem:[#allocation41_spill] sm:$0xff] %v16348_v54  ;;  %22704 = vst [vmem:[#allocation81_spill] sm:$0xff] %v16363_v3 }
 0x8b6   : > { %v3191_v41 = vpack.c.bf16 %v3157_v61, %v3153_v8  ;;  %v3206_v8 = vmul.bf16 %v16357_v58, %v3190_v46  ;;  %v3187_v61 = vpack.c.bf16 %v16240_v21, %v16233_v33  ;;  %v3185_v33 = vpack.c.bf16 %v16222_v43, %v16211_v53  ;;  %v16388_v21 = vld [vmem:[%s22553_s29 + $0x34] ss:$8 sps:$4 sm:$0xff]   ;;  %v16403_v43 = vld [vmem:[%s22553_s29 + $0x30] ss:$8 sps:$4 sm:$0xff]  }
 0x8b7   : > { %v3161_v6 = vpop.f32.mrf.mxu1  ;;  %22707 = vst [vmem:[#allocation82_spill] sm:$0xff] %v16388_v21  ;;  %v3184_v53 = vpack.c.bf16 %v16214_v22, %v16208_v42  ;;  %22709 = vst [vmem:[#allocation83_spill] sm:$0xff] %v16403_v43  ;;  %v16418_v42 = vld [vmem:[%s22553_s29 + $0x24] ss:$8 sps:$4 sm:$0xff]   ;;  %v16486_v46 = vld [vmem:[%s22183_s5 + $0xf8] sm:$0xff] }
 0x8b8   : > { %13641 = vmatmul.mubr.msk.bf16.gmra.mxu0 %vm1358_vm0, %v16275_v60  ;;  %v3207_v57 = vmul.bf16 %v16342_v62, %v3191_v41  ;;  %22711 = vst [vmem:[#allocation85_spill] sm:$0xff] %v16418_v42  ;;  %v3201_v22 = vmul.bf16 %v16418_v42, %v3185_v33  ;;  %v22721_v41 = vld [vmem:[#allocation13_spill] sm:$0xff]  ;;  %12523 = vmatprep.subr.mxu0 %v16486_v46  ;;  %v16550_v33 = vld [vmem:[%s22183_s5 + $0x50] sm:$0xff]  ;;  %v22749_v42 = vld [vmem:[#allocation39_spill] sm:$0xff] }
 0x8b9   : > { %v3163_v30 = vpop.f32.mrf.mxu1  ;;  %13644 = vmatprep.mubr.msk.bf16.mxu0 %vm1358_vm0, %v16282_v31  ;;  %12524 = vmatpush3.msra.mxu0 %v16491_v25 }
 0x8ba   : > { %12525 = vmatprep.subr.mxu0 %v16496_v13 }
 0x8bb   : > { %v3165_v52 = vpop.f32.mrf.mxu1  ;;  %12526 = vmatpush3.msra.mxu0 %v16502_v38 }
 0x8bc   : > { %v3192_v59 = vpack.c.bf16 %v3165_v52, %v3161_v6  ;;  %v3186_v6 = vpack.c.bf16 %v16236_v34, %v16230_v5  ;;  %v16394_v5 = vld [vmem:[%s22573_s4 + $0x58] sm:$0xff]  }
 0x8bd   : > { %v3167_v1 = vpop.f32.mrf.mxu1  ;;  %22708 = vst [vmem:[#allocation43_spill] sm:$0xff] %v16394_v5 }
 0x8be   : > { %v3193_v9 = vpack.c.bf16 %v3167_v1, %v3163_v30  ;;  %v3208_v12 = vmul.bf16 %v16335_v27, %v3192_v59  ;;  %v16380_v30 = vld [vmem:[%s22553_s29 + $0x40] ss:$8 sps:$4 sm:$0xff]   ;;  %v3203_v1 = vmul.bf16 %v16388_v21, %v3187_v61  ;;  %v3202_v34 = vmul.bf16 %v16403_v43, %v3186_v6  ;;  %v16532_v61 = vld [vmem:[%s22183_s5 + $0xd8] sm:$0xff]  ;;  %v16544_v6 = vld [vmem:[%s22183_s5 + $0xd0] sm:$0xff] }
 0x8bf   : > { %v3171_v2 = vpop.f32.mrf.mxu1  ;;  %22706 = vst [vmem:[#allocation60_spill] sm:$0xff] %v16380_v30  ;;  %v3204_v52 = vmul.bf16 %v16380_v30, %v3188_v36  ;;  %v16733_v43 = vld [vmem:[%s22184_s6 + $0x8] sm:$0xff] }
 0x8c0   : > { %13645 = vmatmul.mubr.msk.bf16.gmra.mxu0 %vm1358_vm0, %v16289_v15  ;;  %v3209_v35 = vmul.bf16 %v16329_v45, %v3193_v9  ;;  %v16438_v9 = vld [vmem:[%s22573_s4 + $0x68] sm:$0xff]   ;;  %22750 = vst [vmem:[#allocation68_spill] sm:$0xff] %v16733_v43 }
 0x8c1   : > { %v3173_v48 = vpop.f32.mrf.mxu1  ;;  %13648 = vmatprep.mubr.msk.bf16.mxu0 %vm1358_vm0, %v16296_v11  ;;  %22714 = vst [vmem:[#allocation45_spill] sm:$0xff] %v16438_v9 }
 0x8c3   : > { %v3175_v55 = vpop.f32.mrf.mxu1 }
 0x8c4   : > { %v3194_v44 = vpack.c.bf16 %v3175_v55, %v3171_v2  ;;  %v16409_v2 = vld [vmem:[%s22573_s4 + $0x60] sm:$0xff]  }
 0x8c5   : > { %v3177_v37 = vpop.f32.mrf.mxu1  ;;  %22710 = vst [vmem:[#allocation84_spill] sm:$0xff] %v16409_v2  ;;  %v16424_v55 = vld [vmem:[%s22553_s29 + $0x20] ss:$8 sps:$4 sm:$0xff]  }
 0x8c6   : > { %v3195_v4 = vpack.c.bf16 %v3177_v37, %v3173_v48  ;;  %v3210_v50 = vmul.bf16 %v16316_v7, %v3194_v44  ;;  %v3183_v48 = vpack.c.bf16 %v16200_v18, %v16187_v19  ;;  %22712 = vst [vmem:[#allocation44_spill] sm:$0xff] %v16424_v55  ;;  %v3200_v44 = vmul.bf16 %v16424_v55, %v3184_v53  ;;  %v16432_v19 = vld [vmem:[%s22553_s29 + $0x14] ss:$8 sps:$4 sm:$0xff]  }
 0x8c7   : > { %v3181_v37 = vpack.c.bf16 %v16176_v26, %v16163_v14  ;;  %22713 = vst [vmem:[#allocation86_spill] sm:$0xff] %v16432_v19  ;;  %v16445_v14 = vld [vmem:[%s22553_s29 + $0x10] ss:$8 sps:$4 sm:$0xff]  }
 0x8c8   : > { %v3211_v17 = vmul.bf16 %v16303_v20, %v3195_v4  ;;  %13649 = vmatmul.mubr.msk.bf16.gmra.mxu0 %vm1358_vm0, %v16309_v49  ;;  %v3199_v18 = vmul.bf16 %v16432_v19, %v3183_v48  ;;  %22715 = vst [vmem:[#allocation87_spill] sm:$0xff] %v16445_v14  ;;  %v3198_v26 = vmul.bf16 %v16445_v14, %v3182_v24  ;;  %v16454_v4 = vld [vmem:[%s22573_s4 + $0x70] sm:$0xff]   ;;  %v16476_v24 = vld [vmem:[%s22573_s4 + $0x78] sm:$0xff]   ;;  %v16706_v14 = vld [vmem:[%s22183_s5 + $0x80] sm:$0xff] }
 0x8c9   : > { %13652 = vmatprep.mubr.msk.bf16.mxu0 %vm1358_vm0, %v16322_v56  ;;  %22716 = vst [vmem:[#allocation88_spill] sm:$0xff] %v16454_v4  ;;  %22719 = vst [vmem:[#allocation62_spill] sm:$0xff] %v16476_v24  ;;  %v22746_v19 = vld [vmem:[#allocation35_spill] sm:$0xff]  ;;  %v22748_v55 = vld [vmem:[#allocation37_spill] sm:$0xff] }
 0x8ca   : > { %3405 = vmatprep.subr.bf16.mxu1 %v3211_v17  ;;  %v16461_v17 = vld [vmem:[%s22553_s29 + $0x4] ss:$8 sps:$4 sm:$0xff]   ;;  %22743 = vst [vmem:[#allocation66_spill] sm:$0xff] %v16706_v14 }
 0x8cb   : > { %3406 = vmatpush1.bf16.msra.mxu1 %v3210_v50  ;;  %22717 = vst [vmem:[#allocation61_spill] sm:$0xff] %v16461_v17  ;;  %v3197_v59 = vmul.bf16 %v16461_v17, %v3181_v37  ;;  %v22720_v50 = vld [vmem:[#allocation16_spill] sm:$0xff] }
 0x8cc   : > { %3407 = vmatprep.subr.bf16.mxu1 %v3209_v35  ;;  %v22722_v35 = vpack.c.bf16 %v22720_v50, %v22721_v41  ;;  %v16686_v17 = vld [vmem:[%s22183_s5 + $0x10] sm:$0xff] }
 0x8cd   : > { %22740 = vst [vmem:[#allocation11_spill] sm:$0xff] %v16686_v17 }
 0x8cf   : > { %3408 = vmatpush1.bf16.msra.mxu1 %v3208_v12  ;;  %v16508_v12 = vld [vmem:[%s22183_s5 + $0xe8] sm:$0xff] }
 0x8d0   : > { %3409 = vmatprep.subr.bf16.mxu1 %v3207_v57  ;;  %13653 = vmatmul.mubr.msk.bf16.gmra.mxu0 %vm1358_vm0, %v16348_v54  ;;  %v16520_v57 = vld [vmem:[%s22183_s5 + $0xe0] sm:$0xff] }
 0x8d1   : > { %13656 = vmatprep.mubr.msk.bf16.mxu0 %vm1358_vm0, %v16363_v3  ;;  %12527 = vmatprep.subr.mxu0 %v16508_v12 }
 0x8d2   : > { %12528 = vmatpush3.msra.mxu0 %v16514_v39 }
 0x8d3   : > { %3410 = vmatpush1.bf16.msra.mxu1 %v3206_v8  ;;  %v16526_v8 = vld [vmem:[%s22183_s5 + $0x60] sm:$0xff]  ;;  %12529 = vmatprep.subr.mxu0 %v16520_v57 }
 0x8d4   : > { %3411 = vmatprep.subr.bf16.mxu1 %v3205_v28  ;;  %v16538_v28 = vld [vmem:[%s22183_s5 + $0x58] sm:$0xff]  ;;  %12530 = vmatpush3.msra.mxu0 %v16526_v8 }
 0x8d5   : > { %12531 = vmatprep.subr.mxu0 %v16532_v61 }
 0x8d6   : > { %12532 = vmatpush3.msra.mxu0 %v16538_v28 }
 0x8d7   : > { %3412 = vmatpush1.bf16.msra.mxu1 %v3204_v52  ;;  %12533 = vmatprep.subr.mxu0 %v16544_v6 }
 0x8d8   : > { %3413 = vmatprep.subr.bf16.mxu1 %v3203_v1  ;;  %13657 = vmatmul.mubr.msk.bf16.gmra.mxu0 %vm1358_vm0, %v16394_v5  ;;  %v16556_v1 = vld [vmem:[%s22183_s5 + $0xc8] sm:$0xff] }
 0x8d9   : > { %13660 = vmatprep.mubr.msk.bf16.mxu0 %vm1358_vm0, %v16409_v2  ;;  %12534 = vmatpush3.msra.mxu0 %v16550_v33 }
 0x8da   : > { %12535 = vmatprep.subr.mxu0 %v16556_v1 }
 0x8db   : > { %3414 = vmatpush1.bf16.msra.mxu1 %v3202_v34 }
 0x8dc   : > { %3415 = vmatprep.subr.bf16.mxu1 %v3201_v22 }
 0x8df   : > { %3416 = vmatpush1.bf16.msra.mxu1 %v3200_v44 }
 0x8e0   : > { %3417 = vmatprep.subr.bf16.mxu1 %v3199_v18  ;;  %13661 = vmatmul.mubr.msk.bf16.gmra.mxu0 %vm1358_vm0, %v16438_v9  ;;  %v22745_v9 = vld [vmem:[#allocation38_spill] sm:$0xff] }
 0x8e1   : > { %13664 = vmatprep.mubr.msk.bf16.mxu0 %vm1358_vm0, %v16454_v4  ;;  %v16701_v4 = vld [vmem:[%s22183_s5 + $0x8] sm:$0xff] }
 0x8e2   : > { %22742 = vst [vmem:[#allocation90_spill] sm:$0xff] %v16701_v4 }
 0x8e3   : > { %3418 = vmatpush1.bf16.msra.mxu1 %v3198_v26 }
 0x8e4   : > { %3419 = vmatprep.subr.bf16.mxu1 %v3197_v59 }
 0x8e7   : > { %3420 = vmatpush1.bf16.msra.mxu1 %v3196_v40 }
 0x8e8   : > { %13665 = vmatmul.mubr.msk.bf16.gmra.mxu0 %vm1358_vm0, %v16476_v24  ;;  %v16675_v24 = vld [vmem:[%s22183_s5 + $0x18] sm:$0xff]  ;;  %13668 = vmatprep.subr.mxu1 %v16733_v43 }
 0x8e9   : > { %22738 = vst [vmem:[#allocation74_spill] sm:$0xff] %v16675_v24 }
 0x8ea   : > { %3438 = vmatmul.mubr.bf16.vlgmr.msra.gmra.mxu1 %v22722_v35 }
 0x8eb   : > { %13669 = vmatpush3.msra.mxu1 %v16733_v43 }
 0x948   : > { %v13633_v36 = vpop.f32.mrf.mxu0 }
 0x949   : > { %14248 = vrcp.f32 %v13633_v36  ;;  %v16564_v36 = vld [vmem:[%s22185_s7] sm:$0xff] }
 0x94a   : > { %v2961_v52 = vpop.f32.mrf.mxu0  ;;  %22723 = vst [vmem:[#allocation47_spill] sm:$0xff] %v16564_v36 }
 0x94b   : > { %14250 = vrcp.f32 %v2961_v52 }
 0x956   : > { %v14249_v37 = vpop.eup %14248 }
 0x958   : > { %v14251_v26 = vpop.eup %14250 }
 0x968   : > { %v12500_v53 = vpop.f32.mrf.mxu0 }
 0x96a   : > { %v12501_v34 = vpop.f32.mrf.mxu0 }
 0x96b   : > { %v12502_v22 = vadd.f32 %v12501_v34, %v12500_v53  ;;  %v16572_v53 = vld [vmem:[%s22185_s7 + $0x8] sm:$0xff] }
 0x96c   : > { %v12503_v48 = vpop.f32.mrf.mxu0  ;;  %22724 = vst [vmem:[#allocation48_spill] sm:$0xff] %v16572_v53 }
 0x96d   : > { %v3014_v59 = vmul.f32 %v14251_v26, %v12502_v22  ;;  %v16590_v26 = vld [vmem:[%s22185_s7 + $0x18] sm:$0xff] }
 0x96e   : > { %v12504_v44 = vpop.f32.mrf.mxu0  ;;  %22726 = vst [vmem:[#allocation63_spill] sm:$0xff] %v16590_v26 }
 0x96f   : > { %v12505_v18 = vadd.f32 %v12504_v44, %v12503_v48 }
 0x970   : > { %v16728_v2 = vpop.f32.mrf.mxu0 }
 0x971   : > { %v3016_v40 = vmul.f32 %v14249_v37, %v12505_v18  ;;  %v16582_v37 = vld [vmem:[%s22185_s7 + $0x10] sm:$0xff] }
 0x972   : > { %22725 = vst [vmem:[#allocation49_spill] sm:$0xff] %v16582_v37 }
 0x973   : > { %v12289_v50 = vpack.c.bf16 %v3016_v40, %v3014_v59 }
 0x975   : > { %12321 = vst [vmem:[#allocation2 + $0x8] sm:$0xff] %v12289_v50   ;;  %v16600_v50 = vld [vmem:[%s22183_s5 + $0x48] sm:$0xff] }
 0x976   : > { %12536 = vmatpush3.msra.mxu0 %v16600_v50 }
 0x9aa   : > { %v3439_v41 = vpop.f32.mrf.mxu1 }
 0x9ab   : > { %v16567_v52 = vadd.f32 %v16564_v36, %v3439_v41  ;;  %v16606_v41 = vld [vmem:[%s22183_s5 + $0xc0] sm:$0xff]  ;;  %v16666_v36 = vld [vmem:[%s22183_s5 + $0x98] sm:$0xff] }
 0x9ac   : > { %v3441_v35 = vpop.f32.mrf.mxu1  ;;  %12537 = vmatprep.subr.mxu0 %v16606_v41  ;;  %22736 = vst [vmem:[#allocation56_spill] sm:$0xff] %v16666_v36 }
 0x9ad   : > { %v16575_v34 = vadd.f32 %v16572_v53, %v3441_v35  ;;  %v16612_v35 = vld [vmem:[%s22183_s5 + $0x40] sm:$0xff] }
 0x9ae   : > { %v3443_v48 = vpop.f32.mrf.mxu1  ;;  %22727 = vst [vmem:[#allocation50_spill] sm:$0xff] %v16612_v35  ;;  %12538 = vmatpush3.msra.mxu0 %v16612_v35  ;;  %v16661_v53 = vld [vmem:[%s22183_s5 + $0x20] sm:$0xff] }
 0x9af   : > { %v3448_v22 = vmax.f32 %v16567_v52, %v16575_v34  ;;  %v16585_v18 = vadd.f32 %v16582_v37, %v3443_v48  ;;  %v16618_v48 = vld [vmem:[%s22183_s5 + $0xb8] sm:$0xff]  ;;  %v16650_v37 = vld [vmem:[%s22183_s5 + $0x28] sm:$0xff]  ;;  %22735 = vst [vmem:[#allocation55_spill] sm:$0xff] %v16661_v53 }
 0x9b0   : > { %v3445_v44 = vpop.f32.mrf.mxu1  ;;  %22728 = vst [vmem:[#allocation64_spill] sm:$0xff] %v16618_v48  ;;  %12539 = vmatprep.subr.mxu0 %v16618_v48  ;;  %22733 = vst [vmem:[#allocation54_spill] sm:$0xff] %v16650_v37 }
 0x9b1   : > { %v16593_v59 = vadd.f32 %v16590_v26, %v3445_v44  ;;  %3449 = vmax.xlane.f32.xlu1 %v3448_v22  ;;  %v16624_v22 = vld [vmem:[%s22183_s5 + $0x38] sm:$0xff]  ;;  %v16630_v44 = vld [vmem:[%s22183_s5 + $0xb0] sm:$0xff]  ;;  %v16644_v26 = vld [vmem:[%s22183_s5 + $0xa8] sm:$0xff] }
 0x9b2   : > { %22729 = vst [vmem:[#allocation51_spill] sm:$0xff] %v16624_v22  ;;  %12540 = vmatpush3.msra.mxu0 %v16624_v22  ;;  %22730 = vst [vmem:[#allocation52_spill] sm:$0xff] %v16630_v44  ;;  %v22754_v22 = vmov 0  }
 0x9b3   : > { %v3451_v40 = vmax.f32 %v16585_v18, %v16593_v59  ;;  %12541 = vmatprep.subr.mxu0 %v16630_v44  ;;  %22732 = vst [vmem:[#allocation65_spill] sm:$0xff] %v16644_v26 }
 0x9b5   : > { %3452 = vmax.xlane.f32.xlu0 %v3451_v40  ;;  %v16636_v40 = vld [vmem:[%s22183_s5 + $0x30] sm:$0xff] }
 0x9b6   : > { %22731 = vst [vmem:[#allocation53_spill] sm:$0xff] %v16636_v40  ;;  %12542 = vmatpush3.msra.mxu0 %v16636_v40 }
 0x9b7   : > { %12543 = vmatprep.subr.mxu0 %v16644_v26 }
 0x9b8   : > { %12544 = vmatpush3.msra.mxu0 %v16650_v37 }
 0x9c2   : > { %3715 = vrot.lane.b32.xlu1 %v22673_v0, %s22299_s27  ;;  %v16656_v0 = vld [vmem:[%s22183_s5 + $0xa0] sm:$0xff] }
 0x9c3   : > { %22734 = vst [vmem:[#allocation72_spill] sm:$0xff] %v16656_v0  ;;  %12545 = vmatprep.subr.mxu0 %v16656_v0 }
 0x9c4   : > { %12546 = vmatpush3.msra.mxu0 %v16661_v53 }
 0x9c5   : > { %12547 = vmatprep.subr.mxu0 %v16666_v36 }
 0x9c6   : > { %3717 = vrot.lane.b32.xlu1 %v22674_v23, %s22737_s26  ;;  %12548 = vmatpush3.msra.mxu0 %v16675_v24  ;;  %v16692_v23 = vld [vmem:[%s22183_s5 + $0x88] sm:$0xff] }
 0x9c7   : > { %22741 = vst [vmem:[#allocation10_spill] sm:$0xff] %v16692_v23  ;;  %12549 = vmatprep.subr.mxu0 %v16680_v29 }
 0x9c8   : > { %12550 = vmatpush3.msra.mxu0 %v16686_v17 }
 0x9c9   : > { %12551 = vmatprep.subr.mxu0 %v16692_v23 }
 0x9ca   : > { %3721 = vrot.lane.b32.xlu1 %v22675_v63, %s22737_s26  ;;  %v16714_v63 = vld [vmem:[%s22183_s5] sm:$0xff]  ;;  %12552 = vmatpush3.msra.mxu0 %v16701_v4 }
 0x9cb   : > { %3713 = vrot.lane.b32.xlu0 %v22676_v47, %s22737_s26  ;;  %22744 = vst [vmem:[#allocation67_spill] sm:$0xff] %v16714_v63  ;;  %12553 = vmatprep.subr.mxu0 %v16706_v14  ;;  %v22747_v47 = vld [vmem:[#allocation70_spill] sm:$0xff] }
 0x9cc   : > { %12554 = vmatpush3.msra.mxu0 %v16714_v63 }
 0x9cd   : > { %3767 = vmatprep.subr.bf16.mxu0 %v22747_v47  ;;  %v16741_v47 = vpop.f32.mrf.mxu0 }
 0x9ce   : > { %3725 = vrot.lane.b32.xlu1 %v22745_v9, %s22737_s26  ;;  %v16738_v9 = vld [vmem:[%s22184_s6] sm:$0xff] }
 0x9cf   : > { %3719 = vrot.lane.b32.xlu0 %v22746_v19, %s22737_s26  ;;  %22751 = vst [vmem:[#allocation69_spill] sm:$0xff] %v16738_v9  ;;  %13670 = vmatprep.subr.mxu1 %v16738_v9 }
 0x9d0   : > { %13671 = vmatpush3.msra.mxu1 %v16738_v9 }
 0x9d3   : > { %3723 = vrot.lane.b32.xlu0 %v22748_v55, %s22737_s26 }
 0x9d7   : > { %3727 = vrot.lane.b32.xlu0 %v22749_v42, %s22737_s26  ;;  %v16745_v42 = vpop.f32.mrf.mxu0 }
 0x9d9   : > { %v16750_v19 = vpop.f32.mrf.mxu0 }
 0x9db   : > { %v16752_v5 = vpop.f32.mrf.mxu0 }
 0x9dd   : > { %v16754_v21 = vpop.f32.mrf.mxu0 }
 0x9df   : > { %v16756_v30 = vpop.f32.mrf.mxu0 }
 0x9e1   : > { %v16760_v51 = vpop.f32.mrf.mxu0 }
 0x9e3   : > { %v16762_v3 = vpop.f32.mrf.mxu0 }
 0x9e5   : > { %v16764_v58 = vpop.f32.mrf.mxu0 }
 0x9e7   : > { %v16766_v9 = vpop.f32.mrf.mxu0 }
 0x9e9   : > { %v16770_v54 = vpop.f32.mrf.mxu0 }
 0x9eb   : > { %v16772_v63 = vpop.f32.mrf.mxu0 }
 0x9ed   : > { %v16774_v14 = vpop.f32.mrf.mxu0 }
 0x9ef   : > { %v16776_v62 = vpop.f32.mrf.mxu0 }
 0x9f1   : > { %v16780_v4 = vpop.f32.mrf.mxu0 }
 0x9f2   : > { %v3379_v35 = vpack.c.bf16 %v16780_v4, %v16774_v14  ;;  %v16882_v4 = vld [vmem:[%s22609_s8 + $0x68] sm:$0xff]  }
 0x9f3   : > { %v16782_v27 = vpop.f32.mrf.mxu0 }
 0x9f5   : > { %v16784_v23 = vpop.f32.mrf.mxu0 }
 0x9f7   : > { %v16786_v17 = vpop.f32.mrf.mxu0 }
 0x9f9   : > { %v16790_v29 = vpop.f32.mrf.mxu0 }
 0x9fb   : > { %v16792_v45 = vpop.f32.mrf.mxu0 }
 0x9fd   : > { %v16794_v24 = vpop.f32.mrf.mxu0 }
 0x9ff   : > { %v16798_v36 = vpop.f32.mrf.mxu0 }
 0xa01   : > { %v16802_v0 = vpop.f32.mrf.mxu0 }
 0xa03   : > { %v16806_v40 = vpop.f32.mrf.mxu0 }
 0xa3a   : > { %v3450_v56 = vpop.xlane.xlu1 %3449 }
 0xa3b   : > { %v3454_v43 = vsub.f32 %v16567_v52, %v3450_v56  ;;  %v3455_v7 = vsub.f32 %v16575_v34, %v3450_v56  ;;  %v16808_v34 = vpop.f32.mrf.mxu0 }
 0xa3d   : > { %v3458_v20 = vmul.f32 1.442695, %v3454_v43  ;;  %v3460_v53 = vmul.f32 1.442695, %v3455_v7  ;;  %v16810_v44 = vpop.f32.mrf.mxu0 }
 0xa3e   : > { %v3453_v55 = vpop.xlane.xlu0 %3452 }
 0xa3f   : > { %14252 = vpow2.f32 %v3458_v20  ;;  %v3456_v37 = vsub.f32 %v16585_v18, %v3453_v55  ;;  %v3457_v26 = vsub.f32 %v16593_v59, %v3453_v55  ;;  %v16814_v43 = vpop.f32.mrf.mxu0 }
 0xa40   : > { %14254 = vpow2.f32 %v3460_v53 }
 0xa41   : > { %v3462_v52 = vmul.f32 1.442695, %v3456_v37  ;;  %v3464_v56 = vmul.f32 1.442695, %v3457_v26  ;;  %v13666_v20 = vpop.f32.mrf.mxu0  ;;  %v16821_v37 = vld [vmem:[%s22609_s8 + $0x78] sm:$0xff]  }
 0xa42   : > { %22752 = vst [vmem:[#allocation12_spill] sm:$0xff] %v16821_v37  ;;  %v3714_v11 = vpop.permute.xlu0 %3713 }
 0xa43   : > { %14256 = vpow2.f32 %v3462_v52  ;;  %v3358_v18 = vpop.f32.mrf.mxu0 }
 0xa44   : > { %14258 = vpow2.f32 %v3464_v56  ;;  %v22753_v56 = vld [vmem:[#allocation57_spill] sm:$0xff] }
 0xa45   : > { %v13667_v49 = vpop.f32.mrf.mxu0 }
 0xa46   : > { %v3388_v59 = vpack.c.bf16 %v13667_v49, %v13666_v20 }
 0xa48   : > { %v3404_v26 = vmul.bf16 %v16821_v37, %v3388_v59  ;;  %v3716_v59 = vpop.permute.xlu1 %3715 }
 0xa4a   : > { %12565 = vmatprep.subr.bf16.mxu1 %v3404_v26 }
 0xa4c   : > { %v16816_v55 = vpop.eup %14252  ;;  %v3718_v26 = vpop.permute.xlu1 %3717 }
 0xa4d   : > { %v14255_v53 = vpop.eup %14254 }
 0xa4e   : > { %3562 = vmatprep.mubr.f32.mxu0 %v14255_v53 }
 0xa4f   : > { %3563 = vmatmul.mubr.f32.vlgmr.msra.gmra.mxu0 %v16816_v55 }
 0xa50   : > { %v16825_v52 = vpop.eup %14256  ;;  %3768 = vmatpush1.bf16.msra.mxu0 %v22753_v56 }
 0xa51   : > { %v14259_v7 = vpop.eup %14258 }
 0xa52   : > { %3567 = vmatprep.mubr.f32.mxu0 %v14259_v7  ;;  %v3657_v20 = vpack.c.bf16 %v14259_v7, %v14255_v53  ;;  %v3720_v7 = vpop.permute.xlu0 %3719  ;;  %v3722_v53 = vpop.permute.xlu1 %3721 }
 0xa53   : > { %3568 = vmatmul.mubr.f32.gmra.mxu0 %v16825_v52 }
 0xa54   : > { %3785 = vmatprep.mubr.bf16.mxu0 %v22754_v22 }
 0xa56   : > { %v3726_v56 = vpop.permute.xlu1 %3725 }
 0xa57   : > { %11843 = vmatmul.mubr.msk.bf16.vlgmr.msra.gmra.mxu0 %vm1358_vm0, %v3714_v11  ;;  %v3724_v11 = vpop.permute.xlu0 %3723 }
 0xa58   : > { %3795 = vmatprep.mubr.bf16.mxu0 %v22754_v22 }
 0xa5f   : > { %11844 = vmatmul.mubr.msk.bf16.gmra.mxu0 %vm1358_vm0, %v3716_v59  ;;  %v3728_v59 = vpop.permute.xlu0 %3727 }
 0xa60   : > { %3805 = vmatprep.mubr.bf16.mxu0 %v22754_v22 }
 0xa67   : > { %11845 = vmatmul.mubr.msk.bf16.gmra.mxu0 %vm1358_vm0, %v3718_v26  ;;  %v3361_v26 = vpop.f32.mrf.mxu0 }
 0xa68   : > { %3815 = vmatprep.mubr.bf16.mxu0 %v22754_v22  ;;  %v3387_v48 = vpack.c.bf16 %v3361_v26, %v3358_v18  ;;  %v16865_v18 = vld [vmem:[%s22609_s8 + $0x70] sm:$0xff]   ;;  %v16897_v26 = vld [vmem:[%s22609_s8 + $0x28] sm:$0xff]  }
 0xa6f   : > { %11846 = vmatmul.mubr.msk.bf16.gmra.mxu0 %vm1358_vm0, %v3720_v7 }
 0xa70   : > { %3825 = vmatprep.mubr.bf16.mxu0 %v22754_v22 }
 0xa77   : > { %11847 = vmatmul.mubr.msk.bf16.gmra.mxu0 %vm1358_vm0, %v3722_v53 }
 0xa78   : > { %3835 = vmatprep.mubr.bf16.mxu0 %v22754_v22 }
 0xa7f   : > { %11848 = vmatmul.mubr.msk.bf16.gmra.mxu0 %vm1358_vm0, %v3724_v11 }
 0xa80   : > { %3845 = vmatprep.mubr.bf16.mxu0 %v22754_v22 }
 0xa87   : > { %11849 = vmatmul.mubr.msk.bf16.gmra.mxu0 %vm1358_vm0, %v3726_v56  ;;  %v16852_v56 = vld [vmem:[%s22609_s8 + $0x38] sm:$0xff]  }
 0xa88   : > { %3855 = vmatprep.mubr.bf16.mxu0 %v22754_v22 }
 0xa8f   : > { %11850 = vmatmul.mubr.msk.bf16.gmra.mxu0 %vm1358_vm0, %v3728_v59  ;;  %v22755_v59 = vpack.c.bf16 %v16776_v62, %v16772_v63  ;;  %v16874_v63 = vld [vmem:[%s22609_s8 + $0x30] sm:$0xff]  }
 0xa90   : > { %4123 = vmatprep.mubr.bf16.mxu0 %v22754_v22  ;;  %v3395_v62 = vmul.bf16 %v16874_v63, %v3379_v35 }
 0xa91   : > { %v3396_v22 = vmul.bf16 %v16852_v56, %v22755_v59 }
 0xb0f   : > { %v12555_v7 = vpop.f32.mrf.mxu0 }
 0xb11   : > { %v12556_v53 = vpop.f32.mrf.mxu0 }
 0xb12   : > { %v12557_v49 = vadd.f32 %v12556_v53, %v12555_v7  ;;  %v16910_v53 = vld [vmem:[%s22609_s8 + $0x60] sm:$0xff]  }
 0xb13   : > { %v12558_v37 = vpop.f32.mrf.mxu0 }
 0xb14   : > { %13672 = vmatprep.mubr.msk.f32.mxu1 %vm1358_vm0, %v12557_v49 }
 0xb15   : > { %v12559_v11 = vpop.f32.mrf.mxu0 }
 0xb16   : > { %v12560_v15 = vadd.f32 %v12559_v11, %v12558_v37  ;;  %v3403_v37 = vmul.bf16 %v16865_v18, %v3387_v48 }
 0xb17   : > { %v16860_v7 = vpop.f32.mrf.mxu0 }
 0xb18   : > { %13673 = vmatmul.mubr.msk.f32.vlgmr.msra.gmra.mxu1 %vm1358_vm0, %v12560_v15  ;;  %v22756_v15 = vpack.c.bf16 %v16810_v44, %v16806_v40  ;;  %v22757_v44 = vpack.c.bf16 %v16766_v9, %v16762_v3  ;;  %v16918_v3 = vld [vmem:[%s22609_s8 + $0x20] sm:$0xff]   ;;  %v16926_v9 = vld [vmem:[%s22609_s8 + $0x58] sm:$0xff]  }
 0xb19   : > { %12566 = vmatpush3.bf16.msra.mxu1 %v3396_v22  ;;  %3690 = vmatprep.mubr.bf16.mxu1 %v3657_v20  ;;  %v16869_v49 = vpop.f32.mrf.mxu0  ;;  %v3385_v22 = vpack.c.bf16 %v16814_v43, %v16808_v34  ;;  %v3377_v34 = vpack.c.bf16 %v16770_v54, %v16764_v58 }
 0xb1a   : > { %12567 = vmatprep.subr.bf16.mxu1 %v3403_v37  ;;  %v3402_v48 = vmul.bf16 %v16882_v4, %v22756_v15  ;;  %v3394_v40 = vmul.bf16 %v16897_v26, %v22757_v44  ;;  %v22758_v37 = vpack.c.bf16 %v16798_v36, %v16792_v45  ;;  %v3383_v15 = vpack.c.bf16 %v16802_v0, %v16794_v24  ;;  %v16941_v44 = vld [vmem:[%s22609_s8 + $0x18] sm:$0xff]  }
 0xb1b   : > { %v16877_v14 = vpop.f32.mrf.mxu0  ;;  %v3401_v11 = vmul.bf16 %v16910_v53, %v3385_v22  ;;  %v3393_v54 = vmul.bf16 %v16918_v3, %v3377_v34  ;;  %v22759_v45 = vpack.c.bf16 %v16756_v30, %v16752_v5  ;;  %v3375_v0 = vpack.c.bf16 %v16760_v51, %v16754_v21  ;;  %v16962_v30 = vld [vmem:[%s22609_s8 + $0x10] sm:$0xff]   ;;  %v16970_v5 = vld [vmem:[%s22609_s8 + $0x48] sm:$0xff]  }
 0xb1c   : > { %v3866_v20 = vpack.c.bf16 %v16877_v14, %v16860_v7 }
 0xb1d   : > { %12568 = vmatpush3.bf16.msra.mxu1 %v3395_v62  ;;  %v16892_v35 = vpop.f32.mrf.mxu0  ;;  %v3400_v62 = vmul.bf16 %v16926_v9, %v22758_v37  ;;  %v3392_v36 = vmul.bf16 %v16941_v44, %v22759_v45  ;;  %v3391_v51 = vmul.bf16 %v16962_v30, %v3375_v0  ;;  %v16983_v45 = vld [vmem:[%s22609_s8 + $0x8] sm:$0xff]  }
 0xb1e   : > { %12569 = vmatprep.subr.bf16.mxu1 %v3402_v48 }
 0xb1f   : > { %v16905_v43 = vpop.f32.mrf.mxu0 }
 0xb21   : > { %12570 = vmatpush3.bf16.msra.mxu1 %v3394_v40  ;;  %v16913_v59 = vpop.f32.mrf.mxu0  ;;  %v16954_v40 = vld [vmem:[%s22609_s8 + $0x50] sm:$0xff]  }
 0xb22   : > { %12571 = vmatprep.subr.bf16.mxu1 %v3401_v11  ;;  %v3399_v34 = vmul.bf16 %v16954_v40, %v3383_v15 }
 0xb23   : > { %v16921_v58 = vpop.f32.mrf.mxu0 }
 0xb24   : > { %v3868_v48 = vpack.c.bf16 %v16921_v58, %v16905_v43  ;;  %v22810_v43 = vld [vmem:[#allocation21_spill] sm:$0xff]  ;;  %v22811_v58 = vld [vmem:[#allocation18_spill] sm:$0xff] }
 0xb25   : > { %12572 = vmatpush3.bf16.msra.mxu1 %v3393_v54  ;;  %v16936_v22 = vpop.f32.mrf.mxu0  ;;  %v22760_v54 = vpack.c.bf16 %v16786_v17, %v16782_v27  ;;  %v3373_v27 = vpack.c.bf16 %v16750_v19, %v16741_v47 }
 0xb26   : > { %12573 = vmatprep.subr.bf16.mxu1 %v3400_v62  ;;  %v3381_v62 = vpack.c.bf16 %v16790_v29, %v16784_v23  ;;  %v16996_v23 = vld [vmem:[%s22609_s8 + $0x40] sm:$0xff]  }
 0xb27   : > { %v16949_v24 = vpop.f32.mrf.mxu0  ;;  %v3398_v37 = vmul.bf16 %v16970_v5, %v22760_v54 }
 0xb28   : > { %v3397_v29 = vmul.bf16 %v16996_v23, %v3381_v62 }
 0xb29   : > { %12574 = vmatpush3.bf16.msra.mxu1 %v3392_v36  ;;  %v16957_v11 = vpop.f32.mrf.mxu0  ;;  %v22761_v36 = vpack.c.bf16 %v16745_v42, %v16728_v2  ;;  %v17004_v2 = vld [vmem:[%s22609_s8] sm:$0xff]  }
 0xb2a   : > { %12575 = vmatprep.subr.bf16.mxu1 %v3399_v34  ;;  %v3389_v42 = vmul.bf16 %v17004_v2, %v3373_v27 }
 0xb2b   : > { %v16965_v21 = vpop.f32.mrf.mxu0  ;;  %v3390_v0 = vmul.bf16 %v16983_v45, %v22761_v36 }
 0xb2d   : > { %12576 = vmatpush3.bf16.msra.mxu1 %v3391_v51  ;;  %v16978_v15 = vpop.f32.mrf.mxu0  ;;  %v22762_v51 = vld [vmem:[#allocation14_spill] sm:$0xff] }
 0xb2e   : > { %12577 = vmatprep.subr.bf16.mxu1 %v3398_v37  ;;  %v22763_v37 = vpack.c.bf16 %v16825_v52, %v16816_v55 }
 0xb2f   : > { %v16991_v17 = vpop.f32.mrf.mxu0 }
 0xb31   : > { %12578 = vmatpush3.bf16.msra.mxu1 %v3390_v0  ;;  %v16999_v34 = vpop.f32.mrf.mxu0 }
 0xb32   : > { %12579 = vmatprep.subr.bf16.mxu1 %v3397_v29 }
 0xb33   : > { %v17007_v19 = vpop.f32.mrf.mxu0 }
 0xb35   : > { %12580 = vmatpush3.bf16.msra.mxu1 %v3389_v42  ;;  %v17009_v47 = vpop.f32.mrf.mxu0  ;;  %v22773_v42 = vld [vmem:[#allocation72_spill] sm:$0xff] }
 0xb36   : > { %13675 = vmatprep.subr.bf16.mxu1 %v22762_v51 }
 0xb37   : > { %v17012_v54 = vpop.f32.mrf.mxu0 }
 0xb38   : > { %3691 = vmatmul.mubr.bf16.vlgmr.msra.gmra.mxu1 %v22763_v37  ;;  %v22775_v37 = vld [vmem:[#allocation73_spill] sm:$0xff] }
 0xb39   : > { %13676 = vmatpush3.bf16.msra.mxu1 %v22762_v51  ;;  %v17018_v62 = vpop.f32.mrf.mxu0  ;;  %13677 = vmatprep.mubr.msk.bf16.mxu1 %vm1358_vm0, %v16252_v16  ;;  %v22774_v51 = vld [vmem:[#allocation55_spill] sm:$0xff] }
 0xb3a   : > { %12604 = vmatprep.subr.mxu1 %v16486_v46 }
 0xb3b   : > { %v17023_v36 = vpop.f32.mrf.mxu0 }
 0xb3d   : > { %v17025_v0 = vpop.f32.mrf.mxu0 }
 0xb3f   : > { %v17027_v27 = vpop.f32.mrf.mxu0 }
 0xb40   : > { %13678 = vmatmul.mubr.msk.bf16.vlgmr.msra.gmra.mxu1 %vm1358_vm0, %v16261_v10 }
 0xb41   : > { %v3839_v55 = vpop.f32.mrf.mxu0  ;;  %13681 = vmatprep.mubr.msk.bf16.mxu1 %vm1358_vm0, %v16268_v32  ;;  %12605 = vmatpush3.msra.mxu1 %v16491_v25 }
 0xb42   : > { %12606 = vmatprep.subr.mxu1 %v16496_v13 }
 0xb43   : > { %v17035_v16 = vpop.f32.mrf.mxu0  ;;  %12607 = vmatpush3.msra.mxu1 %v16502_v38  ;;  %v22764_v38 = vld [vmem:[#allocation50_spill] sm:$0xff] }
 0xb44   : > { %12608 = vmatprep.subr.mxu1 %v16508_v12  ;;  %v22765_v12 = vld [vmem:[#allocation71_spill] sm:$0xff] }
 0xb45   : > { %v3843_v46 = vpop.f32.mrf.mxu0  ;;  %12609 = vmatpush3.msra.mxu1 %v16514_v39 }
 0xb46   : > { %12610 = vmatprep.subr.mxu1 %v16520_v57  ;;  %v22767_v57 = vld [vmem:[#allocation58_spill] sm:$0xff] }
 0xb47   : > { %v3847_v10 = vpop.f32.mrf.mxu0  ;;  %12611 = vmatpush3.msra.mxu1 %v16526_v8  ;;  %v22768_v8 = vld [vmem:[#allocation51_spill] sm:$0xff] }
 0xb48   : > { %13682 = vmatmul.mubr.msk.bf16.gmra.mxu1 %vm1358_vm0, %v16275_v60  ;;  %12612 = vmatprep.subr.mxu1 %v16532_v61  ;;  %v22769_v61 = vld [vmem:[#allocation52_spill] sm:$0xff] }
 0xb49   : > { %v3849_v32 = vpop.f32.mrf.mxu0  ;;  %13685 = vmatprep.mubr.msk.bf16.mxu1 %vm1358_vm0, %v16282_v31  ;;  %12613 = vmatpush3.msra.mxu1 %v16538_v28  ;;  %v22766_v31 = vld [vmem:[#allocation64_spill] sm:$0xff] }
 0xb4a   : > { %12614 = vmatprep.subr.mxu1 %v16544_v6  ;;  %v22770_v6 = vld [vmem:[#allocation53_spill] sm:$0xff] }
 0xb4b   : > { %v3851_v25 = vpop.f32.mrf.mxu0  ;;  %12615 = vmatpush3.msra.mxu1 %v16550_v33  ;;  %v22771_v33 = vld [vmem:[#allocation65_spill] sm:$0xff] }
 0xb4c   : > { %12616 = vmatprep.subr.mxu1 %v16556_v1 }
 0xb4d   : > { %v3853_v13 = vpop.f32.mrf.mxu0  ;;  %12617 = vmatpush3.msra.mxu1 %v16600_v50 }
 0xb4e   : > { %12618 = vmatprep.subr.mxu1 %v16606_v41  ;;  %v22772_v41 = vld [vmem:[#allocation54_spill] sm:$0xff]  ;;  %v3879_v52 = vpack.c.bf16 %v3853_v13, %v3849_v32  ;;  %v3877_v32 = vpack.c.bf16 %v3843_v46, %v3839_v55  ;;  %v3875_v55 = vpack.c.bf16 %v17025_v0, %v17018_v62  ;;  %v22787_v46 = vld [vmem:[#allocation80_spill] sm:$0xff]  ;;  %v3873_v0 = vpack.c.bf16 %v17009_v47, %v16999_v34  ;;  %v22798_v47 = vld [vmem:[#allocation83_spill] sm:$0xff] }
 0xb4f   : > { %v3857_v60 = vpop.f32.mrf.mxu0  ;;  %12619 = vmatpush3.msra.mxu1 %v22764_v38  ;;  %v22781_v13 = vld [vmem:[#allocation78_spill] sm:$0xff]  ;;  %v3870_v34 = vpack.c.bf16 %v16965_v21, %v16949_v24  ;;  %v22803_v24 = vld [vmem:[#allocation45_spill] sm:$0xff]  ;;  %v22805_v21 = vld [vmem:[#allocation88_spill] sm:$0xff] }
 0xb50   : > { %13686 = vmatmul.mubr.msk.bf16.gmra.mxu1 %vm1358_vm0, %v22765_v12  ;;  %12620 = vmatprep.subr.mxu1 %v22766_v31  ;;  %v22776_v12 = vld [vmem:[#allocation75_spill] sm:$0xff]  ;;  %v22777_v31 = vld [vmem:[#allocation56_spill] sm:$0xff] }
 0xb51   : > { %v3859_v39 = vpop.f32.mrf.mxu0  ;;  %13689 = vmatprep.mubr.msk.bf16.mxu1 %vm1358_vm0, %v22767_v57  ;;  %12621 = vmatpush3.msra.mxu1 %v22768_v8  ;;  %v3878_v57 = vpack.c.bf16 %v3851_v25, %v3847_v10  ;;  %v22778_v8 = vld [vmem:[#allocation76_spill] sm:$0xff]  ;;  %v3876_v10 = vpack.c.bf16 %v17035_v16, %v17027_v27  ;;  %v22785_v25 = vld [vmem:[#allocation79_spill] sm:$0xff]  ;;  %v3874_v27 = vpack.c.bf16 %v17023_v36, %v17012_v54 }
 0xb52   : > { %12622 = vmatprep.subr.mxu1 %v22769_v61  ;;  %v22791_v16 = vld [vmem:[#allocation59_spill] sm:$0xff]  ;;  %v3872_v54 = vpack.c.bf16 %v17007_v19, %v16991_v17  ;;  %v22795_v36 = vld [vmem:[#allocation60_spill] sm:$0xff]  ;;  %v3869_v17 = vpack.c.bf16 %v16936_v22, %v16913_v59  ;;  %v22800_v19 = vld [vmem:[#allocation85_spill] sm:$0xff] }
 0xb53   : > { %v3861_v28 = vpop.f32.mrf.mxu0  ;;  %12623 = vmatpush3.msra.mxu1 %v22770_v6  ;;  %v22782_v6 = vld [vmem:[#allocation89_spill] sm:$0xff]  ;;  %v17097_v62 = vld [vmem:[%s22521_s23 + $0x4] ss:$8 sps:$4 sm:$0xff]  }
 0xb54   : > { %12624 = vmatprep.subr.mxu1 %v22771_v33  ;;  %v3880_v1 = vpack.c.bf16 %v3861_v28, %v3857_v60  ;;  %v22779_v60 = vld [vmem:[#allocation77_spill] sm:$0xff]  ;;  %v22780_v28 = vld [vmem:[#allocation74_spill] sm:$0xff]  ;;  %v22783_v33 = vld [vmem:[#allocation11_spill] sm:$0xff]  ;;  %22793 = vst [vmem:[#allocation15_spill] sm:$0xff] %v17097_v62 }
 0xb55   : > { %v3863_v50 = vpop.f32.mrf.mxu0  ;;  %12625 = vmatpush3.msra.mxu1 %v22772_v41  ;;  %v22786_v41 = vld [vmem:[#allocation90_spill] sm:$0xff]  ;;  %v22804_v59 = vld [vmem:[#allocation87_spill] sm:$0xff] }
 0xb56   : > { %v3881_v29 = vpack.c.bf16 %v3863_v50, %v3859_v39  ;;  %12626 = vmatprep.subr.mxu1 %v22773_v42  ;;  %v3896_v61 = vmul.bf16 %v22778_v8, %v3880_v1  ;;  %v3895_v39 = vmul.bf16 %v22781_v13, %v3879_v52  ;;  %v22784_v50 = vld [vmem:[#allocation10_spill] sm:$0xff]  ;;  %v3894_v1 = vmul.bf16 %v22785_v25, %v3878_v57  ;;  %v22789_v42 = vld [vmem:[#allocation67_spill] sm:$0xff]  ;;  %v22799_v13 = vld [vmem:[#allocation84_spill] sm:$0xff] }
 0xb57   : > { %12627 = vmatpush3.msra.mxu1 %v22774_v51  ;;  %v3893_v52 = vmul.bf16 %v22787_v46, %v3877_v32  ;;  %v22790_v51 = vld [vmem:[#allocation41_spill] sm:$0xff]  ;;  %v3890_v57 = vmul.bf16 %v22795_v36, %v3874_v27  ;;  %v3871_v8 = vpack.c.bf16 %v16978_v15, %v16957_v11  ;;  %v3888_v32 = vmul.bf16 %v22798_v47, %v3872_v54  ;;  %v22801_v15 = vld [vmem:[#allocation44_spill] sm:$0xff]  ;;  %v22814_v54 = vld [vmem:[#allocation47_spill] sm:$0xff] }
 0xb58   : > { %v3897_v38 = vmul.bf16 %v22775_v37, %v3881_v29  ;;  %13690 = vmatmul.mubr.msk.bf16.gmra.mxu1 %vm1358_vm0, %v22776_v12  ;;  %12628 = vmatprep.subr.mxu1 %v22777_v31  ;;  %v22788_v29 = vld [vmem:[#allocation66_spill] sm:$0xff]  ;;  %v3892_v37 = vmul.bf16 %v22791_v16, %v3876_v10  ;;  %v3884_v22 = vmul.bf16 %v22804_v59, %v3868_v48  ;;  %v22806_v10 = vld [vmem:[#allocation61_spill] sm:$0xff] }
 0xb59   : > { %13693 = vmatprep.mubr.msk.bf16.mxu1 %vm1358_vm0, %v22779_v60  ;;  %12629 = vmatpush3.msra.mxu1 %v22780_v28  ;;  %v22794_v12 = vld [vmem:[#allocation42_spill] sm:$0xff]  ;;  %v22797_v28 = vld [vmem:[#allocation43_spill] sm:$0xff]  ;;  %v3887_v11 = vmul.bf16 %v22800_v19, %v3871_v8  ;;  %v22812_v48 = vpack.c.bf16 %v22810_v43, %v22811_v58  ;;  %v22818_v19 = vld [vmem:[#allocation33_spill] sm:$0xff] }
 0xb5a   : > { %4091 = vmatprep.subr.bf16.mxu0 %v3897_v38  ;;  %12630 = vmatprep.subr.mxu1 %v22782_v6  ;;  %v22792_v38 = vld [vmem:[#allocation81_spill] sm:$0xff]  ;;  %v3891_v31 = vmul.bf16 %v22794_v12, %v3875_v55  ;;  %v3867_v6 = vpack.c.bf16 %v16892_v35, %v16869_v49  ;;  %v22807_v49 = vld [vmem:[#allocation46_spill] sm:$0xff] }
 0xb5b   : > { %4092 = vmatpush1.bf16.msra.mxu0 %v3896_v61  ;;  %12631 = vmatpush3.msra.mxu1 %v22783_v33  ;;  %v22796_v61 = vld [vmem:[#allocation82_spill] sm:$0xff]  ;;  %v3882_v35 = vmul.bf16 %v22807_v49, %v3866_v20  ;;  %v22813_v55 = vld [vmem:[#allocation69_spill] sm:$0xff] }
 0xb5c   : > { %4093 = vmatprep.subr.bf16.mxu0 %v3895_v39  ;;  %12632 = vmatprep.subr.mxu1 %v22784_v50  ;;  %v3889_v60 = vmul.bf16 %v22796_v61, %v3873_v0  ;;  %v3886_v39 = vmul.bf16 %v22801_v15, %v3870_v34  ;;  %v22802_v33 = vld [vmem:[#allocation86_spill] sm:$0xff]  ;;  %v3883_v25 = vmul.bf16 %v22806_v10, %v3867_v6  ;;  %v22816_v34 = vld [vmem:[#allocation49_spill] sm:$0xff]  ;;  %v22820_v15 = vld [vmem:[#allocation36_spill] sm:$0xff] }
 0xb5d   : > { %12633 = vmatpush3.msra.mxu1 %v22786_v41  ;;  %v3885_v50 = vmul.bf16 %v22802_v33, %v3869_v17  ;;  %v22809_v41 = vld [vmem:[#allocation68_spill] sm:$0xff]  ;;  %v22822_v6 = vld [vmem:[#allocation38_spill] sm:$0xff]  ;;  %v22823_v33 = vld [vmem:[#allocation35_spill] sm:$0xff] }
 0xb5e   : > { %12634 = vmatprep.subr.mxu1 %v22788_v29 }
 0xb5f   : > { %4094 = vmatpush1.bf16.msra.mxu0 %v3894_v1  ;;  %12635 = vmatpush3.msra.mxu1 %v22789_v42  ;;  %v22808_v1 = vld [vmem:[#allocation62_spill] sm:$0xff] }
 0xb60   : > { %4095 = vmatprep.subr.bf16.mxu0 %v3893_v52  ;;  %13694 = vmatmul.mubr.msk.bf16.gmra.mxu1 %vm1358_vm0, %v22790_v51 }
 0xb61   : > { %13697 = vmatprep.mubr.msk.bf16.mxu1 %vm1358_vm0, %v22792_v38  ;;  %4453 = vmatprep.subr.bf16.mxu1 %v17097_v62 }
 0xb63   : > { %4096 = vmatpush1.bf16.msra.mxu0 %v3892_v37 }
 0xb64   : > { %4097 = vmatprep.subr.bf16.mxu0 %v3891_v31 }
 0xb67   : > { %4098 = vmatpush1.bf16.msra.mxu0 %v3890_v57  ;;  %v22815_v57 = vld [vmem:[#allocation48_spill] sm:$0xff] }
 0xb68   : > { %4099 = vmatprep.subr.bf16.mxu0 %v3889_v60  ;;  %13698 = vmatmul.mubr.msk.bf16.gmra.mxu1 %vm1358_vm0, %v22797_v28 }
 0xb69   : > { %13701 = vmatprep.mubr.msk.bf16.mxu1 %vm1358_vm0, %v22799_v13 }
 0xb6b   : > { %4100 = vmatpush1.bf16.msra.mxu0 %v3888_v32  ;;  %v22817_v32 = vld [vmem:[#allocation63_spill] sm:$0xff] }
 0xb6c   : > { %4101 = vmatprep.subr.bf16.mxu0 %v3887_v11  ;;  %v22819_v11 = vld [vmem:[#allocation34_spill] sm:$0xff] }
 0xb6f   : > { %4102 = vmatpush1.bf16.msra.mxu0 %v3886_v39  ;;  %v22821_v39 = vld [vmem:[#allocation32_spill] sm:$0xff] }
 0xb70   : > { %4103 = vmatprep.subr.bf16.mxu0 %v3885_v50  ;;  %13702 = vmatmul.mubr.msk.bf16.gmra.mxu1 %vm1358_vm0, %v22803_v24  ;;  %v22824_v50 = vld [vmem:[#allocation37_spill] sm:$0xff]  ;;  %v22825_v24 = vld [vmem:[#allocation39_spill] sm:$0xff] }
 0xb71   : > { %13705 = vmatprep.mubr.msk.bf16.mxu1 %vm1358_vm0, %v22805_v21 }
 0xb73   : > { %4104 = vmatpush1.bf16.msra.mxu0 %v3884_v22 }
 0xb74   : > { %4105 = vmatprep.subr.bf16.mxu0 %v3883_v25 }
 0xb77   : > { %4106 = vmatpush1.bf16.msra.mxu0 %v3882_v35 }
 0xb78   : > { %13706 = vmatmul.mubr.msk.bf16.gmra.mxu1 %vm1358_vm0, %v22808_v1  ;;  %13709 = vmatprep.subr.mxu0 %v22809_v41 }
 0xb7a   : > { %4124 = vmatmul.mubr.bf16.vlgmr.msra.gmra.mxu0 %v22812_v48 }
 0xb7b   : > { %13710 = vmatpush3.msra.mxu0 %v22809_v41 }
 0xb7c   : > { %13711 = vmatprep.subr.mxu0 %v22813_v55 }
 0xb7d   : > { %13712 = vmatpush3.msra.mxu0 %v22813_v55 }
 0xbd8   : > { %v13674_v46 = vpop.f32.mrf.mxu1 }
 0xbd9   : > { %14260 = vrcp.f32 %v13674_v46 }
 0xbda   : > { %v3647_v7 = vpop.f32.mrf.mxu1 }
 0xbdb   : > { %14262 = vrcp.f32 %v3647_v7 }
 0xbe6   : > { %v14261_v51 = vpop.eup %14260 }
 0xbe8   : > { %v14263_v16 = vpop.eup %14262 }
 0xbf8   : > { %v12581_v14 = vpop.f32.mrf.mxu1 }
 0xbfa   : > { %v12582_v20 = vpop.f32.mrf.mxu1 }
 0xbfb   : > { %v12583_v29 = vadd.f32 %v12582_v20, %v12581_v14 }
 0xbfc   : > { %v12584_v52 = vpop.f32.mrf.mxu1 }
 0xbfd   : > { %v3700_v37 = vmul.f32 %v14263_v16, %v12583_v29 }
 0xbfe   : > { %v12585_v42 = vpop.f32.mrf.mxu1 }
 0xbff   : > { %v12586_v27 = vadd.f32 %v12585_v42, %v12584_v52 }
 0xc00   : > { %v17157_v59 = vpop.f32.mrf.mxu1 }
 0xc01   : > { %v3702_v38 = vmul.f32 %v14261_v51, %v12586_v27 }
 0xc02   : > { %v17159_v22 = vpop.f32.mrf.mxu1 }
 0xc03   : > { %v12294_v0 = vpack.c.bf16 %v3702_v38, %v3700_v37 }
 0xc04   : > { %v17161_v21 = vpop.f32.mrf.mxu1 }
 0xc05   : > { %12322 = vst [vmem:[#allocation2 + $0x10] sm:$0xff] %v12294_v0  }
 0xc06   : > { %v17165_v25 = vpop.f32.mrf.mxu1 }
 0xc08   : > { %v17167_v49 = vpop.f32.mrf.mxu1 }
 0xc0a   : > { %v17169_v35 = vpop.f32.mrf.mxu1 }
 0xc0c   : > { %v17171_v1 = vpop.f32.mrf.mxu1 }
 0xc0e   : > { %v17175_v43 = vpop.f32.mrf.mxu1 }
 0xc10   : > { %v17177_v58 = vpop.f32.mrf.mxu1 }
 0xc12   : > { %v17179_v48 = vpop.f32.mrf.mxu1 }
 0xc14   : > { %v17181_v55 = vpop.f32.mrf.mxu1 }
 0xc16   : > { %v17185_v7 = vpop.f32.mrf.mxu1 }
 0xc18   : > { %v17187_v14 = vpop.f32.mrf.mxu1 }
 0xc1a   : > { %v17189_v20 = vpop.f32.mrf.mxu1 }
 0xc1c   : > { %v17191_v52 = vpop.f32.mrf.mxu1 }
 0xc1e   : > { %v17195_v42 = vpop.f32.mrf.mxu1 }
 0xc20   : > { %v17197_v51 = vpop.f32.mrf.mxu1 }
 0xc22   : > { %v17199_v27 = vpop.f32.mrf.mxu1 }
 0xc24   : > { %v17201_v16 = vpop.f32.mrf.mxu1 }
 0xc26   : > { %v17205_v38 = vpop.f32.mrf.mxu1 }
 0xc28   : > { %v17207_v0 = vpop.f32.mrf.mxu1 }
 0xc3a   : > { %v4125_v12 = vpop.f32.mrf.mxu0 }
 0xc3b   : > { %v4126_v36 = vadd.f32 %v22814_v54, %v4125_v12  ;;  %v17209_v12 = vpop.f32.mrf.mxu1 }
 0xc3c   : > { %v4127_v31 = vpop.f32.mrf.mxu0 }
 0xc3d   : > { %v4128_v8 = vadd.f32 %v22815_v57, %v4127_v31 }
 0xc3e   : > { %v4129_v61 = vpop.f32.mrf.mxu0 }
 0xc3f   : > { %v4134_v60 = vmax.f32 %v4126_v36, %v4128_v8  ;;  %v4130_v47 = vadd.f32 %v22816_v34, %v4129_v61  ;;  %v17211_v61 = vpop.f32.mrf.mxu1 }
 0xc40   : > { %v4131_v28 = vpop.f32.mrf.mxu0 }
 0xc41   : > { %v4132_v13 = vadd.f32 %v22817_v32, %v4131_v28  ;;  %4135 = vmax.xlane.f32.xlu1 %v4134_v60  ;;  %v17215_v32 = vpop.f32.mrf.mxu1 }
 0xc43   : > { %v4137_v17 = vmax.f32 %v4130_v47, %v4132_v13  ;;  %v17217_v41 = vpop.f32.mrf.mxu1 }
 0xc45   : > { %4138 = vmax.xlane.f32.xlu0 %v4137_v17 }
 0xc52   : > { %4401 = vrot.lane.b32.xlu1 %v22818_v19, %s14600_s20 }
 0xc56   : > { %4403 = vrot.lane.b32.xlu1 %v22819_v11, %s14600_s20 }
 0xc5a   : > { %4407 = vrot.lane.b32.xlu1 %v22820_v15, %s14600_s20 }
 0xc5b   : > { %4399 = vrot.lane.b32.xlu0 %v22821_v39, %s14600_s20 }
 0xc5e   : > { %4411 = vrot.lane.b32.xlu1 %v22822_v6, %s14600_s20 }
 0xc5f   : > { %4405 = vrot.lane.b32.xlu0 %v22823_v33, %s14600_s20 }
 0xc63   : > { %4409 = vrot.lane.b32.xlu0 %v22824_v50, %s14600_s20 }
 0xc67   : > { %4413 = vrot.lane.b32.xlu0 %v22825_v24, %s14600_s20  ;;  %s14604_s20 = smov [#allocation3]  }
 0xcca   : > { %v4136_v31 = vpop.xlane.xlu1 %4135 }
 0xccb   : > { %v4140_v54 = vsub.f32 %v4126_v36, %v4136_v31  ;;  %v4141_v57 = vsub.f32 %v4128_v8, %v4136_v31  ;;  %v17219_v36 = vpop.f32.mrf.mxu1 }
 0xccd   : > { %v4144_v28 = vmul.f32 1.442695, %v4140_v54  ;;  %v4146_v34 = vmul.f32 1.442695, %v4141_v57  ;;  %v17221_v8 = vpop.f32.mrf.mxu1 }
 0xcce   : > { %v4139_v17 = vpop.xlane.xlu0 %4138  ;;  %v4402_v31 = vpop.permute.xlu1 %4401 }
 0xccf   : > { %14264 = vpow2.f32 %v4144_v28  ;;  %v4142_v10 = vsub.f32 %v4130_v47, %v4139_v17  ;;  %v4143_v37 = vsub.f32 %v4132_v13, %v4139_v17  ;;  %v17225_v54 = vpop.f32.mrf.mxu1 }
 0xcd0   : > { %14266 = vpow2.f32 %v4146_v34 }
 0xcd1   : > { %v4148_v46 = vmul.f32 1.442695, %v4142_v10  ;;  %v4150_v29 = vmul.f32 1.442695, %v4143_v37  ;;  %v13707_v57 = vpop.f32.mrf.mxu1  ;;  %v22826_v10 = vld [vmem:[#allocation12_spill] sm:$0xff] }
 0xcd3   : > { %14268 = vpow2.f32 %v4148_v46  ;;  %v4044_v28 = vpop.f32.mrf.mxu1 }
 0xcd4   : > { %14270 = vpow2.f32 %v4150_v29  ;;  %v17236_v29 = vld [vmem:[%s22521_s23] ss:$8 sps:$4 sm:$0xff]  }
 0xcd5   : > { %v13708_v47 = vpop.f32.mrf.mxu1  ;;  %22827 = vst [vmem:[#allocation16_spill] sm:$0xff] %v17236_v29 }
 0xcd6   : > { %v4074_v17 = vpack.c.bf16 %v13708_v47, %v13707_v57 }
 0xcd8   : > { %v4090_v37 = vmul.bf16 %v22826_v10, %v4074_v17  ;;  %v22828_v17 = vmov 0   ;;  %v4400_v10 = vpop.permute.xlu0 %4399 }
 0xcda   : > { %12646 = vmatprep.subr.bf16.mxu0 %v4090_v37  ;;  %v4404_v37 = vpop.permute.xlu1 %4403 }
 0xcdc   : > { %v17227_v13 = vpop.eup %14264 }
 0xcdd   : > { %v14267_v34 = vpop.eup %14266 }
 0xcde   : > { %4248 = vmatprep.mubr.f32.mxu1 %v14267_v34 }
 0xcdf   : > { %4249 = vmatmul.mubr.f32.vlgmr.msra.gmra.mxu1 %v17227_v13 }
 0xce0   : > { %v17231_v46 = vpop.eup %14268  ;;  %4454 = vmatpush1.bf16.msra.mxu1 %v17236_v29 }
 0xce1   : > { %v14271_v60 = vpop.eup %14270 }
 0xce2   : > { %4253 = vmatprep.mubr.f32.mxu1 %v14271_v60  ;;  %v4343_v47 = vpack.c.bf16 %v14271_v60, %v14267_v34  ;;  %v4406_v60 = vpop.permute.xlu0 %4405  ;;  %v4408_v34 = vpop.permute.xlu1 %4407 }
 0xce3   : > { %4254 = vmatmul.mubr.f32.gmra.mxu1 %v17231_v46 }
 0xce4   : > { %4471 = vmatprep.mubr.bf16.mxu1 %v22828_v17 }
 0xce7   : > { %11871 = vmatmul.mubr.msk.bf16.vlgmr.msra.gmra.mxu1 %vm1358_vm0, %v4400_v10  ;;  %v4410_v10 = vpop.permute.xlu0 %4409 }
 0xce8   : > { %4481 = vmatprep.mubr.bf16.mxu1 %v22828_v17 }
 0xcef   : > { %11872 = vmatmul.mubr.msk.bf16.gmra.mxu1 %vm1358_vm0, %v4402_v31  ;;  %v4412_v31 = vpop.permute.xlu1 %4411 }
 0xcf0   : > { %4491 = vmatprep.mubr.bf16.mxu1 %v22828_v17 }
 0xcf7   : > { %11873 = vmatmul.mubr.msk.bf16.gmra.mxu1 %vm1358_vm0, %v4404_v37  ;;  %v4414_v37 = vpop.permute.xlu0 %4413 }
 0xcf8   : > { %4501 = vmatprep.mubr.bf16.mxu1 %v22828_v17 }
 0xcff   : > { %11874 = vmatmul.mubr.msk.bf16.gmra.mxu1 %vm1358_vm0, %v4406_v60  ;;  %v4047_v60 = vpop.f32.mrf.mxu1 }
 0xd00   : > { %4511 = vmatprep.mubr.bf16.mxu1 %v22828_v17  ;;  %v4073_v50 = vpack.c.bf16 %v4047_v60, %v4044_v28  ;;  %v17375_v60 = vld [vmem:[%s22573_s4 + $0x10] sm:$0xff]  }
 0xd07   : > { %11875 = vmatmul.mubr.msk.bf16.gmra.mxu1 %vm1358_vm0, %v4408_v34 }
 0xd08   : > { %4521 = vmatprep.mubr.bf16.mxu1 %v22828_v17 }
 0xd0f   : > { %11876 = vmatmul.mubr.msk.bf16.gmra.mxu1 %vm1358_vm0, %v4410_v10 }
 0xd10   : > { %4531 = vmatprep.mubr.bf16.mxu1 %v22828_v17 }
 0xd17   : > { %11877 = vmatmul.mubr.msk.bf16.gmra.mxu1 %vm1358_vm0, %v4412_v31  ;;  %v22829_v31 = vpack.c.bf16 %v17191_v52, %v17187_v14 }
 0xd18   : > { %4541 = vmatprep.mubr.bf16.mxu1 %v22828_v17 }
 0xd19   : > { %v4082_v33 = vmul.bf16 %v16852_v56, %v22829_v31  ;;  %v22830_v56 = vpack.c.bf16 %v17221_v8, %v17217_v41 }
 0xd1b   : > { %v4088_v14 = vmul.bf16 %v16882_v4, %v22830_v56  ;;  %v17389_v56 = vld [vmem:[%s22573_s4 + $0x20] sm:$0xff]  }
 0xd1f   : > { %11878 = vmatmul.mubr.msk.bf16.gmra.mxu1 %vm1358_vm0, %v4414_v37  ;;  %v4065_v37 = vpack.c.bf16 %v17195_v42, %v17189_v20  ;;  %v4071_v20 = vpack.c.bf16 %v17225_v54, %v17219_v36 }
 0xd20   : > { %4809 = vmatprep.mubr.bf16.mxu1 %v22828_v17  ;;  %v4089_v17 = vmul.bf16 %v16865_v18, %v4073_v50  ;;  %v4063_v50 = vpack.c.bf16 %v17185_v7, %v17179_v48  ;;  %v4069_v48 = vpack.c.bf16 %v17215_v32, %v17209_v12 }
 0xd21   : > { %v4087_v4 = vmul.bf16 %v16910_v53, %v4071_v20 }
 0xd22   : > { %v4079_v42 = vmul.bf16 %v16918_v3, %v4063_v50  ;;  %v22833_v3 = vpack.c.bf16 %v17171_v1, %v17167_v49  ;;  %v22834_v49 = vpack.c.bf16 %v17201_v16, %v17197_v51 }
 0xd24   : > { %v4078_v7 = vmul.bf16 %v16941_v44, %v22833_v3  ;;  %v4084_v44 = vmul.bf16 %v16970_v5, %v22834_v49  ;;  %v17423_v49 = vld [vmem:[%s22553_s29 + $0x70] ss:$8 sps:$4 sm:$0xff]  }
 0xd25   : > { %22843 = vst [vmem:[#allocation50_spill] sm:$0xff] %v17423_v49 }
 0xd9f   : > { %v12636_v57 = vpop.f32.mrf.mxu1 }
 0xda1   : > { %v12637_v34 = vpop.f32.mrf.mxu1 }
 0xda2   : > { %v12638_v29 = vadd.f32 %v12637_v34, %v12636_v57  ;;  %v22837_v57 = vld [vmem:[#allocation20_spill] sm:$0xff] }
 0xda3   : > { %v12639_v24 = vpop.f32.mrf.mxu1 }
 0xda4   : > { %13713 = vmatprep.mubr.msk.f32.mxu0 %vm1358_vm0, %v12638_v29 }
 0xda5   : > { %v12640_v10 = vpop.f32.mrf.mxu1 }
 0xda6   : > { %v12641_v62 = vadd.f32 %v12640_v10, %v12639_v24  ;;  %v4081_v24 = vmul.bf16 %v16874_v63, %v4065_v37  ;;  %v22831_v63 = vpack.c.bf16 %v17181_v55, %v17177_v58  ;;  %v22832_v58 = vpack.c.bf16 %v17211_v61, %v17207_v0  ;;  %v17382_v37 = vld [vmem:[%s22573_s4 + $0x18] sm:$0xff]  }
 0xda7   : > { %v17266_v6 = vpop.f32.mrf.mxu1  ;;  %v4061_v0 = vpack.c.bf16 %v17175_v43, %v17169_v35  ;;  %v4067_v35 = vpack.c.bf16 %v17205_v38, %v17199_v27  ;;  %v22836_v38 = vld [vmem:[#allocation17_spill] sm:$0xff] }
 0xda8   : > { %13714 = vmatmul.mubr.msk.f32.vlgmr.msra.gmra.mxu0 %vm1358_vm0, %v12641_v62 }
 0xda9   : > { %12647 = vmatpush3.bf16.msra.mxu0 %v4082_v33  ;;  %4376 = vmatprep.mubr.bf16.mxu0 %v4343_v47  ;;  %v17270_v28 = vpop.f32.mrf.mxu1  ;;  %v4080_v33 = vmul.bf16 %v16897_v26, %v22831_v63  ;;  %v4086_v26 = vmul.bf16 %v16926_v9, %v22832_v58  ;;  %v4085_v9 = vmul.bf16 %v16954_v40, %v4069_v48 }
 0xdaa   : > { %12648 = vmatprep.subr.bf16.mxu0 %v4089_v17  ;;  %v4077_v32 = vmul.bf16 %v16962_v30, %v4061_v0  ;;  %v22835_v40 = vpack.c.bf16 %v17161_v21, %v17157_v59  ;;  %v4059_v30 = vpack.c.bf16 %v17165_v25, %v17159_v22  ;;  %v4083_v51 = vmul.bf16 %v16996_v23, %v4067_v35  ;;  %v17429_v35 = vld [vmem:[%s22573_s4 + $0x40] sm:$0xff]  }
 0xdab   : > { %v17273_v29 = vpop.f32.mrf.mxu1  ;;  %v1242_v59 = vpack.c.bf16 %v22837_v57, %v22836_v38  ;;  %v22838_v23 = vpack.c.bf16 %v17231_v46, %v17227_v13  ;;  %v17368_v13 = vld [vmem:[%s22573_s4 + $0x8] sm:$0xff]   ;;  %22844 = vst [vmem:[#allocation71_spill] sm:$0xff] %v17429_v35 }
 0xdac   : > { %v4552_v18 = vpack.c.bf16 %v17273_v29, %v17266_v6  ;;  %v4076_v43 = vmul.bf16 %v16983_v45, %v22835_v40  ;;  %v4075_v27 = vmul.bf16 %v17004_v2, %v4059_v30  ;;  %v17359_v2 = vld [vmem:[%s22573_s4] sm:$0xff]   ;;  %v17598_v6 = vld [vmem:[%s22183_s5 + $0x78] sm:$0xff]  ;;  %v17603_v29 = vld [vmem:[%s22183_s5 + $0xf0] sm:$0xff] }
 0xdad   : > { %12649 = vmatpush3.bf16.msra.mxu0 %v4081_v24  ;;  %v17283_v62 = vpop.f32.mrf.mxu1 }
 0xdae   : > { %12650 = vmatprep.subr.bf16.mxu0 %v4088_v14 }
 0xdaf   : > { %v17291_v41 = vpop.f32.mrf.mxu1 }
 0xdb1   : > { %12651 = vmatpush3.bf16.msra.mxu0 %v4080_v33  ;;  %v17294_v52 = vpop.f32.mrf.mxu1  ;;  %v17396_v33 = vld [vmem:[%s22573_s4 + $0x28] sm:$0xff]  }
 0xdb2   : > { %12652 = vmatprep.subr.bf16.mxu0 %v4087_v4  ;;  %22839 = vst [vmem:[#allocation13_spill] sm:$0xff] %v17396_v33  ;;  %v17403_v4 = vld [vmem:[%s22573_s4 + $0x30] sm:$0xff]  }
 0xdb3   : > { %v17297_v36 = vpop.f32.mrf.mxu1  ;;  %22840 = vst [vmem:[#allocation70_spill] sm:$0xff] %v17403_v4 }
 0xdb4   : > { %v4554_v55 = vpack.c.bf16 %v17297_v36, %v17291_v41  ;;  %v17574_v41 = vld [vmem:[%s22553_s29] ss:$8 sps:$4 sm:$0xff]  }
 0xdb5   : > { %12653 = vmatpush3.bf16.msra.mxu0 %v4079_v42  ;;  %v17307_v53 = vpop.f32.mrf.mxu1  ;;  %22864 = vst [vmem:[#allocation79_spill] sm:$0xff] %v17574_v41  ;;  %v4568_v36 = vmul.bf16 %v17574_v41, %v4552_v18  ;;  %v17609_v18 = vld [vmem:[%s22183_s5 + $0x70] sm:$0xff] }
 0xdb6   : > { %12654 = vmatprep.subr.bf16.mxu0 %v4086_v26  ;;  %v17787_v41 = vld [vmem:[%s22183_s5 + $0x90] sm:$0xff] }
 0xdb7   : > { %v17315_v61 = vpop.f32.mrf.mxu1  ;;  %22884 = vst [vmem:[#allocation45_spill] sm:$0xff] %v17787_v41 }
 0xdb9   : > { %12655 = vmatpush3.bf16.msra.mxu0 %v4078_v7  ;;  %v17318_v12 = vpop.f32.mrf.mxu1  ;;  %v17410_v7 = vld [vmem:[%s22553_s29 + $0x74] ss:$8 sps:$4 sm:$0xff]  }
 0xdba   : > { %12656 = vmatprep.subr.bf16.mxu0 %v4085_v9  ;;  %22841 = vst [vmem:[#allocation57_spill] sm:$0xff] %v17410_v7  ;;  %v17416_v9 = vld [vmem:[%s22573_s4 + $0x38] sm:$0xff]  }
 0xdbb   : > { %v17321_v8 = vpop.f32.mrf.mxu1  ;;  %22842 = vst [vmem:[#allocation14_spill] sm:$0xff] %v17416_v9 }
 0xdbd   : > { %12657 = vmatpush3.bf16.msra.mxu0 %v4077_v32  ;;  %v17329_v1 = vpop.f32.mrf.mxu1 }
 0xdbe   : > { %12658 = vmatprep.subr.bf16.mxu0 %v4084_v44 }
 0xdbf   : > { %v17337_v54 = vpop.f32.mrf.mxu1 }
 0xdc1   : > { %12659 = vmatpush3.bf16.msra.mxu0 %v4076_v43  ;;  %v17340_v5 = vpop.f32.mrf.mxu1  ;;  %v17436_v43 = vld [vmem:[%s22553_s29 + $0x64] ss:$8 sps:$4 sm:$0xff]  }
 0xdc2   : > { %12660 = vmatprep.subr.bf16.mxu0 %v4083_v51  ;;  %22845 = vst [vmem:[#allocation64_spill] sm:$0xff] %v17436_v43 }
 0xdc3   : > { %v17343_v16 = vpop.f32.mrf.mxu1 }
 0xdc5   : > { %12661 = vmatpush3.bf16.msra.mxu0 %v4075_v27  ;;  %v17347_v45 = vpop.f32.mrf.mxu1  ;;  %v17442_v27 = vld [vmem:[%s22553_s29 + $0x60] ss:$8 sps:$4 sm:$0xff]  }
 0xdc6   : > { %13716 = vmatprep.subr.bf16.mxu0 %v1242_v59  ;;  %22846 = vst [vmem:[#allocation58_spill] sm:$0xff] %v17442_v27 }
 0xdc7   : > { %v17349_v22 = vpop.f32.mrf.mxu1 }
 0xdc8   : > { %4377 = vmatmul.mubr.bf16.vlgmr.msra.gmra.mxu0 %v22838_v23 }
 0xdc9   : > { %13717 = vmatpush3.bf16.msra.mxu0 %v1242_v59  ;;  %v17354_v21 = vpop.f32.mrf.mxu1  ;;  %13718 = vmatprep.mubr.msk.bf16.mxu0 %vm1358_vm0, %v17359_v2  ;;  %v17449_v59 = vld [vmem:[%s22553_s29 + $0x54] ss:$8 sps:$4 sm:$0xff]  }
 0xdca   : > { %22847 = vst [vmem:[#allocation51_spill] sm:$0xff] %v17449_v59 }
 0xdcb   : > { %v17363_v25 = vpop.f32.mrf.mxu1 }
 0xdcd   : > { %v4519_v47 = vpop.f32.mrf.mxu1 }
 0xdce   : > { %v4561_v57 = vpack.c.bf16 %v4519_v47, %v17354_v21  ;;  %v4560_v21 = vpack.c.bf16 %v17363_v25, %v17349_v22  ;;  %v17464_v47 = vld [vmem:[%s22553_s29 + $0x50] ss:$8 sps:$4 sm:$0xff]   ;;  %v17479_v22 = vld [vmem:[%s22553_s29 + $0x44] ss:$8 sps:$4 sm:$0xff]  }
 0xdcf   : > { %v4523_v17 = vpop.f32.mrf.mxu1  ;;  %22849 = vst [vmem:[#allocation53_spill] sm:$0xff] %v17464_v47  ;;  %22851 = vst [vmem:[#allocation54_spill] sm:$0xff] %v17479_v22 }
 0xdd0   : > { %13719 = vmatmul.mubr.msk.bf16.vlgmr.msra.gmra.mxu0 %vm1358_vm0, %v17368_v13  ;;  %v4577_v25 = vmul.bf16 %v17479_v22, %v4561_v57  ;;  %v17621_v57 = vld [vmem:[%s22183_s5 + $0x68] sm:$0xff] }
 0xdd1   : > { %v4525_v46 = vpop.f32.mrf.mxu1  ;;  %13722 = vmatprep.mubr.msk.bf16.mxu0 %vm1358_vm0, %v17375_v60 }
 0xdd3   : > { %v4527_v34 = vpop.f32.mrf.mxu1 }
 0xdd4   : > { %v4562_v51 = vpack.c.bf16 %v4527_v34, %v4523_v17  ;;  %v17455_v17 = vld [vmem:[%s22573_s4 + $0x48] sm:$0xff]   ;;  %v17470_v34 = vld [vmem:[%s22573_s4 + $0x50] sm:$0xff]  }
 0xdd5   : > { %v4529_v10 = vpop.f32.mrf.mxu1  ;;  %22848 = vst [vmem:[#allocation52_spill] sm:$0xff] %v17455_v17  ;;  %22850 = vst [vmem:[#allocation65_spill] sm:$0xff] %v17470_v34 }
 0xdd6   : > { %v4563_v40 = vpack.c.bf16 %v4529_v10, %v4525_v46  ;;  %v4578_v46 = vmul.bf16 %v17464_v47, %v4562_v51  ;;  %v4559_v10 = vpack.c.bf16 %v17347_v45, %v17340_v5  ;;  %v4557_v5 = vpack.c.bf16 %v17329_v1, %v17318_v12  ;;  %v17495_v45 = vld [vmem:[%s22553_s29 + $0x34] ss:$8 sps:$4 sm:$0xff]   ;;  %v17510_v1 = vld [vmem:[%s22553_s29 + $0x30] ss:$8 sps:$4 sm:$0xff]  }
 0xdd7   : > { %v4533_v31 = vpop.f32.mrf.mxu1  ;;  %22853 = vst [vmem:[#allocation55_spill] sm:$0xff] %v17495_v45  ;;  %v4556_v12 = vpack.c.bf16 %v17321_v8, %v17315_v61  ;;  %22855 = vst [vmem:[#allocation75_spill] sm:$0xff] %v17510_v1  ;;  %v17525_v61 = vld [vmem:[%s22553_s29 + $0x24] ss:$8 sps:$4 sm:$0xff]   ;;  %v17593_v51 = vld [vmem:[%s22183_s5 + $0xf8] sm:$0xff] }
 0xdd8   : > { %13723 = vmatmul.mubr.msk.bf16.gmra.mxu0 %vm1358_vm0, %v17382_v37  ;;  %v4579_v23 = vmul.bf16 %v17449_v59, %v4563_v40  ;;  %22857 = vst [vmem:[#allocation76_spill] sm:$0xff] %v17525_v61  ;;  %v4573_v8 = vmul.bf16 %v17525_v61, %v4557_v5  ;;  %v22867_v40 = vld [vmem:[#allocation23_spill] sm:$0xff]  ;;  %12685 = vmatprep.subr.mxu0 %v17593_v51  ;;  %v17657_v5 = vld [vmem:[%s22183_s5 + $0x50] sm:$0xff] }
 0xdd9   : > { %v4535_v24 = vpop.f32.mrf.mxu1  ;;  %13726 = vmatprep.mubr.msk.bf16.mxu0 %vm1358_vm0, %v17389_v56  ;;  %12686 = vmatpush3.msra.mxu0 %v17598_v6  ;;  %v22894_v61 = vld [vmem:[#allocation39_spill] sm:$0xff] }
 0xdda   : > { %12687 = vmatprep.subr.mxu0 %v17603_v29 }
 0xddb   : > { %v4537_v14 = vpop.f32.mrf.mxu1  ;;  %12688 = vmatpush3.msra.mxu0 %v17609_v18 }
 0xddc   : > { %v4564_v32 = vpack.c.bf16 %v4537_v14, %v4533_v31  ;;  %v4558_v31 = vpack.c.bf16 %v17343_v16, %v17337_v54  ;;  %v17501_v54 = vld [vmem:[%s22573_s4 + $0x58] sm:$0xff]  }
 0xddd   : > { %v4539_v20 = vpop.f32.mrf.mxu1  ;;  %22854 = vst [vmem:[#allocation73_spill] sm:$0xff] %v17501_v54 }
 0xdde   : > { %v4565_v48 = vpack.c.bf16 %v4539_v20, %v4535_v24  ;;  %v4580_v38 = vmul.bf16 %v17442_v27, %v4564_v32  ;;  %v17487_v24 = vld [vmem:[%s22553_s29 + $0x40] ss:$8 sps:$4 sm:$0xff]   ;;  %v4575_v20 = vmul.bf16 %v17495_v45, %v4559_v10  ;;  %v4574_v16 = vmul.bf16 %v17510_v1, %v4558_v31  ;;  %v17639_v10 = vld [vmem:[%s22183_s5 + $0xd8] sm:$0xff]  ;;  %v17651_v31 = vld [vmem:[%s22183_s5 + $0xd0] sm:$0xff] }
 0xddf   : > { %v4543_v63 = vpop.f32.mrf.mxu1  ;;  %22852 = vst [vmem:[#allocation72_spill] sm:$0xff] %v17487_v24  ;;  %v4576_v14 = vmul.bf16 %v17487_v24, %v4560_v21  ;;  %v17840_v1 = vld [vmem:[%s22184_s6 + $0x8] sm:$0xff] }
 0xde0   : > { %13727 = vmatmul.mubr.msk.bf16.gmra.mxu0 %vm1358_vm0, %v17396_v33  ;;  %v4581_v30 = vmul.bf16 %v17436_v43, %v4565_v48  ;;  %v17545_v48 = vld [vmem:[%s22573_s4 + $0x68] sm:$0xff]   ;;  %22895 = vst [vmem:[#allocation68_spill] sm:$0xff] %v17840_v1 }
 0xde1   : > { %v4545_v50 = vpop.f32.mrf.mxu1  ;;  %13730 = vmatprep.mubr.msk.bf16.mxu0 %vm1358_vm0, %v17403_v4  ;;  %22860 = vst [vmem:[#allocation78_spill] sm:$0xff] %v17545_v48 }
 0xde3   : > { %v4547_v42 = vpop.f32.mrf.mxu1 }
 0xde4   : > { %v4566_v58 = vpack.c.bf16 %v4547_v42, %v4543_v63  ;;  %v17516_v63 = vld [vmem:[%s22573_s4 + $0x60] sm:$0xff]  }
 0xde5   : > { %v4549_v26 = vpop.f32.mrf.mxu1  ;;  %22856 = vst [vmem:[#allocation56_spill] sm:$0xff] %v17516_v63  ;;  %v17531_v42 = vld [vmem:[%s22553_s29 + $0x20] ss:$8 sps:$4 sm:$0xff]  }
 0xde6   : > { %v4567_v3 = vpack.c.bf16 %v4549_v26, %v4545_v50  ;;  %v4582_v44 = vmul.bf16 %v17423_v49, %v4566_v58  ;;  %v4555_v50 = vpack.c.bf16 %v17307_v53, %v17294_v52  ;;  %22858 = vst [vmem:[#allocation77_spill] sm:$0xff] %v17531_v42  ;;  %v4572_v58 = vmul.bf16 %v17531_v42, %v4556_v12  ;;  %v17539_v52 = vld [vmem:[%s22553_s29 + $0x14] ss:$8 sps:$4 sm:$0xff]  }
 0xde7   : > { %v4553_v26 = vpack.c.bf16 %v17283_v62, %v17270_v28  ;;  %22859 = vst [vmem:[#allocation74_spill] sm:$0xff] %v17539_v52  ;;  %v17552_v28 = vld [vmem:[%s22553_s29 + $0x10] ss:$8 sps:$4 sm:$0xff]  }
 0xde8   : > { %v4583_v0 = vmul.bf16 %v17410_v7, %v4567_v3  ;;  %13731 = vmatmul.mubr.msk.bf16.gmra.mxu0 %vm1358_vm0, %v17416_v9  ;;  %v4571_v53 = vmul.bf16 %v17539_v52, %v4555_v50  ;;  %22861 = vst [vmem:[#allocation89_spill] sm:$0xff] %v17552_v28  ;;  %v4570_v62 = vmul.bf16 %v17552_v28, %v4554_v55  ;;  %v17561_v3 = vld [vmem:[%s22573_s4 + $0x70] sm:$0xff]   ;;  %v17583_v55 = vld [vmem:[%s22573_s4 + $0x78] sm:$0xff]   ;;  %v17813_v28 = vld [vmem:[%s22183_s5 + $0x80] sm:$0xff] }
 0xde9   : > { %13734 = vmatprep.mubr.msk.bf16.mxu0 %vm1358_vm0, %v17429_v35  ;;  %22862 = vst [vmem:[#allocation11_spill] sm:$0xff] %v17561_v3  ;;  %22865 = vst [vmem:[#allocation90_spill] sm:$0xff] %v17583_v55  ;;  %v22891_v52 = vld [vmem:[#allocation35_spill] sm:$0xff]  ;;  %v22893_v42 = vld [vmem:[#allocation37_spill] sm:$0xff] }
 0xdea   : > { %4777 = vmatprep.subr.bf16.mxu1 %v4583_v0  ;;  %v17568_v0 = vld [vmem:[%s22553_s29 + $0x4] ss:$8 sps:$4 sm:$0xff]   ;;  %22888 = vst [vmem:[#allocation46_spill] sm:$0xff] %v17813_v28 }
 0xdeb   : > { %4778 = vmatpush1.bf16.msra.mxu1 %v4582_v44  ;;  %22863 = vst [vmem:[#allocation10_spill] sm:$0xff] %v17568_v0  ;;  %v4569_v32 = vmul.bf16 %v17568_v0, %v4553_v26  ;;  %v22866_v44 = vld [vmem:[#allocation25_spill] sm:$0xff]  ;;  %v17793_v0 = vld [vmem:[%s22183_s5 + $0x10] sm:$0xff] }
 0xdec   : > { %4779 = vmatprep.subr.bf16.mxu1 %v4581_v30  ;;  %v22868_v30 = vpack.c.bf16 %v22866_v44, %v22867_v40  ;;  %22885 = vst [vmem:[#allocation87_spill] sm:$0xff] %v17793_v0 }
 0xdef   : > { %4780 = vmatpush1.bf16.msra.mxu1 %v4580_v38  ;;  %v17615_v38 = vld [vmem:[%s22183_s5 + $0xe8] sm:$0xff] }
 0xdf0   : > { %4781 = vmatprep.subr.bf16.mxu1 %v4579_v23  ;;  %13735 = vmatmul.mubr.msk.bf16.gmra.mxu0 %vm1358_vm0, %v17455_v17  ;;  %v17627_v23 = vld [vmem:[%s22183_s5 + $0xe0] sm:$0xff] }
 0xdf1   : > { %13738 = vmatprep.mubr.msk.bf16.mxu0 %vm1358_vm0, %v17470_v34  ;;  %12689 = vmatprep.subr.mxu0 %v17615_v38 }
 0xdf2   : > { %12690 = vmatpush3.msra.mxu0 %v17621_v57 }
 0xdf3   : > { %4782 = vmatpush1.bf16.msra.mxu1 %v4578_v46  ;;  %v17633_v46 = vld [vmem:[%s22183_s5 + $0x60] sm:$0xff]  ;;  %12691 = vmatprep.subr.mxu0 %v17627_v23 }
 0xdf4   : > { %4783 = vmatprep.subr.bf16.mxu1 %v4577_v25  ;;  %v17645_v25 = vld [vmem:[%s22183_s5 + $0x58] sm:$0xff]  ;;  %12692 = vmatpush3.msra.mxu0 %v17633_v46 }
 0xdf5   : > { %12693 = vmatprep.subr.mxu0 %v17639_v10 }
 0xdf6   : > { %12694 = vmatpush3.msra.mxu0 %v17645_v25 }
 0xdf7   : > { %4784 = vmatpush1.bf16.msra.mxu1 %v4576_v14  ;;  %12695 = vmatprep.subr.mxu0 %v17651_v31 }
 0xdf8   : > { %4785 = vmatprep.subr.bf16.mxu1 %v4575_v20  ;;  %13739 = vmatmul.mubr.msk.bf16.gmra.mxu0 %vm1358_vm0, %v17501_v54  ;;  %v17663_v20 = vld [vmem:[%s22183_s5 + $0xc8] sm:$0xff] }
 0xdf9   : > { %13742 = vmatprep.mubr.msk.bf16.mxu0 %vm1358_vm0, %v17516_v63  ;;  %12696 = vmatpush3.msra.mxu0 %v17657_v5 }
 0xdfa   : > { %12697 = vmatprep.subr.mxu0 %v17663_v20 }
 0xdfb   : > { %4786 = vmatpush1.bf16.msra.mxu1 %v4574_v16 }
 0xdfc   : > { %4787 = vmatprep.subr.bf16.mxu1 %v4573_v8 }
 0xdff   : > { %4788 = vmatpush1.bf16.msra.mxu1 %v4572_v58 }
 0xe00   : > { %4789 = vmatprep.subr.bf16.mxu1 %v4571_v53  ;;  %13743 = vmatmul.mubr.msk.bf16.gmra.mxu0 %vm1358_vm0, %v17545_v48  ;;  %v22890_v48 = vld [vmem:[#allocation38_spill] sm:$0xff] }
 0xe01   : > { %13746 = vmatprep.mubr.msk.bf16.mxu0 %vm1358_vm0, %v17561_v3  ;;  %v17808_v3 = vld [vmem:[%s22183_s5 + $0x8] sm:$0xff] }
 0xe02   : > { %22887 = vst [vmem:[#allocation61_spill] sm:$0xff] %v17808_v3 }
 0xe03   : > { %4790 = vmatpush1.bf16.msra.mxu1 %v4570_v62 }
 0xe04   : > { %4791 = vmatprep.subr.bf16.mxu1 %v4569_v32 }
 0xe07   : > { %4792 = vmatpush1.bf16.msra.mxu1 %v4568_v36 }
 0xe08   : > { %13747 = vmatmul.mubr.msk.bf16.gmra.mxu0 %vm1358_vm0, %v17583_v55  ;;  %v17782_v55 = vld [vmem:[%s22183_s5 + $0x18] sm:$0xff]  ;;  %13750 = vmatprep.subr.mxu1 %v17840_v1 }
 0xe09   : > { %22883 = vst [vmem:[#allocation86_spill] sm:$0xff] %v17782_v55 }
 0xe0a   : > { %4810 = vmatmul.mubr.bf16.vlgmr.msra.gmra.mxu1 %v22868_v30 }
 0xe0b   : > { %13751 = vmatpush3.msra.mxu1 %v17840_v1 }
 0xe68   : > { %v13715_v21 = vpop.f32.mrf.mxu0 }
 0xe69   : > { %14272 = vrcp.f32 %v13715_v21  ;;  %v17671_v21 = vld [vmem:[%s22185_s7] sm:$0xff] }
 0xe6a   : > { %v4333_v14 = vpop.f32.mrf.mxu0  ;;  %22869 = vst [vmem:[#allocation80_spill] sm:$0xff] %v17671_v21 }
 0xe6b   : > { %14274 = vrcp.f32 %v4333_v14 }
 0xe76   : > { %v14273_v26 = vpop.eup %14272 }
 0xe78   : > { %v14275_v62 = vpop.eup %14274 }
 0xe88   : > { %v12662_v12 = vpop.f32.mrf.mxu0 }
 0xe8a   : > { %v12663_v16 = vpop.f32.mrf.mxu0 }
 0xe8b   : > { %v12664_v8 = vadd.f32 %v12663_v16, %v12662_v12  ;;  %v17679_v12 = vld [vmem:[%s22185_s7 + $0x8] sm:$0xff] }
 0xe8c   : > { %v12665_v50 = vpop.f32.mrf.mxu0  ;;  %22870 = vst [vmem:[#allocation66_spill] sm:$0xff] %v17679_v12 }
 0xe8d   : > { %v4386_v32 = vmul.f32 %v14275_v62, %v12664_v8  ;;  %v17697_v62 = vld [vmem:[%s22185_s7 + $0x18] sm:$0xff] }
 0xe8e   : > { %v12666_v58 = vpop.f32.mrf.mxu0  ;;  %22872 = vst [vmem:[#allocation41_spill] sm:$0xff] %v17697_v62 }
 0xe8f   : > { %v12667_v53 = vadd.f32 %v12666_v58, %v12665_v50 }
 0xe90   : > { %v17835_v63 = vpop.f32.mrf.mxu0 }
 0xe91   : > { %v4388_v36 = vmul.f32 %v14273_v26, %v12667_v53  ;;  %v17689_v26 = vld [vmem:[%s22185_s7 + $0x10] sm:$0xff] }
 0xe92   : > { %22871 = vst [vmem:[#allocation67_spill] sm:$0xff] %v17689_v26 }
 0xe93   : > { %v12299_v44 = vpack.c.bf16 %v4388_v36, %v4386_v32 }
 0xe95   : > { %12323 = vst [vmem:[#allocation2 + $0x18] sm:$0xff] %v12299_v44   ;;  %v17707_v44 = vld [vmem:[%s22183_s5 + $0x48] sm:$0xff] }
 0xe96   : > { %12698 = vmatpush3.msra.mxu0 %v17707_v44 }
 0xeca   : > { %v4811_v40 = vpop.f32.mrf.mxu1 }
 0xecb   : > { %v17674_v14 = vadd.f32 %v17671_v21, %v4811_v40  ;;  %v17713_v40 = vld [vmem:[%s22183_s5 + $0xc0] sm:$0xff]  ;;  %v17773_v21 = vld [vmem:[%s22183_s5 + $0x98] sm:$0xff] }
 0xecc   : > { %v4813_v30 = vpop.f32.mrf.mxu1  ;;  %12699 = vmatprep.subr.mxu0 %v17713_v40  ;;  %22882 = vst [vmem:[#allocation44_spill] sm:$0xff] %v17773_v21 }
 0xecd   : > { %v17682_v16 = vadd.f32 %v17679_v12, %v4813_v30  ;;  %v17719_v30 = vld [vmem:[%s22183_s5 + $0x40] sm:$0xff] }
 0xece   : > { %v4815_v50 = vpop.f32.mrf.mxu1  ;;  %22873 = vst [vmem:[#allocation59_spill] sm:$0xff] %v17719_v30  ;;  %12700 = vmatpush3.msra.mxu0 %v17719_v30  ;;  %v17768_v12 = vld [vmem:[%s22183_s5 + $0x20] sm:$0xff] }
 0xecf   : > { %v4820_v8 = vmax.f32 %v17674_v14, %v17682_v16  ;;  %v17692_v53 = vadd.f32 %v17689_v26, %v4815_v50  ;;  %v17725_v50 = vld [vmem:[%s22183_s5 + $0xb8] sm:$0xff]  ;;  %v17757_v26 = vld [vmem:[%s22183_s5 + $0x28] sm:$0xff]  ;;  %22881 = vst [vmem:[#allocation85_spill] sm:$0xff] %v17768_v12 }
 0xed0   : > { %v4817_v58 = vpop.f32.mrf.mxu1  ;;  %22874 = vst [vmem:[#allocation81_spill] sm:$0xff] %v17725_v50  ;;  %12701 = vmatprep.subr.mxu0 %v17725_v50  ;;  %22879 = vst [vmem:[#allocation83_spill] sm:$0xff] %v17757_v26 }
 0xed1   : > { %v17700_v32 = vadd.f32 %v17697_v62, %v4817_v58  ;;  %4821 = vmax.xlane.f32.xlu1 %v4820_v8  ;;  %v17731_v8 = vld [vmem:[%s22183_s5 + $0x38] sm:$0xff]  ;;  %v17737_v58 = vld [vmem:[%s22183_s5 + $0xb0] sm:$0xff]  ;;  %v17751_v62 = vld [vmem:[%s22183_s5 + $0xa8] sm:$0xff] }
 0xed2   : > { %22875 = vst [vmem:[#allocation42_spill] sm:$0xff] %v17731_v8  ;;  %12702 = vmatpush3.msra.mxu0 %v17731_v8  ;;  %22876 = vst [vmem:[#allocation60_spill] sm:$0xff] %v17737_v58  ;;  %v22899_v8 = vmov 0  }
 0xed3   : > { %v4823_v36 = vmax.f32 %v17692_v53, %v17700_v32  ;;  %12703 = vmatprep.subr.mxu0 %v17737_v58  ;;  %22878 = vst [vmem:[#allocation43_spill] sm:$0xff] %v17751_v62 }
 0xed5   : > { %4824 = vmax.xlane.f32.xlu0 %v4823_v36  ;;  %v17743_v36 = vld [vmem:[%s22183_s5 + $0x30] sm:$0xff] }
 0xed6   : > { %22877 = vst [vmem:[#allocation82_spill] sm:$0xff] %v17743_v36  ;;  %12704 = vmatpush3.msra.mxu0 %v17743_v36 }
 0xed7   : > { %12705 = vmatprep.subr.mxu0 %v17751_v62 }
 0xed8   : > { %12706 = vmatpush3.msra.mxu0 %v17757_v26 }
 0xee2   : > { %5087 = vrot.lane.b32.xlu1 %v22818_v19, %s14601_s28  ;;  %v17763_v19 = vld [vmem:[%s22183_s5 + $0xa0] sm:$0xff] }
 0xee3   : > { %22880 = vst [vmem:[#allocation84_spill] sm:$0xff] %v17763_v19  ;;  %12707 = vmatprep.subr.mxu0 %v17763_v19 }
 0xee4   : > { %12708 = vmatpush3.msra.mxu0 %v17768_v12 }
 0xee5   : > { %12709 = vmatprep.subr.mxu0 %v17773_v21 }
 0xee6   : > { %5089 = vrot.lane.b32.xlu1 %v22819_v11, %s14601_s28  ;;  %12710 = vmatpush3.msra.mxu0 %v17782_v55  ;;  %v17799_v11 = vld [vmem:[%s22183_s5 + $0x88] sm:$0xff] }
 0xee7   : > { %22886 = vst [vmem:[#allocation88_spill] sm:$0xff] %v17799_v11  ;;  %12711 = vmatprep.subr.mxu0 %v17787_v41 }
 0xee8   : > { %12712 = vmatpush3.msra.mxu0 %v17793_v0 }
 0xee9   : > { %12713 = vmatprep.subr.mxu0 %v17799_v11 }
 0xeea   : > { %5093 = vrot.lane.b32.xlu1 %v22820_v15, %s14601_s28  ;;  %v17821_v15 = vld [vmem:[%s22183_s5] sm:$0xff]  ;;  %12714 = vmatpush3.msra.mxu0 %v17808_v3 }
 0xeeb   : > { %5085 = vrot.lane.b32.xlu0 %v22821_v39, %s14601_s28  ;;  %22889 = vst [vmem:[#allocation62_spill] sm:$0xff] %v17821_v15  ;;  %12715 = vmatprep.subr.mxu0 %v17813_v28  ;;  %v22892_v39 = vld [vmem:[#allocation15_spill] sm:$0xff] }
 0xeec   : > { %12716 = vmatpush3.msra.mxu0 %v17821_v15 }
 0xeed   : > { %5139 = vmatprep.subr.bf16.mxu0 %v22892_v39  ;;  %v17848_v39 = vpop.f32.mrf.mxu0 }
 0xeee   : > { %5097 = vrot.lane.b32.xlu1 %v22890_v48, %s14601_s28  ;;  %v17845_v48 = vld [vmem:[%s22184_s6] sm:$0xff] }
 0xeef   : > { %5091 = vrot.lane.b32.xlu0 %v22891_v52, %s14601_s28  ;;  %22896 = vst [vmem:[#allocation21_spill] sm:$0xff] %v17845_v48  ;;  %13752 = vmatprep.subr.mxu1 %v17845_v48 }
 0xef0   : > { %13753 = vmatpush3.msra.mxu1 %v17845_v48 }
 0xef3   : > { %5095 = vrot.lane.b32.xlu0 %v22893_v42, %s14601_s28 }
 0xef7   : > { %5099 = vrot.lane.b32.xlu0 %v22894_v61, %s14601_s28  ;;  %v17852_v61 = vpop.f32.mrf.mxu0 }
 0xef9   : > { %v17857_v52 = vpop.f32.mrf.mxu0 }
 0xefb   : > { %v17859_v54 = vpop.f32.mrf.mxu0 }
 0xefd   : > { %v17861_v45 = vpop.f32.mrf.mxu0 }
 0xeff   : > { %v17863_v24 = vpop.f32.mrf.mxu0 }
 0xf01   : > { %v17867_v22 = vpop.f32.mrf.mxu0 }
 0xf03   : > { %v17869_v34 = vpop.f32.mrf.mxu0 }
 0xf05   : > { %v17871_v47 = vpop.f32.mrf.mxu0 }
 0xf07   : > { %v17873_v48 = vpop.f32.mrf.mxu0 }
 0xf09   : > { %v17877_v17 = vpop.f32.mrf.mxu0 }
 0xf0b   : > { %v17879_v15 = vpop.f32.mrf.mxu0 }
 0xf0d   : > { %v17881_v28 = vpop.f32.mrf.mxu0 }
 0xf0f   : > { %v17883_v59 = vpop.f32.mrf.mxu0 }
 0xf11   : > { %v17887_v3 = vpop.f32.mrf.mxu0 }
 0xf12   : > { %v4751_v30 = vpack.c.bf16 %v17887_v3, %v17881_v28  ;;  %v17989_v3 = vld [vmem:[%s22609_s8 + $0x68] sm:$0xff]  }
 0xf13   : > { %v17889_v27 = vpop.f32.mrf.mxu0 }
 0xf15   : > { %v17891_v11 = vpop.f32.mrf.mxu0 }
 0xf17   : > { %v17893_v0 = vpop.f32.mrf.mxu0 }
 0xf19   : > { %v17897_v41 = vpop.f32.mrf.mxu0 }
 0xf1b   : > { %v17899_v43 = vpop.f32.mrf.mxu0 }
 0xf1d   : > { %v17901_v55 = vpop.f32.mrf.mxu0 }
 0xf1f   : > { %v17905_v21 = vpop.f32.mrf.mxu0 }
 0xf21   : > { %v17909_v19 = vpop.f32.mrf.mxu0 }
 0xf23   : > { %v17913_v36 = vpop.f32.mrf.mxu0 }
 0xf5a   : > { %v4822_v35 = vpop.xlane.xlu1 %4821 }
 0xf5b   : > { %v4826_v1 = vsub.f32 %v17674_v14, %v4822_v35  ;;  %v4827_v49 = vsub.f32 %v17682_v16, %v4822_v35  ;;  %v17915_v16 = vpop.f32.mrf.mxu0 }
 0xf5d   : > { %v4830_v7 = vmul.f32 1.442695, %v4826_v1  ;;  %v4832_v12 = vmul.f32 1.442695, %v4827_v49  ;;  %v17917_v58 = vpop.f32.mrf.mxu0 }
 0xf5e   : > { %v4825_v42 = vpop.xlane.xlu0 %4824 }
 0xf5f   : > { %14276 = vpow2.f32 %v4830_v7  ;;  %v4828_v26 = vsub.f32 %v17692_v53, %v4825_v42  ;;  %v4829_v62 = vsub.f32 %v17700_v32, %v4825_v42  ;;  %v17921_v1 = vpop.f32.mrf.mxu0 }
 0xf60   : > { %14278 = vpow2.f32 %v4832_v12 }
 0xf61   : > { %v4834_v14 = vmul.f32 1.442695, %v4828_v26  ;;  %v4836_v35 = vmul.f32 1.442695, %v4829_v62  ;;  %v13748_v7 = vpop.f32.mrf.mxu0  ;;  %v17928_v26 = vld [vmem:[%s22609_s8 + $0x78] sm:$0xff]  }
 0xf62   : > { %22897 = vst [vmem:[#allocation18_spill] sm:$0xff] %v17928_v26  ;;  %v5086_v4 = vpop.permute.xlu0 %5085 }
 0xf63   : > { %14280 = vpow2.f32 %v4834_v14  ;;  %v4730_v53 = vpop.f32.mrf.mxu0 }
 0xf64   : > { %14282 = vpow2.f32 %v4836_v35  ;;  %v22898_v35 = vld [vmem:[#allocation16_spill] sm:$0xff] }
 0xf65   : > { %v13749_v9 = vpop.f32.mrf.mxu0 }
 0xf66   : > { %v4760_v32 = vpack.c.bf16 %v13749_v9, %v13748_v7 }
 0xf68   : > { %v4776_v62 = vmul.bf16 %v17928_v26, %v4760_v32  ;;  %v5088_v32 = vpop.permute.xlu1 %5087 }
 0xf6a   : > { %12727 = vmatprep.subr.bf16.mxu1 %v4776_v62 }
 0xf6c   : > { %v17923_v42 = vpop.eup %14276  ;;  %v5090_v62 = vpop.permute.xlu1 %5089 }
 0xf6d   : > { %v14279_v12 = vpop.eup %14278 }
 0xf6e   : > { %4934 = vmatprep.mubr.f32.mxu0 %v14279_v12 }
 0xf6f   : > { %4935 = vmatmul.mubr.f32.vlgmr.msra.gmra.mxu0 %v17923_v42 }
 0xf70   : > { %v17932_v14 = vpop.eup %14280  ;;  %5140 = vmatpush1.bf16.msra.mxu0 %v22898_v35 }
 0xf71   : > { %v14283_v49 = vpop.eup %14282 }
 0xf72   : > { %4939 = vmatprep.mubr.f32.mxu0 %v14283_v49  ;;  %v5029_v7 = vpack.c.bf16 %v14283_v49, %v14279_v12  ;;  %v5092_v49 = vpop.permute.xlu0 %5091  ;;  %v5094_v12 = vpop.permute.xlu1 %5093 }
 0xf73   : > { %4940 = vmatmul.mubr.f32.gmra.mxu0 %v17932_v14 }
 0xf74   : > { %5157 = vmatprep.mubr.bf16.mxu0 %v22899_v8 }
 0xf76   : > { %v5098_v35 = vpop.permute.xlu1 %5097 }
 0xf77   : > { %11899 = vmatmul.mubr.msk.bf16.vlgmr.msra.gmra.mxu0 %vm1358_vm0, %v5086_v4  ;;  %v5096_v4 = vpop.permute.xlu0 %5095 }
 0xf78   : > { %5167 = vmatprep.mubr.bf16.mxu0 %v22899_v8 }
 0xf7f   : > { %11900 = vmatmul.mubr.msk.bf16.gmra.mxu0 %vm1358_vm0, %v5088_v32  ;;  %v5100_v32 = vpop.permute.xlu0 %5099 }
 0xf80   : > { %5177 = vmatprep.mubr.bf16.mxu0 %v22899_v8 }
 0xf87   : > { %11901 = vmatmul.mubr.msk.bf16.gmra.mxu0 %vm1358_vm0, %v5090_v62  ;;  %v4733_v62 = vpop.f32.mrf.mxu0 }
 0xf88   : > { %5187 = vmatprep.mubr.bf16.mxu0 %v22899_v8  ;;  %v4759_v50 = vpack.c.bf16 %v4733_v62, %v4730_v53  ;;  %v17972_v53 = vld [vmem:[%s22609_s8 + $0x70] sm:$0xff]   ;;  %v18004_v62 = vld [vmem:[%s22609_s8 + $0x28] sm:$0xff]  }
 0xf8f   : > { %11902 = vmatmul.mubr.msk.bf16.gmra.mxu0 %vm1358_vm0, %v5092_v49 }
 0xf90   : > { %5197 = vmatprep.mubr.bf16.mxu0 %v22899_v8 }
 0xf97   : > { %11903 = vmatmul.mubr.msk.bf16.gmra.mxu0 %vm1358_vm0, %v5094_v12 }
 0xf98   : > { %5207 = vmatprep.mubr.bf16.mxu0 %v22899_v8 }
 0xf9f   : > { %11904 = vmatmul.mubr.msk.bf16.gmra.mxu0 %vm1358_vm0, %v5096_v4 }
 0xfa0   : > { %5217 = vmatprep.mubr.bf16.mxu0 %v22899_v8 }
 0xfa7   : > { %11905 = vmatmul.mubr.msk.bf16.gmra.mxu0 %vm1358_vm0, %v5098_v35  ;;  %v17959_v35 = vld [vmem:[%s22609_s8 + $0x38] sm:$0xff]  }
 0xfa8   : > { %5227 = vmatprep.mubr.bf16.mxu0 %v22899_v8 }
 0xfaf   : > { %11906 = vmatmul.mubr.msk.bf16.gmra.mxu0 %vm1358_vm0, %v5100_v32  ;;  %v22900_v32 = vpack.c.bf16 %v17883_v59, %v17879_v15  ;;  %v17981_v15 = vld [vmem:[%s22609_s8 + $0x30] sm:$0xff]  }
 0xfb0   : > { %5495 = vmatprep.mubr.bf16.mxu0 %v22899_v8  ;;  %v4767_v59 = vmul.bf16 %v17981_v15, %v4751_v30 }
 0xfb1   : > { %v4768_v8 = vmul.bf16 %v17959_v35, %v22900_v32 }
0x102f   : > { %v12717_v49 = vpop.f32.mrf.mxu0 }
0x1031   : > { %v12718_v12 = vpop.f32.mrf.mxu0 }
0x1032   : > { %v12719_v9 = vadd.f32 %v12718_v12, %v12717_v49  ;;  %v18017_v12 = vld [vmem:[%s22609_s8 + $0x60] sm:$0xff]  }
0x1033   : > { %v12720_v26 = vpop.f32.mrf.mxu0 }
0x1034   : > { %13754 = vmatprep.mubr.msk.f32.mxu1 %vm1358_vm0, %v12719_v9 }
0x1035   : > { %v12721_v4 = vpop.f32.mrf.mxu0 }
0x1036   : > { %v12722_v33 = vadd.f32 %v12721_v4, %v12720_v26  ;;  %v4775_v26 = vmul.bf16 %v17972_v53, %v4759_v50 }
0x1037   : > { %v17967_v49 = vpop.f32.mrf.mxu0 }
0x1038   : > { %13755 = vmatmul.mubr.msk.f32.vlgmr.msra.gmra.mxu1 %vm1358_vm0, %v12722_v33  ;;  %v22901_v33 = vpack.c.bf16 %v17917_v58, %v17913_v36  ;;  %v22902_v58 = vpack.c.bf16 %v17873_v48, %v17869_v34  ;;  %v18025_v34 = vld [vmem:[%s22609_s8 + $0x20] sm:$0xff]   ;;  %v18033_v48 = vld [vmem:[%s22609_s8 + $0x58] sm:$0xff]  }
0x1039   : > { %12728 = vmatpush3.bf16.msra.mxu1 %v4768_v8  ;;  %5062 = vmatprep.mubr.bf16.mxu1 %v5029_v7  ;;  %v17976_v9 = vpop.f32.mrf.mxu0  ;;  %v4757_v8 = vpack.c.bf16 %v17921_v1, %v17915_v16  ;;  %v4749_v16 = vpack.c.bf16 %v17877_v17, %v17871_v47 }
0x103a   : > { %12729 = vmatprep.subr.bf16.mxu1 %v4775_v26  ;;  %v4774_v50 = vmul.bf16 %v17989_v3, %v22901_v33  ;;  %v4766_v36 = vmul.bf16 %v18004_v62, %v22902_v58  ;;  %v22903_v26 = vpack.c.bf16 %v17905_v21, %v17899_v43  ;;  %v4755_v33 = vpack.c.bf16 %v17909_v19, %v17901_v55  ;;  %v18048_v58 = vld [vmem:[%s22609_s8 + $0x18] sm:$0xff]  }
0x103b   : > { %v17984_v28 = vpop.f32.mrf.mxu0  ;;  %v4773_v4 = vmul.bf16 %v18017_v12, %v4757_v8  ;;  %v4765_v17 = vmul.bf16 %v18025_v34, %v4749_v16  ;;  %v22904_v43 = vpack.c.bf16 %v17863_v24, %v17859_v54  ;;  %v4747_v19 = vpack.c.bf16 %v17867_v22, %v17861_v45  ;;  %v18069_v24 = vld [vmem:[%s22609_s8 + $0x10] sm:$0xff]   ;;  %v18077_v54 = vld [vmem:[%s22609_s8 + $0x48] sm:$0xff]  }
0x103c   : > { %v5238_v7 = vpack.c.bf16 %v17984_v28, %v17967_v49 }
0x103d   : > { %12730 = vmatpush3.bf16.msra.mxu1 %v4767_v59  ;;  %v17999_v30 = vpop.f32.mrf.mxu0  ;;  %v4772_v59 = vmul.bf16 %v18033_v48, %v22903_v26  ;;  %v4764_v21 = vmul.bf16 %v18048_v58, %v22904_v43  ;;  %v4763_v22 = vmul.bf16 %v18069_v24, %v4747_v19  ;;  %v18090_v43 = vld [vmem:[%s22609_s8 + $0x8] sm:$0xff]  }
0x103e   : > { %12731 = vmatprep.subr.bf16.mxu1 %v4774_v50 }
0x103f   : > { %v18012_v1 = vpop.f32.mrf.mxu0 }
0x1041   : > { %12732 = vmatpush3.bf16.msra.mxu1 %v4766_v36  ;;  %v18020_v32 = vpop.f32.mrf.mxu0  ;;  %v18061_v36 = vld [vmem:[%s22609_s8 + $0x50] sm:$0xff]  }
0x1042   : > { %12733 = vmatprep.subr.bf16.mxu1 %v4773_v4  ;;  %v4771_v16 = vmul.bf16 %v18061_v36, %v4755_v33 }
0x1043   : > { %v18028_v47 = vpop.f32.mrf.mxu0 }
0x1044   : > { %v5240_v50 = vpack.c.bf16 %v18028_v47, %v18012_v1  ;;  %v22955_v1 = vld [vmem:[#allocation27_spill] sm:$0xff]  ;;  %v22956_v47 = vld [vmem:[#allocation26_spill] sm:$0xff] }
0x1045   : > { %12734 = vmatpush3.bf16.msra.mxu1 %v4765_v17  ;;  %v18043_v8 = vpop.f32.mrf.mxu0  ;;  %v22905_v17 = vpack.c.bf16 %v17893_v0, %v17889_v27  ;;  %v4745_v27 = vpack.c.bf16 %v17857_v52, %v17848_v39 }
0x1046   : > { %12735 = vmatprep.subr.bf16.mxu1 %v4772_v59  ;;  %v4753_v59 = vpack.c.bf16 %v17897_v41, %v17891_v11  ;;  %v18103_v11 = vld [vmem:[%s22609_s8 + $0x40] sm:$0xff]  }
0x1047   : > { %v18056_v55 = vpop.f32.mrf.mxu0  ;;  %v4770_v26 = vmul.bf16 %v18077_v54, %v22905_v17 }
0x1048   : > { %v4769_v41 = vmul.bf16 %v18103_v11, %v4753_v59 }
0x1049   : > { %12736 = vmatpush3.bf16.msra.mxu1 %v4764_v21  ;;  %v18064_v4 = vpop.f32.mrf.mxu0  ;;  %v22906_v21 = vpack.c.bf16 %v17852_v61, %v17835_v63  ;;  %v18111_v63 = vld [vmem:[%s22609_s8] sm:$0xff]  }
0x104a   : > { %12737 = vmatprep.subr.bf16.mxu1 %v4771_v16  ;;  %v4761_v61 = vmul.bf16 %v18111_v63, %v4745_v27 }
0x104b   : > { %v18072_v45 = vpop.f32.mrf.mxu0  ;;  %v4762_v19 = vmul.bf16 %v18090_v43, %v22906_v21 }
0x104d   : > { %12738 = vmatpush3.bf16.msra.mxu1 %v4763_v22  ;;  %v18085_v33 = vpop.f32.mrf.mxu0  ;;  %v22907_v22 = vld [vmem:[#allocation19_spill] sm:$0xff] }
0x104e   : > { %12739 = vmatprep.subr.bf16.mxu1 %v4770_v26  ;;  %v22908_v26 = vpack.c.bf16 %v17932_v14, %v17923_v42 }
0x104f   : > { %v18098_v0 = vpop.f32.mrf.mxu0 }
0x1051   : > { %12740 = vmatpush3.bf16.msra.mxu1 %v4762_v19  ;;  %v18106_v16 = vpop.f32.mrf.mxu0 }
0x1052   : > { %12741 = vmatprep.subr.bf16.mxu1 %v4769_v41 }
0x1053   : > { %v18114_v52 = vpop.f32.mrf.mxu0 }
0x1055   : > { %12742 = vmatpush3.bf16.msra.mxu1 %v4761_v61  ;;  %v18116_v39 = vpop.f32.mrf.mxu0  ;;  %v22918_v61 = vld [vmem:[#allocation84_spill] sm:$0xff] }
0x1056   : > { %13757 = vmatprep.subr.bf16.mxu1 %v22907_v22 }
0x1057   : > { %v18119_v17 = vpop.f32.mrf.mxu0 }
0x1058   : > { %5063 = vmatmul.mubr.bf16.vlgmr.msra.gmra.mxu1 %v22908_v26  ;;  %v22920_v26 = vld [vmem:[#allocation57_spill] sm:$0xff] }
0x1059   : > { %13758 = vmatpush3.bf16.msra.mxu1 %v22907_v22  ;;  %v18125_v59 = vpop.f32.mrf.mxu0  ;;  %13759 = vmatprep.mubr.msk.bf16.mxu1 %vm1358_vm0, %v17359_v2  ;;  %v22919_v22 = vld [vmem:[#allocation85_spill] sm:$0xff] }
0x105a   : > { %12766 = vmatprep.subr.mxu1 %v17593_v51 }
0x105b   : > { %v18130_v21 = vpop.f32.mrf.mxu0 }
0x105d   : > { %v18132_v19 = vpop.f32.mrf.mxu0 }
0x105f   : > { %v18134_v27 = vpop.f32.mrf.mxu0 }
0x1060   : > { %13760 = vmatmul.mubr.msk.bf16.vlgmr.msra.gmra.mxu1 %vm1358_vm0, %v17368_v13 }
0x1061   : > { %v5211_v42 = vpop.f32.mrf.mxu0  ;;  %13763 = vmatprep.mubr.msk.bf16.mxu1 %vm1358_vm0, %v17375_v60  ;;  %12767 = vmatpush3.msra.mxu1 %v17598_v6 }
0x1062   : > { %12768 = vmatprep.subr.mxu1 %v17603_v29 }
0x1063   : > { %v18142_v2 = vpop.f32.mrf.mxu0  ;;  %12769 = vmatpush3.msra.mxu1 %v17609_v18  ;;  %v22909_v18 = vld [vmem:[#allocation59_spill] sm:$0xff] }
0x1064   : > { %12770 = vmatprep.subr.mxu1 %v17615_v38  ;;  %v22910_v38 = vld [vmem:[#allocation13_spill] sm:$0xff] }
0x1065   : > { %v5215_v51 = vpop.f32.mrf.mxu0  ;;  %12771 = vmatpush3.msra.mxu1 %v17621_v57 }
0x1066   : > { %12772 = vmatprep.subr.mxu1 %v17627_v23  ;;  %v22912_v23 = vld [vmem:[#allocation70_spill] sm:$0xff] }
0x1067   : > { %v5219_v13 = vpop.f32.mrf.mxu0  ;;  %12773 = vmatpush3.msra.mxu1 %v17633_v46  ;;  %v22913_v46 = vld [vmem:[#allocation42_spill] sm:$0xff] }
0x1068   : > { %13764 = vmatmul.mubr.msk.bf16.gmra.mxu1 %vm1358_vm0, %v17382_v37  ;;  %12774 = vmatprep.subr.mxu1 %v17639_v10  ;;  %v22914_v10 = vld [vmem:[#allocation60_spill] sm:$0xff] }
0x1069   : > { %v5221_v60 = vpop.f32.mrf.mxu0  ;;  %13767 = vmatprep.mubr.msk.bf16.mxu1 %vm1358_vm0, %v17389_v56  ;;  %12775 = vmatpush3.msra.mxu1 %v17645_v25  ;;  %v22911_v56 = vld [vmem:[#allocation81_spill] sm:$0xff] }
0x106a   : > { %12776 = vmatprep.subr.mxu1 %v17651_v31  ;;  %v22915_v31 = vld [vmem:[#allocation82_spill] sm:$0xff] }
0x106b   : > { %v5223_v6 = vpop.f32.mrf.mxu0  ;;  %12777 = vmatpush3.msra.mxu1 %v17657_v5  ;;  %v22916_v5 = vld [vmem:[#allocation43_spill] sm:$0xff] }
0x106c   : > { %12778 = vmatprep.subr.mxu1 %v17663_v20 }
0x106d   : > { %v5225_v29 = vpop.f32.mrf.mxu0  ;;  %12779 = vmatpush3.msra.mxu1 %v17707_v44 }
0x106e   : > { %12780 = vmatprep.subr.mxu1 %v17713_v40  ;;  %v22917_v40 = vld [vmem:[#allocation83_spill] sm:$0xff]  ;;  %v5251_v14 = vpack.c.bf16 %v5225_v29, %v5221_v60  ;;  %v5249_v60 = vpack.c.bf16 %v5215_v51, %v5211_v42  ;;  %v22926_v29 = vld [vmem:[#allocation64_spill] sm:$0xff]  ;;  %v5247_v42 = vpack.c.bf16 %v18132_v19, %v18125_v59  ;;  %v5245_v19 = vpack.c.bf16 %v18116_v39, %v18106_v16 }
0x106f   : > { %v5229_v37 = vpop.f32.mrf.mxu0  ;;  %12781 = vmatpush3.msra.mxu1 %v22909_v18  ;;  %v22932_v51 = vld [vmem:[#allocation51_spill] sm:$0xff]  ;;  %v5242_v16 = vpack.c.bf16 %v18072_v45, %v18056_v55  ;;  %v22948_v55 = vld [vmem:[#allocation78_spill] sm:$0xff] }
0x1070   : > { %13768 = vmatmul.mubr.msk.bf16.gmra.mxu1 %vm1358_vm0, %v22910_v38  ;;  %12782 = vmatprep.subr.mxu1 %v22911_v56  ;;  %v22921_v38 = vld [vmem:[#allocation14_spill] sm:$0xff]  ;;  %v22922_v56 = vld [vmem:[#allocation44_spill] sm:$0xff]  ;;  %v22943_v39 = vld [vmem:[#allocation75_spill] sm:$0xff] }
0x1071   : > { %v5231_v57 = vpop.f32.mrf.mxu0  ;;  %13771 = vmatprep.mubr.msk.bf16.mxu1 %vm1358_vm0, %v22912_v23  ;;  %12783 = vmatpush3.msra.mxu1 %v22913_v46  ;;  %v5250_v23 = vpack.c.bf16 %v5223_v6, %v5219_v13  ;;  %v22923_v46 = vld [vmem:[#allocation50_spill] sm:$0xff]  ;;  %v5248_v13 = vpack.c.bf16 %v18142_v2, %v18134_v27  ;;  %v5246_v27 = vpack.c.bf16 %v18130_v21, %v18119_v17  ;;  %v22936_v2 = vld [vmem:[#allocation53_spill] sm:$0xff]  ;;  %v22940_v21 = vld [vmem:[#allocation72_spill] sm:$0xff] }
0x1072   : > { %12784 = vmatprep.subr.mxu1 %v22914_v10  ;;  %v22930_v6 = vld [vmem:[#allocation58_spill] sm:$0xff]  ;;  %v5244_v17 = vpack.c.bf16 %v18114_v52, %v18098_v0  ;;  %v5241_v0 = vpack.c.bf16 %v18043_v8, %v18020_v32  ;;  %v22945_v52 = vld [vmem:[#allocation76_spill] sm:$0xff]  ;;  %v22949_v32 = vld [vmem:[#allocation89_spill] sm:$0xff] }
0x1073   : > { %v5233_v25 = vpop.f32.mrf.mxu0  ;;  %12785 = vmatpush3.msra.mxu1 %v22915_v31  ;;  %v22927_v31 = vld [vmem:[#allocation45_spill] sm:$0xff]  ;;  %v18204_v59 = vld [vmem:[%s22521_s23 + $0x4] ss:$8 sps:$4 sm:$0xff]   ;;  %v5256_v8 = vmul.bf16 %v22949_v32, %v5240_v50  ;;  %v22957_v50 = vpack.c.bf16 %v22955_v1, %v22956_v47 }
0x1074   : > { %12786 = vmatprep.subr.mxu1 %v22916_v5  ;;  %v5252_v20 = vpack.c.bf16 %v5233_v25, %v5229_v37  ;;  %v22924_v37 = vld [vmem:[#allocation71_spill] sm:$0xff]  ;;  %v22925_v25 = vld [vmem:[#allocation86_spill] sm:$0xff]  ;;  %22938 = vst [vmem:[#allocation69_spill] sm:$0xff] %v18204_v59 }
0x1075   : > { %v5235_v44 = vpop.f32.mrf.mxu0  ;;  %12787 = vmatpush3.msra.mxu1 %v22917_v40  ;;  %v22928_v5 = vld [vmem:[#allocation87_spill] sm:$0xff]  ;;  %v22931_v40 = vld [vmem:[#allocation61_spill] sm:$0xff] }
0x1076   : > { %v5253_v41 = vpack.c.bf16 %v5235_v44, %v5231_v57  ;;  %12788 = vmatprep.subr.mxu1 %v22918_v61  ;;  %v5268_v10 = vmul.bf16 %v22923_v46, %v5252_v20  ;;  %v5267_v57 = vmul.bf16 %v22926_v29, %v5251_v14  ;;  %v22929_v44 = vld [vmem:[#allocation88_spill] sm:$0xff]  ;;  %v5266_v20 = vmul.bf16 %v22930_v6, %v5250_v23  ;;  %v22934_v61 = vld [vmem:[#allocation62_spill] sm:$0xff]  ;;  %v22950_v45 = vld [vmem:[#allocation11_spill] sm:$0xff] }
0x1077   : > { %12789 = vmatpush3.msra.mxu1 %v22919_v22  ;;  %v5265_v14 = vmul.bf16 %v22932_v51, %v5249_v60  ;;  %v22935_v22 = vld [vmem:[#allocation52_spill] sm:$0xff]  ;;  %v5262_v23 = vmul.bf16 %v22940_v21, %v5246_v27  ;;  %v5243_v46 = vpack.c.bf16 %v18085_v33, %v18064_v4  ;;  %v5260_v60 = vmul.bf16 %v22943_v39, %v5244_v17  ;;  %v22946_v33 = vld [vmem:[#allocation77_spill] sm:$0xff] }
0x1078   : > { %v5269_v18 = vmul.bf16 %v22920_v26, %v5253_v41  ;;  %13772 = vmatmul.mubr.msk.bf16.gmra.mxu1 %vm1358_vm0, %v22921_v38  ;;  %12790 = vmatprep.subr.mxu1 %v22922_v56  ;;  %v22933_v41 = vld [vmem:[#allocation46_spill] sm:$0xff]  ;;  %v5264_v26 = vmul.bf16 %v22936_v2, %v5248_v13  ;;  %v22944_v29 = vld [vmem:[#allocation56_spill] sm:$0xff] }
0x1079   : > { %13775 = vmatprep.mubr.msk.bf16.mxu1 %vm1358_vm0, %v22924_v37  ;;  %12791 = vmatpush3.msra.mxu1 %v22925_v25  ;;  %v22939_v38 = vld [vmem:[#allocation54_spill] sm:$0xff]  ;;  %v22942_v25 = vld [vmem:[#allocation73_spill] sm:$0xff]  ;;  %v5259_v4 = vmul.bf16 %v22945_v52, %v5243_v46  ;;  %v22959_v17 = vld [vmem:[#allocation80_spill] sm:$0xff] }
0x107a   : > { %5463 = vmatprep.subr.bf16.mxu0 %v5269_v18  ;;  %12792 = vmatprep.subr.mxu1 %v22927_v31  ;;  %v22937_v18 = vld [vmem:[#allocation65_spill] sm:$0xff]  ;;  %v5263_v56 = vmul.bf16 %v22939_v38, %v5247_v42  ;;  %v5239_v31 = vpack.c.bf16 %v17999_v30, %v17976_v9  ;;  %v22951_v13 = vld [vmem:[#allocation10_spill] sm:$0xff]  ;;  %v22952_v9 = vld [vmem:[#allocation79_spill] sm:$0xff] }
0x107b   : > { %5464 = vmatpush1.bf16.msra.mxu0 %v5268_v10  ;;  %12793 = vmatpush3.msra.mxu1 %v22928_v5  ;;  %v22941_v10 = vld [vmem:[#allocation55_spill] sm:$0xff]  ;;  %v22947_v5 = vld [vmem:[#allocation74_spill] sm:$0xff]  ;;  %v5254_v30 = vmul.bf16 %v22952_v9, %v5238_v7  ;;  %v22958_v42 = vld [vmem:[#allocation21_spill] sm:$0xff] }
0x107c   : > { %5465 = vmatprep.subr.bf16.mxu0 %v5267_v57  ;;  %12794 = vmatprep.subr.mxu1 %v22929_v44  ;;  %v5261_v37 = vmul.bf16 %v22941_v10, %v5245_v19  ;;  %v5258_v57 = vmul.bf16 %v22946_v33, %v5242_v16  ;;  %v5257_v44 = vmul.bf16 %v22947_v5, %v5241_v0  ;;  %v22961_v16 = vld [vmem:[#allocation67_spill] sm:$0xff]  ;;  %v22963_v52 = vld [vmem:[#allocation33_spill] sm:$0xff]  ;;  %v22965_v33 = vld [vmem:[#allocation36_spill] sm:$0xff] }
0x107d   : > { %12795 = vmatpush3.msra.mxu1 %v22931_v40  ;;  %v5255_v6 = vmul.bf16 %v22951_v13, %v5239_v31  ;;  %v22954_v40 = vld [vmem:[#allocation68_spill] sm:$0xff]  ;;  %v22967_v31 = vld [vmem:[#allocation38_spill] sm:$0xff]  ;;  %v22968_v5 = vld [vmem:[#allocation35_spill] sm:$0xff] }
0x107e   : > { %12796 = vmatprep.subr.mxu1 %v22933_v41 }
0x107f   : > { %5466 = vmatpush1.bf16.msra.mxu0 %v5266_v20  ;;  %12797 = vmatpush3.msra.mxu1 %v22934_v61  ;;  %v22953_v20 = vld [vmem:[#allocation90_spill] sm:$0xff] }
0x1080   : > { %5467 = vmatprep.subr.bf16.mxu0 %v5265_v14  ;;  %13776 = vmatmul.mubr.msk.bf16.gmra.mxu1 %vm1358_vm0, %v22935_v22 }
0x1081   : > { %13779 = vmatprep.mubr.msk.bf16.mxu1 %vm1358_vm0, %v22937_v18  ;;  %5825 = vmatprep.subr.bf16.mxu1 %v18204_v59 }
0x1083   : > { %5468 = vmatpush1.bf16.msra.mxu0 %v5264_v26 }
0x1084   : > { %5469 = vmatprep.subr.bf16.mxu0 %v5263_v56 }
0x1087   : > { %5470 = vmatpush1.bf16.msra.mxu0 %v5262_v23  ;;  %v22960_v23 = vld [vmem:[#allocation66_spill] sm:$0xff] }
0x1088   : > { %5471 = vmatprep.subr.bf16.mxu0 %v5261_v37  ;;  %13780 = vmatmul.mubr.msk.bf16.gmra.mxu1 %vm1358_vm0, %v22942_v25 }
0x1089   : > { %13783 = vmatprep.mubr.msk.bf16.mxu1 %vm1358_vm0, %v22944_v29 }
0x108b   : > { %5472 = vmatpush1.bf16.msra.mxu0 %v5260_v60  ;;  %v22962_v60 = vld [vmem:[#allocation41_spill] sm:$0xff] }
0x108c   : > { %5473 = vmatprep.subr.bf16.mxu0 %v5259_v4  ;;  %v22964_v4 = vld [vmem:[#allocation34_spill] sm:$0xff] }
0x108f   : > { %5474 = vmatpush1.bf16.msra.mxu0 %v5258_v57  ;;  %v22966_v57 = vld [vmem:[#allocation32_spill] sm:$0xff] }
0x1090   : > { %5475 = vmatprep.subr.bf16.mxu0 %v5257_v44  ;;  %13784 = vmatmul.mubr.msk.bf16.gmra.mxu1 %vm1358_vm0, %v22948_v55  ;;  %v22969_v44 = vld [vmem:[#allocation37_spill] sm:$0xff]  ;;  %v22970_v55 = vld [vmem:[#allocation39_spill] sm:$0xff] }
0x1091   : > { %13787 = vmatprep.mubr.msk.bf16.mxu1 %vm1358_vm0, %v22950_v45 }
0x1093   : > { %5476 = vmatpush1.bf16.msra.mxu0 %v5256_v8 }
0x1094   : > { %5477 = vmatprep.subr.bf16.mxu0 %v5255_v6 }
0x1097   : > { %5478 = vmatpush1.bf16.msra.mxu0 %v5254_v30 }
0x1098   : > { %13788 = vmatmul.mubr.msk.bf16.gmra.mxu1 %vm1358_vm0, %v22953_v20  ;;  %13791 = vmatprep.subr.mxu0 %v22954_v40 }
0x109a   : > { %5496 = vmatmul.mubr.bf16.vlgmr.msra.gmra.mxu0 %v22957_v50 }
0x109b   : > { %13792 = vmatpush3.msra.mxu0 %v22954_v40 }
0x109c   : > { %13793 = vmatprep.subr.mxu0 %v22958_v42 }
0x109d   : > { %13794 = vmatpush3.msra.mxu0 %v22958_v42 }
0x10f8   : > { %v13756_v51 = vpop.f32.mrf.mxu1 }
0x10f9   : > { %14284 = vrcp.f32 %v13756_v51 }
0x10fa   : > { %v5019_v49 = vpop.f32.mrf.mxu1 }
0x10fb   : > { %14286 = vrcp.f32 %v5019_v49 }
0x1106   : > { %v14285_v22 = vpop.eup %14284 }
0x1108   : > { %v14287_v2 = vpop.eup %14286 }
0x1118   : > { %v12743_v28 = vpop.f32.mrf.mxu1 }
0x111a   : > { %v12744_v7 = vpop.f32.mrf.mxu1 }
0x111b   : > { %v12745_v41 = vadd.f32 %v12744_v7, %v12743_v28 }
0x111c   : > { %v12746_v14 = vpop.f32.mrf.mxu1 }
0x111d   : > { %v5072_v26 = vmul.f32 %v14287_v2, %v12745_v41 }
0x111e   : > { %v12747_v61 = vpop.f32.mrf.mxu1 }
0x111f   : > { %v12748_v27 = vadd.f32 %v12747_v61, %v12746_v14 }
0x1120   : > { %v18264_v32 = vpop.f32.mrf.mxu1 }
0x1121   : > { %v5074_v18 = vmul.f32 %v14285_v22, %v12748_v27 }
0x1122   : > { %v18266_v8 = vpop.f32.mrf.mxu1 }
0x1123   : > { %v12304_v19 = vpack.c.bf16 %v5074_v18, %v5072_v26 }
0x1124   : > { %v18268_v45 = vpop.f32.mrf.mxu1 }
0x1125   : > { %12324 = vst [vmem:[#allocation2 + $0x20] sm:$0xff] %v12304_v19  }
0x1126   : > { %v18272_v6 = vpop.f32.mrf.mxu1 }
0x1128   : > { %v18274_v9 = vpop.f32.mrf.mxu1 }
0x112a   : > { %v18276_v30 = vpop.f32.mrf.mxu1 }
0x112c   : > { %v18278_v20 = vpop.f32.mrf.mxu1 }
0x112e   : > { %v18282_v1 = vpop.f32.mrf.mxu1 }
0x1130   : > { %v18284_v47 = vpop.f32.mrf.mxu1 }
0x1132   : > { %v18286_v50 = vpop.f32.mrf.mxu1 }
0x1134   : > { %v18288_v42 = vpop.f32.mrf.mxu1 }
0x1136   : > { %v18292_v49 = vpop.f32.mrf.mxu1 }
0x1138   : > { %v18294_v28 = vpop.f32.mrf.mxu1 }
0x113a   : > { %v18296_v7 = vpop.f32.mrf.mxu1 }
0x113c   : > { %v18298_v14 = vpop.f32.mrf.mxu1 }
0x113e   : > { %v18302_v61 = vpop.f32.mrf.mxu1 }
0x1140   : > { %v18304_v22 = vpop.f32.mrf.mxu1 }
0x1142   : > { %v18306_v27 = vpop.f32.mrf.mxu1 }
0x1144   : > { %v18308_v2 = vpop.f32.mrf.mxu1 }
0x1146   : > { %v18312_v18 = vpop.f32.mrf.mxu1 }
0x1148   : > { %v18314_v19 = vpop.f32.mrf.mxu1 }
0x115a   : > { %v5497_v38 = vpop.f32.mrf.mxu0 }
0x115b   : > { %v5498_v21 = vadd.f32 %v22959_v17, %v5497_v38  ;;  %v18316_v38 = vpop.f32.mrf.mxu1 }
0x115c   : > { %v5499_v56 = vpop.f32.mrf.mxu0 }
0x115d   : > { %v5500_v46 = vadd.f32 %v22960_v23, %v5499_v56 }
0x115e   : > { %v5501_v10 = vpop.f32.mrf.mxu0 }
0x115f   : > { %v5506_v37 = vmax.f32 %v5498_v21, %v5500_v46  ;;  %v5502_v39 = vadd.f32 %v22961_v16, %v5501_v10  ;;  %v18318_v10 = vpop.f32.mrf.mxu1 }
0x1160   : > { %v5503_v25 = vpop.f32.mrf.mxu0 }
0x1161   : > { %v5504_v29 = vadd.f32 %v22962_v60, %v5503_v25  ;;  %5507 = vmax.xlane.f32.xlu1 %v5506_v37  ;;  %v18322_v60 = vpop.f32.mrf.mxu1 }
0x1163   : > { %v5509_v0 = vmax.f32 %v5502_v39, %v5504_v29  ;;  %v18324_v40 = vpop.f32.mrf.mxu1 }
0x1165   : > { %5510 = vmax.xlane.f32.xlu0 %v5509_v0 }
0x1172   : > { %5773 = vrot.lane.b32.xlu1 %v22963_v52, %s14602_s9 }
0x1176   : > { %5775 = vrot.lane.b32.xlu1 %v22964_v4, %s14602_s9 }
0x117a   : > { %5779 = vrot.lane.b32.xlu1 %v22965_v33, %s14602_s9 }
0x117b   : > { %5771 = vrot.lane.b32.xlu0 %v22966_v57, %s14602_s9 }
0x117e   : > { %5783 = vrot.lane.b32.xlu1 %v22967_v31, %s14602_s9 }
0x117f   : > { %5777 = vrot.lane.b32.xlu0 %v22968_v5, %s14602_s9 }
0x1183   : > { %5781 = vrot.lane.b32.xlu0 %v22969_v44, %s14602_s9 }
0x1187   : > { %5785 = vrot.lane.b32.xlu0 %v22970_v55, %s14602_s9  ;;  %s594_s9 = sand.u32 1, %s14586_s30  }
0x1188   : > { %s11680_s26 = sshll.u32 %s594_s9, 7 }
0x1189   : > { %s22034_s28 = scalar_lea.vmem [#allocation3], %s11680_s26  ;;  %s14538_s26 = sshll.u32 %s14604_s20, 4  ;;  %s14539_s26 = int_to_ptr.vmem [resolvable:$false] %s14538_s26 }
0x118a   : > { %s11614_s27 = sshll.u32 %s22034_s28, 4  ;;  %s22132_s27 = int_to_ptr.vmem [resolvable:$true] %s11614_s27 }
0x118b   : > { %p14541_p0 = scmp.lt.s32.totalorder %s22132_s27, %s14539_s26 }
0x11ea   : > { %v5508_v56 = vpop.xlane.xlu1 %5507 }
0x11eb   : > { %v5512_v17 = vsub.f32 %v5498_v21, %v5508_v56  ;;  %v5513_v23 = vsub.f32 %v5500_v46, %v5508_v56  ;;  %v18326_v21 = vpop.f32.mrf.mxu1 }
0x11ed   : > { %v5516_v25 = vmul.f32 1.442695, %v5512_v17  ;;  %v5518_v16 = vmul.f32 1.442695, %v5513_v23  ;;  %v18328_v46 = vpop.f32.mrf.mxu1 }
0x11ee   : > { %v5511_v0 = vpop.xlane.xlu0 %5510  ;;  %v5774_v56 = vpop.permute.xlu1 %5773 }
0x11ef   : > { %14288 = vpow2.f32 %v5516_v25  ;;  %v5514_v13 = vsub.f32 %v5502_v39, %v5511_v0  ;;  %v5515_v26 = vsub.f32 %v5504_v29, %v5511_v0  ;;  %v18332_v17 = vpop.f32.mrf.mxu1 }
0x11f0   : > { %14290 = vpow2.f32 %v5518_v16 }
0x11f1   : > { %v5520_v51 = vmul.f32 1.442695, %v5514_v13  ;;  %v5522_v41 = vmul.f32 1.442695, %v5515_v26  ;;  %v13789_v23 = vpop.f32.mrf.mxu1  ;;  %v22971_v13 = vld [vmem:[#allocation18_spill] sm:$0xff] }
0x11f3   : > { %14292 = vpow2.f32 %v5520_v51  ;;  %v5416_v25 = vpop.f32.mrf.mxu1 }
0x11f4   : > { %14294 = vpow2.f32 %v5522_v41  ;;  %v18343_v41 = vld [vmem:[%s22521_s23] ss:$8 sps:$4 sm:$0xff]  }
0x11f5   : > { %v13790_v39 = vpop.f32.mrf.mxu1  ;;  %22972 = vst [vmem:[#allocation47_spill] sm:$0xff] %v18343_v41 }
0x11f6   : > { %v5446_v0 = vpack.c.bf16 %v13790_v39, %v13789_v23 }
0x11f8   : > { %v5462_v26 = vmul.bf16 %v22971_v13, %v5446_v0  ;;  %v22973_v0 = vmov 0   ;;  %v5772_v13 = vpop.permute.xlu0 %5771 }
0x11fa   : > { %12808 = vmatprep.subr.bf16.mxu0 %v5462_v26  ;;  %v5776_v26 = vpop.permute.xlu1 %5775 }
0x11fc   : > { %v18334_v29 = vpop.eup %14288 }
0x11fd   : > { %v14291_v16 = vpop.eup %14290 }
0x11fe   : > { %5620 = vmatprep.mubr.f32.mxu1 %v14291_v16 }
0x11ff   : > { %5621 = vmatmul.mubr.f32.vlgmr.msra.gmra.mxu1 %v18334_v29 }
0x1200   : > { %v18338_v51 = vpop.eup %14292  ;;  %5826 = vmatpush1.bf16.msra.mxu1 %v18343_v41 }
0x1201   : > { %v14295_v37 = vpop.eup %14294 }
0x1202   : > { %5625 = vmatprep.mubr.f32.mxu1 %v14295_v37  ;;  %v5715_v39 = vpack.c.bf16 %v14295_v37, %v14291_v16  ;;  %v5778_v37 = vpop.permute.xlu0 %5777  ;;  %v5780_v16 = vpop.permute.xlu1 %5779 }
0x1203   : > { %5626 = vmatmul.mubr.f32.gmra.mxu1 %v18338_v51 }
0x1204   : > { %5843 = vmatprep.mubr.bf16.mxu1 %v22973_v0 }
0x1207   : > { %11927 = vmatmul.mubr.msk.bf16.vlgmr.msra.gmra.mxu1 %vm1358_vm0, %v5772_v13  ;;  %v5782_v13 = vpop.permute.xlu0 %5781 }
0x1208   : > { %5853 = vmatprep.mubr.bf16.mxu1 %v22973_v0 }
0x120f   : > { %11928 = vmatmul.mubr.msk.bf16.gmra.mxu1 %vm1358_vm0, %v5774_v56  ;;  %v5784_v56 = vpop.permute.xlu1 %5783 }
0x1210   : > { %5863 = vmatprep.mubr.bf16.mxu1 %v22973_v0 }
0x1217   : > { %11929 = vmatmul.mubr.msk.bf16.gmra.mxu1 %vm1358_vm0, %v5776_v26  ;;  %v5786_v26 = vpop.permute.xlu0 %5785 }
0x1218   : > { %5873 = vmatprep.mubr.bf16.mxu1 %v22973_v0 }
0x121f   : > { %11930 = vmatmul.mubr.msk.bf16.gmra.mxu1 %vm1358_vm0, %v5778_v37  ;;  %v5419_v37 = vpop.f32.mrf.mxu1 }
0x1220   : > { %5883 = vmatprep.mubr.bf16.mxu1 %v22973_v0  ;;  %v5445_v44 = vpack.c.bf16 %v5419_v37, %v5416_v25  ;;  %v18482_v37 = vld [vmem:[%s22573_s4 + $0x10] sm:$0xff]  }
0x1227   : > { %11931 = vmatmul.mubr.msk.bf16.gmra.mxu1 %vm1358_vm0, %v5780_v16 }
0x1228   : > { %5893 = vmatprep.mubr.bf16.mxu1 %v22973_v0 }
0x122f   : > { %11932 = vmatmul.mubr.msk.bf16.gmra.mxu1 %vm1358_vm0, %v5782_v13 }
0x1230   : > { %5903 = vmatprep.mubr.bf16.mxu1 %v22973_v0 }
0x1237   : > { %11933 = vmatmul.mubr.msk.bf16.gmra.mxu1 %vm1358_vm0, %v5784_v56  ;;  %v22974_v56 = vpack.c.bf16 %v18298_v14, %v18294_v28 }
0x1238   : > { %5913 = vmatprep.mubr.bf16.mxu1 %v22973_v0 }
0x1239   : > { %v5454_v5 = vmul.bf16 %v17959_v35, %v22974_v56  ;;  %v22975_v35 = vpack.c.bf16 %v18328_v46, %v18324_v40 }
0x123b   : > { %v5460_v28 = vmul.bf16 %v17989_v3, %v22975_v35  ;;  %v18496_v35 = vld [vmem:[%s22573_s4 + $0x20] sm:$0xff]  }
0x123f   : > { %11934 = vmatmul.mubr.msk.bf16.gmra.mxu1 %vm1358_vm0, %v5786_v26  ;;  %v5437_v26 = vpack.c.bf16 %v18302_v61, %v18296_v7  ;;  %v5443_v7 = vpack.c.bf16 %v18332_v17, %v18326_v21 }
0x1240   : > { %6181 = vmatprep.mubr.bf16.mxu1 %v22973_v0  ;;  %v5461_v0 = vmul.bf16 %v17972_v53, %v5445_v44  ;;  %v5435_v44 = vpack.c.bf16 %v18292_v49, %v18286_v50  ;;  %v5441_v50 = vpack.c.bf16 %v18322_v60, %v18316_v38 }
0x1241   : > { %v5459_v3 = vmul.bf16 %v18017_v12, %v5443_v7 }
0x1242   : > { %v5451_v61 = vmul.bf16 %v18025_v34, %v5435_v44  ;;  %v22978_v34 = vpack.c.bf16 %v18278_v20, %v18274_v9  ;;  %v22979_v9 = vpack.c.bf16 %v18308_v2, %v18304_v22 }
0x1244   : > { %v5450_v49 = vmul.bf16 %v18048_v58, %v22978_v34  ;;  %v5456_v58 = vmul.bf16 %v18077_v54, %v22979_v9  ;;  %v18530_v9 = vld [vmem:[%s22553_s29 + $0x70] ss:$8 sps:$4 sm:$0xff]  }
0x1245   : > { %22988 = vst [vmem:[#allocation17_spill] sm:$0xff] %v18530_v9 }
0x12bf   : > { %v12798_v23 = vpop.f32.mrf.mxu1 }
0x12c1   : > { %v12799_v16 = vpop.f32.mrf.mxu1 }
0x12c2   : > { %v12800_v41 = vadd.f32 %v12799_v16, %v12798_v23  ;;  %v22982_v23 = vld [vmem:[#allocation40_spill] sm:$0xff] }
0x12c3   : > { %v12801_v55 = vpop.f32.mrf.mxu1 }
0x12c4   : > { %13795 = vmatprep.mubr.msk.f32.mxu0 %vm1358_vm0, %v12800_v41 }
0x12c5   : > { %v12802_v13 = vpop.f32.mrf.mxu1 }
0x12c6   : > { %v12803_v59 = vadd.f32 %v12802_v13, %v12801_v55  ;;  %v5453_v55 = vmul.bf16 %v17981_v15, %v5437_v26  ;;  %v22976_v15 = vpack.c.bf16 %v18288_v42, %v18284_v47  ;;  %v22977_v47 = vpack.c.bf16 %v18318_v10, %v18314_v19  ;;  %v18489_v26 = vld [vmem:[%s22573_s4 + $0x18] sm:$0xff]  }
0x12c7   : > { %v18373_v31 = vpop.f32.mrf.mxu1  ;;  %v5433_v19 = vpack.c.bf16 %v18282_v1, %v18276_v30  ;;  %v5439_v30 = vpack.c.bf16 %v18312_v18, %v18306_v27  ;;  %v22981_v18 = vld [vmem:[#allocation22_spill] sm:$0xff] }
0x12c8   : > { %13796 = vmatmul.mubr.msk.f32.vlgmr.msra.gmra.mxu0 %vm1358_vm0, %v12803_v59 }
0x12c9   : > { %12809 = vmatpush3.bf16.msra.mxu0 %v5454_v5  ;;  %5748 = vmatprep.mubr.bf16.mxu0 %v5715_v39  ;;  %v18377_v25 = vpop.f32.mrf.mxu1  ;;  %v5452_v5 = vmul.bf16 %v18004_v62, %v22976_v15  ;;  %v5458_v62 = vmul.bf16 %v18033_v48, %v22977_v47  ;;  %v5457_v48 = vmul.bf16 %v18061_v36, %v5441_v50 }
0x12ca   : > { %12810 = vmatprep.subr.bf16.mxu0 %v5461_v0  ;;  %v5449_v60 = vmul.bf16 %v18069_v24, %v5433_v19  ;;  %v22980_v36 = vpack.c.bf16 %v18268_v45, %v18264_v32  ;;  %v5431_v24 = vpack.c.bf16 %v18272_v6, %v18266_v8  ;;  %v5455_v22 = vmul.bf16 %v18103_v11, %v5439_v30  ;;  %v18536_v30 = vld [vmem:[%s22573_s4 + $0x40] sm:$0xff]  }
0x12cb   : > { %v18380_v41 = vpop.f32.mrf.mxu1  ;;  %v1244_v32 = vpack.c.bf16 %v22982_v23, %v22981_v18  ;;  %v22983_v11 = vpack.c.bf16 %v18338_v51, %v18334_v29  ;;  %v18475_v29 = vld [vmem:[%s22573_s4 + $0x8] sm:$0xff]   ;;  %22989 = vst [vmem:[#allocation20_spill] sm:$0xff] %v18536_v30 }
0x12cc   : > { %v5924_v53 = vpack.c.bf16 %v18380_v41, %v18373_v31  ;;  %v5448_v1 = vmul.bf16 %v18090_v43, %v22980_v36  ;;  %v5447_v27 = vmul.bf16 %v18111_v63, %v5431_v24  ;;  %v18466_v63 = vld [vmem:[%s22573_s4] sm:$0xff]   ;;  %v18705_v31 = vld [vmem:[%s22183_s5 + $0x78] sm:$0xff]  ;;  %v18710_v41 = vld [vmem:[%s22183_s5 + $0xf0] sm:$0xff] }
0x12cd   : > { %12811 = vmatpush3.bf16.msra.mxu0 %v5453_v55  ;;  %v18390_v59 = vpop.f32.mrf.mxu1 }
0x12ce   : > { %12812 = vmatprep.subr.bf16.mxu0 %v5460_v28 }
0x12cf   : > { %v18398_v40 = vpop.f32.mrf.mxu1 }
0x12d1   : > { %12813 = vmatpush3.bf16.msra.mxu0 %v5452_v5  ;;  %v18401_v14 = vpop.f32.mrf.mxu1  ;;  %v18503_v5 = vld [vmem:[%s22573_s4 + $0x28] sm:$0xff]  }
0x12d2   : > { %12814 = vmatprep.subr.bf16.mxu0 %v5459_v3  ;;  %22984 = vst [vmem:[#allocation48_spill] sm:$0xff] %v18503_v5  ;;  %v18510_v3 = vld [vmem:[%s22573_s4 + $0x30] sm:$0xff]  }
0x12d3   : > { %v18404_v21 = vpop.f32.mrf.mxu1  ;;  %22985 = vst [vmem:[#allocation49_spill] sm:$0xff] %v18510_v3 }
0x12d4   : > { %v5926_v42 = vpack.c.bf16 %v18404_v21, %v18398_v40  ;;  %v18681_v40 = vld [vmem:[%s22553_s29] ss:$8 sps:$4 sm:$0xff]  }
0x12d5   : > { %12815 = vmatpush3.bf16.msra.mxu0 %v5451_v61  ;;  %v18414_v12 = vpop.f32.mrf.mxu1  ;;  %23009 = vst [vmem:[#allocation50_spill] sm:$0xff] %v18681_v40  ;;  %v5940_v21 = vmul.bf16 %v18681_v40, %v5924_v53  ;;  %v18716_v53 = vld [vmem:[%s22183_s5 + $0x70] sm:$0xff] }
0x12d6   : > { %12816 = vmatprep.subr.bf16.mxu0 %v5458_v62  ;;  %v18894_v40 = vld [vmem:[%s22183_s5 + $0x90] sm:$0xff] }
0x12d7   : > { %v18422_v10 = vpop.f32.mrf.mxu1  ;;  %23029 = vst [vmem:[#allocation55_spill] sm:$0xff] %v18894_v40 }
0x12d9   : > { %12817 = vmatpush3.bf16.msra.mxu0 %v5450_v49  ;;  %v18425_v38 = vpop.f32.mrf.mxu1  ;;  %v18517_v49 = vld [vmem:[%s22553_s29 + $0x74] ss:$8 sps:$4 sm:$0xff]  }
0x12da   : > { %12818 = vmatprep.subr.bf16.mxu0 %v5457_v48  ;;  %22986 = vst [vmem:[#allocation63_spill] sm:$0xff] %v18517_v49  ;;  %v18523_v48 = vld [vmem:[%s22573_s4 + $0x38] sm:$0xff]  }
0x12db   : > { %v18428_v46 = vpop.f32.mrf.mxu1  ;;  %22987 = vst [vmem:[#allocation12_spill] sm:$0xff] %v18523_v48 }
0x12dd   : > { %12819 = vmatpush3.bf16.msra.mxu0 %v5449_v60  ;;  %v18436_v20 = vpop.f32.mrf.mxu1 }
0x12de   : > { %12820 = vmatprep.subr.bf16.mxu0 %v5456_v58 }
0x12df   : > { %v18444_v17 = vpop.f32.mrf.mxu1 }
0x12e1   : > { %12821 = vmatpush3.bf16.msra.mxu0 %v5448_v1  ;;  %v18447_v54 = vpop.f32.mrf.mxu1  ;;  %v18543_v1 = vld [vmem:[%s22553_s29 + $0x64] ss:$8 sps:$4 sm:$0xff]  }
0x12e2   : > { %12822 = vmatprep.subr.bf16.mxu0 %v5455_v22  ;;  %22990 = vst [vmem:[#allocation25_spill] sm:$0xff] %v18543_v1 }
0x12e3   : > { %v18450_v2 = vpop.f32.mrf.mxu1 }
0x12e5   : > { %12823 = vmatpush3.bf16.msra.mxu0 %v5447_v27  ;;  %v18454_v43 = vpop.f32.mrf.mxu1  ;;  %v18549_v27 = vld [vmem:[%s22553_s29 + $0x60] ss:$8 sps:$4 sm:$0xff]  }
0x12e6   : > { %13798 = vmatprep.subr.bf16.mxu0 %v1244_v32  ;;  %22991 = vst [vmem:[#allocation23_spill] sm:$0xff] %v18549_v27 }
0x12e7   : > { %v18456_v8 = vpop.f32.mrf.mxu1 }
0x12e8   : > { %5749 = vmatmul.mubr.bf16.vlgmr.msra.gmra.mxu0 %v22983_v11 }
0x12e9   : > { %13799 = vmatpush3.bf16.msra.mxu0 %v1244_v32  ;;  %v18461_v45 = vpop.f32.mrf.mxu1  ;;  %13800 = vmatprep.mubr.msk.bf16.mxu0 %vm1358_vm0, %v18466_v63  ;;  %v18556_v32 = vld [vmem:[%s22553_s29 + $0x54] ss:$8 sps:$4 sm:$0xff]  }
0x12ea   : > { %22992 = vst [vmem:[#allocation15_spill] sm:$0xff] %v18556_v32 }
0x12eb   : > { %v18470_v6 = vpop.f32.mrf.mxu1 }
0x12ed   : > { %v5891_v39 = vpop.f32.mrf.mxu1 }
0x12ee   : > { %v5933_v23 = vpack.c.bf16 %v5891_v39, %v18461_v45  ;;  %v5932_v45 = vpack.c.bf16 %v18470_v6, %v18456_v8  ;;  %v18571_v39 = vld [vmem:[%s22553_s29 + $0x50] ss:$8 sps:$4 sm:$0xff]   ;;  %v18586_v8 = vld [vmem:[%s22553_s29 + $0x44] ss:$8 sps:$4 sm:$0xff]  }
0x12ef   : > { %v5895_v0 = vpop.f32.mrf.mxu1  ;;  %22994 = vst [vmem:[#allocation19_spill] sm:$0xff] %v18571_v39  ;;  %22996 = vst [vmem:[#allocation13_spill] sm:$0xff] %v18586_v8 }
0x12f0   : > { %13801 = vmatmul.mubr.msk.bf16.vlgmr.msra.gmra.mxu0 %vm1358_vm0, %v18475_v29  ;;  %v5949_v6 = vmul.bf16 %v18586_v8, %v5933_v23  ;;  %v18728_v23 = vld [vmem:[%s22183_s5 + $0x68] sm:$0xff] }
0x12f1   : > { %v5897_v51 = vpop.f32.mrf.mxu1  ;;  %13804 = vmatprep.mubr.msk.bf16.mxu0 %vm1358_vm0, %v18482_v37 }
0x12f3   : > { %v5899_v16 = vpop.f32.mrf.mxu1 }
0x12f4   : > { %v5934_v22 = vpack.c.bf16 %v5899_v16, %v5895_v0  ;;  %v18562_v0 = vld [vmem:[%s22573_s4 + $0x48] sm:$0xff]   ;;  %v18577_v16 = vld [vmem:[%s22573_s4 + $0x50] sm:$0xff]  }
0x12f5   : > { %v5901_v13 = vpop.f32.mrf.mxu1  ;;  %22993 = vst [vmem:[#allocation16_spill] sm:$0xff] %v18562_v0  ;;  %22995 = vst [vmem:[#allocation59_spill] sm:$0xff] %v18577_v16 }
0x12f6   : > { %v5935_v36 = vpack.c.bf16 %v5901_v13, %v5897_v51  ;;  %v5950_v51 = vmul.bf16 %v18571_v39, %v5934_v22  ;;  %v5931_v13 = vpack.c.bf16 %v18454_v43, %v18447_v54  ;;  %v5929_v54 = vpack.c.bf16 %v18436_v20, %v18425_v38  ;;  %v18602_v43 = vld [vmem:[%s22553_s29 + $0x34] ss:$8 sps:$4 sm:$0xff]   ;;  %v18617_v20 = vld [vmem:[%s22553_s29 + $0x30] ss:$8 sps:$4 sm:$0xff]  }
0x12f7   : > { %v5905_v56 = vpop.f32.mrf.mxu1  ;;  %22998 = vst [vmem:[#allocation70_spill] sm:$0xff] %v18602_v43  ;;  %v5928_v38 = vpack.c.bf16 %v18428_v46, %v18422_v10  ;;  %23000 = vst [vmem:[#allocation60_spill] sm:$0xff] %v18617_v20  ;;  %v18632_v10 = vld [vmem:[%s22553_s29 + $0x24] ss:$8 sps:$4 sm:$0xff]   ;;  %v18700_v22 = vld [vmem:[%s22183_s5 + $0xf8] sm:$0xff] }
0x12f8   : > { %13805 = vmatmul.mubr.msk.bf16.gmra.mxu0 %vm1358_vm0, %v18489_v26  ;;  %v5951_v11 = vmul.bf16 %v18556_v32, %v5935_v36  ;;  %23002 = vst [vmem:[#allocation43_spill] sm:$0xff] %v18632_v10  ;;  %v5945_v46 = vmul.bf16 %v18632_v10, %v5929_v54  ;;  %v23012_v36 = vld [vmem:[#allocation28_spill] sm:$0xff]  ;;  %12847 = vmatprep.subr.mxu0 %v18700_v22  ;;  %v23039_v10 = vld [vmem:[#allocation39_spill] sm:$0xff] }
0x12f9   : > { %v5907_v55 = vpop.f32.mrf.mxu1  ;;  %13808 = vmatprep.mubr.msk.bf16.mxu0 %vm1358_vm0, %v18496_v35  ;;  %12848 = vmatpush3.msra.mxu0 %v18705_v31  ;;  %v18764_v54 = vld [vmem:[%s22183_s5 + $0x50] sm:$0xff] }
0x12fa   : > { %12849 = vmatprep.subr.mxu0 %v18710_v41 }
0x12fb   : > { %v5909_v28 = vpop.f32.mrf.mxu1  ;;  %12850 = vmatpush3.msra.mxu0 %v18716_v53 }
0x12fc   : > { %v5936_v60 = vpack.c.bf16 %v5909_v28, %v5905_v56  ;;  %v5930_v56 = vpack.c.bf16 %v18450_v2, %v18444_v17  ;;  %v18608_v17 = vld [vmem:[%s22573_s4 + $0x58] sm:$0xff]  }
0x12fd   : > { %v5911_v7 = vpop.f32.mrf.mxu1  ;;  %22999 = vst [vmem:[#allocation42_spill] sm:$0xff] %v18608_v17 }
0x12fe   : > { %v5937_v50 = vpack.c.bf16 %v5911_v7, %v5907_v55  ;;  %v5952_v18 = vmul.bf16 %v18549_v27, %v5936_v60  ;;  %v18594_v55 = vld [vmem:[%s22553_s29 + $0x40] ss:$8 sps:$4 sm:$0xff]   ;;  %v5947_v7 = vmul.bf16 %v18602_v43, %v5931_v13  ;;  %v5946_v2 = vmul.bf16 %v18617_v20, %v5930_v56  ;;  %v18746_v13 = vld [vmem:[%s22183_s5 + $0xd8] sm:$0xff]  ;;  %v18758_v56 = vld [vmem:[%s22183_s5 + $0xd0] sm:$0xff] }
0x12ff   : > { %v5915_v15 = vpop.f32.mrf.mxu1  ;;  %22997 = vst [vmem:[#allocation81_spill] sm:$0xff] %v18594_v55  ;;  %v5948_v28 = vmul.bf16 %v18594_v55, %v5932_v45  ;;  %v18947_v20 = vld [vmem:[%s22184_s6 + $0x8] sm:$0xff] }
0x1300   : > { %13809 = vmatmul.mubr.msk.bf16.gmra.mxu0 %vm1358_vm0, %v18503_v5  ;;  %v5953_v24 = vmul.bf16 %v18543_v1, %v5937_v50  ;;  %v18652_v50 = vld [vmem:[%s22573_s4 + $0x68] sm:$0xff]   ;;  %23040 = vst [vmem:[#allocation74_spill] sm:$0xff] %v18947_v20 }
0x1301   : > { %v5917_v44 = vpop.f32.mrf.mxu1  ;;  %13812 = vmatprep.mubr.msk.bf16.mxu0 %vm1358_vm0, %v18510_v3  ;;  %23005 = vst [vmem:[#allocation85_spill] sm:$0xff] %v18652_v50 }
0x1303   : > { %v5919_v61 = vpop.f32.mrf.mxu1 }
0x1304   : > { %v5938_v47 = vpack.c.bf16 %v5919_v61, %v5915_v15  ;;  %v18623_v15 = vld [vmem:[%s22573_s4 + $0x60] sm:$0xff]  }
0x1305   : > { %v5921_v62 = vpop.f32.mrf.mxu1  ;;  %23001 = vst [vmem:[#allocation82_spill] sm:$0xff] %v18623_v15  ;;  %v18638_v61 = vld [vmem:[%s22553_s29 + $0x20] ss:$8 sps:$4 sm:$0xff]  }
0x1306   : > { %v5939_v34 = vpack.c.bf16 %v5921_v62, %v5917_v44  ;;  %v5954_v58 = vmul.bf16 %v18530_v9, %v5938_v47  ;;  %v5927_v44 = vpack.c.bf16 %v18414_v12, %v18401_v14  ;;  %23003 = vst [vmem:[#allocation83_spill] sm:$0xff] %v18638_v61  ;;  %v5944_v47 = vmul.bf16 %v18638_v61, %v5928_v38  ;;  %v18646_v14 = vld [vmem:[%s22553_s29 + $0x14] ss:$8 sps:$4 sm:$0xff]  }
0x1307   : > { %v5925_v62 = vpack.c.bf16 %v18390_v59, %v18377_v25  ;;  %23004 = vst [vmem:[#allocation84_spill] sm:$0xff] %v18646_v14  ;;  %v18659_v25 = vld [vmem:[%s22553_s29 + $0x10] ss:$8 sps:$4 sm:$0xff]  }
0x1308   : > { %v5955_v19 = vmul.bf16 %v18517_v49, %v5939_v34  ;;  %13813 = vmatmul.mubr.msk.bf16.gmra.mxu0 %vm1358_vm0, %v18523_v48  ;;  %v5943_v12 = vmul.bf16 %v18646_v14, %v5927_v44  ;;  %23006 = vst [vmem:[#allocation57_spill] sm:$0xff] %v18659_v25  ;;  %v5942_v59 = vmul.bf16 %v18659_v25, %v5926_v42  ;;  %v18668_v34 = vld [vmem:[%s22573_s4 + $0x70] sm:$0xff]   ;;  %v18690_v42 = vld [vmem:[%s22573_s4 + $0x78] sm:$0xff]   ;;  %v18920_v25 = vld [vmem:[%s22183_s5 + $0x80] sm:$0xff] }
0x1309   : > { %13816 = vmatprep.mubr.msk.bf16.mxu0 %vm1358_vm0, %v18536_v30  ;;  %23007 = vst [vmem:[#allocation14_spill] sm:$0xff] %v18668_v34  ;;  %23010 = vst [vmem:[#allocation71_spill] sm:$0xff] %v18690_v42  ;;  %v23036_v14 = vld [vmem:[#allocation35_spill] sm:$0xff]  ;;  %v23038_v61 = vld [vmem:[#allocation37_spill] sm:$0xff] }
0x130a   : > { %6149 = vmatprep.subr.bf16.mxu1 %v5955_v19  ;;  %v18675_v19 = vld [vmem:[%s22553_s29 + $0x4] ss:$8 sps:$4 sm:$0xff]   ;;  %23033 = vst [vmem:[#allocation76_spill] sm:$0xff] %v18920_v25 }
0x130b   : > { %6150 = vmatpush1.bf16.msra.mxu1 %v5954_v58  ;;  %23008 = vst [vmem:[#allocation44_spill] sm:$0xff] %v18675_v19  ;;  %v5941_v60 = vmul.bf16 %v18675_v19, %v5925_v62  ;;  %v23011_v58 = vld [vmem:[#allocation29_spill] sm:$0xff]  ;;  %v18900_v19 = vld [vmem:[%s22183_s5 + $0x10] sm:$0xff] }
0x130c   : > { %6151 = vmatprep.subr.bf16.mxu1 %v5953_v24  ;;  %v23013_v24 = vpack.c.bf16 %v23011_v58, %v23012_v36  ;;  %23030 = vst [vmem:[#allocation73_spill] sm:$0xff] %v18900_v19 }
0x130f   : > { %6152 = vmatpush1.bf16.msra.mxu1 %v5952_v18  ;;  %v18722_v18 = vld [vmem:[%s22183_s5 + $0xe8] sm:$0xff] }
0x1310   : > { %6153 = vmatprep.subr.bf16.mxu1 %v5951_v11  ;;  %13817 = vmatmul.mubr.msk.bf16.gmra.mxu0 %vm1358_vm0, %v18562_v0  ;;  %v18734_v11 = vld [vmem:[%s22183_s5 + $0xe0] sm:$0xff] }
0x1311   : > { %13820 = vmatprep.mubr.msk.bf16.mxu0 %vm1358_vm0, %v18577_v16  ;;  %12851 = vmatprep.subr.mxu0 %v18722_v18 }
0x1312   : > { %12852 = vmatpush3.msra.mxu0 %v18728_v23 }
0x1313   : > { %6154 = vmatpush1.bf16.msra.mxu1 %v5950_v51  ;;  %v18740_v51 = vld [vmem:[%s22183_s5 + $0x60] sm:$0xff]  ;;  %12853 = vmatprep.subr.mxu0 %v18734_v11 }
0x1314   : > { %6155 = vmatprep.subr.bf16.mxu1 %v5949_v6  ;;  %v18752_v6 = vld [vmem:[%s22183_s5 + $0x58] sm:$0xff]  ;;  %12854 = vmatpush3.msra.mxu0 %v18740_v51 }
0x1315   : > { %12855 = vmatprep.subr.mxu0 %v18746_v13 }
0x1316   : > { %12856 = vmatpush3.msra.mxu0 %v18752_v6 }
0x1317   : > { %6156 = vmatpush1.bf16.msra.mxu1 %v5948_v28  ;;  %12857 = vmatprep.subr.mxu0 %v18758_v56 }
0x1318   : > { %6157 = vmatprep.subr.bf16.mxu1 %v5947_v7  ;;  %13821 = vmatmul.mubr.msk.bf16.gmra.mxu0 %vm1358_vm0, %v18608_v17  ;;  %v18770_v7 = vld [vmem:[%s22183_s5 + $0xc8] sm:$0xff] }
0x1319   : > { %13824 = vmatprep.mubr.msk.bf16.mxu0 %vm1358_vm0, %v18623_v15  ;;  %12858 = vmatpush3.msra.mxu0 %v18764_v54 }
0x131a   : > { %12859 = vmatprep.subr.mxu0 %v18770_v7 }
0x131b   : > { %6158 = vmatpush1.bf16.msra.mxu1 %v5946_v2 }
0x131c   : > { %6159 = vmatprep.subr.bf16.mxu1 %v5945_v46 }
0x131f   : > { %6160 = vmatpush1.bf16.msra.mxu1 %v5944_v47 }
0x1320   : > { %6161 = vmatprep.subr.bf16.mxu1 %v5943_v12  ;;  %13825 = vmatmul.mubr.msk.bf16.gmra.mxu0 %vm1358_vm0, %v18652_v50  ;;  %v23035_v50 = vld [vmem:[#allocation38_spill] sm:$0xff] }
0x1321   : > { %13828 = vmatprep.mubr.msk.bf16.mxu0 %vm1358_vm0, %v18668_v34  ;;  %v18915_v34 = vld [vmem:[%s22183_s5 + $0x8] sm:$0xff] }
0x1322   : > { %23032 = vst [vmem:[#allocation56_spill] sm:$0xff] %v18915_v34 }
0x1323   : > { %6162 = vmatpush1.bf16.msra.mxu1 %v5942_v59 }
0x1324   : > { %6163 = vmatprep.subr.bf16.mxu1 %v5941_v60 }
0x1327   : > { %6164 = vmatpush1.bf16.msra.mxu1 %v5940_v21 }
0x1328   : > { %13829 = vmatmul.mubr.msk.bf16.gmra.mxu0 %vm1358_vm0, %v18690_v42  ;;  %v18889_v42 = vld [vmem:[%s22183_s5 + $0x18] sm:$0xff]  ;;  %13832 = vmatprep.subr.mxu1 %v18947_v20 }
0x1329   : > { %23028 = vst [vmem:[#allocation72_spill] sm:$0xff] %v18889_v42 }
0x132a   : > { %6182 = vmatmul.mubr.bf16.vlgmr.msra.gmra.mxu1 %v23013_v24 }
0x132b   : > { %13833 = vmatpush3.msra.mxu1 %v18947_v20 }
0x1388   : > { %v13797_v45 = vpop.f32.mrf.mxu0 }
0x1389   : > { %14296 = vrcp.f32 %v13797_v45  ;;  %v18778_v45 = vld [vmem:[%s22185_s7] sm:$0xff] }
0x138a   : > { %v5705_v28 = vpop.f32.mrf.mxu0  ;;  %23014 = vst [vmem:[#allocation86_spill] sm:$0xff] %v18778_v45 }
0x138b   : > { %14298 = vrcp.f32 %v5705_v28 }
0x1396   : > { %v14297_v62 = vpop.eup %14296 }
0x1398   : > { %v14299_v59 = vpop.eup %14298 }
0x13a8   : > { %v12824_v38 = vpop.f32.mrf.mxu0 }
0x13aa   : > { %v12825_v2 = vpop.f32.mrf.mxu0 }
0x13ab   : > { %v12826_v46 = vadd.f32 %v12825_v2, %v12824_v38  ;;  %v18786_v38 = vld [vmem:[%s22185_s7 + $0x8] sm:$0xff] }
0x13ac   : > { %v12827_v44 = vpop.f32.mrf.mxu0  ;;  %23015 = vst [vmem:[#allocation64_spill] sm:$0xff] %v18786_v38 }
0x13ad   : > { %v5758_v60 = vmul.f32 %v14299_v59, %v12826_v46  ;;  %v18804_v59 = vld [vmem:[%s22185_s7 + $0x18] sm:$0xff] }
0x13ae   : > { %v12828_v47 = vpop.f32.mrf.mxu0  ;;  %23017 = vst [vmem:[#allocation87_spill] sm:$0xff] %v18804_v59 }
0x13af   : > { %v12829_v12 = vadd.f32 %v12828_v47, %v12827_v44 }
0x13b0   : > { %v18942_v15 = vpop.f32.mrf.mxu0 }
0x13b1   : > { %v5760_v21 = vmul.f32 %v14297_v62, %v12829_v12  ;;  %v18796_v62 = vld [vmem:[%s22185_s7 + $0x10] sm:$0xff] }
0x13b2   : > { %23016 = vst [vmem:[#allocation45_spill] sm:$0xff] %v18796_v62 }
0x13b3   : > { %v12309_v58 = vpack.c.bf16 %v5760_v21, %v5758_v60 }
0x13b5   : > { %12325 = vst [vmem:[#allocation2 + $0x28] sm:$0xff] %v12309_v58   ;;  %v18814_v58 = vld [vmem:[%s22183_s5 + $0x48] sm:$0xff] }
0x13b6   : > { %12860 = vmatpush3.msra.mxu0 %v18814_v58 }
0x13ea   : > { %v6183_v36 = vpop.f32.mrf.mxu1 }
0x13eb   : > { %v18781_v28 = vadd.f32 %v18778_v45, %v6183_v36  ;;  %v18820_v36 = vld [vmem:[%s22183_s5 + $0xc0] sm:$0xff]  ;;  %v18880_v45 = vld [vmem:[%s22183_s5 + $0x98] sm:$0xff] }
0x13ec   : > { %v6185_v24 = vpop.f32.mrf.mxu1  ;;  %12861 = vmatprep.subr.mxu0 %v18820_v36  ;;  %23027 = vst [vmem:[#allocation54_spill] sm:$0xff] %v18880_v45 }
0x13ed   : > { %v18789_v2 = vadd.f32 %v18786_v38, %v6185_v24  ;;  %v18826_v24 = vld [vmem:[%s22183_s5 + $0x40] sm:$0xff] }
0x13ee   : > { %v6187_v44 = vpop.f32.mrf.mxu1  ;;  %23018 = vst [vmem:[#allocation88_spill] sm:$0xff] %v18826_v24  ;;  %12862 = vmatpush3.msra.mxu0 %v18826_v24  ;;  %v18875_v38 = vld [vmem:[%s22183_s5 + $0x20] sm:$0xff] }
0x13ef   : > { %v6192_v46 = vmax.f32 %v18781_v28, %v18789_v2  ;;  %v18799_v12 = vadd.f32 %v18796_v62, %v6187_v44  ;;  %v18832_v44 = vld [vmem:[%s22183_s5 + $0xb8] sm:$0xff]  ;;  %v18864_v62 = vld [vmem:[%s22183_s5 + $0x28] sm:$0xff]  ;;  %23026 = vst [vmem:[#allocation65_spill] sm:$0xff] %v18875_v38 }
0x13f0   : > { %v6189_v47 = vpop.f32.mrf.mxu1  ;;  %23019 = vst [vmem:[#allocation58_spill] sm:$0xff] %v18832_v44  ;;  %12863 = vmatprep.subr.mxu0 %v18832_v44  ;;  %23024 = vst [vmem:[#allocation52_spill] sm:$0xff] %v18864_v62 }
0x13f1   : > { %v18807_v60 = vadd.f32 %v18804_v59, %v6189_v47  ;;  %6193 = vmax.xlane.f32.xlu1 %v6192_v46  ;;  %v18838_v46 = vld [vmem:[%s22183_s5 + $0x38] sm:$0xff]  ;;  %v18844_v47 = vld [vmem:[%s22183_s5 + $0xb0] sm:$0xff]  ;;  %v18858_v59 = vld [vmem:[%s22183_s5 + $0xa8] sm:$0xff] }
0x13f2   : > { %23020 = vst [vmem:[#allocation61_spill] sm:$0xff] %v18838_v46  ;;  %12864 = vmatpush3.msra.mxu0 %v18838_v46  ;;  %23021 = vst [vmem:[#allocation51_spill] sm:$0xff] %v18844_v47  ;;  %v23044_v46 = vmov 0  }
0x13f3   : > { %v6195_v21 = vmax.f32 %v18799_v12, %v18807_v60  ;;  %12865 = vmatprep.subr.mxu0 %v18844_v47  ;;  %23023 = vst [vmem:[#allocation62_spill] sm:$0xff] %v18858_v59 }
0x13f5   : > { %6196 = vmax.xlane.f32.xlu0 %v6195_v21  ;;  %v18850_v21 = vld [vmem:[%s22183_s5 + $0x30] sm:$0xff] }
0x13f6   : > { %23022 = vst [vmem:[#allocation46_spill] sm:$0xff] %v18850_v21  ;;  %12866 = vmatpush3.msra.mxu0 %v18850_v21 }
0x13f7   : > { %12867 = vmatprep.subr.mxu0 %v18858_v59 }
0x13f8   : > { %12868 = vmatpush3.msra.mxu0 %v18864_v62 }
0x1402   : > { %6459 = vrot.lane.b32.xlu1 %v22963_v52, %s14603_s22  ;;  %v18870_v52 = vld [vmem:[%s22183_s5 + $0xa0] sm:$0xff] }
0x1403   : > { %23025 = vst [vmem:[#allocation53_spill] sm:$0xff] %v18870_v52  ;;  %12869 = vmatprep.subr.mxu0 %v18870_v52 }
0x1404   : > { %12870 = vmatpush3.msra.mxu0 %v18875_v38 }
0x1405   : > { %12871 = vmatprep.subr.mxu0 %v18880_v45 }
0x1406   : > { %6461 = vrot.lane.b32.xlu1 %v22964_v4, %s14603_s22  ;;  %12872 = vmatpush3.msra.mxu0 %v18889_v42  ;;  %v18906_v4 = vld [vmem:[%s22183_s5 + $0x88] sm:$0xff] }
0x1407   : > { %23031 = vst [vmem:[#allocation75_spill] sm:$0xff] %v18906_v4  ;;  %12873 = vmatprep.subr.mxu0 %v18894_v40 }
0x1408   : > { %12874 = vmatpush3.msra.mxu0 %v18900_v19 }
0x1409   : > { %12875 = vmatprep.subr.mxu0 %v18906_v4 }
0x140a   : > { %6465 = vrot.lane.b32.xlu1 %v22965_v33, %s14603_s22  ;;  %v18928_v33 = vld [vmem:[%s22183_s5] sm:$0xff]  ;;  %12876 = vmatpush3.msra.mxu0 %v18915_v34 }
0x140b   : > { %6457 = vrot.lane.b32.xlu0 %v22966_v57, %s14603_s22  ;;  %23034 = vst [vmem:[#allocation77_spill] sm:$0xff] %v18928_v33  ;;  %12877 = vmatprep.subr.mxu0 %v18920_v25  ;;  %v23037_v57 = vld [vmem:[#allocation69_spill] sm:$0xff] }
0x140c   : > { %12878 = vmatpush3.msra.mxu0 %v18928_v33 }
0x140d   : > { %6511 = vmatprep.subr.bf16.mxu0 %v23037_v57 }
0x140e   : > { %6469 = vrot.lane.b32.xlu1 %v23035_v50, %s14603_s22  ;;  %v18952_v50 = vld [vmem:[%s22184_s6] sm:$0xff] }
0x140f   : > { %6463 = vrot.lane.b32.xlu0 %v23036_v14, %s14603_s22  ;;  %23041 = vst [vmem:[#allocation78_spill] sm:$0xff] %v18952_v50  ;;  %v18955_v14 = vpop.f32.mrf.mxu0  ;;  %13834 = vmatprep.subr.mxu1 %v18952_v50 }
0x1410   : > { %13835 = vmatpush3.msra.mxu1 %v18952_v50 }
0x1413   : > { %6467 = vrot.lane.b32.xlu0 %v23038_v61, %s14603_s22 }
0x1417   : > { %6471 = vrot.lane.b32.xlu0 %v23039_v10, %s14603_s22  ;;  %v18959_v10 = vpop.f32.mrf.mxu0  ;;  %s12280_s22 = sshll.u32 %s14728_s1, 11  ;;  %s14534_s1 = scalar_lea.vmem %s22132_s27, 2048 }
0x1418   : > { %s22130_s2 = scalar_lea.hbm %s22197_s19, %s12280_s22  ;;  %p14535_p11 = scmp.ne.s32.totalorder %s22132_s27, %s14534_s1 }
0x1419   : > { %v18964_v57 = vpop.f32.mrf.mxu0  ;;  %s14540_s22 = scalar_lea.vmem %s14539_s26, 4096 }
0x141a   : > { %p14536_p12 = pnand %p14535_p11, %p14745_p5  ;;  %p14542_p1 = scmp.lt.s32.totalorder %s14540_s22, %s14534_s1 }
0x141b   : > { %v18966_v17 = vpop.f32.mrf.mxu0 }
0x141c   : > { %p14537_p13 = pneg %p14536_p12  ;;  %p14543_p2 = por %p14542_p1, %p14541_p0 }
0x141d   : > { %v18968_v43 = vpop.f32.mrf.mxu0 }
0x141e   : > { %p14544_p3 = pnand %p14543_p2, %p14537_p13 }
0x141f   : > { %v18970_v55 = vpop.f32.mrf.mxu0 }
0x1421   : > { %v18974_v8 = vpop.f32.mrf.mxu0 }
0x1423   : > { %v18976_v16 = vpop.f32.mrf.mxu0 }
0x1425   : > { %v18978_v39 = vpop.f32.mrf.mxu0 }
0x1427   : > { %v18980_v50 = vpop.f32.mrf.mxu0 }
0x1429   : > { %v18984_v0 = vpop.f32.mrf.mxu0 }
0x142b   : > { %v18986_v33 = vpop.f32.mrf.mxu0 }
0x142d   : > { %v18988_v25 = vpop.f32.mrf.mxu0 }
0x142f   : > { %v18990_v32 = vpop.f32.mrf.mxu0 }
0x1431   : > { %v18994_v34 = vpop.f32.mrf.mxu0 }
0x1432   : > { %v6123_v24 = vpack.c.bf16 %v18994_v34, %v18988_v25 }
0x1433   : > { %v18996_v27 = vpop.f32.mrf.mxu0 }
0x1435   : > { %v18998_v4 = vpop.f32.mrf.mxu0 }
0x1437   : > { %v19000_v19 = vpop.f32.mrf.mxu0 }
0x1439   : > { %v19004_v40 = vpop.f32.mrf.mxu0 }
0x143b   : > { %v19006_v1 = vpop.f32.mrf.mxu0 }
0x143d   : > { %v19008_v42 = vpop.f32.mrf.mxu0 }
0x143f   : > { %v19012_v45 = vpop.f32.mrf.mxu0 }
0x1441   : > { %v19016_v52 = vpop.f32.mrf.mxu0 }
0x1443   : > { %v19020_v21 = vpop.f32.mrf.mxu0 }
0x147a   : > { %v6194_v30 = vpop.xlane.xlu1 %6193 }
0x147b   : > { %v6198_v20 = vsub.f32 %v18781_v28, %v6194_v30  ;;  %v6199_v9 = vsub.f32 %v18789_v2, %v6194_v30  ;;  %v19022_v2 = vpop.f32.mrf.mxu0 }
0x147d   : > { %v6202_v49 = vmul.f32 1.442695, %v6198_v20  ;;  %v6204_v38 = vmul.f32 1.442695, %v6199_v9  ;;  %v19024_v47 = vpop.f32.mrf.mxu0 }
0x147e   : > { %v6197_v61 = vpop.xlane.xlu0 %6196 }
0x147f   : > { %14300 = vpow2.f32 %v6202_v49  ;;  %v6200_v62 = vsub.f32 %v18799_v12, %v6197_v61  ;;  %v6201_v59 = vsub.f32 %v18807_v60, %v6197_v61  ;;  %v19028_v20 = vpop.f32.mrf.mxu0 }
0x1480   : > { %14302 = vpow2.f32 %v6204_v38 }
0x1481   : > { %v6206_v28 = vmul.f32 1.442695, %v6200_v62  ;;  %v6208_v30 = vmul.f32 1.442695, %v6201_v59  ;;  %v13830_v49 = vpop.f32.mrf.mxu0  ;;  %v19035_v62 = vld [vmem:[%s22609_s8 + $0x78] sm:$0xff]  }
0x1482   : > { %23042 = vst [vmem:[#allocation89_spill] sm:$0xff] %v19035_v62  ;;  %v6458_v3 = vpop.permute.xlu0 %6457 }
0x1483   : > { %14304 = vpow2.f32 %v6206_v28  ;;  %v6102_v12 = vpop.f32.mrf.mxu0 }
0x1484   : > { %14306 = vpow2.f32 %v6208_v30  ;;  %v23043_v30 = vld [vmem:[#allocation47_spill] sm:$0xff] }
0x1485   : > { %v13831_v48 = vpop.f32.mrf.mxu0 }
0x1486   : > { %v6132_v61 = vpack.c.bf16 %v13831_v48, %v13830_v49 }
0x1488   : > { %v6148_v59 = vmul.bf16 %v19035_v62, %v6132_v61  ;;  %v6460_v61 = vpop.permute.xlu1 %6459 }
0x148a   : > { %12889 = vmatprep.subr.bf16.mxu1 %v6148_v59 }
0x148c   : > { %v19030_v60 = vpop.eup %14300  ;;  %v6462_v59 = vpop.permute.xlu1 %6461 }
0x148d   : > { %v14303_v38 = vpop.eup %14302 }
0x148e   : > { %6306 = vmatprep.mubr.f32.mxu0 %v14303_v38 }
0x148f   : > { %6307 = vmatmul.mubr.f32.vlgmr.msra.gmra.mxu0 %v19030_v60 }
0x1490   : > { %v19039_v28 = vpop.eup %14304  ;;  %6512 = vmatpush1.bf16.msra.mxu0 %v23043_v30 }
0x1491   : > { %v14307_v9 = vpop.eup %14306 }
0x1492   : > { %6311 = vmatprep.mubr.f32.mxu0 %v14307_v9  ;;  %v6401_v49 = vpack.c.bf16 %v14307_v9, %v14303_v38  ;;  %v6464_v9 = vpop.permute.xlu0 %6463  ;;  %v6466_v38 = vpop.permute.xlu1 %6465 }
0x1493   : > { %6312 = vmatmul.mubr.f32.gmra.mxu0 %v19039_v28 }
0x1494   : > { %6529 = vmatprep.mubr.bf16.mxu0 %v23044_v46 }
0x1496   : > { %v6470_v30 = vpop.permute.xlu1 %6469 }
0x1497   : > { %11955 = vmatmul.mubr.msk.bf16.vlgmr.msra.gmra.mxu0 %vm1358_vm0, %v6458_v3  ;;  %v6468_v3 = vpop.permute.xlu0 %6467 }
0x1498   : > { %6539 = vmatprep.mubr.bf16.mxu0 %v23044_v46 }
0x149f   : > { %11956 = vmatmul.mubr.msk.bf16.gmra.mxu0 %vm1358_vm0, %v6460_v61  ;;  %v6472_v61 = vpop.permute.xlu0 %6471 }
0x14a0   : > { %6549 = vmatprep.mubr.bf16.mxu0 %v23044_v46 }
0x14a7   : > { %11957 = vmatmul.mubr.msk.bf16.gmra.mxu0 %vm1358_vm0, %v6462_v59  ;;  %v6105_v59 = vpop.f32.mrf.mxu0 }
0x14a8   : > { %6559 = vmatprep.mubr.bf16.mxu0 %v23044_v46  ;;  %v6131_v44 = vpack.c.bf16 %v6105_v59, %v6102_v12  ;;  %v19079_v12 = vld [vmem:[%s22609_s8 + $0x70] sm:$0xff]   ;;  %v19111_v59 = vld [vmem:[%s22609_s8 + $0x28] sm:$0xff]  }
0x14af   : > { %11958 = vmatmul.mubr.msk.bf16.gmra.mxu0 %vm1358_vm0, %v6464_v9 }
0x14b0   : > { %6569 = vmatprep.mubr.bf16.mxu0 %v23044_v46 }
0x14b7   : > { %11959 = vmatmul.mubr.msk.bf16.gmra.mxu0 %vm1358_vm0, %v6466_v38 }
0x14b8   : > { %6579 = vmatprep.mubr.bf16.mxu0 %v23044_v46 }
0x14bf   : > { %11960 = vmatmul.mubr.msk.bf16.gmra.mxu0 %vm1358_vm0, %v6468_v3 }
0x14c0   : > { %6589 = vmatprep.mubr.bf16.mxu0 %v23044_v46 }
0x14c7   : > { %11961 = vmatmul.mubr.msk.bf16.gmra.mxu0 %vm1358_vm0, %v6470_v30  ;;  %v19066_v30 = vld [vmem:[%s22609_s8 + $0x38] sm:$0xff]  }
0x14c8   : > { %6599 = vmatprep.mubr.bf16.mxu0 %v23044_v46 }
0x14cf   : > { %11962 = vmatmul.mubr.msk.bf16.gmra.mxu0 %vm1358_vm0, %v6472_v61  ;;  %v23045_v61 = vpack.c.bf16 %v18990_v32, %v18986_v33  ;;  %v19088_v32 = vld [vmem:[%s22609_s8 + $0x30] sm:$0xff]   ;;  %v6129_v33 = vpack.c.bf16 %v19028_v20, %v19022_v2  ;;  %v6121_v2 = vpack.c.bf16 %v18984_v0, %v18978_v39 }
0x14d0   : > { %6867 = vmatprep.mubr.bf16.mxu0 %v23044_v46  ;;  %v6139_v25 = vmul.bf16 %v19088_v32, %v6123_v24 }
0x14d1   : > { %v6140_v46 = vmul.bf16 %v19066_v30, %v23045_v61 }
0x154f   : > { %v12879_v9 = vpop.f32.mrf.mxu0 }
0x1551   : > { %v12880_v38 = vpop.f32.mrf.mxu0 }
0x1552   : > { %v12881_v48 = vadd.f32 %v12880_v38, %v12879_v9  ;;  %v19124_v38 = vld [vmem:[%s22609_s8 + $0x60] sm:$0xff]  }
0x1553   : > { %v12882_v62 = vpop.f32.mrf.mxu0 }
0x1554   : > { %13836 = vmatprep.mubr.msk.f32.mxu1 %vm1358_vm0, %v12881_v48 }
0x1555   : > { %v12883_v3 = vpop.f32.mrf.mxu0 }
0x1556   : > { %v12884_v5 = vadd.f32 %v12883_v3, %v12882_v62  ;;  %v6147_v62 = vmul.bf16 %v19079_v12, %v6131_v44  ;;  %v19096_v44 = vld [vmem:[%s22609_s8 + $0x68] sm:$0xff]   ;;  %v6145_v3 = vmul.bf16 %v19124_v38, %v6129_v33 }
0x1557   : > { %v19074_v9 = vpop.f32.mrf.mxu0 }
0x1558   : > { %13837 = vmatmul.mubr.msk.f32.vlgmr.msra.gmra.mxu1 %vm1358_vm0, %v12884_v5  ;;  %v23046_v5 = vpack.c.bf16 %v19024_v47, %v19020_v21  ;;  %v23047_v47 = vpack.c.bf16 %v18980_v50, %v18976_v16  ;;  %v19132_v16 = vld [vmem:[%s22609_s8 + $0x20] sm:$0xff]   ;;  %v19140_v50 = vld [vmem:[%s22609_s8 + $0x58] sm:$0xff]  }
0x1559   : > { %12890 = vmatpush3.bf16.msra.mxu1 %v6140_v46  ;;  %6434 = vmatprep.mubr.bf16.mxu1 %v6401_v49  ;;  %v19083_v48 = vpop.f32.mrf.mxu0  ;;  %v6137_v0 = vmul.bf16 %v19132_v16, %v6121_v2 }
0x155a   : > { %12891 = vmatprep.subr.bf16.mxu1 %v6147_v62  ;;  %v6146_v46 = vmul.bf16 %v19096_v44, %v23046_v5  ;;  %v6138_v21 = vmul.bf16 %v19111_v59, %v23047_v47  ;;  %v23048_v62 = vpack.c.bf16 %v19012_v45, %v19006_v1  ;;  %v6127_v5 = vpack.c.bf16 %v19016_v52, %v19008_v42  ;;  %v19155_v47 = vld [vmem:[%s22609_s8 + $0x18] sm:$0xff]  }
0x155b   : > { %v19091_v34 = vpop.f32.mrf.mxu0  ;;  %v23049_v1 = vpack.c.bf16 %v18970_v55, %v18966_v17  ;;  %v6119_v42 = vpack.c.bf16 %v18974_v8, %v18968_v43  ;;  %v19176_v55 = vld [vmem:[%s22609_s8 + $0x10] sm:$0xff]   ;;  %v19184_v17 = vld [vmem:[%s22609_s8 + $0x48] sm:$0xff]  }
0x155c   : > { %v6610_v49 = vpack.c.bf16 %v19091_v34, %v19074_v9 }
0x155d   : > { %12892 = vmatpush3.bf16.msra.mxu1 %v6139_v25  ;;  %v19106_v24 = vpop.f32.mrf.mxu0  ;;  %v6144_v25 = vmul.bf16 %v19140_v50, %v23048_v62  ;;  %v6136_v45 = vmul.bf16 %v19155_v47, %v23049_v1  ;;  %v6135_v8 = vmul.bf16 %v19176_v55, %v6119_v42  ;;  %v19197_v1 = vld [vmem:[%s22609_s8 + $0x8] sm:$0xff]  }
0x155e   : > { %12893 = vmatprep.subr.bf16.mxu1 %v6146_v46 }
0x155f   : > { %v19119_v20 = vpop.f32.mrf.mxu0 }
0x1561   : > { %12894 = vmatpush3.bf16.msra.mxu1 %v6138_v21  ;;  %v19127_v61 = vpop.f32.mrf.mxu0  ;;  %v19168_v21 = vld [vmem:[%s22609_s8 + $0x50] sm:$0xff]  }
0x1562   : > { %12895 = vmatprep.subr.bf16.mxu1 %v6145_v3  ;;  %v6143_v2 = vmul.bf16 %v19168_v21, %v6127_v5 }
0x1563   : > { %v19135_v39 = vpop.f32.mrf.mxu0 }
0x1564   : > { %v6612_v46 = vpack.c.bf16 %v19135_v39, %v19119_v20  ;;  %v23100_v20 = vld [vmem:[#allocation31_spill] sm:$0xff]  ;;  %v23101_v39 = vld [vmem:[#allocation30_spill] sm:$0xff] }
0x1565   : > { %12896 = vmatpush3.bf16.msra.mxu1 %v6137_v0  ;;  %v19150_v33 = vpop.f32.mrf.mxu0  ;;  %v23050_v0 = vpack.c.bf16 %v19000_v19, %v18996_v27  ;;  %v6117_v27 = vpack.c.bf16 %v18964_v57, %v18955_v14 }
0x1566   : > { %12897 = vmatprep.subr.bf16.mxu1 %v6144_v25  ;;  %v6125_v25 = vpack.c.bf16 %v19004_v40, %v18998_v4  ;;  %v19210_v40 = vld [vmem:[%s22609_s8 + $0x40] sm:$0xff]  }
0x1567   : > { %v19163_v52 = vpop.f32.mrf.mxu0  ;;  %v6142_v62 = vmul.bf16 %v19184_v17, %v23050_v0 }
0x1568   : > { %v6141_v4 = vmul.bf16 %v19210_v40, %v6125_v25 }
0x1569   : > { %12898 = vmatpush3.bf16.msra.mxu1 %v6136_v45  ;;  %v19171_v3 = vpop.f32.mrf.mxu0  ;;  %v23051_v45 = vpack.c.bf16 %v18959_v10, %v18942_v15  ;;  %v19218_v15 = vld [vmem:[%s22609_s8] sm:$0xff]  }
0x156a   : > { %12899 = vmatprep.subr.bf16.mxu1 %v6143_v2  ;;  %23052 = vst [vmem:[#allocation11_spill] sm:$0xff] %v19218_v15  ;;  %v6133_v14 = vmul.bf16 %v19218_v15, %v6117_v27 }
0x156b   : > { %v19179_v43 = vpop.f32.mrf.mxu0  ;;  %v6134_v42 = vmul.bf16 %v19197_v1, %v23051_v45 }
0x156d   : > { %12900 = vmatpush3.bf16.msra.mxu1 %v6135_v8  ;;  %v19192_v5 = vpop.f32.mrf.mxu0  ;;  %v23053_v8 = vld [vmem:[#allocation24_spill] sm:$0xff] }
0x156e   : > { %12901 = vmatprep.subr.bf16.mxu1 %v6142_v62  ;;  %v23054_v62 = vpack.c.bf16 %v19039_v28, %v19030_v60 }
0x156f   : > { %v19205_v19 = vpop.f32.mrf.mxu0 }
0x1571   : > { %12902 = vmatpush3.bf16.msra.mxu1 %v6134_v42  ;;  %v19213_v2 = vpop.f32.mrf.mxu0 }
0x1572   : > { %12903 = vmatprep.subr.bf16.mxu1 %v6141_v4 }
0x1573   : > { %v19221_v10 = vpop.f32.mrf.mxu0 }
0x1575   : > { %12904 = vmatpush3.bf16.msra.mxu1 %v6133_v14  ;;  %v19223_v57 = vpop.f32.mrf.mxu0  ;;  %v23064_v14 = vld [vmem:[#allocation53_spill] sm:$0xff] }
0x1576   : > { %13839 = vmatprep.subr.bf16.mxu1 %v23053_v8 }
0x1577   : > { %v19226_v0 = vpop.f32.mrf.mxu0 }
0x1578   : > { %6435 = vmatmul.mubr.bf16.vlgmr.msra.gmra.mxu1 %v23054_v62  ;;  %v23066_v62 = vld [vmem:[#allocation63_spill] sm:$0xff] }
0x1579   : > { %13840 = vmatpush3.bf16.msra.mxu1 %v23053_v8  ;;  %v19232_v25 = vpop.f32.mrf.mxu0  ;;  %13841 = vmatprep.mubr.msk.bf16.mxu1 %vm1358_vm0, %v18466_v63  ;;  %v23065_v8 = vld [vmem:[#allocation65_spill] sm:$0xff] }
0x157a   : > { %12928 = vmatprep.subr.mxu1 %v18700_v22 }
0x157b   : > { %v19237_v45 = vpop.f32.mrf.mxu0 }
0x157d   : > { %v19239_v42 = vpop.f32.mrf.mxu0 }
0x157f   : > { %v19241_v27 = vpop.f32.mrf.mxu0 }
0x1580   : > { %13842 = vmatmul.mubr.msk.bf16.vlgmr.msra.gmra.mxu1 %vm1358_vm0, %v18475_v29 }
0x1581   : > { %v6583_v60 = vpop.f32.mrf.mxu0  ;;  %13845 = vmatprep.mubr.msk.bf16.mxu1 %vm1358_vm0, %v18482_v37  ;;  %12929 = vmatpush3.msra.mxu1 %v18705_v31 }
0x1582   : > { %12930 = vmatprep.subr.mxu1 %v18710_v41 }
0x1583   : > { %v19249_v63 = vpop.f32.mrf.mxu0  ;;  %12931 = vmatpush3.msra.mxu1 %v18716_v53  ;;  %v23055_v53 = vld [vmem:[#allocation88_spill] sm:$0xff] }
0x1584   : > { %12932 = vmatprep.subr.mxu1 %v18722_v18  ;;  %v23056_v18 = vld [vmem:[#allocation48_spill] sm:$0xff] }
0x1585   : > { %v6587_v22 = vpop.f32.mrf.mxu0  ;;  %12933 = vmatpush3.msra.mxu1 %v18728_v23 }
0x1586   : > { %12934 = vmatprep.subr.mxu1 %v18734_v11  ;;  %v23058_v11 = vld [vmem:[#allocation49_spill] sm:$0xff] }
0x1587   : > { %v6591_v29 = vpop.f32.mrf.mxu0  ;;  %12935 = vmatpush3.msra.mxu1 %v18740_v51  ;;  %v23059_v51 = vld [vmem:[#allocation61_spill] sm:$0xff] }
0x1588   : > { %13846 = vmatmul.mubr.msk.bf16.gmra.mxu1 %vm1358_vm0, %v18489_v26  ;;  %12936 = vmatprep.subr.mxu1 %v18746_v13  ;;  %v23060_v13 = vld [vmem:[#allocation51_spill] sm:$0xff] }
0x1589   : > { %v6593_v37 = vpop.f32.mrf.mxu0  ;;  %13849 = vmatprep.mubr.msk.bf16.mxu1 %vm1358_vm0, %v18496_v35  ;;  %12937 = vmatpush3.msra.mxu1 %v18752_v6  ;;  %v23057_v35 = vld [vmem:[#allocation58_spill] sm:$0xff] }
0x158a   : > { %12938 = vmatprep.subr.mxu1 %v18758_v56  ;;  %v23061_v56 = vld [vmem:[#allocation46_spill] sm:$0xff] }
0x158b   : > { %v6595_v31 = vpop.f32.mrf.mxu0  ;;  %12939 = vmatpush3.msra.mxu1 %v18764_v54  ;;  %v23062_v54 = vld [vmem:[#allocation62_spill] sm:$0xff] }
0x158c   : > { %12940 = vmatprep.subr.mxu1 %v18770_v7 }
0x158d   : > { %v6597_v41 = vpop.f32.mrf.mxu0  ;;  %12941 = vmatpush3.msra.mxu1 %v18814_v58 }
0x158e   : > { %12942 = vmatprep.subr.mxu1 %v18820_v36  ;;  %v23063_v36 = vld [vmem:[#allocation52_spill] sm:$0xff]  ;;  %v6623_v28 = vpack.c.bf16 %v6597_v41, %v6593_v37  ;;  %v6621_v37 = vpack.c.bf16 %v6587_v22, %v6583_v60  ;;  %v23072_v41 = vld [vmem:[#allocation25_spill] sm:$0xff]  ;;  %v6619_v60 = vpack.c.bf16 %v19239_v42, %v19232_v25  ;;  %v23078_v22 = vld [vmem:[#allocation15_spill] sm:$0xff]  ;;  %v6617_v25 = vpack.c.bf16 %v19223_v57, %v19213_v2 }
0x158f   : > { %v6601_v26 = vpop.f32.mrf.mxu0  ;;  %12943 = vmatpush3.msra.mxu1 %v23055_v53  ;;  %v23084_v42 = vld [vmem:[#allocation13_spill] sm:$0xff]  ;;  %v6614_v2 = vpack.c.bf16 %v19179_v43, %v19163_v52  ;;  %v23088_v57 = vld [vmem:[#allocation60_spill] sm:$0xff]  ;;  %v23095_v43 = vld [vmem:[#allocation14_spill] sm:$0xff] }
0x1590   : > { %13850 = vmatmul.mubr.msk.bf16.gmra.mxu1 %vm1358_vm0, %v23056_v18  ;;  %12944 = vmatprep.subr.mxu1 %v23057_v35  ;;  %v23067_v18 = vld [vmem:[#allocation12_spill] sm:$0xff]  ;;  %v23068_v35 = vld [vmem:[#allocation54_spill] sm:$0xff]  ;;  %v23093_v52 = vld [vmem:[#allocation85_spill] sm:$0xff] }
0x1591   : > { %v6603_v23 = vpop.f32.mrf.mxu0  ;;  %13853 = vmatprep.mubr.msk.bf16.mxu1 %vm1358_vm0, %v23058_v11  ;;  %12945 = vmatpush3.msra.mxu1 %v23059_v51  ;;  %v6622_v11 = vpack.c.bf16 %v6595_v31, %v6591_v29  ;;  %v23069_v51 = vld [vmem:[#allocation17_spill] sm:$0xff]  ;;  %v6620_v29 = vpack.c.bf16 %v19249_v63, %v19241_v27  ;;  %v23076_v31 = vld [vmem:[#allocation23_spill] sm:$0xff]  ;;  %v6618_v27 = vpack.c.bf16 %v19237_v45, %v19226_v0  ;;  %v23086_v45 = vld [vmem:[#allocation70_spill] sm:$0xff] }
0x1592   : > { %12946 = vmatprep.subr.mxu1 %v23060_v13  ;;  %v23082_v63 = vld [vmem:[#allocation19_spill] sm:$0xff]  ;;  %v6615_v0 = vpack.c.bf16 %v19192_v5, %v19171_v3 }
0x1593   : > { %v6605_v6 = vpop.f32.mrf.mxu0  ;;  %12947 = vmatpush3.msra.mxu1 %v23061_v56  ;;  %v23073_v56 = vld [vmem:[#allocation55_spill] sm:$0xff] }
0x1594   : > { %12948 = vmatprep.subr.mxu1 %v23062_v54  ;;  %v6624_v7 = vpack.c.bf16 %v6605_v6, %v6601_v26  ;;  %v23070_v26 = vld [vmem:[#allocation20_spill] sm:$0xff]  ;;  %v23074_v54 = vld [vmem:[#allocation73_spill] sm:$0xff]  ;;  %v23091_v5 = vld [vmem:[#allocation83_spill] sm:$0xff] }
0x1595   : > { %v6607_v58 = vpop.f32.mrf.mxu0  ;;  %12949 = vmatpush3.msra.mxu1 %v23063_v36  ;;  %v23071_v6 = vld [vmem:[#allocation72_spill] sm:$0xff] }
0x1596   : > { %v6625_v4 = vpack.c.bf16 %v6607_v58, %v6603_v23  ;;  %12950 = vmatprep.subr.mxu1 %v23064_v14  ;;  %v6640_v13 = vmul.bf16 %v23069_v51, %v6624_v7  ;;  %v6639_v23 = vmul.bf16 %v23072_v41, %v6623_v28  ;;  %v23075_v58 = vld [vmem:[#allocation75_spill] sm:$0xff]  ;;  %v6638_v7 = vmul.bf16 %v23076_v31, %v6622_v11  ;;  %v23077_v36 = vld [vmem:[#allocation56_spill] sm:$0xff]  ;;  %v23080_v14 = vld [vmem:[#allocation77_spill] sm:$0xff] }
0x1597   : > { %12951 = vmatpush3.msra.mxu1 %v23065_v8  ;;  %v6637_v28 = vmul.bf16 %v23078_v22, %v6621_v37  ;;  %v23081_v8 = vld [vmem:[#allocation16_spill] sm:$0xff]  ;;  %v23085_v11 = vld [vmem:[#allocation81_spill] sm:$0xff]  ;;  %v23089_v37 = vld [vmem:[#allocation82_spill] sm:$0xff]  ;;  %v6630_v41 = vmul.bf16 %v23091_v5, %v6614_v2 }
0x1598   : > { %v6641_v53 = vmul.bf16 %v23066_v62, %v6625_v4  ;;  %13854 = vmatmul.mubr.msk.bf16.gmra.mxu1 %vm1358_vm0, %v23067_v18  ;;  %12952 = vmatprep.subr.mxu1 %v23068_v35  ;;  %v23079_v4 = vld [vmem:[#allocation76_spill] sm:$0xff]  ;;  %v6636_v62 = vmul.bf16 %v23082_v63, %v6620_v29  ;;  %v6635_v18 = vmul.bf16 %v23084_v42, %v6619_v60  ;;  %v23098_v31 = vld [vmem:[#allocation71_spill] sm:$0xff] }
0x1599   : > { %13857 = vmatprep.mubr.msk.bf16.mxu1 %vm1358_vm0, %v23070_v26  ;;  %12953 = vmatpush3.msra.mxu1 %v23071_v6  ;;  %v6616_v35 = vpack.c.bf16 %v19221_v10, %v19205_v19  ;;  %v6634_v51 = vmul.bf16 %v23085_v11, %v6618_v27  ;;  %v23087_v26 = vld [vmem:[#allocation42_spill] sm:$0xff]  ;;  %v6613_v19 = vpack.c.bf16 %v19150_v33, %v19127_v61  ;;  %v23090_v10 = vld [vmem:[#allocation43_spill] sm:$0xff]  ;;  %v23094_v61 = vld [vmem:[#allocation57_spill] sm:$0xff] }
0x159a   : > { %6835 = vmatprep.subr.bf16.mxu0 %v6641_v53  ;;  %12954 = vmatprep.subr.mxu1 %v23073_v56  ;;  %v23083_v53 = vld [vmem:[#allocation59_spill] sm:$0xff]  ;;  %v6631_v3 = vmul.bf16 %v23090_v10, %v6615_v0  ;;  %v23092_v56 = vld [vmem:[#allocation84_spill] sm:$0xff]  ;;  %v6628_v33 = vmul.bf16 %v23094_v61, %v6612_v46  ;;  %v23102_v46 = vpack.c.bf16 %v23100_v20, %v23101_v39 }
0x159b   : > { %6836 = vmatpush1.bf16.msra.mxu0 %v6640_v13  ;;  %12955 = vmatpush3.msra.mxu1 %v23074_v54  ;;  %v6633_v13 = vmul.bf16 %v23086_v45, %v6617_v25  ;;  %v6632_v6 = vmul.bf16 %v23088_v57, %v6616_v35  ;;  %v6629_v54 = vmul.bf16 %v23092_v56, %v6613_v19  ;;  %v23105_v11 = vld [vmem:[#allocation64_spill] sm:$0xff]  ;;  %v23107_v57 = vld [vmem:[#allocation87_spill] sm:$0xff]  ;;  %v14052_v19 = vld [vmem:[%s22189_s11 + $0x38] sm:$0xff]  }
0x159c   : > { %6837 = vmatprep.subr.bf16.mxu0 %v6639_v23  ;;  %12956 = vmatprep.subr.mxu1 %v23075_v58  ;;  %v6611_v23 = vpack.c.bf16 %v19106_v24, %v19083_v48  ;;  %v23096_v58 = vld [vmem:[#allocation44_spill] sm:$0xff]  ;;  %v23097_v48 = vld [vmem:[#allocation50_spill] sm:$0xff] }
0x159d   : > { %12957 = vmatpush3.msra.mxu1 %v23077_v36  ;;  %v6626_v24 = vmul.bf16 %v23097_v48, %v6610_v49  ;;  %v23103_v36 = vld [vmem:[#allocation78_spill] sm:$0xff] }
0x159e   : > { %12958 = vmatprep.subr.mxu1 %v23079_v4  ;;  %v6627_v29 = vmul.bf16 %v23096_v58, %v6611_v23 }
0x159f   : > { %6838 = vmatpush1.bf16.msra.mxu0 %v6638_v7  ;;  %12959 = vmatpush3.msra.mxu1 %v23080_v14  ;;  %v23099_v7 = vld [vmem:[#allocation74_spill] sm:$0xff] }
0x15a0   : > { %6839 = vmatprep.subr.bf16.mxu0 %v6637_v28  ;;  %13858 = vmatmul.mubr.msk.bf16.gmra.mxu1 %vm1358_vm0, %v23081_v8 }
0x15a1   : > { %13861 = vmatprep.mubr.msk.bf16.mxu1 %vm1358_vm0, %v23083_v53  ;;  %13880 = vmatprep.subr.bf16.mxu1 %v14052_v19 }
0x15a3   : > { %6840 = vmatpush1.bf16.msra.mxu0 %v6636_v62 }
0x15a4   : > { %6841 = vmatprep.subr.bf16.mxu0 %v6635_v18  ;;  %v23104_v18 = vld [vmem:[#allocation86_spill] sm:$0xff] }
0x15a7   : > { %6842 = vmatpush1.bf16.msra.mxu0 %v6634_v51 }
0x15a8   : > { %6843 = vmatprep.subr.bf16.mxu0 %v6633_v13  ;;  %13862 = vmatmul.mubr.msk.bf16.gmra.mxu1 %vm1358_vm0, %v23087_v26  ;;  %v23106_v26 = vld [vmem:[#allocation45_spill] sm:$0xff] }
0x15a9   : > { %13865 = vmatprep.mubr.msk.bf16.mxu1 %vm1358_vm0, %v23089_v37 }
0x15ab   : > { %6844 = vmatpush1.bf16.msra.mxu0 %v6632_v6 }
0x15ac   : > { %6845 = vmatprep.subr.bf16.mxu0 %v6631_v3 }
0x15af   : > { %6846 = vmatpush1.bf16.msra.mxu0 %v6630_v41 }
0x15b0   : > { %6847 = vmatprep.subr.bf16.mxu0 %v6629_v54  ;;  %13866 = vmatmul.mubr.msk.bf16.gmra.mxu1 %vm1358_vm0, %v23093_v52 }
0x15b1   : > { %13869 = vmatprep.mubr.msk.bf16.mxu1 %vm1358_vm0, %v23095_v43 }
0x15b3   : > { %6848 = vmatpush1.bf16.msra.mxu0 %v6628_v33 }
0x15b4   : > { %6849 = vmatprep.subr.bf16.mxu0 %v6627_v29 }
0x15b7   : > { %6850 = vmatpush1.bf16.msra.mxu0 %v6626_v24 }
0x15b8   : > { %13870 = vmatmul.mubr.msk.bf16.gmra.mxu1 %vm1358_vm0, %v23098_v31  ;;  %13873 = vmatprep.subr.mxu0 %v23099_v7 }
0x15ba   : > { %6868 = vmatmul.mubr.bf16.vlgmr.msra.gmra.mxu0 %v23102_v46 }
0x15bb   : > { %13874 = vmatpush3.msra.mxu0 %v23099_v7 }
0x15bc   : > { %13875 = vmatprep.subr.mxu0 %v23103_v36 }
0x15bd   : > { %13876 = vmatpush3.msra.mxu0 %v23103_v36 }
0x1618   : > { %v13838_v60 = vpop.f32.mrf.mxu1 }
0x1619   : > { %14308 = vrcp.f32 %v13838_v60 }
0x161a   : > { %v6391_v9 = vpop.f32.mrf.mxu1 }
0x161b   : > { %14310 = vrcp.f32 %v6391_v9 }
0x1626   : > { %v14309_v14 = vpop.eup %14308 }
0x1628   : > { %v14311_v27 = vpop.eup %14310 }
0x1638   : > { %v12905_v34 = vpop.f32.mrf.mxu1 }
0x163a   : > { %v12906_v49 = vpop.f32.mrf.mxu1 }
0x163b   : > { %v12907_v28 = vadd.f32 %v12906_v49, %v12905_v34 }
0x163c   : > { %v12908_v22 = vpop.f32.mrf.mxu1 }
0x163d   : > { %v6444_v63 = vmul.f32 %v14311_v27, %v12907_v28 }
0x163e   : > { %v12909_v4 = vpop.f32.mrf.mxu1 }
0x163f   : > { %v12910_v8 = vadd.f32 %v12909_v4, %v12908_v22 }
0x1640   : > { %v19360_v10 = vpop.f32.mrf.mxu1 }
0x1641   : > { %v6446_v62 = vmul.f32 %v14309_v14, %v12910_v8  ;;  %v23108_v14 = vld [vmem:[#allocation89_spill] sm:$0xff] }
0x1642   : > { %v19362_v3 = vpop.f32.mrf.mxu1 }
0x1643   : > { %v12314_v53 = vpack.c.bf16 %v6446_v62, %v6444_v63 }
0x1644   : > { %v19364_v5 = vpop.f32.mrf.mxu1 }
0x1645   : > { %12326 = vst [vmem:[#allocation2 + $0x30] sm:$0xff] %v12314_v53  }
0x1646   : > { %v19368_v23 = vpop.f32.mrf.mxu1 }
0x1648   : > { %v19370_v56 = vpop.f32.mrf.mxu1 }
0x164a   : > { %v19372_v54 = vpop.f32.mrf.mxu1 }
0x164c   : > { %v19374_v52 = vpop.f32.mrf.mxu1 }
0x164e   : > { %v19378_v33 = vpop.f32.mrf.mxu1 }
0x1650   : > { %v19380_v43 = vpop.f32.mrf.mxu1 }
0x1652   : > { %v19382_v58 = vpop.f32.mrf.mxu1 }
0x1654   : > { %v19384_v29 = vpop.f32.mrf.mxu1 }
0x1656   : > { %v19388_v24 = vpop.f32.mrf.mxu1 }
0x1658   : > { %v19390_v31 = vpop.f32.mrf.mxu1 }
0x165a   : > { %v19392_v7 = vpop.f32.mrf.mxu1 }
0x165c   : > { %v19394_v20 = vpop.f32.mrf.mxu1 }
0x165e   : > { %v19398_v46 = vpop.f32.mrf.mxu1 }
0x1660   : > { %v19400_v36 = vpop.f32.mrf.mxu1 }
0x1662   : > { %v19402_v60 = vpop.f32.mrf.mxu1 }
0x1664   : > { %v19404_v9 = vpop.f32.mrf.mxu1 }
0x1666   : > { %v19408_v49 = vpop.f32.mrf.mxu1 }
0x1668   : > { %v19410_v22 = vpop.f32.mrf.mxu1 }
0x166a   : > { %v19412_v28 = vpop.f32.mrf.mxu1 }
0x166c   : > { %v19414_v4 = vpop.f32.mrf.mxu1 }
0x166e   : > { %v19418_v8 = vpop.f32.mrf.mxu1 }
0x1670   : > { %v19420_v27 = vpop.f32.mrf.mxu1 }
0x1672   : > { %v19422_v63 = vpop.f32.mrf.mxu1 }
0x1674   : > { %v19424_v62 = vpop.f32.mrf.mxu1 }
0x167a   : > { %v6869_v25 = vpop.f32.mrf.mxu0 }
0x167b   : > { %v6870_v35 = vadd.f32 %v23104_v18, %v6869_v25  ;;  %v19428_v25 = vpop.f32.mrf.mxu1 }
0x167c   : > { %v6871_v42 = vpop.f32.mrf.mxu0 }
0x167d   : > { %v6872_v51 = vadd.f32 %v23105_v11, %v6871_v42  ;;  %v13871_v42 = vpop.f32.mrf.mxu1 }
0x167e   : > { %v6873_v0 = vpop.f32.mrf.mxu0 }
0x167f   : > { %v6878_v45 = vmax.f32 %v6870_v35, %v6872_v51  ;;  %v6874_v2 = vadd.f32 %v23106_v26, %v6873_v0  ;;  %v19430_v11 = vpop.f32.mrf.mxu1 }
0x1680   : > { %v6875_v13 = vpop.f32.mrf.mxu0 }
0x1681   : > { %v6876_v6 = vadd.f32 %v23107_v57, %v6875_v13  ;;  %6879 = vmax.xlane.f32.xlu1 %v6878_v45  ;;  %v13872_v13 = vpop.f32.mrf.mxu1 }
0x1683   : > { %v6881_v37 = vmax.f32 %v6874_v2, %v6876_v6 }
0x1685   : > { %6882 = vmax.xlane.f32.xlu0 %v6881_v37  ;;  %v6818_v37 = vpack.c.bf16 %v13872_v13, %v13871_v42  ;;  %v14060_v42 = vld [vmem:[%s22189_s11] sm:$0xff]  }
0x1686   : > { %v14064_v13 = vld [vmem:[#allocation2 + $0x20] sm:$0xff]  }
0x1687   : > { %v6834_v48 = vmul.bf16 %v23108_v14, %v6818_v37  ;;  %v14058_v14 = vld [vmem:[%s22189_s11 + $0x10] sm:$0xff]   ;;  %v6791_v37 = vpop.f32.mrf.mxu1 }
0x1689   : > { %12970 = vmatprep.subr.bf16.mxu0 %v6834_v48  ;;  %v14054_v48 = vld [vmem:[#allocation2] sm:$0xff]  }
0x170a   : > { %v6880_v18 = vpop.xlane.xlu1 %6879 }
0x170b   : > { %v6884_v0 = vsub.f32 %v6870_v35, %v6880_v18  ;;  %v6885_v45 = vsub.f32 %v6872_v51, %v6880_v18  ;;  %v14053_v51 = vld [vmem:[%s22189_s11 + $0x30] sm:$0xff]   ;;  %v14061_v18 = vld [vmem:[#allocation2 + $0x8] sm:$0xff]  }
0x170d   : > { %v6888_v26 = vmul.f32 1.442695, %v6884_v0  ;;  %v6890_v57 = vmul.f32 1.442695, %v6885_v45  ;;  %v14062_v0 = vld [vmem:[#allocation2 + $0x10] sm:$0xff]   ;;  %v14063_v45 = vld [vmem:[#allocation2 + $0x18] sm:$0xff]  }
0x170e   : > { %v6883_v41 = vpop.xlane.xlu0 %6882 }
0x170f   : > { %14312 = vpow2.f32 %v6888_v26  ;;  %v6886_v34 = vsub.f32 %v6874_v2, %v6883_v41  ;;  %v6887_v61 = vsub.f32 %v6876_v6, %v6883_v41  ;;  %v14055_v41 = vld [vmem:[%s22189_s11 + $0x28] sm:$0xff]  }
0x1710   : > { %14314 = vpow2.f32 %v6890_v57  ;;  %v14065_v26 = vld [vmem:[#allocation2 + $0x28] sm:$0xff]   ;;  %v14066_v57 = vld [vmem:[#allocation2 + $0x30] sm:$0xff]  }
0x1711   : > { %v6892_v53 = vmul.f32 1.442695, %v6886_v34  ;;  %v6894_v39 = vmul.f32 1.442695, %v6887_v61  ;;  %v14057_v34 = vld [vmem:[%s22189_s11 + $0x18] sm:$0xff]  }
0x1713   : > { %14316 = vpow2.f32 %v6892_v53  ;;  %v14059_v53 = vld [vmem:[%s22189_s11 + $0x8] sm:$0xff]  }
0x1714   : > { %14318 = vpow2.f32 %v6894_v39 }
0x171c   : > { %v19433_v15 = vpop.eup %14312 }
0x171d   : > { %v14315_v35 = vpop.eup %14314 }
0x171e   : > { %6992 = vmatprep.mubr.f32.mxu1 %v14315_v35 }
0x171f   : > { %6993 = vmatmul.mubr.f32.vlgmr.msra.gmra.mxu1 %v19433_v15 }
0x1720   : > { %v19439_v2 = vpop.eup %14316  ;;  %13881 = vmatpush3.bf16.msra.mxu1 %v14052_v19  ;;  %v14056_v19 = vld [vmem:[%s22189_s11 + $0x20] sm:$0xff]  }
0x1721   : > { %v14319_v6 = vpop.eup %14318  ;;  %13882 = vmatprep.subr.bf16.mxu1 %v14053_v51  ;;  %v7086_v61 = vpack.c.bf16 %v19439_v2, %v19433_v15 }
0x1722   : > { %6997 = vmatprep.mubr.f32.mxu1 %v14319_v6  ;;  %v7087_v39 = vpack.c.bf16 %v14319_v6, %v14315_v35 }
0x1723   : > { %6998 = vmatmul.mubr.f32.gmra.mxu1 %v19439_v2 }
0x1724   : > { %13883 = vmatpush3.bf16.msra.mxu1 %v14053_v51  ;;  %13896 = vmatprep.mubr.bf16.mxu1 %v14054_v48  ;;  %v6817_v48 = vpack.c.bf16 %v6791_v37, %v19430_v11  ;;  %v14522_v37 = vld [vmem:[%s14759_s24 + $0x20] sm:$0xff] }
0x1725   : > { %13884 = vmatprep.subr.bf16.mxu1 %v14055_v41 }
0x1728   : > { %13885 = vmatpush3.bf16.msra.mxu1 %v14055_v41 }
0x1729   : > { %13886 = vmatprep.subr.bf16.mxu1 %v14056_v19 }
0x172c   : > { %13887 = vmatpush3.bf16.msra.mxu1 %v14056_v19 }
0x172d   : > { %13888 = vmatprep.subr.bf16.mxu1 %v14057_v34 }
0x1730   : > { %13889 = vmatpush3.bf16.msra.mxu1 %v14057_v34 }
0x1731   : > { %13890 = vmatprep.subr.bf16.mxu1 %v14058_v14 }
0x1734   : > { %13891 = vmatpush3.bf16.msra.mxu1 %v14058_v14  ;;  %v23109_v14 = vpack.c.bf16 %v19394_v20, %v19390_v31 }
0x1735   : > { %13892 = vmatprep.subr.bf16.mxu1 %v14059_v53 }
0x1738   : > { %13893 = vmatpush3.bf16.msra.mxu1 %v14059_v53  ;;  %v6826_v53 = vmul.bf16 %v19066_v30, %v23109_v14  ;;  %v6815_v30 = vpack.c.bf16 %v19428_v25, %v19422_v63 }
0x1739   : > { %13894 = vmatprep.subr.bf16.mxu1 %v14060_v42 }
0x173c   : > { %13895 = vmatpush3.bf16.msra.mxu1 %v14060_v42  ;;  %v6809_v42 = vpack.c.bf16 %v19398_v46, %v19392_v7  ;;  %v6807_v7 = vpack.c.bf16 %v19388_v24, %v19382_v58 }
0x173e   : > { %v6825_v11 = vmul.bf16 %v19088_v32, %v6809_v42  ;;  %v6831_v32 = vmul.bf16 %v19124_v38, %v6815_v30  ;;  %v6823_v20 = vmul.bf16 %v19132_v16, %v6807_v7  ;;  %v6805_v38 = vpack.c.bf16 %v19378_v33, %v19372_v54  ;;  %v14525_v42 = vld [vmem:[%s14759_s24 + $0x38] sm:$0xff] }
0x173f   : > { %13897 = vmatmul.mubr.bf16.vlgmr.msra.gmra.mxu1 %v14061_v18  ;;  %v6833_v18 = vmul.bf16 %v19079_v12, %v6817_v48  ;;  %v23111_v12 = vpack.c.bf16 %v19384_v29, %v19380_v43  ;;  %v6803_v54 = vpack.c.bf16 %v19368_v23, %v19362_v3  ;;  %v14518_v23 = vld [vmem:[%s14759_s24] sm:$0xff]  ;;  %v14524_v48 = vld [vmem:[%s14759_s24 + $0x28] sm:$0xff] }
0x1740   : > { %13900 = vmatprep.mubr.bf16.mxu1 %v14062_v0  ;;  %v23110_v0 = vpack.c.bf16 %v19424_v62, %v19420_v27  ;;  %v6813_v27 = vpack.c.bf16 %v19418_v8, %v19412_v28  ;;  %v6821_v58 = vmul.bf16 %v19176_v55, %v6805_v38  ;;  %v23120_v62 = vmov 0  }
0x1741   : > { %v6824_v31 = vmul.bf16 %v19111_v59, %v23111_v12  ;;  %v23113_v59 = vpack.c.bf16 %v19374_v52, %v19370_v56  ;;  %v6811_v56 = vpack.c.bf16 %v19408_v49, %v19402_v60  ;;  %v14519_v49 = vld [vmem:[%s14759_s24 + $0x10] sm:$0xff] }
0x1742   : > { %v6829_v16 = vmul.bf16 %v19168_v21, %v6813_v27 }
0x1743   : > { %v6822_v43 = vmul.bf16 %v19155_v47, %v23113_v59  ;;  %v23115_v47 = vpack.c.bf16 %v19364_v5, %v19360_v10  ;;  %v6827_v52 = vmul.bf16 %v19210_v40, %v6811_v56  ;;  %v23116_v10 = vld [vmem:[#allocation11_spill] sm:$0xff] }
0x1745   : > { %v6820_v21 = vmul.bf16 %v19197_v1, %v23115_v47  ;;  %v6819_v1 = vmul.bf16 %v23116_v10, %v6803_v54 }
0x1747   : > { %13901 = vmatmul.mubr.bf16.gmra.mxu1 %v14063_v45  ;;  %v6832_v45 = vmul.bf16 %v19096_v44, %v23110_v0  ;;  %v23112_v44 = vpack.c.bf16 %v19414_v4, %v19410_v22  ;;  %v14520_v4 = vld [vmem:[%s14759_s24 + $0x8] sm:$0xff]  ;;  %v14526_v0 = vld [vmem:[%s14759_s24 + $0x40] sm:$0xff] }
0x1748   : > { %13904 = vmatprep.mubr.bf16.mxu1 %v14064_v13  ;;  %v14521_v13 = vld [vmem:[%s14759_s24 + $0x18] sm:$0xff] }
0x1749   : > { %v6830_v46 = vmul.bf16 %v19140_v50, %v23112_v44  ;;  %v23114_v50 = vpack.c.bf16 %v19404_v9, %v19400_v36 }
0x174b   : > { %v6828_v29 = vmul.bf16 %v19184_v17, %v23114_v50  ;;  %v19517_v17 = vld [vmem:[%s22190_s12] ss:$0 sm:$0xff] }
0x174f   : > { %13905 = vmatmul.mubr.bf16.gmra.mxu1 %v14065_v26 }
0x1750   : > { %13908 = vmatprep.mubr.bf16.mxu1 %v14066_v57 }
0x17df   : > { %v12960_v35 = vpop.f32.mrf.mxu1 }
0x17e1   : > { %v12961_v51 = vpop.f32.mrf.mxu1 }
0x17e2   : > { %v12962_v6 = vadd.f32 %v12961_v51, %v12960_v35  ;;  %v14523_v51 = vld [vmem:[%s14759_s24 + $0x30] sm:$0xff] }
0x17e3   : > { %v12963_v41 = vpop.f32.mrf.mxu1 }
0x17e4   : > { %13877 = vmatprep.mubr.msk.f32.mxu0 %vm1358_vm0, %v12962_v6 }
0x17e5   : > { %v12964_v19 = vpop.f32.mrf.mxu1 }
0x17e6   : > { %v12965_v34 = vadd.f32 %v12964_v19, %v12963_v41 }
0x17e8   : > { %13878 = vmatmul.mubr.msk.f32.vlgmr.msra.gmra.mxu0 %vm1358_vm0, %v12965_v34 }
0x17e9   : > { %12971 = vmatpush3.bf16.msra.mxu0 %v6826_v53  ;;  %7120 = vmatprep.mubr.bf16.mxu0 %v7087_v39 }
0x17ea   : > { %12972 = vmatprep.subr.bf16.mxu0 %v6833_v18 }
0x17ed   : > { %12973 = vmatpush3.bf16.msra.mxu0 %v6825_v11 }
0x17ee   : > { %12974 = vmatprep.subr.bf16.mxu0 %v6832_v45 }
0x17f1   : > { %12975 = vmatpush3.bf16.msra.mxu0 %v6824_v31  ;;  %v14527_v31 = vld [vmem:[%s14759_s24 + $0x50] sm:$0xff] }
0x17f2   : > { %12976 = vmatprep.subr.bf16.mxu0 %v6831_v32 }
0x17f5   : > { %12977 = vmatpush3.bf16.msra.mxu0 %v6823_v20  ;;  %v14528_v20 = vld [vmem:[%s14759_s24 + $0x48] sm:$0xff] }
0x17f6   : > { %12978 = vmatprep.subr.bf16.mxu0 %v6830_v46  ;;  %v14529_v46 = vld [vmem:[%s14759_s24 + $0x58] sm:$0xff] }
0x17f9   : > { %12979 = vmatpush3.bf16.msra.mxu0 %v6822_v43 }
0x17fa   : > { %12980 = vmatprep.subr.bf16.mxu0 %v6829_v16 }
0x17fd   : > { %12981 = vmatpush3.bf16.msra.mxu0 %v6821_v58 }
0x17fe   : > { %12982 = vmatprep.subr.bf16.mxu0 %v6828_v29 }
0x17ff   : > { %v13898_v55 = vpop.f32.mrf.mxu1 }
0x1800   : > { %v7321_v3 = vadd.f32 %v13898_v55, %v19517_v17 }
0x1801   : > { %12983 = vmatpush3.bf16.msra.mxu0 %v6820_v21  ;;  %v7312_v33 = vpop.f32.mrf.mxu1 }
0x1802   : > { %v7313_v24 = vadd.f32 %v19517_v17, %v7312_v33  ;;  %12984 = vmatprep.subr.bf16.mxu0 %v6827_v52  ;;  %v19528_v22 = vadd.f32 %v14519_v49, %v7321_v3 }
0x1803   : > { %v13899_v5 = vpop.f32.mrf.mxu1 }
0x1804   : > { %v19523_v36 = vadd.f32 %v14518_v23, %v7313_v24  ;;  %23118 = vst [vmem:[#allocation79_spill] sm:$0xff] %v19528_v22  ;;  %v7324_v28 = vadd.f32 %v13899_v5, %v19517_v17 }
0x1805   : > { %12985 = vmatpush3.bf16.msra.mxu0 %v6819_v1  ;;  %v7315_v40 = vpop.f32.mrf.mxu1 }
0x1806   : > { %23117 = vst [vmem:[#allocation10_spill] sm:$0xff] %v19523_v36  ;;  %v7316_v60 = vadd.f32 %v19517_v17, %v7315_v40  ;;  %7393 = vadd.xlane.f32.xlu0 %v19523_v36  ;;  %v19542_v26 = vadd.f32 %v14521_v13, %v7324_v28 }
0x1807   : > { %v13902_v9 = vpop.f32.mrf.mxu1 }
0x1808   : > { %v19532_v8 = vadd.f32 %v14520_v4, %v7316_v60  ;;  %7121 = vmatmul.mubr.bf16.vlgmr.msra.gmra.mxu0 %v7086_v61  ;;  %23121 = vst [vmem:[#allocation68_spill] sm:$0xff] %v19542_v26  ;;  %v7337_v57 = vadd.f32 %v13902_v9, %v19517_v17  ;;  %v14530_v4 = vld [vmem:[%s14759_s24 + $0x60] sm:$0xff] }
0x1809   : > { %v7328_v63 = vpop.f32.mrf.mxu1  ;;  %8505 = vmatprep.mubr.bf16.mxu0 %v23120_v62 }
0x180a   : > { %23119 = vst [vmem:[#allocation90_spill] sm:$0xff] %v19532_v8  ;;  %v7329_v25 = vadd.f32 %v19517_v17, %v7328_v63  ;;  %7395 = vadd.xlane.f32.xlu1 %v19532_v8  ;;  %7397 = vadd.xlane.f32.xlu0 %v19528_v22  ;;  %v19552_v6 = vadd.f32 %v14523_v51, %v7337_v57 }
0x180b   : > { %v13903_v39 = vpop.f32.mrf.mxu1 }
0x180c   : > { %v19546_v15 = vadd.f32 %v14522_v37, %v7329_v25  ;;  %23123 = vst [vmem:[#allocation26_spill] sm:$0xff] %v19552_v6  ;;  %v7340_v41 = vadd.f32 %v13903_v39, %v19517_v17 }
0x180d   : > { %v7331_v2 = vpop.f32.mrf.mxu1 }
0x180e   : > { %23122 = vst [vmem:[#allocation27_spill] sm:$0xff] %v19546_v15  ;;  %v7332_v61 = vadd.f32 %v19517_v17, %v7331_v2  ;;  %7399 = vadd.xlane.f32.xlu1 %v19542_v26  ;;  %7401 = vadd.xlane.f32.xlu0 %v19546_v15  ;;  %v19562_v18 = vadd.f32 %v14525_v42, %v7340_v41  ;;  %v14532_v41 = vld [vmem:[%s14759_s24 + $0x68] sm:$0xff] }
0x180f   : > { %v13906_v35 = vpop.f32.mrf.mxu1 }
0x1810   : > { %v19556_v19 = vadd.f32 %v14524_v48, %v7332_v61  ;;  %23125 = vst [vmem:[#allocation80_spill] sm:$0xff] %v19562_v18  ;;  %v7353_v11 = vadd.f32 %v13906_v35, %v19517_v17  ;;  %v14531_v61 = vld [vmem:[%s14759_s24 + $0x70] sm:$0xff] }
0x1811   : > { %v7344_v34 = vpop.f32.mrf.mxu1 }
0x1812   : > { %23124 = vst [vmem:[#allocation21_spill] sm:$0xff] %v19556_v19  ;;  %v7345_v14 = vadd.f32 %v19517_v17, %v7344_v34  ;;  %7403 = vadd.xlane.f32.xlu1 %v19556_v19  ;;  %7405 = vadd.xlane.f32.xlu0 %v19552_v6  ;;  %v19572_v7 = vadd.f32 %v14527_v31, %v7353_v11 }
0x1813   : > { %v13907_v53 = vpop.f32.mrf.mxu1 }
0x1814   : > { %v19566_v45 = vadd.f32 %v14526_v0, %v7345_v14  ;;  %23127 = vst [vmem:[#allocation67_spill] sm:$0xff] %v19572_v7  ;;  %v7356_v32 = vadd.f32 %v13907_v53, %v19517_v17 }
0x1815   : > { %v7347_v30 = vpop.f32.mrf.mxu1 }
0x1816   : > { %23126 = vst [vmem:[#allocation66_spill] sm:$0xff] %v19566_v45  ;;  %v7348_v12 = vadd.f32 %v19517_v17, %v7347_v30  ;;  %7407 = vadd.xlane.f32.xlu1 %v19562_v18  ;;  %7409 = vadd.xlane.f32.xlu0 %v19566_v45  ;;  %v19581_v27 = vadd.f32 %v14529_v46, %v7356_v32 }
0x1818   : > { %v19576_v44 = vadd.f32 %v14528_v20, %v7348_v12  ;;  %23129 = vst [vmem:[#allocation33_spill] sm:$0xff] %v19581_v27 }
0x181a   : > { %23128 = vst [vmem:[#allocation41_spill] sm:$0xff] %v19576_v44  ;;  %7411 = vadd.xlane.f32.xlu1 %v19576_v44  ;;  %7413 = vadd.xlane.f32.xlu0 %v19572_v7 }
0x181e   : > { %7415 = vadd.xlane.f32.xlu1 %v19581_v27 }
0x188f   : > { %v7394_v24 = vpop.xlane.xlu0 %7393 }
0x1890   : > { %v7425_v60 = vmul.f32 0.0078125, %v7394_v24  ;;  %v7742_v24 = vld [vmem:[%s22193_s15 + $0x3c8] sm:$0xff] }
0x1892   : > { %v19593_v13 = vsub.f32 %v19523_v36, %v7425_v60 }
0x1893   : > { %v7396_v10 = vpop.xlane.xlu1 %7395  ;;  %v7398_v1 = vpop.xlane.xlu0 %7397 }
0x1894   : > { %v7426_v57 = vmul.f32 0.0078125, %v7396_v10  ;;  %v7427_v2 = vmul.f32 0.0078125, %v7398_v1  ;;  %v7457_v53 = vmul.f32 %v19593_v13, %v19593_v13 }
0x1896   : > { %v19605_v14 = vsub.f32 %v19532_v8, %v7426_v57  ;;  %v19610_v42 = vsub.f32 %v19528_v22, %v7427_v2 }
0x1897   : > { %v7400_v3 = vpop.xlane.xlu1 %7399  ;;  %v7402_v9 = vpop.xlane.xlu0 %7401 }
0x1898   : > { %v7428_v11 = vmul.f32 0.0078125, %v7400_v3  ;;  %v7429_v0 = vmul.f32 0.0078125, %v7402_v9  ;;  %v7717_v9 = vld [vmem:[%s22193_s15 + $0x300] sm:$0xff] }
0x189a   : > { %v19617_v46 = vsub.f32 %v19542_v26, %v7428_v11 }
0x189b   : > { %v7404_v37 = vpop.xlane.xlu1 %7403  ;;  %v7406_v34 = vpop.xlane.xlu0 %7405 }
0x189c   : > { %v7430_v31 = vmul.f32 0.0078125, %v7404_v37  ;;  %v7431_v32 = vmul.f32 0.0078125, %v7406_v34  ;;  %v7726_v37 = vld [vmem:[%s22193_s15 + $0x348] sm:$0xff] }
0x189f   : > { %v7408_v12 = vpop.xlane.xlu1 %7407  ;;  %v7410_v20 = vpop.xlane.xlu0 %7409 }
0x18a3   : > { %v7414_v10 = vpop.xlane.xlu0 %7413 }
0x18a8   : > { %v13879_v59 = vpop.f32.mrf.mxu0 }
0x18a9   : > { %14320 = vrcp.f32 %v13879_v59  ;;  %v19620_v59 = vsub.f32 %v19546_v15, %v7429_v0 }
0x18aa   : > { %v7077_v43 = vpop.f32.mrf.mxu0 }
0x18ab   : > { %14322 = vrcp.f32 %v7077_v43  ;;  %v7458_v43 = vmul.f32 %v19605_v14, %v19605_v14 }
0x18b6   : > { %v14321_v56 = vpop.eup %14320 }
0x18b8   : > { %v14323_v21 = vpop.eup %14322 }
0x18c8   : > { %v12986_v38 = vpop.f32.mrf.mxu0 }
0x18ca   : > { %v12987_v16 = vpop.f32.mrf.mxu0 }
0x18cb   : > { %v12988_v50 = vadd.f32 %v12987_v16, %v12986_v38  ;;  %v7459_v38 = vmul.f32 %v19610_v42, %v19610_v42  ;;  %v19627_v16 = vsub.f32 %v19556_v19, %v7430_v31  ;;  %v7709_v31 = vld [vmem:[%s22193_s15 + $0x2c0] sm:$0xff] }
0x18cc   : > { %v12989_v58 = vpop.f32.mrf.mxu0 }
0x18cd   : > { %v7130_v54 = vmul.f32 %v14323_v21, %v12988_v50  ;;  %v7432_v50 = vmul.f32 0.0078125, %v7408_v12  ;;  %v7734_v21 = vld [vmem:[%s22193_s15 + $0x388] sm:$0xff]  ;;  %v7701_v12 = vld [vmem:[%s22193_s15 + $0x280] sm:$0xff] }
0x18ce   : > { %v12990_v29 = vpop.f32.mrf.mxu0  ;;  %v12117_v3 = vcombine.high %v7734_v21, %v7742_v24 }
0x18cf   : > { %v12991_v47 = vadd.f32 %v12990_v29, %v12989_v58  ;;  %v19630_v58 = vsub.f32 %v19552_v6, %v7431_v32  ;;  %v7412_v29 = vpop.xlane.xlu1 %7411  ;;  %v7702_v32 = vld [vmem:[%s22193_s15 + $0x288] sm:$0xff] }
0x18d0   : > { %8586 = vmatprep.subr.bf16.mxu1 %v12117_v3 }
0x18d1   : > { %v7132_v55 = vmul.f32 %v14321_v56, %v12991_v47  ;;  %v7733_v56 = vld [vmem:[%s22193_s15 + $0x380] sm:$0xff]  ;;  %v7463_v60 = vmul.f32 %v19630_v58, %v19630_v58 }
0x18d2   : > { %v7741_v47 = vld [vmem:[%s22193_s15 + $0x3c0] sm:$0xff] }
0x18d3   : > { %v12319_v52 = vpack.c.bf16 %v7132_v55, %v7130_v54  ;;  %v7433_v54 = vmul.f32 0.0078125, %v7410_v20  ;;  %v7460_v55 = vmul.f32 %v19617_v46, %v19617_v46  ;;  %v12114_v1 = vcombine.low %v7733_v56, %v7741_v47  ;;  %v7416_v2 = vpop.xlane.xlu1 %7415 }
0x18d4   : > { %v7436_v0 = vmul.f32 0.0078125, %v7416_v2  ;;  %v12083_v20 = vcombine.high %v7701_v12, %v7709_v31  ;;  %v7661_v2 = vld [vmem:[%s22193_s15 + $0x140] sm:$0xff] }
0x18d5   : > { %12327 = vst [vmem:[#allocation2 + $0x38] sm:$0xff] %v12319_v52   ;;  %v7461_v52 = vmul.f32 %v19620_v59, %v19620_v59 }
0x18dc   : > { %v14067_v33 = vld [vmem:[#allocation2 + $0x38] sm:$0xff]  }
0x18dd   : > { %13909 = vmatmul.mubr.bf16.gmra.mxu1 %v14067_v33  ;;  %v12115_v33 = vcombine.high %v7733_v56, %v7741_v47  ;;  %v19693_v56 = vsub.f32 %v19581_v27, %v7436_v0 }
0x18de   : > { %8618 = vmatprep.mubr.bf16.mxu1 %v23120_v62 }
0x18df   : > { %8473 = vmatprep.subr.bf16.mxu0 %v12115_v33  ;;  %v7468_v3 = vmul.f32 %v19693_v56, %v19693_v56 }
0x18e0   : > { %8474 = vmatpush1.bf16.msra.mxu0 %v12114_v1 }
0x199d   : > { %v13910_v5 = vpop.f32.mrf.mxu1 }
0x199e   : > { %v7369_v28 = vadd.f32 %v13910_v5, %v19517_v17  ;;  %v12116_v5 = vcombine.low %v7734_v21, %v7742_v24  ;;  %v7694_v24 = vld [vmem:[%s22193_s15 + $0x248] sm:$0xff] }
0x199f   : > { %v7360_v23 = vpop.f32.mrf.mxu1 }
0x19a0   : > { %v7361_v40 = vadd.f32 %v19517_v17, %v7360_v23  ;;  %v19596_v35 = vadd.f32 %v14531_v61, %v7369_v28  ;;  %v19649_v23 = vsub.f32 %v19562_v18, %v7432_v50  ;;  %v7718_v28 = vld [vmem:[%s22193_s15 + $0x308] sm:$0xff]  ;;  %8587 = vmatpush1.bf16.msra.mxu1 %v12116_v5 }
0x19a1   : > { %v13911_v49 = vpop.f32.mrf.mxu1 }
0x19a2   : > { %v19588_v63 = vadd.f32 %v14530_v4, %v7361_v40  ;;  %23131 = vst [vmem:[#allocation36_spill] sm:$0xff] %v19596_v35  ;;  %v7372_v51 = vadd.f32 %v13911_v49, %v19517_v17  ;;  %v7462_v40 = vmul.f32 %v19627_v16, %v19627_v16  ;;  %v7725_v49 = vld [vmem:[%s22193_s15 + $0x340] sm:$0xff]  ;;  %v19665_v4 = vsub.f32 %v19566_v45, %v7433_v54 }
0x19a3   : > { %v7363_v25 = vpop.f32.mrf.mxu1  ;;  %v12099_v57 = vcombine.high %v7717_v9, %v7725_v49  ;;  %v12098_v61 = vcombine.low %v7717_v9, %v7725_v49  ;;  %v7464_v34 = vmul.f32 %v19649_v23, %v19649_v23  ;;  %v7685_v54 = vld [vmem:[%s22193_s15 + $0x200] sm:$0xff]  ;;  %v7670_v9 = vld [vmem:[%s22193_s15 + $0x188] sm:$0xff] }
0x19a4   : > { %23130 = vst [vmem:[#allocation34_spill] sm:$0xff] %v19588_v63  ;;  %v7364_v39 = vadd.f32 %v19517_v17, %v7363_v25  ;;  %7417 = vadd.xlane.f32.xlu0 %v19588_v63  ;;  %v14533_v17 = vld [vmem:[%s14759_s24 + $0x78] sm:$0xff]  ;;  %v7434_v25 = vmul.f32 0.0078125, %v7412_v29  ;;  %s22138_s24 = scalar_lea.sflag [#allocation4], %s594_s9 }
0x19a5   : > { %v19613_v30 = vadd.f32 %v14533_v17, %v7372_v51  ;;  %v12100_v51 = vcombine.low %v7718_v28, %v7726_v37  ;;  %8475 = vmatprep.subr.bf16.mxu0 %v12099_v57  ;;  %v7465_v17 = vmul.f32 %v19665_v4, %v19665_v4 }
0x19a6   : > { %v19600_v48 = vadd.f32 %v14532_v41, %v7364_v39  ;;  %v7435_v39 = vmul.f32 0.0078125, %v7414_v10  ;;  %v12101_v41 = vcombine.high %v7718_v28, %v7726_v37  ;;  %8476 = vmatpush1.bf16.msra.mxu0 %v12098_v61  ;;  %v7678_v28 = vld [vmem:[%s22193_s15 + $0x1c8] sm:$0xff]  ;;  %v7653_v37 = vld [vmem:[%s22193_s15 + $0x100] sm:$0xff] }
0x19a7   : > { %23133 = vst [vmem:[#allocation18_spill] sm:$0xff] %v19613_v30  ;;  %8477 = vmatprep.subr.bf16.mxu0 %v12083_v20  ;;  %v12053_v57 = vcombine.high %v7670_v9, %v7678_v28  ;;  %v7654_v61 = vld [vmem:[%s22193_s15 + $0x108] sm:$0xff] }
0x19a8   : > { %23132 = vst [vmem:[#allocation32_spill] sm:$0xff] %v19600_v48  ;;  %7419 = vadd.xlane.f32.xlu1 %v19600_v48  ;;  %7421 = vadd.xlane.f32.xlu0 %v19596_v35  ;;  %v19676_v11 = vsub.f32 %v19572_v7, %v7435_v39  ;;  %v12052_v39 = vcombine.low %v7670_v9, %v7678_v28 }
0x19a9   : > { %8588 = vmatprep.subr.bf16.mxu1 %v12101_v41  ;;  %v7662_v41 = vld [vmem:[%s22193_s15 + $0x148] sm:$0xff] }
0x19aa   : > { %8589 = vmatpush1.bf16.msra.mxu1 %v12100_v51  ;;  %v7467_v21 = vmul.f32 %v19676_v11, %v19676_v11  ;;  %v12035_v51 = vcombine.high %v7653_v37, %v7661_v2  ;;  %v12036_v0 = vcombine.low %v7654_v61, %v7662_v41 }
0x19ac   : > { %7423 = vadd.xlane.f32.xlu1 %v19613_v30  ;;  %7473 = vadd.xlane.f32.xlu0 %v7457_v53  ;;  %v19673_v53 = vsub.f32 %v19576_v44, %v7434_v25 }
0x19ae   : > { %v7466_v47 = vmul.f32 %v19673_v53, %v19673_v53 }
0x19b0   : > { %7475 = vadd.xlane.f32.xlu1 %v7458_v43  ;;  %7477 = vadd.xlane.f32.xlu0 %v7459_v38  ;;  %v7710_v43 = vld [vmem:[%s22193_s15 + $0x2c8] sm:$0xff]  ;;  %v12082_v38 = vcombine.low %v7701_v12, %v7709_v31  ;;  %v7637_v12 = vld [vmem:[%s22193_s15 + $0x80] sm:$0xff] }
0x19b1   : > { %v12084_v50 = vcombine.low %v7702_v32, %v7710_v43  ;;  %v12085_v29 = vcombine.high %v7702_v32, %v7710_v43  ;;  %v7645_v31 = vld [vmem:[%s22193_s15 + $0xc0] sm:$0xff]  ;;  %v7638_v32 = vld [vmem:[%s22193_s15 + $0x88] sm:$0xff] }
0x19b2   : > { %8478 = vmatpush1.bf16.msra.mxu0 %v12082_v38  ;;  %v12019_v20 = vcombine.high %v7637_v12, %v7645_v31  ;;  %v7646_v43 = vld [vmem:[%s22193_s15 + $0xc8] sm:$0xff]  ;;  %v12018_v38 = vcombine.low %v7637_v12, %v7645_v31 }
0x19b3   : > { %8590 = vmatprep.subr.bf16.mxu1 %v12085_v29  ;;  %v12021_v29 = vcombine.high %v7638_v32, %v7646_v43 }
0x19b4   : > { %7479 = vadd.xlane.f32.xlu1 %v7460_v55  ;;  %7481 = vadd.xlane.f32.xlu0 %v7461_v52  ;;  %v7693_v55 = vld [vmem:[%s22193_s15 + $0x240] sm:$0xff]  ;;  %v7686_v52 = vld [vmem:[%s22193_s15 + $0x208] sm:$0xff] }
0x19b5   : > { %8591 = vmatpush1.bf16.msra.mxu1 %v12084_v50  ;;  %v12067_v33 = vcombine.high %v7685_v54, %v7693_v55  ;;  %v12066_v10 = vcombine.low %v7685_v54, %v7693_v55  ;;  %v12068_v1 = vcombine.low %v7686_v52, %v7694_v24  ;;  %v12069_v5 = vcombine.high %v7686_v52, %v7694_v24  ;;  %v7622_v54 = vld [vmem:[%s22193_s15 + $0x8] sm:$0xff] }
0x19b6   : > { %v12020_v50 = vcombine.low %v7638_v32, %v7646_v43  ;;  %v7630_v52 = vld [vmem:[%s22193_s15 + $0x48] sm:$0xff] }
0x19b7   : > { %8479 = vmatprep.subr.bf16.mxu0 %v12067_v33  ;;  %8592 = vmatprep.subr.bf16.mxu1 %v12069_v5  ;;  %v12004_v24 = vcombine.low %v7622_v54, %v7630_v52 }
0x19b8   : > { %7483 = vadd.xlane.f32.xlu1 %v7462_v40  ;;  %7485 = vadd.xlane.f32.xlu0 %v7463_v60  ;;  %v7669_v40 = vld [vmem:[%s22193_s15 + $0x180] sm:$0xff] }
0x19b9   : > { %8480 = vmatpush1.bf16.msra.mxu0 %v12066_v10  ;;  %v7677_v60 = vld [vmem:[%s22193_s15 + $0x1c0] sm:$0xff]  ;;  %8593 = vmatpush1.bf16.msra.mxu1 %v12068_v1  ;;  %v12005_v10 = vcombine.high %v7622_v54, %v7630_v52 }
0x19ba   : > { %v12051_v49 = vcombine.high %v7669_v40, %v7677_v60  ;;  %v12050_v25 = vcombine.low %v7669_v40, %v7677_v60  ;;  %8594 = vmatprep.subr.bf16.mxu1 %v12053_v57 }
0x19bc   : > { %7487 = vadd.xlane.f32.xlu1 %v7464_v34  ;;  %7489 = vadd.xlane.f32.xlu0 %v7465_v17  ;;  %v12034_v34 = vcombine.low %v7653_v37, %v7661_v2  ;;  %v12037_v17 = vcombine.high %v7654_v61, %v7662_v41 }
0x19bd   : > { %8481 = vmatprep.subr.bf16.mxu0 %v12051_v49  ;;  %8595 = vmatpush1.bf16.msra.mxu1 %v12052_v39 }
0x19be   : > { %8482 = vmatpush1.bf16.msra.mxu0 %v12050_v25  ;;  %8596 = vmatprep.subr.bf16.mxu1 %v12037_v17 }
0x19bf   : > { %8483 = vmatprep.subr.bf16.mxu0 %v12035_v51 }
0x19c0   : > { %7491 = vadd.xlane.f32.xlu1 %v7466_v47  ;;  %7493 = vadd.xlane.f32.xlu0 %v7467_v21  ;;  %v7621_v47 = vld [vmem:[%s22193_s15] sm:$0xff] }
0x19c1   : > { %8597 = vmatpush1.bf16.msra.mxu1 %v12036_v0  ;;  %v7629_v21 = vld [vmem:[%s22193_s15 + $0x40] sm:$0xff] }
0x19c2   : > { %8484 = vmatpush1.bf16.msra.mxu0 %v12034_v34  ;;  %8598 = vmatprep.subr.bf16.mxu1 %v12021_v29  ;;  %v12003_v55 = vcombine.high %v7621_v47, %v7629_v21  ;;  %v12002_v33 = vcombine.low %v7621_v47, %v7629_v21 }
0x19c3   : > { %8485 = vmatprep.subr.bf16.mxu0 %v12019_v20 }
0x19c4   : > { %7495 = vadd.xlane.f32.xlu1 %v7468_v3 }
0x19c5   : > { %8599 = vmatpush1.bf16.msra.mxu1 %v12020_v50 }
0x19c6   : > { %8486 = vmatpush1.bf16.msra.mxu0 %v12018_v38  ;;  %8600 = vmatprep.subr.bf16.mxu1 %v12005_v10 }
0x19c7   : > { %8487 = vmatprep.subr.bf16.mxu0 %v12003_v55 }
0x19c9   : > { %8601 = vmatpush1.bf16.msra.mxu1 %v12004_v24 }
0x19ca   : > { %8488 = vmatpush1.bf16.msra.mxu0 %v12002_v33 }
0x1a2d   : > { %v7418_v1 = vpop.xlane.xlu0 %7417 }
0x1a2e   : > { %v7437_v5 = vmul.f32 0.0078125, %v7418_v1 }
0x1a30   : > { %v19762_v3 = vsub.f32 %v19588_v63, %v7437_v5  ;;  %v7753_v63 = vlaneseq }
0x1a31   : > { %v7420_v40 = vpop.xlane.xlu1 %7419  ;;  %v7422_v60 = vpop.xlane.xlu0 %7421 }
0x1a32   : > { %v7438_v9 = vmul.f32 0.0078125, %v7420_v40  ;;  %v7439_v49 = vmul.f32 0.0078125, %v7422_v60  ;;  %v7469_v28 = vmul.f32 %v19762_v3, %v19762_v3 }
0x1a34   : > { %v19767_v25 = vsub.f32 %v19600_v48, %v7438_v9  ;;  %v19770_v39 = vsub.f32 %v19596_v35, %v7439_v49  ;;  %7497 = vadd.xlane.f32.xlu0 %v7469_v28  ;;  %v19785_v49 = vld [vmem:[%s22191_s13] ss:$0 sm:$0xff]  ;;  %v14101_v48 = vld [vmem:[%s22195_s17 + $0x1f8] sm:$0xff]  }
0x1a35   : > { %v7424_v57 = vpop.xlane.xlu1 %7423  ;;  %v7474_v37 = vpop.xlane.xlu0 %7473  ;;  %v14097_v35 = vld [vmem:[%s22195_s17 + $0xc0] sm:$0xff]  }
0x1a36   : > { %v7440_v2 = vmul.f32 0.0078125, %v7424_v57  ;;  %v7505_v61 = vmul.f32 0.0078125, %v7474_v37  ;;  %v7470_v51 = vmul.f32 %v19767_v25, %v19767_v25  ;;  %v7471_v41 = vmul.f32 %v19770_v39, %v19770_v39  ;;  %v7735_v37 = vld [vmem:[%s22193_s15 + $0x390] sm:$0xff] }
0x1a38   : > { %v19777_v34 = vsub.f32 %v19613_v30, %v7440_v2  ;;  %v7521_v0 = vadd.f32 1e-05, %v7505_v61  ;;  %7499 = vadd.xlane.f32.xlu1 %v7470_v51  ;;  %7501 = vadd.xlane.f32.xlu0 %v7471_v41  ;;  %v7743_v2 = vld [vmem:[%s22193_s15 + $0x3d0] sm:$0xff]  ;;  %v7736_v61 = vld [vmem:[%s22193_s15 + $0x398] sm:$0xff]  ;;  %v14094_v30 = vld [vmem:[%s22195_s17 + $0x8] sm:$0xff]  }
0x1a39   : > { %v7476_v17 = vpop.xlane.xlu1 %7475  ;;  %v7478_v12 = vpop.xlane.xlu0 %7477  ;;  %v12119_v41 = vcombine.high %v7735_v37, %v7743_v2 }
0x1a3a   : > { %14324 = vrsqrt.f32 %v7521_v0  ;;  %v7506_v31 = vmul.f32 0.0078125, %v7476_v17  ;;  %v7507_v32 = vmul.f32 0.0078125, %v7478_v12  ;;  %v7472_v20 = vmul.f32 %v19777_v34, %v19777_v34  ;;  %v7744_v0 = vld [vmem:[%s22193_s15 + $0x3d8] sm:$0xff] }
0x1a3b   : > { %8699 = vmatprep.subr.bf16.mxu0 %v12119_v41 }
0x1a3c   : > { %v7522_v43 = vadd.f32 1e-05, %v7506_v31  ;;  %v7523_v38 = vadd.f32 1e-05, %v7507_v32  ;;  %7503 = vadd.xlane.f32.xlu1 %v7472_v20  ;;  %v19804_v20 = vld [vmem:[%s22192_s14] ss:$0 sm:$0xff] }
0x1a3d   : > { %v7480_v50 = vpop.xlane.xlu1 %7479  ;;  %v7482_v29 = vpop.xlane.xlu0 %7481 }
0x1a3e   : > { %14326 = vrsqrt.f32 %v7522_v43  ;;  %v7508_v47 = vmul.f32 0.0078125, %v7480_v50  ;;  %v7509_v21 = vmul.f32 0.0078125, %v7482_v29 }
0x1a3f   : > { %14328 = vrsqrt.f32 %v7523_v38  ;;  %v12121_v38 = vcombine.high %v7736_v61, %v7744_v0 }
0x1a40   : > { %v7524_v54 = vadd.f32 1e-05, %v7508_v47  ;;  %v7525_v33 = vadd.f32 1e-05, %v7509_v21 }
0x1a41   : > { %v7484_v55 = vpop.xlane.xlu1 %7483  ;;  %v7486_v10 = vpop.xlane.xlu0 %7485  ;;  %8812 = vmatprep.subr.bf16.mxu1 %v12121_v38 }
0x1a42   : > { %14330 = vrsqrt.f32 %v7524_v54  ;;  %v7510_v52 = vmul.f32 0.0078125, %v7484_v55  ;;  %v7511_v60 = vmul.f32 0.0078125, %v7486_v10  ;;  %v7728_v10 = vld [vmem:[%s22193_s15 + $0x358] sm:$0xff] }
0x1a44   : > { %v7526_v24 = vadd.f32 1e-05, %v7510_v52  ;;  %v7527_v51 = vadd.f32 1e-05, %v7511_v60  ;;  %v12120_v60 = vcombine.low %v7736_v61, %v7744_v0  ;;  %v7712_v61 = vld [vmem:[%s22193_s15 + $0x2d8] sm:$0xff] }
0x1a45   : > { %v7488_v1 = vpop.xlane.xlu1 %7487  ;;  %v7490_v31 = vpop.xlane.xlu0 %7489 }
0x1a46   : > { %14332 = vrsqrt.f32 %v7526_v24  ;;  %v7512_v5 = vmul.f32 0.0078125, %v7488_v1  ;;  %v7513_v47 = vmul.f32 0.0078125, %v7490_v31  ;;  %v7720_v24 = vld [vmem:[%s22193_s15 + $0x318] sm:$0xff] }
0x1a47   : > { %v14325_v40 = vpop.eup %14324  ;;  %14334 = vrsqrt.f32 %v7525_v33  ;;  %v7727_v33 = vld [vmem:[%s22193_s15 + $0x350] sm:$0xff]  ;;  %v12104_v38 = vcombine.low %v7720_v24, %v7728_v10 }
0x1a48   : > { %v7553_v9 = vmul.f32 %v14325_v40, %v19593_v13  ;;  %v7528_v28 = vadd.f32 1e-05, %v7512_v5 }
0x1a49   : > { %v7492_v57 = vpop.xlane.xlu1 %7491 }
0x1a4a   : > { %v7575_v17 = vmul.f32 %v19785_v49, %v7553_v9  ;;  %v7514_v43 = vmul.f32 0.0078125, %v7492_v57  ;;  %14336 = vrsqrt.f32 %v7528_v28  ;;  %v12105_v57 = vcombine.high %v7720_v24, %v7728_v10 }
0x1a4b   : > { %v14327_v13 = vpop.eup %14326  ;;  %14338 = vrsqrt.f32 %v7527_v51 }
0x1a4c   : > { %v7554_v12 = vmul.f32 %v14327_v13, %v19605_v14  ;;  %v14329_v32 = vpop.eup %14328  ;;  %v7719_v14 = vld [vmem:[%s22193_s15 + $0x310] sm:$0xff]  ;;  %v7597_v21 = vadd.f32 %v19804_v20, %v7575_v17  ;;  %v7530_v1 = vadd.f32 1e-05, %v7514_v43  ;;  %v7529_v17 = vadd.f32 1e-05, %v7513_v47 }
0x1a4d   : > { %v7555_v55 = vmul.f32 %v14329_v32, %v19610_v42  ;;  %v12118_v42 = vcombine.low %v7735_v37, %v7743_v2  ;;  %v7496_v9 = vpop.xlane.xlu1 %7495  ;;  %v12103_v28 = vcombine.high %v7719_v14, %v7727_v33  ;;  %v7703_v13 = vld [vmem:[%s22193_s15 + $0x290] sm:$0xff]  ;;  %v7704_v2 = vld [vmem:[%s22193_s15 + $0x298] sm:$0xff]  ;;  %v12102_v43 = vcombine.low %v7719_v14, %v7727_v33 }
0x1a4e   : > { %v7576_v50 = vmul.f32 %v19785_v49, %v7554_v12  ;;  %v7711_v37 = vld [vmem:[%s22193_s15 + $0x2d0] sm:$0xff]  ;;  %14340 = vrsqrt.f32 %v7530_v1  ;;  %v7494_v12 = vpop.xlane.xlu0 %7493  ;;  %v7516_v32 = vmul.f32 0.0078125, %v7496_v9  ;;  %v12089_v47 = vcombine.high %v7704_v2, %v7712_v61  ;;  %v7696_v14 = vld [vmem:[%s22193_s15 + $0x258] sm:$0xff] }
0x1a4f   : > { %v14331_v29 = vpop.eup %14330  ;;  %v7577_v41 = vmul.f32 %v19785_v49, %v7555_v55  ;;  %14342 = vrsqrt.f32 %v7529_v17  ;;  %v7695_v55 = vld [vmem:[%s22193_s15 + $0x250] sm:$0xff]  ;;  %v12086_v10 = vcombine.low %v7703_v13, %v7711_v37  ;;  %v12088_v1 = vcombine.low %v7704_v2, %v7712_v61 }
0x1a50   : > { %v7598_v54 = vadd.f32 %v19804_v20, %v7576_v50  ;;  %v7556_v52 = vmul.f32 %v14331_v29, %v19617_v46  ;;  %v12087_v29 = vcombine.high %v7703_v13, %v7711_v37  ;;  %v7532_v24 = vadd.f32 1e-05, %v7516_v32  ;;  %v7671_v9 = vld [vmem:[%s22193_s15 + $0x190] sm:$0xff] }
0x1a51   : > { %v7679_v13 = vld [vmem:[%s22193_s15 + $0x1d0] sm:$0xff] }
0x1a52   : > { %v19823_v5 = vpack.c.bf16 %v7598_v54, %v7597_v21  ;;  %v7578_v40 = vmul.f32 %v19785_v49, %v7556_v52  ;;  %v7599_v21 = vadd.f32 %v19804_v20, %v7577_v41  ;;  %v7515_v54 = vmul.f32 0.0078125, %v7494_v12  ;;  %v7680_v41 = vld [vmem:[%s22193_s15 + $0x1d8] sm:$0xff]  ;;  %v7655_v32 = vld [vmem:[%s22193_s15 + $0x110] sm:$0xff] }
0x1a53   : > { %v14333_v46 = vpop.eup %14332  ;;  %14344 = vrsqrt.f32 %v7532_v24  ;;  %v12055_v12 = vcombine.high %v7671_v9, %v7679_v13  ;;  %v7640_v24 = vld [vmem:[%s22193_s15 + $0x98] sm:$0xff] }
0x1a54   : > { %v14335_v51 = vpop.eup %14334  ;;  %8506 = vmatmul.mubr.bf16.vlgmr.msra.gmra.mxu0 %v19823_v5  ;;  %8619 = vmatmul.mubr.bf16.vlgmr.msra.gmra.mxu1 %v19823_v5  ;;  %v7558_v0 = vmul.f32 %v14333_v46, %v19627_v16  ;;  %v7600_v31 = vadd.f32 %v19804_v20, %v7578_v40  ;;  %v7687_v16 = vld [vmem:[%s22193_s15 + $0x210] sm:$0xff] }
0x1a55   : > { %8515 = vmatprep.mubr.bf16.mxu0 %v23120_v62  ;;  %8628 = vmatprep.mubr.bf16.mxu1 %v23120_v62  ;;  %v7557_v50 = vmul.f32 %v14335_v51, %v19620_v59  ;;  %v7688_v59 = vld [vmem:[%s22193_s15 + $0x218] sm:$0xff]  ;;  %v12070_v2 = vcombine.low %v7687_v16, %v7695_v55 }
0x1a56   : > { %8700 = vmatpush1.bf16.msra.mxu0 %v12118_v42  ;;  %8813 = vmatpush1.bf16.msra.mxu1 %v12120_v60  ;;  %v7580_v52 = vmul.f32 %v19785_v49, %v7558_v0  ;;  %v19860_v33 = vpack.c.bf16 %v7600_v31, %v7599_v21  ;;  %v12071_v60 = vcombine.high %v7687_v16, %v7695_v55  ;;  %v7672_v51 = vld [vmem:[%s22193_s15 + $0x198] sm:$0xff] }
0x1a57   : > { %8701 = vmatprep.subr.bf16.mxu0 %v12103_v28  ;;  %8814 = vmatprep.subr.bf16.mxu1 %v12105_v57  ;;  %v14337_v40 = vpop.eup %14336  ;;  %v7579_v42 = vmul.f32 %v19785_v49, %v7557_v50  ;;  %v12073_v46 = vcombine.high %v7688_v59, %v7696_v14  ;;  %v7531_v57 = vadd.f32 1e-05, %v7515_v54  ;;  %v12072_v61 = vcombine.low %v7688_v59, %v7696_v14  ;;  %v7664_v50 = vld [vmem:[%s22193_s15 + $0x158] sm:$0xff]  ;;  %v7639_v59 = vld [vmem:[%s22193_s15 + $0x90] sm:$0xff] }
0x1a58   : > { %v14339_v28 = vpop.eup %14338  ;;  %v7602_v17 = vadd.f32 %v19804_v20, %v7580_v52  ;;  %v7560_v37 = vmul.f32 %v14337_v40, %v19649_v23  ;;  %v12057_v31 = vcombine.high %v7672_v51, %v7680_v41  ;;  %v7663_v23 = vld [vmem:[%s22193_s15 + $0x150] sm:$0xff]  ;;  %v12056_v21 = vcombine.low %v7672_v51, %v7680_v41  ;;  %v7624_v41 = vld [vmem:[%s22193_s15 + $0x18] sm:$0xff] }
0x1a59   : > { %v7601_v0 = vadd.f32 %v19804_v20, %v7579_v42  ;;  %14346 = vrsqrt.f32 %v7531_v57  ;;  %v12039_v54 = vcombine.high %v7655_v32, %v7663_v23  ;;  %v7647_v52 = vld [vmem:[%s22193_s15 + $0xd0] sm:$0xff] }
0x1a5a   : > { %8702 = vmatpush1.bf16.msra.mxu0 %v12102_v43  ;;  %8815 = vmatpush1.bf16.msra.mxu1 %v12104_v38  ;;  %v7559_v43 = vmul.f32 %v14339_v28, %v19630_v58  ;;  %v7656_v38 = vld [vmem:[%s22193_s15 + $0x118] sm:$0xff]  ;;  %v7582_v16 = vmul.f32 %v19785_v49, %v7560_v37  ;;  %v12054_v58 = vcombine.low %v7671_v9, %v7679_v13  ;;  %v7623_v57 = vld [vmem:[%s22193_s15 + $0x10] sm:$0xff] }
0x1a5b   : > { %8703 = vmatprep.subr.bf16.mxu0 %v12087_v29  ;;  %8816 = vmatprep.subr.bf16.mxu1 %v12089_v47  ;;  %v19895_v29 = vpack.c.bf16 %v7602_v17, %v7601_v0  ;;  %v14341_v47 = vpop.eup %14340  ;;  %v12041_v55 = vcombine.high %v7656_v38, %v7664_v50  ;;  %v12023_v9 = vcombine.high %v7639_v59, %v7647_v52  ;;  %v7631_v51 = vld [vmem:[%s22193_s15 + $0x50] sm:$0xff]  ;;  %v7632_v17 = vld [vmem:[%s22193_s15 + $0x58] sm:$0xff] }
0x1a5c   : > { %8516 = vmatmul.mubr.bf16.gmra.mxu0 %v19860_v33  ;;  %8629 = vmatmul.mubr.bf16.gmra.mxu1 %v19860_v33  ;;  %v7581_v14 = vmul.f32 %v19785_v49, %v7559_v43  ;;  %v7562_v40 = vmul.f32 %v14341_v47, %v19673_v53  ;;  %v7604_v42 = vadd.f32 %v19804_v20, %v7582_v16 }
0x1a5d   : > { %8525 = vmatprep.mubr.bf16.mxu0 %v23120_v62  ;;  %8638 = vmatprep.mubr.bf16.mxu1 %v23120_v62  ;;  %v12008_v47 = vcombine.low %v7624_v41, %v7632_v17 }
0x1a5e   : > { %8704 = vmatpush1.bf16.msra.mxu0 %v12086_v10  ;;  %8817 = vmatpush1.bf16.msra.mxu1 %v12088_v1  ;;  %v7648_v10 = vld [vmem:[%s22193_s15 + $0xd8] sm:$0xff]  ;;  %v14343_v1 = vpop.eup %14342  ;;  %v7603_v53 = vadd.f32 %v19804_v20, %v7581_v14  ;;  %v7584_v37 = vmul.f32 %v19785_v49, %v7562_v40  ;;  %v19962_v14 = vld [vmem:[%s22193_s15 + $0x3a0] sm:$0xff] }
0x1a5f   : > { %8705 = vmatprep.subr.bf16.mxu0 %v12071_v60  ;;  %8818 = vmatprep.subr.bf16.mxu1 %v12073_v46  ;;  %v12038_v60 = vcombine.low %v7655_v32, %v7663_v23  ;;  %v12040_v46 = vcombine.low %v7656_v38, %v7664_v50  ;;  %v12025_v28 = vcombine.high %v7640_v24, %v7648_v10 }
0x1a60   : > { %v7561_v13 = vmul.f32 %v14343_v1, %v19665_v4  ;;  %v12024_v4 = vcombine.low %v7640_v24, %v7648_v10  ;;  %v14345_v0 = vpop.eup %14344  ;;  %v7606_v23 = vadd.f32 %v19804_v20, %v7584_v37  ;;  %v12006_v50 = vcombine.low %v7623_v57, %v7631_v51  ;;  %v19972_v24 = vld [vmem:[%s22193_s15 + $0x3a8] sm:$0xff] }
0x1a61   : > { %v7564_v38 = vmul.f32 %v14345_v0, %v19693_v56  ;;  %v19979_v1 = vld [vmem:[%s22193_s15 + $0x3e8] sm:$0xff] }
0x1a62   : > { %8706 = vmatpush1.bf16.msra.mxu0 %v12070_v2  ;;  %8819 = vmatpush1.bf16.msra.mxu1 %v12072_v61  ;;  %v19932_v2 = vpack.c.bf16 %v7604_v42, %v7603_v53  ;;  %v12022_v61 = vcombine.low %v7639_v59, %v7647_v52  ;;  %v7583_v32 = vmul.f32 %v19785_v49, %v7561_v13  ;;  %v19967_v52 = vld [vmem:[%s22193_s15 + $0x3e0] sm:$0xff] }
0x1a63   : > { %8707 = vmatprep.subr.bf16.mxu0 %v12055_v12  ;;  %8820 = vmatprep.subr.bf16.mxu1 %v12057_v31  ;;  %v12007_v12 = vcombine.high %v7623_v57, %v7631_v51  ;;  %v12009_v31 = vcombine.high %v7624_v41, %v7632_v17  ;;  %v12123_v10 = vcombine.high %v19962_v14, %v19967_v52 }
0x1a64   : > { %8526 = vmatmul.mubr.bf16.gmra.mxu0 %v19895_v29  ;;  %8639 = vmatmul.mubr.bf16.gmra.mxu1 %v19895_v29  ;;  %v7605_v16 = vadd.f32 %v19804_v20, %v7583_v32  ;;  %v12122_v40 = vcombine.low %v19962_v14, %v19967_v52  ;;  %v12124_v42 = vcombine.low %v19972_v24, %v19979_v1  ;;  %v7730_v14 = vld [vmem:[%s22193_s15 + $0x368] sm:$0xff] }
0x1a65   : > { %8535 = vmatprep.mubr.bf16.mxu0 %v23120_v62  ;;  %8648 = vmatprep.mubr.bf16.mxu1 %v23120_v62 }
0x1a66   : > { %8708 = vmatpush1.bf16.msra.mxu0 %v12054_v58  ;;  %8821 = vmatpush1.bf16.msra.mxu1 %v12056_v21  ;;  %v14347_v43 = vpop.eup %14346  ;;  %v19943_v21 = vpack.c.bf16 %v7606_v23, %v7605_v16 }
0x1a67   : > { %8709 = vmatprep.subr.bf16.mxu0 %v12039_v54  ;;  %8822 = vmatprep.subr.bf16.mxu1 %v12041_v55  ;;  %v7563_v58 = vmul.f32 %v14347_v43, %v19676_v11  ;;  %v7586_v54 = vmul.f32 %v19785_v49, %v7564_v38 }
0x1a69   : > { %v7585_v55 = vmul.f32 %v19785_v49, %v7563_v58  ;;  %v7608_v56 = vadd.f32 %v19804_v20, %v7586_v54 }
0x1a6a   : > { %8710 = vmatpush1.bf16.msra.mxu0 %v12038_v60  ;;  %8823 = vmatpush1.bf16.msra.mxu1 %v12040_v46  ;;  %v12125_v60 = vcombine.high %v19972_v24, %v19979_v1  ;;  %v7713_v1 = vld [vmem:[%s22193_s15 + $0x2e0] sm:$0xff] }
0x1a6b   : > { %8711 = vmatprep.subr.bf16.mxu0 %v12023_v9  ;;  %8824 = vmatprep.subr.bf16.mxu1 %v12025_v28  ;;  %v7607_v11 = vadd.f32 %v19804_v20, %v7585_v55 }
0x1a6c   : > { %8536 = vmatmul.mubr.bf16.gmra.mxu0 %v19932_v2  ;;  %8649 = vmatmul.mubr.bf16.gmra.mxu1 %v19932_v2 }
0x1a6d   : > { %8545 = vmatprep.mubr.bf16.mxu0 %v23120_v62  ;;  %8658 = vmatprep.mubr.bf16.mxu1 %v23120_v62  ;;  %v19953_v59 = vpack.c.bf16 %v7608_v56, %v7607_v11 }
0x1a6e   : > { %8712 = vmatpush1.bf16.msra.mxu0 %v12022_v61  ;;  %8825 = vmatpush1.bf16.msra.mxu1 %v12024_v4 }
0x1a6f   : > { %8713 = vmatprep.subr.bf16.mxu0 %v12007_v12  ;;  %8826 = vmatprep.subr.bf16.mxu1 %v12009_v31 }
0x1a72   : > { %8714 = vmatpush1.bf16.msra.mxu0 %v12006_v50  ;;  %8827 = vmatpush1.bf16.msra.mxu1 %v12008_v47 }
0x1a73   : > { %8925 = vmatprep.subr.bf16.mxu0 %v12123_v10  ;;  %9038 = vmatprep.subr.bf16.mxu1 %v12125_v60  ;;  %v7705_v10 = vld [vmem:[%s22193_s15 + $0x2a0] sm:$0xff]  ;;  %v7706_v60 = vld [vmem:[%s22193_s15 + $0x2a8] sm:$0xff] }
0x1a74   : > { %8546 = vmatmul.mubr.bf16.gmra.mxu0 %v19943_v21  ;;  %8659 = vmatmul.mubr.bf16.gmra.mxu1 %v19943_v21 }
0x1a75   : > { %8555 = vmatprep.mubr.bf16.mxu0 %v23120_v62  ;;  %8668 = vmatprep.mubr.bf16.mxu1 %v23120_v62 }
0x1a7c   : > { %8556 = vmatmul.mubr.bf16.gmra.mxu0 %v19953_v59  ;;  %8669 = vmatmul.mubr.bf16.gmra.mxu1 %v19953_v59 }
0x1a7d   : > { %8565 = vmatprep.mubr.bf16.mxu0 %v23120_v62  ;;  %8678 = vmatprep.mubr.bf16.mxu1 %v23120_v62 }
0x1abd   : > { %v7498_v46 = vpop.xlane.xlu0 %7497 }
0x1abe   : > { %v7517_v9 = vmul.f32 0.0078125, %v7498_v46  ;;  %v7714_v46 = vld [vmem:[%s22193_s15 + $0x2e8] sm:$0xff] }
0x1ac0   : > { %v7533_v28 = vadd.f32 1e-05, %v7517_v9 }
0x1ac1   : > { %v7500_v57 = vpop.xlane.xlu1 %7499  ;;  %v7502_v53 = vpop.xlane.xlu0 %7501 }
0x1ac2   : > { %14348 = vrsqrt.f32 %v7533_v28  ;;  %v7518_v13 = vmul.f32 0.0078125, %v7500_v57  ;;  %v7519_v51 = vmul.f32 0.0078125, %v7502_v53  ;;  %v12091_v57 = vcombine.high %v7705_v10, %v7713_v1 }
0x1ac3   : > { %v12093_v53 = vcombine.high %v7706_v60, %v7714_v46 }
0x1ac4   : > { %v7534_v41 = vadd.f32 1e-05, %v7518_v13  ;;  %v7535_v17 = vadd.f32 1e-05, %v7519_v51  ;;  %v7689_v13 = vld [vmem:[%s22193_s15 + $0x220] sm:$0xff] }
0x1ac5   : > { %v7504_v37 = vpop.xlane.xlu1 %7503  ;;  %v7697_v51 = vld [vmem:[%s22193_s15 + $0x260] sm:$0xff] }
0x1ac6   : > { %14350 = vrsqrt.f32 %v7534_v41  ;;  %v7520_v61 = vmul.f32 0.0078125, %v7504_v37  ;;  %v7690_v41 = vld [vmem:[%s22193_s15 + $0x228] sm:$0xff]  ;;  %v12075_v37 = vcombine.high %v7689_v13, %v7697_v51 }
0x1ac7   : > { %14352 = vrsqrt.f32 %v7535_v17  ;;  %v12092_v17 = vcombine.low %v7706_v60, %v7714_v46  ;;  %v7633_v60 = vld [vmem:[%s22193_s15 + $0x60] sm:$0xff]  ;;  %v7626_v46 = vld [vmem:[%s22193_s15 + $0x28] sm:$0xff] }
0x1ac8   : > { %v7536_v4 = vadd.f32 1e-05, %v7520_v61 }
0x1aca   : > { %14354 = vrsqrt.f32 %v7536_v4  ;;  %v7673_v4 = vld [vmem:[%s22193_s15 + $0x1a0] sm:$0xff] }
0x1acf   : > { %v14349_v0 = vpop.eup %14348 }
0x1ad0   : > { %v7565_v12 = vmul.f32 %v14349_v0, %v19762_v3  ;;  %v7681_v0 = vld [vmem:[%s22193_s15 + $0x1e0] sm:$0xff] }
0x1ad2   : > { %v7587_v32 = vmul.f32 %v19785_v49, %v7565_v12  ;;  %v7674_v12 = vld [vmem:[%s22193_s15 + $0x1a8] sm:$0xff] }
0x1ad3   : > { %v14351_v31 = vpop.eup %14350 }
0x1ad4   : > { %v7566_v43 = vmul.f32 %v14351_v31, %v19767_v25  ;;  %v14353_v23 = vpop.eup %14352  ;;  %v7609_v47 = vadd.f32 %v19804_v20, %v7587_v32  ;;  %v7682_v31 = vld [vmem:[%s22193_s15 + $0x1e8] sm:$0xff]  ;;  %v12074_v32 = vcombine.low %v7689_v13, %v7697_v51  ;;  %v7739_v51 = vld [vmem:[%s22193_s15 + $0x3b0] sm:$0xff] }
0x1ad5   : > { %v7567_v58 = vmul.f32 %v14353_v23, %v19770_v39  ;;  %v12059_v23 = vcombine.high %v7673_v4, %v7681_v0 }
0x1ad6   : > { %v7588_v38 = vmul.f32 %v19785_v49, %v7566_v43 }
0x1ad7   : > { %v14355_v50 = vpop.eup %14354  ;;  %v7589_v56 = vmul.f32 %v19785_v49, %v7567_v58  ;;  %v7666_v58 = vld [vmem:[%s22193_s15 + $0x168] sm:$0xff] }
0x1ad8   : > { %v7610_v16 = vadd.f32 %v19804_v20, %v7588_v38  ;;  %v7568_v54 = vmul.f32 %v14355_v50, %v19777_v34  ;;  %v7721_v34 = vld [vmem:[%s22193_s15 + $0x320] sm:$0xff]  ;;  %v12061_v38 = vcombine.high %v7674_v12, %v7682_v31 }
0x1ad9   : > { %v7611_v39 = vadd.f32 %v19804_v20, %v7589_v56  ;;  %v7657_v50 = vld [vmem:[%s22193_s15 + $0x120] sm:$0xff] }
0x1ada   : > { %v19995_v55 = vpack.c.bf16 %v7610_v16, %v7609_v47  ;;  %v7590_v3 = vmul.f32 %v19785_v49, %v7568_v54  ;;  %v7729_v49 = vld [vmem:[%s22193_s15 + $0x360] sm:$0xff]  ;;  %v7658_v16 = vld [vmem:[%s22193_s15 + $0x128] sm:$0xff]  ;;  %v12058_v54 = vcombine.low %v7673_v4, %v7681_v0  ;;  %v7723_v0 = vld [vmem:[%s22193_s15 + $0x330] sm:$0xff] }
0x1adb   : > { %v12107_v52 = vcombine.high %v7721_v34, %v7729_v49  ;;  %v12106_v9 = vcombine.low %v7721_v34, %v7729_v49  ;;  %v7665_v47 = vld [vmem:[%s22193_s15 + $0x160] sm:$0xff]  ;;  %v7642_v49 = vld [vmem:[%s22193_s15 + $0xa8] sm:$0xff] }
0x1adc   : > { %8566 = vmatmul.mubr.bf16.gmra.mxu0 %v19995_v55  ;;  %8679 = vmatmul.mubr.bf16.gmra.mxu1 %v19995_v55  ;;  %v7612_v25 = vadd.f32 %v19804_v20, %v7590_v3  ;;  %v7722_v20 = vld [vmem:[%s22193_s15 + $0x328] sm:$0xff]  ;;  %v12060_v3 = vcombine.low %v7674_v12, %v7682_v31  ;;  %v12043_v56 = vcombine.high %v7657_v50, %v7665_v47  ;;  %v7649_v34 = vld [vmem:[%s22193_s15 + $0xe0] sm:$0xff]  ;;  %v7731_v12 = vld [vmem:[%s22193_s15 + $0x370] sm:$0xff] }
0x1add   : > { %8575 = vmatprep.mubr.bf16.mxu0 %v23120_v62  ;;  %8688 = vmatprep.mubr.bf16.mxu1 %v23120_v62  ;;  %v12109_v24 = vcombine.high %v7722_v20, %v7730_v14  ;;  %v12108_v28 = vcombine.low %v7722_v20, %v7730_v14  ;;  %v7650_v20 = vld [vmem:[%s22193_s15 + $0xe8] sm:$0xff]  ;;  %v12042_v14 = vcombine.low %v7657_v50, %v7665_v47  ;;  %v7724_v31 = vld [vmem:[%s22193_s15 + $0x338] sm:$0xff]  ;;  %v7707_v47 = vld [vmem:[%s22193_s15 + $0x2b0] sm:$0xff] }
0x1ade   : > { %v20005_v11 = vpack.c.bf16 %v7612_v25, %v7611_v39  ;;  %v12045_v25 = vcombine.high %v7658_v16, %v7666_v58  ;;  %v7641_v39 = vld [vmem:[%s22193_s15 + $0xa0] sm:$0xff] }
0x1ae4   : > { %8576 = vmatmul.mubr.bf16.gmra.mxu0 %v20005_v11  ;;  %8689 = vmatmul.mubr.bf16.gmra.mxu1 %v20005_v11 }
0x1ae5   : > { %8731 = vmatprep.mubr.bf16.mxu0 %v23120_v62  ;;  %8844 = vmatprep.mubr.bf16.mxu1 %v23120_v62 }
0x1aec   : > { %8732 = vmatmul.mubr.bf16.vlgmr.msra.gmra.mxu0 %v19823_v5  ;;  %8845 = vmatmul.mubr.bf16.vlgmr.msra.gmra.mxu1 %v19823_v5 }
0x1aed   : > { %8741 = vmatprep.mubr.bf16.mxu0 %v23120_v62  ;;  %8854 = vmatprep.mubr.bf16.mxu1 %v23120_v62 }
0x1aee   : > { %8926 = vmatpush1.bf16.msra.mxu0 %v12122_v40  ;;  %9039 = vmatpush1.bf16.msra.mxu1 %v12124_v42  ;;  %v7698_v40 = vld [vmem:[%s22193_s15 + $0x268] sm:$0xff]  ;;  %v12090_v42 = vcombine.low %v7705_v10, %v7713_v1  ;;  %v12029_v10 = vcombine.high %v7642_v49, %v7650_v20  ;;  %v7625_v1 = vld [vmem:[%s22193_s15 + $0x20] sm:$0xff] }
0x1aef   : > { %8927 = vmatprep.subr.bf16.mxu0 %v12107_v52  ;;  %9040 = vmatprep.subr.bf16.mxu1 %v12109_v24  ;;  %v12077_v61 = vcombine.high %v7690_v41, %v7698_v40  ;;  %v12076_v43 = vcombine.low %v7690_v41, %v7698_v40  ;;  %v12044_v52 = vcombine.low %v7658_v16, %v7666_v58  ;;  %v7747_v41 = vld [vmem:[%s22193_s15 + $0x3f0] sm:$0xff]  ;;  %v7740_v40 = vld [vmem:[%s22193_s15 + $0x3b8] sm:$0xff] }
0x1af0   : > { %v12027_v24 = vcombine.high %v7641_v39, %v7649_v34  ;;  %v7715_v16 = vld [vmem:[%s22193_s15 + $0x2f0] sm:$0xff]  ;;  %v7708_v58 = vld [vmem:[%s22193_s15 + $0x2b8] sm:$0xff] }
0x1af2   : > { %8928 = vmatpush1.bf16.msra.mxu0 %v12106_v9  ;;  %9041 = vmatpush1.bf16.msra.mxu1 %v12108_v28  ;;  %v7634_v9 = vld [vmem:[%s22193_s15 + $0x68] sm:$0xff]  ;;  %v12026_v28 = vcombine.low %v7641_v39, %v7649_v34  ;;  %v7691_v34 = vld [vmem:[%s22193_s15 + $0x230] sm:$0xff] }
0x1af3   : > { %8929 = vmatprep.subr.bf16.mxu0 %v12091_v57  ;;  %9042 = vmatprep.subr.bf16.mxu1 %v12093_v53  ;;  %v12028_v57 = vcombine.low %v7642_v49, %v7650_v20  ;;  %v12011_v53 = vcombine.high %v7625_v1, %v7633_v60  ;;  %v12013_v13 = vcombine.high %v7626_v46, %v7634_v9  ;;  %v7699_v49 = vld [vmem:[%s22193_s15 + $0x270] sm:$0xff]  ;;  %v7692_v20 = vld [vmem:[%s22193_s15 + $0x238] sm:$0xff] }
0x1af4   : > { %8742 = vmatmul.mubr.bf16.gmra.mxu0 %v19860_v33  ;;  %8855 = vmatmul.mubr.bf16.gmra.mxu1 %v19860_v33 }
0x1af5   : > { %8751 = vmatprep.mubr.bf16.mxu0 %v23120_v62  ;;  %8864 = vmatprep.mubr.bf16.mxu1 %v23120_v62 }
0x1af6   : > { %8930 = vmatpush1.bf16.msra.mxu0 %v12090_v42  ;;  %9043 = vmatpush1.bf16.msra.mxu1 %v12092_v17  ;;  %v7748_v42 = vld [vmem:[%s22193_s15 + $0x3f8] sm:$0xff]  ;;  %v12010_v17 = vcombine.low %v7625_v1, %v7633_v60  ;;  %v7675_v60 = vld [vmem:[%s22193_s15 + $0x1b0] sm:$0xff] }
0x1af7   : > { %8931 = vmatprep.subr.bf16.mxu0 %v12075_v37  ;;  %9044 = vmatprep.subr.bf16.mxu1 %v12077_v61  ;;  %v12012_v37 = vcombine.low %v7626_v46, %v7634_v9  ;;  %v12127_v61 = vcombine.high %v7739_v51, %v7747_v41  ;;  %v12129_v4 = vcombine.high %v7740_v40, %v7748_v42  ;;  %v7683_v46 = vld [vmem:[%s22193_s15 + $0x1f0] sm:$0xff]  ;;  %v7676_v9 = vld [vmem:[%s22193_s15 + $0x1b8] sm:$0xff] }
0x1afa   : > { %8932 = vmatpush1.bf16.msra.mxu0 %v12074_v32  ;;  %9045 = vmatpush1.bf16.msra.mxu1 %v12076_v43  ;;  %v7732_v32 = vld [vmem:[%s22193_s15 + $0x378] sm:$0xff]  ;;  %v12126_v43 = vcombine.low %v7739_v51, %v7747_v41  ;;  %v7659_v41 = vld [vmem:[%s22193_s15 + $0x130] sm:$0xff] }
0x1afb   : > { %8933 = vmatprep.subr.bf16.mxu0 %v12059_v23  ;;  %9046 = vmatprep.subr.bf16.mxu1 %v12061_v38  ;;  %v12128_v23 = vcombine.low %v7740_v40, %v7748_v42  ;;  %v12111_v38 = vcombine.high %v7723_v0, %v7731_v12  ;;  %v12113_v50 = vcombine.high %v7724_v31, %v7732_v32  ;;  %v7667_v40 = vld [vmem:[%s22193_s15 + $0x170] sm:$0xff]  ;;  %v7660_v42 = vld [vmem:[%s22193_s15 + $0x138] sm:$0xff] }
0x1afc   : > { %8752 = vmatmul.mubr.bf16.gmra.mxu0 %v19895_v29  ;;  %8865 = vmatmul.mubr.bf16.gmra.mxu1 %v19895_v29 }
0x1afd   : > { %8761 = vmatprep.mubr.bf16.mxu0 %v23120_v62  ;;  %8874 = vmatprep.mubr.bf16.mxu1 %v23120_v62 }
0x1afe   : > { %8934 = vmatpush1.bf16.msra.mxu0 %v12058_v54  ;;  %9047 = vmatpush1.bf16.msra.mxu1 %v12060_v3  ;;  %v7716_v54 = vld [vmem:[%s22193_s15 + $0x2f8] sm:$0xff]  ;;  %v12110_v3 = vcombine.low %v7723_v0, %v7731_v12  ;;  %v7643_v12 = vld [vmem:[%s22193_s15 + $0xb0] sm:$0xff] }
0x1aff   : > { %8935 = vmatprep.subr.bf16.mxu0 %v12043_v56  ;;  %9048 = vmatprep.subr.bf16.mxu1 %v12045_v25  ;;  %v12112_v56 = vcombine.low %v7724_v31, %v7732_v32  ;;  %v12095_v25 = vcombine.high %v7707_v47, %v7715_v16  ;;  %v12097_v39 = vcombine.high %v7708_v58, %v7716_v54  ;;  %v7651_v31 = vld [vmem:[%s22193_s15 + $0xf0] sm:$0xff]  ;;  %v7644_v32 = vld [vmem:[%s22193_s15 + $0xb8] sm:$0xff] }
0x1b02   : > { %8936 = vmatpush1.bf16.msra.mxu0 %v12042_v14  ;;  %9049 = vmatpush1.bf16.msra.mxu1 %v12044_v52  ;;  %v7700_v14 = vld [vmem:[%s22193_s15 + $0x278] sm:$0xff]  ;;  %v12094_v52 = vcombine.low %v7707_v47, %v7715_v16  ;;  %v12031_v16 = vcombine.high %v7643_v12, %v7651_v31 }
0x1b03   : > { %8937 = vmatprep.subr.bf16.mxu0 %v12027_v24  ;;  %9050 = vmatprep.subr.bf16.mxu1 %v12029_v10  ;;  %v12096_v24 = vcombine.low %v7708_v58, %v7716_v54  ;;  %v12079_v10 = vcombine.high %v7691_v34, %v7699_v49  ;;  %v12081_v1 = vcombine.high %v7692_v20, %v7700_v14  ;;  %v7627_v54 = vld [vmem:[%s22193_s15 + $0x30] sm:$0xff] }
0x1b04   : > { %8762 = vmatmul.mubr.bf16.gmra.mxu0 %v19932_v2  ;;  %8875 = vmatmul.mubr.bf16.gmra.mxu1 %v19932_v2 }
0x1b05   : > { %8771 = vmatprep.mubr.bf16.mxu0 %v23120_v62  ;;  %8884 = vmatprep.mubr.bf16.mxu1 %v23120_v62 }
0x1b06   : > { %8938 = vmatpush1.bf16.msra.mxu0 %v12026_v28  ;;  %9051 = vmatpush1.bf16.msra.mxu1 %v12028_v57  ;;  %v7684_v28 = vld [vmem:[%s22193_s15 + $0x1f8] sm:$0xff]  ;;  %v12078_v57 = vcombine.low %v7691_v34, %v7699_v49  ;;  %v12030_v49 = vcombine.low %v7643_v12, %v7651_v31 }
0x1b07   : > { %8939 = vmatprep.subr.bf16.mxu0 %v12011_v53  ;;  %9052 = vmatprep.subr.bf16.mxu1 %v12013_v13  ;;  %v12080_v53 = vcombine.low %v7692_v20, %v7700_v14  ;;  %v12063_v13 = vcombine.high %v7675_v60, %v7683_v46  ;;  %v12065_v51 = vcombine.high %v7676_v9, %v7684_v28 }
0x1b0a   : > { %8940 = vmatpush1.bf16.msra.mxu0 %v12010_v17  ;;  %9053 = vmatpush1.bf16.msra.mxu1 %v12012_v37  ;;  %v7668_v17 = vld [vmem:[%s22193_s15 + $0x178] sm:$0xff]  ;;  %v12062_v37 = vcombine.low %v7675_v60, %v7683_v46 }
0x1b0b   : > { %9151 = vmatprep.subr.bf16.mxu0 %v12127_v61  ;;  %9264 = vmatprep.subr.bf16.mxu1 %v12129_v4  ;;  %v12064_v61 = vcombine.low %v7676_v9, %v7684_v28  ;;  %v12047_v4 = vcombine.high %v7659_v41, %v7667_v40  ;;  %v12049_v0 = vcombine.high %v7660_v42, %v7668_v17  ;;  %v14068_v46 = vld [vmem:[%s22195_s17 + $0x78] sm:$0xff]  }
0x1b0c   : > { %8772 = vmatmul.mubr.bf16.gmra.mxu0 %v19943_v21  ;;  %8885 = vmatmul.mubr.bf16.gmra.mxu1 %v19943_v21  ;;  %v12048_v47 = vcombine.low %v7660_v42, %v7668_v17  ;;  %v14069_v9 = vld [vmem:[%s22195_s17 + $0xf8] sm:$0xff]  }
0x1b0d   : > { %8781 = vmatprep.mubr.bf16.mxu0 %v23120_v62  ;;  %8894 = vmatprep.mubr.bf16.mxu1 %v23120_v62 }
0x1b14   : > { %8782 = vmatmul.mubr.bf16.gmra.mxu0 %v19953_v59  ;;  %8895 = vmatmul.mubr.bf16.gmra.mxu1 %v19953_v59 }
0x1b15   : > { %8791 = vmatprep.mubr.bf16.mxu0 %v23120_v62  ;;  %8904 = vmatprep.mubr.bf16.mxu1 %v23120_v62 }
0x1b1c   : > { %8792 = vmatmul.mubr.bf16.gmra.mxu0 %v19995_v55  ;;  %8905 = vmatmul.mubr.bf16.gmra.mxu1 %v19995_v55 }
0x1b1d   : > { %8801 = vmatprep.mubr.bf16.mxu0 %v23120_v62  ;;  %8914 = vmatprep.mubr.bf16.mxu1 %v23120_v62 }
0x1b24   : > { %8802 = vmatmul.mubr.bf16.gmra.mxu0 %v20005_v11  ;;  %8915 = vmatmul.mubr.bf16.gmra.mxu1 %v20005_v11 }
0x1b25   : > { %8957 = vmatprep.mubr.bf16.mxu0 %v23120_v62  ;;  %9070 = vmatprep.mubr.bf16.mxu1 %v23120_v62 }
0x1b2c   : > { %8958 = vmatmul.mubr.bf16.vlgmr.msra.gmra.mxu0 %v19823_v5  ;;  %9071 = vmatmul.mubr.bf16.vlgmr.msra.gmra.mxu1 %v19823_v5 }
0x1b2d   : > { %8967 = vmatprep.mubr.bf16.mxu0 %v23120_v62  ;;  %9080 = vmatprep.mubr.bf16.mxu1 %v23120_v62 }
0x1b2e   : > { %9152 = vmatpush1.bf16.msra.mxu0 %v12126_v43  ;;  %9265 = vmatpush1.bf16.msra.mxu1 %v12128_v23  ;;  %v7652_v43 = vld [vmem:[%s22193_s15 + $0xf8] sm:$0xff]  ;;  %v20223_v23 = vpop.f32.mrf.mxu0 }
0x1b2f   : > { %9153 = vmatprep.subr.bf16.mxu0 %v12111_v38  ;;  %9266 = vmatprep.subr.bf16.mxu1 %v12113_v50  ;;  %v20225_v38 = vpop.f32.mrf.mxu1  ;;  %v12046_v50 = vcombine.low %v7659_v41, %v7667_v40  ;;  %v12033_v58 = vcombine.high %v7644_v32, %v7652_v43  ;;  %v12032_v20 = vcombine.low %v7644_v32, %v7652_v43 }
0x1b31   : > { %v20241_v34 = vpop.f32.mrf.mxu1 }
0x1b32   : > { %9154 = vmatpush1.bf16.msra.mxu0 %v12110_v3  ;;  %9267 = vmatpush1.bf16.msra.mxu1 %v12112_v56  ;;  %v7635_v3 = vld [vmem:[%s22193_s15 + $0x70] sm:$0xff]  ;;  %v7628_v56 = vld [vmem:[%s22193_s15 + $0x38] sm:$0xff] }
0x1b33   : > { %9155 = vmatprep.subr.bf16.mxu0 %v12095_v25  ;;  %9268 = vmatprep.subr.bf16.mxu1 %v12097_v39  ;;  %v7636_v25 = vld [vmem:[%s22193_s15 + $0x78] sm:$0xff]  ;;  %v20239_v39 = vpop.f32.mrf.mxu0  ;;  %v12015_v14 = vcombine.high %v7627_v54, %v7635_v3 }
0x1b34   : > { %8968 = vmatmul.mubr.bf16.gmra.mxu0 %v19860_v33  ;;  %9081 = vmatmul.mubr.bf16.gmra.mxu1 %v19860_v33  ;;  %v12016_v60 = vcombine.low %v7628_v56, %v7636_v25 }
0x1b35   : > { %8977 = vmatprep.mubr.bf16.mxu0 %v23120_v62  ;;  %9090 = vmatprep.mubr.bf16.mxu1 %v23120_v62 }
0x1b36   : > { %9156 = vmatpush1.bf16.msra.mxu0 %v12094_v52  ;;  %9269 = vmatpush1.bf16.msra.mxu1 %v12096_v24  ;;  %v12017_v52 = vcombine.high %v7628_v56, %v7636_v25  ;;  %v20247_v24 = vpop.f32.mrf.mxu0  ;;  %v14074_v25 = vld [vmem:[%s22195_s17 + $0x30] sm:$0xff]  }
0x1b37   : > { %9157 = vmatprep.subr.bf16.mxu0 %v12079_v10  ;;  %9270 = vmatprep.subr.bf16.mxu1 %v12081_v1  ;;  %v20249_v10 = vpop.f32.mrf.mxu1  ;;  %v12014_v1 = vcombine.low %v7627_v54, %v7635_v3  ;;  %v14073_v54 = vld [vmem:[%s22195_s17 + $0xf0] sm:$0xff]  }
0x1b38   : > { %v20257_v28 = vpop.f32.mrf.mxu0 }
0x1b3a   : > { %9158 = vmatpush1.bf16.msra.mxu0 %v12078_v57  ;;  %9271 = vmatpush1.bf16.msra.mxu1 %v12080_v53  ;;  %v20259_v57 = vpop.f32.mrf.mxu1  ;;  %v20265_v53 = vpop.f32.mrf.mxu0 }
0x1b3b   : > { %9159 = vmatprep.subr.bf16.mxu0 %v12063_v13  ;;  %9272 = vmatprep.subr.bf16.mxu1 %v12065_v51 }
0x1b3c   : > { %8978 = vmatmul.mubr.bf16.gmra.mxu0 %v19895_v29  ;;  %9091 = vmatmul.mubr.bf16.gmra.mxu1 %v19895_v29  ;;  %v20267_v13 = vpop.f32.mrf.mxu1  ;;  %v20269_v51 = vpop.f32.mrf.mxu0 }
0x1b3d   : > { %8987 = vmatprep.mubr.bf16.mxu0 %v23120_v62  ;;  %9100 = vmatprep.mubr.bf16.mxu1 %v23120_v62 }
0x1b3e   : > { %9160 = vmatpush1.bf16.msra.mxu0 %v12062_v37  ;;  %9273 = vmatpush1.bf16.msra.mxu1 %v12064_v61  ;;  %v20271_v41 = vpop.f32.mrf.mxu1  ;;  %v20277_v40 = vpop.f32.mrf.mxu0 }
0x1b3f   : > { %9161 = vmatprep.subr.bf16.mxu0 %v12047_v4  ;;  %9274 = vmatprep.subr.bf16.mxu1 %v12049_v0 }
0x1b40   : > { %v20279_v42 = vpop.f32.mrf.mxu1  ;;  %v20281_v17 = vpop.f32.mrf.mxu0 }
0x1b42   : > { %9162 = vmatpush1.bf16.msra.mxu0 %v12046_v50  ;;  %9275 = vmatpush1.bf16.msra.mxu1 %v12048_v47  ;;  %v20283_v37 = vpop.f32.mrf.mxu1  ;;  %v20289_v61 = vpop.f32.mrf.mxu0  ;;  %v14070_v47 = vld [vmem:[%s22195_s17 + $0x38] sm:$0xff]  }
0x1b43   : > { %9163 = vmatprep.subr.bf16.mxu0 %v12031_v16  ;;  %9276 = vmatprep.subr.bf16.mxu1 %v12033_v58  ;;  %v14071_v16 = vld [vmem:[%s22195_s17 + $0xb8] sm:$0xff]   ;;  %v14072_v58 = vld [vmem:[%s22195_s17 + $0x70] sm:$0xff]  }
0x1b44   : > { %8988 = vmatmul.mubr.bf16.gmra.mxu0 %v19932_v2  ;;  %9101 = vmatmul.mubr.bf16.gmra.mxu1 %v19932_v2  ;;  %v20291_v4 = vpop.f32.mrf.mxu1  ;;  %v20293_v0 = vpop.f32.mrf.mxu0 }
0x1b45   : > { %8997 = vmatprep.mubr.bf16.mxu0 %v23120_v62  ;;  %9110 = vmatprep.mubr.bf16.mxu1 %v23120_v62 }
0x1b46   : > { %9164 = vmatpush1.bf16.msra.mxu0 %v12030_v49  ;;  %9277 = vmatpush1.bf16.msra.mxu1 %v12032_v20  ;;  %v20295_v12 = vpop.f32.mrf.mxu1  ;;  %v20301_v31 = vpop.f32.mrf.mxu0  ;;  %v14075_v49 = vld [vmem:[%s22195_s17 + $0xb0] sm:$0xff]   ;;  %v14077_v20 = vld [vmem:[%s22195_s17 + $0xe8] sm:$0xff]  }
0x1b47   : > { %9165 = vmatprep.subr.bf16.mxu0 %v12015_v14  ;;  %9278 = vmatprep.subr.bf16.mxu1 %v12017_v52 }
0x1b48   : > { %v20303_v32 = vpop.f32.mrf.mxu1  ;;  %v20305_v43 = vpop.f32.mrf.mxu0 }
0x1b4a   : > { %9166 = vmatpush1.bf16.msra.mxu0 %v12014_v1  ;;  %9279 = vmatpush1.bf16.msra.mxu1 %v12016_v60  ;;  %v20307_v50 = vpop.f32.mrf.mxu1  ;;  %v20325_v3 = vpop.f32.mrf.mxu0  ;;  %v14078_v1 = vld [vmem:[%s22195_s17 + $0x28] sm:$0xff]  }
0x1b4b   : > { %13008 = vmatprep.subr.bf16.mxu0 %v14068_v46  ;;  %13072 = vmatprep.subr.bf16.mxu1 %v14069_v9  ;;  %v14079_v60 = vld [vmem:[%s22195_s17 + $0xa8] sm:$0xff]   ;;  %v14080_v46 = vld [vmem:[%s22195_s17 + $0x60] sm:$0xff]  }
0x1b4c   : > { %8998 = vmatmul.mubr.bf16.gmra.mxu0 %v19943_v21  ;;  %9111 = vmatmul.mubr.bf16.gmra.mxu1 %v19943_v21  ;;  %v20327_v56 = vpop.f32.mrf.mxu1  ;;  %v20341_v14 = vpop.f32.mrf.mxu0  ;;  %v14081_v9 = vld [vmem:[%s22195_s17 + $0xe0] sm:$0xff]  }
0x1b4d   : > { %9007 = vmatprep.mubr.bf16.mxu0 %v23120_v62  ;;  %9120 = vmatprep.mubr.bf16.mxu1 %v23120_v62 }
0x1b4e   : > { %v20343_v52 = vpop.f32.mrf.mxu1 }
0x1b54   : > { %9008 = vmatmul.mubr.bf16.gmra.mxu0 %v19953_v59  ;;  %9121 = vmatmul.mubr.bf16.gmra.mxu1 %v19953_v59 }
0x1b55   : > { %9017 = vmatprep.mubr.bf16.mxu0 %v23120_v62  ;;  %9130 = vmatprep.mubr.bf16.mxu1 %v23120_v62 }
0x1b5c   : > { %9018 = vmatmul.mubr.bf16.gmra.mxu0 %v19995_v55  ;;  %9131 = vmatmul.mubr.bf16.gmra.mxu1 %v19995_v55 }
0x1b5d   : > { %9027 = vmatprep.mubr.bf16.mxu0 %v23120_v62  ;;  %9140 = vmatprep.mubr.bf16.mxu1 %v23120_v62 }
0x1b64   : > { %9028 = vmatmul.mubr.bf16.gmra.mxu0 %v20005_v11  ;;  %9141 = vmatmul.mubr.bf16.gmra.mxu1 %v20005_v11 }
0x1b65   : > { %9183 = vmatprep.mubr.bf16.mxu0 %v23120_v62  ;;  %9296 = vmatprep.mubr.bf16.mxu1 %v23120_v62 }
0x1b6c   : > { %9184 = vmatmul.mubr.bf16.vlgmr.msra.gmra.mxu0 %v19823_v5  ;;  %9297 = vmatmul.mubr.bf16.vlgmr.msra.gmra.mxu1 %v19823_v5  ;;  %v14076_v5 = vld [vmem:[%s22195_s17 + $0x68] sm:$0xff]  }
0x1b6d   : > { %9193 = vmatprep.mubr.bf16.mxu0 %v23120_v62  ;;  %9306 = vmatprep.mubr.bf16.mxu1 %v23120_v62 }
0x1b6e   : > { %13009 = vmatpush3.bf16.msra.mxu0 %v14070_v47  ;;  %13073 = vmatpush3.bf16.msra.mxu1 %v14071_v16  ;;  %v20361_v47 = vpop.f32.mrf.mxu0  ;;  %v20363_v16 = vpop.f32.mrf.mxu1 }
0x1b6f   : > { %13010 = vmatprep.subr.bf16.mxu0 %v14072_v58  ;;  %13074 = vmatprep.subr.bf16.mxu1 %v14073_v54  ;;  %v14082_v58 = vld [vmem:[%s22195_s17 + $0x20] sm:$0xff]  }
0x1b70   : > { %v14083_v54 = vld [vmem:[%s22195_s17 + $0xa0] sm:$0xff]  }
0x1b72   : > { %13011 = vmatpush3.bf16.msra.mxu0 %v14074_v25  ;;  %13075 = vmatpush3.bf16.msra.mxu1 %v14075_v49  ;;  %v14085_v25 = vld [vmem:[%s22195_s17 + $0xd8] sm:$0xff]   ;;  %v20377_v49 = vpop.f32.mrf.mxu0 }
0x1b73   : > { %13012 = vmatprep.subr.bf16.mxu0 %v14076_v5  ;;  %13076 = vmatprep.subr.bf16.mxu1 %v14077_v20  ;;  %v20379_v5 = vpop.f32.mrf.mxu1  ;;  %v14086_v20 = vld [vmem:[%s22195_s17 + $0x18] sm:$0xff]  }
0x1b74   : > { %9194 = vmatmul.mubr.bf16.gmra.mxu0 %v19860_v33  ;;  %9307 = vmatmul.mubr.bf16.gmra.mxu1 %v19860_v33  ;;  %v14084_v33 = vld [vmem:[%s22195_s17 + $0x58] sm:$0xff]  }
0x1b75   : > { %9203 = vmatprep.mubr.bf16.mxu0 %v23120_v62  ;;  %9316 = vmatprep.mubr.bf16.mxu1 %v23120_v62 }
0x1b76   : > { %13013 = vmatpush3.bf16.msra.mxu0 %v14078_v1  ;;  %13077 = vmatpush3.bf16.msra.mxu1 %v14079_v60  ;;  %v14087_v1 = vld [vmem:[%s22195_s17 + $0x98] sm:$0xff]   ;;  %v14088_v60 = vld [vmem:[%s22195_s17 + $0x50] sm:$0xff]  }
0x1b77   : > { %13014 = vmatprep.subr.bf16.mxu0 %v14080_v46  ;;  %13078 = vmatprep.subr.bf16.mxu1 %v14081_v9  ;;  %v14089_v46 = vld [vmem:[%s22195_s17 + $0xd0] sm:$0xff]   ;;  %v20397_v9 = vpop.f32.mrf.mxu0 }
0x1b7a   : > { %13015 = vmatpush3.bf16.msra.mxu0 %v14082_v58  ;;  %13079 = vmatpush3.bf16.msra.mxu1 %v14083_v54  ;;  %v20399_v58 = vpop.f32.mrf.mxu1  ;;  %v14090_v54 = vld [vmem:[%s22195_s17 + $0x10] sm:$0xff]  }
0x1b7b   : > { %13016 = vmatprep.subr.bf16.mxu0 %v14084_v33  ;;  %13080 = vmatprep.subr.bf16.mxu1 %v14085_v25  ;;  %v14091_v33 = vld [vmem:[%s22195_s17 + $0x90] sm:$0xff]   ;;  %v14093_v25 = vld [vmem:[%s22195_s17 + $0xc8] sm:$0xff]  }
0x1b7c   : > { %9204 = vmatmul.mubr.bf16.gmra.mxu0 %v19895_v29  ;;  %9317 = vmatmul.mubr.bf16.gmra.mxu1 %v19895_v29  ;;  %v14092_v29 = vld [vmem:[%s22195_s17 + $0x48] sm:$0xff]  }
0x1b7d   : > { %9213 = vmatprep.mubr.bf16.mxu0 %v23120_v62  ;;  %9326 = vmatprep.mubr.bf16.mxu1 %v23120_v62 }
0x1b7e   : > { %13017 = vmatpush3.bf16.msra.mxu0 %v14086_v20  ;;  %13081 = vmatpush3.bf16.msra.mxu1 %v14087_v1  ;;  %v20413_v20 = vpop.f32.mrf.mxu0  ;;  %v20415_v1 = vpop.f32.mrf.mxu1 }
0x1b7f   : > { %13018 = vmatprep.subr.bf16.mxu0 %v14088_v60  ;;  %13082 = vmatprep.subr.bf16.mxu1 %v14089_v46  ;;  %v14095_v60 = vld [vmem:[%s22195_s17 + $0x88] sm:$0xff]   ;;  %v14096_v46 = vld [vmem:[%s22195_s17 + $0x40] sm:$0xff]  }
0x1b82   : > { %13019 = vmatpush3.bf16.msra.mxu0 %v14090_v54  ;;  %13083 = vmatpush3.bf16.msra.mxu1 %v14091_v33  ;;  %v20433_v54 = vpop.f32.mrf.mxu0  ;;  %v20435_v33 = vpop.f32.mrf.mxu1 }
0x1b83   : > { %13020 = vmatprep.subr.bf16.mxu0 %v14092_v29  ;;  %13084 = vmatprep.subr.bf16.mxu1 %v14093_v25  ;;  %v14098_v29 = vld [vmem:[%s22195_s17] sm:$0xff]  }
0x1b84   : > { %9214 = vmatmul.mubr.bf16.gmra.mxu0 %v19932_v2  ;;  %9327 = vmatmul.mubr.bf16.gmra.mxu1 %v19932_v2  ;;  %v14099_v25 = vld [vmem:[%s22195_s17 + $0x80] sm:$0xff]   ;;  %v14100_v2 = vld [vmem:[%s22195_s17 + $0x178] sm:$0xff]  }
0x1b85   : > { %9223 = vmatprep.mubr.bf16.mxu0 %v23120_v62  ;;  %9336 = vmatprep.mubr.bf16.mxu1 %v23120_v62 }
0x1b86   : > { %13021 = vmatpush3.bf16.msra.mxu0 %v14094_v30  ;;  %13085 = vmatpush3.bf16.msra.mxu1 %v14095_v60  ;;  %v20449_v30 = vpop.f32.mrf.mxu0  ;;  %v20451_v60 = vpop.f32.mrf.mxu1 }
0x1b87   : > { %13022 = vmatprep.subr.bf16.mxu0 %v14096_v46  ;;  %13086 = vmatprep.subr.bf16.mxu1 %v14097_v35 }
0x1b88   : > { %v20457_v35 = vpop.f32.mrf.mxu0  ;;  %v20459_v46 = vpop.f32.mrf.mxu1 }
0x1b8a   : > { %13023 = vmatpush3.bf16.msra.mxu0 %v14098_v29  ;;  %13087 = vmatpush3.bf16.msra.mxu1 %v14099_v25  ;;  %v20461_v27 = vpop.f32.mrf.mxu0  ;;  %v20463_v7 = vpop.f32.mrf.mxu1  ;;  %v20465_v29 = vshrl.u32 %v7753_v63, 7  ;;  %v20480_v63 = vld [vmem:[%s22194_s16] sm:$0xff] }
0x1b8b   : > { %13136 = vmatprep.subr.bf16.mxu0 %v14100_v2  ;;  %13200 = vmatprep.subr.bf16.mxu1 %v14101_v48  ;;  %23135 = vst [vmem:[#allocation40_spill] sm:$0xff] %v20480_v63 }
0x1b8c   : > { %9224 = vmatmul.mubr.bf16.gmra.mxu0 %v19943_v21  ;;  %9337 = vmatmul.mubr.bf16.gmra.mxu1 %v19943_v21  ;;  %23134 = vst [vmem:[#allocation22_spill] sm:$0xff] %v20465_v29  ;;  %v22487_v48 = vsub.s32 1, %v20465_v29  ;;  %v22490_v21 = vsub.s32 3, %v20465_v29  ;;  %v20473_v25 = vpop.f32.mrf.mxu0  ;;  %v20475_v2 = vpop.f32.mrf.mxu1  ;;  %v23140_v36 = vsub.s32 0, %v20465_v29 }
0x1b8d   : > { %9233 = vmatprep.mubr.bf16.mxu0 %v23120_v62  ;;  %9346 = vmatprep.mubr.bf16.mxu1 %v23120_v62 }
0x1b8e   : > { %v20490_v44 = vrot.slane %v20480_v63, %v22490_v21  ;;  %v20492_v45 = vpop.f32.mrf.mxu0  ;;  %v20494_v18 = vpop.f32.mrf.mxu1 }
0x1b90   : > { %v8627_v19 = vadd.f32 %v20259_v57, %v20490_v44 }
0x1b92   : > { %v9396_v8 = vmax.f32 %v8627_v19, 0.0 }
0x1b94   : > { %9234 = vmatmul.mubr.bf16.gmra.mxu0 %v19953_v59  ;;  %9347 = vmatmul.mubr.bf16.gmra.mxu1 %v19953_v59  ;;  %v20485_v59 = vrot.slane %v20480_v63, %v22487_v48 }
0x1b95   : > { %9243 = vmatprep.mubr.bf16.mxu0 %v23120_v62  ;;  %9356 = vmatprep.mubr.bf16.mxu1 %v23120_v62 }
0x1b96   : > { %v8514_v6 = vadd.f32 %v20257_v28, %v20485_v59  ;;  %v8510_v21 = vadd.f32 %v20239_v39, %v20485_v59  ;;  %v8623_v28 = vadd.f32 %v20241_v34, %v20490_v44  ;;  %v23141_v39 = vsub.s32 2, %v20465_v29 }
0x1b98   : > { %v9394_v15 = vmax.f32 %v8514_v6, 0.0 }
0x1b9c   : > { %v20502_v26 = vpop.f32.mrf.mxu0  ;;  %v20504_v22 = vpop.f32.mrf.mxu1  ;;  %9244 = vmatmul.mubr.bf16.gmra.mxu0 %v19995_v55  ;;  %9357 = vmatmul.mubr.bf16.gmra.mxu1 %v19995_v55  ;;  %v20521_v55 = vrot.slane %v20480_v63, %v23140_v36 }
0x1b9d   : > { %23136 = vst [vmem:[#allocation29_spill] sm:$0xff] %v20502_v26  ;;  %23137 = vst [vmem:[#allocation28_spill] sm:$0xff] %v20504_v22  ;;  %9253 = vmatprep.mubr.bf16.mxu0 %v23120_v62  ;;  %9366 = vmatprep.mubr.bf16.mxu1 %v23120_v62  ;;  %v20526_v22 = vrot.slane %v20480_v63, %v23141_v39  ;;  %v9378_v62 = vmax.f32 %v8510_v21, 0.0  ;;  %v8524_v39 = vadd.f32 %v20281_v17, %v20485_v59 }
0x1b9e   : > { %v20514_v57 = vpop.f32.mrf.mxu0  ;;  %v20516_v48 = vpop.f32.mrf.mxu1  ;;  %v8512_v6 = vadd.f32 %v20247_v24, %v20521_v55  ;;  %v8637_v63 = vadd.f32 %v20283_v37, %v20490_v44  ;;  %v8508_v21 = vadd.f32 %v20223_v23, %v20521_v55  ;;  %v8520_v17 = vadd.f32 %v20269_v51, %v20485_v59 }
0x1b9f   : > { %23138 = vst [vmem:[#allocation38_spill] sm:$0xff] %v20514_v57  ;;  %23139 = vst [vmem:[#allocation35_spill] sm:$0xff] %v20516_v48  ;;  %v9380_v57 = vmax.f32 %v8623_v28, 0.0  ;;  %v8625_v19 = vadd.f32 %v20249_v10, %v20526_v22  ;;  %v9634_v29 = vpack.c.bf16 %v9394_v15, %v9378_v62  ;;  %v8621_v24 = vadd.f32 %v20225_v38, %v20526_v22 }
0x1ba0   : > { %v20528_v34 = vpop.f32.mrf.mxu0  ;;  %v20530_v26 = vpop.f32.mrf.mxu1  ;;  %v9393_v15 = vmax.f32 %v8512_v6, 0.0  ;;  %v9428_v62 = vmax.f32 %v8637_v63, 0.0  ;;  %v8635_v51 = vadd.f32 %v20279_v42, %v20526_v22  ;;  %v8631_v63 = vadd.f32 %v20267_v13, %v20526_v22  ;;  %v14102_v42 = vld [vmem:[%s22195_s17 + $0x138] sm:$0xff]  }
0x1ba1   : > { %23142 = vst [vmem:[#allocation69_spill] sm:$0xff] %v20528_v34  ;;  %23143 = vst [vmem:[#allocation37_spill] sm:$0xff] %v20530_v26  ;;  %v9636_v26 = vpack.c.bf16 %v9396_v8, %v9380_v57  ;;  %v8633_v8 = vadd.f32 %v20271_v41, %v20490_v44  ;;  %v9395_v23 = vmax.f32 %v8625_v19, 0.0  ;;  %v9426_v57 = vmax.f32 %v8524_v39, 0.0 }
0x1ba2   : > { %v20536_v48 = vpop.f32.mrf.mxu0  ;;  %v20538_v36 = vpop.f32.mrf.mxu1  ;;  %v8518_v39 = vadd.f32 %v20265_v53, %v20521_v55  ;;  %v8647_v53 = vadd.f32 %v20307_v50, %v20490_v44  ;;  %v8643_v50 = vadd.f32 %v20295_v12, %v20490_v44 }
0x1ba4   : > { %v20548_v28 = vpop.f32.mrf.mxu0  ;;  %v20550_v10 = vpop.f32.mrf.mxu1  ;;  %9254 = vmatmul.mubr.bf16.gmra.mxu0 %v20005_v11  ;;  %9367 = vmatmul.mubr.bf16.gmra.mxu1 %v20005_v11  ;;  %v8522_v11 = vadd.f32 %v20277_v40, %v20521_v55  ;;  %v9460_v12 = vmax.f32 %v8647_v53, 0.0  ;;  %v8645_v53 = vadd.f32 %v20303_v32, %v20526_v22 }
0x1ba5   : > { %23144 = vst [vmem:[#allocation39_spill] sm:$0xff] %v20548_v28  ;;  %23145 = vst [vmem:[#allocation47_spill] sm:$0xff] %v20550_v10  ;;  %10824 = vmatprep.mubr.bf16.mxu0 %v9634_v29  ;;  %10921 = vmatprep.mubr.bf16.mxu1 %v9636_v26  ;;  %v9377_v10 = vmax.f32 %v8508_v21, 0.0  ;;  %v9379_v28 = vmax.f32 %v8621_v24, 0.0  ;;  %v9410_v26 = vmax.f32 %v8520_v17, 0.0  ;;  %v9412_v29 = vmax.f32 %v8633_v8, 0.0 }
0x1ba6   : > { %v20558_v37 = vpop.f32.mrf.mxu0  ;;  %v20560_v38 = vpop.f32.mrf.mxu1  ;;  %v14103_v24 = vld [vmem:[%s22195_s17 + $0x1b8] sm:$0xff]   ;;  %v14104_v17 = vld [vmem:[%s22195_s17 + $0x170] sm:$0xff]  }
0x1ba7   : > { %v9633_v6 = vpack.c.bf16 %v9393_v15, %v9377_v10  ;;  %v9635_v19 = vpack.c.bf16 %v9395_v23, %v9379_v28  ;;  %v8534_v28 = vadd.f32 %v20305_v43, %v20485_v59  ;;  %v9650_v10 = vpack.c.bf16 %v9426_v57, %v9410_v26  ;;  %v14105_v8 = vld [vmem:[%s22195_s17 + $0x1f0] sm:$0xff]  }
0x1ba8   : > { %v20566_v34 = vpop.f32.mrf.mxu0  ;;  %v20568_v41 = vpop.f32.mrf.mxu1  ;;  %v9652_v13 = vpack.c.bf16 %v9428_v62, %v9412_v29  ;;  %v9425_v15 = vmax.f32 %v8522_v11, 0.0  ;;  %v9427_v23 = vmax.f32 %v8635_v51, 0.0  ;;  %v8530_v43 = vadd.f32 %v20293_v0, %v20485_v59  ;;  %v14106_v51 = vld [vmem:[%s22195_s17 + $0x130] sm:$0xff]  }
0x1ba9   : > { %23146 = vst [vmem:[#allocation24_spill] sm:$0xff] %v20566_v34  ;;  %23147 = vst [vmem:[#allocation88_spill] sm:$0xff] %v20568_v41  ;;  %v9409_v57 = vmax.f32 %v8518_v39, 0.0  ;;  %v9411_v62 = vmax.f32 %v8631_v63, 0.0  ;;  %v14107_v0 = vld [vmem:[%s22195_s17 + $0x1b0] sm:$0xff]   ;;  %v9458_v29 = vmax.f32 %v8534_v28, 0.0  ;;  %v8532_v28 = vadd.f32 %v20301_v31, %v20521_v55 }
0x1baa   : > { %v20574_v21 = vpop.f32.mrf.mxu0  ;;  %v20576_v40 = vpop.f32.mrf.mxu1  ;;  %v14110_v31 = vld [vmem:[%s22195_s17 + $0x128] sm:$0xff]  }
0x1bab   : > { %v9649_v39 = vpack.c.bf16 %v9425_v15, %v9409_v57  ;;  %v9651_v63 = vpack.c.bf16 %v9427_v23, %v9411_v62  ;;  %v8544_v15 = vadd.f32 %v20377_v49, %v20485_v59  ;;  %v14112_v49 = vld [vmem:[%s22195_s17 + $0x160] sm:$0xff]   ;;  %v8540_v62 = vadd.f32 %v20341_v14, %v20485_v59 }
0x1bac   : > { %v20594_v41 = vpop.f32.mrf.mxu0  ;;  %v20596_v34 = vpop.f32.mrf.mxu1  ;;  %10825 = vmatmul.mubr.bf16.vlgmr.msra.gmra.mxu0 %v9633_v6  ;;  %10922 = vmatmul.mubr.bf16.vlgmr.msra.gmra.mxu1 %v9635_v19  ;;  %v14108_v6 = vld [vmem:[%s22195_s17 + $0x168] sm:$0xff]   ;;  %v14114_v14 = vld [vmem:[%s22195_s17 + $0x120] sm:$0xff]  }
0x1bad   : > { %10832 = vmatprep.mubr.bf16.mxu0 %v9650_v10  ;;  %10929 = vmatprep.mubr.bf16.mxu1 %v9652_v13  ;;  %v14109_v19 = vld [vmem:[%s22195_s17 + $0x1e8] sm:$0xff]   ;;  %v9442_v10 = vmax.f32 %v8530_v43, 0.0  ;;  %v9444_v13 = vmax.f32 %v8643_v50, 0.0  ;;  %v14113_v50 = vld [vmem:[%s22195_s17 + $0x1e0] sm:$0xff]  }
0x1bae   : > { %v20602_v26 = vpop.f32.mrf.mxu0  ;;  %v20604_v11 = vpop.f32.mrf.mxu1  ;;  %13137 = vmatpush3.bf16.msra.mxu0 %v14102_v42  ;;  %13201 = vmatpush3.bf16.msra.mxu1 %v14103_v24 }
0x1baf   : > { %13138 = vmatprep.subr.bf16.mxu0 %v14104_v17  ;;  %13202 = vmatprep.subr.bf16.mxu1 %v14105_v8  ;;  %v8528_v17 = vadd.f32 %v20289_v61, %v20521_v55  ;;  %v8641_v8 = vadd.f32 %v20291_v4, %v20526_v22  ;;  %v14111_v61 = vld [vmem:[%s22195_s17 + $0x1a8] sm:$0xff]   ;;  %v8657_v4 = vadd.f32 %v20379_v5, %v20490_v44  ;;  %v9457_v5 = vmax.f32 %v8532_v28, 0.0  ;;  %v14116_v28 = vld [vmem:[%s22195_s17 + $0x158] sm:$0xff]  }
0x1bb0   : > { %v20618_v42 = vpop.f32.mrf.mxu0  ;;  %v20620_v24 = vpop.f32.mrf.mxu1  ;;  %v9666_v32 = vpack.c.bf16 %v9458_v29, %v9442_v10  ;;  %v9668_v43 = vpack.c.bf16 %v9460_v12, %v9444_v13  ;;  %v9459_v29 = vmax.f32 %v8645_v53, 0.0  ;;  %v8653_v12 = vadd.f32 %v20343_v52, %v20490_v44  ;;  %v14117_v53 = vld [vmem:[%s22195_s17 + $0x1d8] sm:$0xff]  }
0x1bb1   : > { %v9443_v13 = vmax.f32 %v8641_v8, 0.0  ;;  %v9492_v52 = vmax.f32 %v8657_v4, 0.0 }
0x1bb2   : > { %v20632_v23 = vpop.f32.mrf.mxu0  ;;  %v20634_v57 = vpop.f32.mrf.mxu1  ;;  %13139 = vmatpush3.bf16.msra.mxu0 %v14106_v51  ;;  %13203 = vmatpush3.bf16.msra.mxu1 %v14107_v0 }
0x1bb3   : > { %13140 = vmatprep.subr.bf16.mxu0 %v14108_v6  ;;  %13204 = vmatprep.subr.bf16.mxu1 %v14109_v19  ;;  %v9490_v6 = vmax.f32 %v8544_v15, 0.0  ;;  %v9474_v15 = vmax.f32 %v8540_v62, 0.0 }
0x1bb4   : > { %v20652_v51 = vpop.f32.mrf.mxu0  ;;  %v20654_v0 = vpop.f32.mrf.mxu1  ;;  %10833 = vmatmul.mubr.bf16.gmra.mxu0 %v9649_v39  ;;  %10930 = vmatmul.mubr.bf16.gmra.mxu1 %v9651_v63  ;;  %v14115_v39 = vld [vmem:[%s22195_s17 + $0x1a0] sm:$0xff]   ;;  %v9441_v63 = vmax.f32 %v8528_v17, 0.0 }
0x1bb5   : > { %23148 = vst [vmem:[#allocation48_spill] sm:$0xff] %v20654_v0  ;;  %10840 = vmatprep.mubr.bf16.mxu0 %v9666_v32  ;;  %10937 = vmatprep.mubr.bf16.mxu1 %v9668_v43  ;;  %v9667_v32 = vpack.c.bf16 %v9459_v29, %v9443_v13  ;;  %v9476_v43 = vmax.f32 %v8653_v12, 0.0  ;;  %v14120_v12 = vld [vmem:[%s22195_s17 + $0x150] sm:$0xff]  }
0x1bb6   : > { %v20658_v19 = vpop.f32.mrf.mxu0  ;;  %v20660_v10 = vpop.f32.mrf.mxu1  ;;  %13141 = vmatpush3.bf16.msra.mxu0 %v14110_v31  ;;  %13205 = vmatpush3.bf16.msra.mxu1 %v14111_v61  ;;  %v8542_v31 = vadd.f32 %v20361_v47, %v20521_v55  ;;  %v8655_v61 = vadd.f32 %v20363_v16, %v20526_v22  ;;  %v9665_v4 = vpack.c.bf16 %v9457_v5, %v9441_v63  ;;  %v14118_v16 = vld [vmem:[%s22195_s17 + $0x118] sm:$0xff]  }
0x1bb7   : > { %13142 = vmatprep.subr.bf16.mxu0 %v14112_v49  ;;  %13206 = vmatprep.subr.bf16.mxu1 %v14113_v50  ;;  %v8538_v49 = vadd.f32 %v20325_v3, %v20521_v55  ;;  %v8651_v50 = vadd.f32 %v20327_v56, %v20526_v22  ;;  %v9682_v47 = vpack.c.bf16 %v9490_v6, %v9474_v15  ;;  %v14119_v5 = vld [vmem:[%s22195_s17 + $0x198] sm:$0xff]   ;;  %v14121_v6 = vld [vmem:[%s22195_s17 + $0x1d0] sm:$0xff]  }
0x1bb8   : > { %v20678_v17 = vpop.f32.mrf.mxu0  ;;  %v20680_v8 = vpop.f32.mrf.mxu1  ;;  %v8554_v3 = vadd.f32 %v20449_v30, %v20485_v59  ;;  %v8667_v56 = vadd.f32 %v20451_v60, %v20490_v44  ;;  %v9684_v29 = vpack.c.bf16 %v9492_v52, %v9476_v43  ;;  %v8550_v30 = vadd.f32 %v20413_v20, %v20485_v59  ;;  %v14123_v20 = vld [vmem:[%s22195_s17 + $0x190] sm:$0xff]  }
0x1bb9   : > { %v8663_v60 = vadd.f32 %v20415_v1, %v20490_v44  ;;  %v9473_v52 = vmax.f32 %v8538_v49, 0.0 }
0x1bba   : > { %v20686_v62 = vpop.f32.mrf.mxu0  ;;  %v20688_v0 = vpop.f32.mrf.mxu1  ;;  %13143 = vmatpush3.bf16.msra.mxu0 %v14114_v14  ;;  %13207 = vmatpush3.bf16.msra.mxu1 %v14115_v39  ;;  %v9489_v14 = vmax.f32 %v8542_v31, 0.0  ;;  %v9491_v39 = vmax.f32 %v8655_v61, 0.0  ;;  %v14122_v31 = vld [vmem:[%s22195_s17 + $0x110] sm:$0xff]   ;;  %v9522_v61 = vmax.f32 %v8554_v3, 0.0  ;;  %v9524_v1 = vmax.f32 %v8667_v56, 0.0 }
0x1bbb   : > { %13144 = vmatprep.subr.bf16.mxu0 %v14116_v28  ;;  %13208 = vmatprep.subr.bf16.mxu1 %v14117_v53  ;;  %v9475_v28 = vmax.f32 %v8651_v50, 0.0  ;;  %v8552_v3 = vadd.f32 %v20433_v54, %v20521_v55  ;;  %v8665_v56 = vadd.f32 %v20435_v33, %v20526_v22  ;;  %v14126_v54 = vld [vmem:[%s22195_s17 + $0x108] sm:$0xff]  }
0x1bbc   : > { %v20706_v63 = vpop.f32.mrf.mxu0  ;;  %v20708_v13 = vpop.f32.mrf.mxu1  ;;  %10841 = vmatmul.mubr.bf16.gmra.mxu0 %v9665_v4  ;;  %10938 = vmatmul.mubr.bf16.gmra.mxu1 %v9667_v32  ;;  %v14124_v4 = vld [vmem:[%s22195_s17 + $0x148] sm:$0xff]   ;;  %v9681_v43 = vpack.c.bf16 %v9489_v14, %v9473_v52  ;;  %v8560_v52 = vadd.f32 %v20461_v27, %v20485_v59  ;;  %v14130_v27 = vld [vmem:[%s22195_s17 + $0x100] sm:$0xff]  }
0x1bbd   : > { %10848 = vmatprep.mubr.bf16.mxu0 %v9682_v47  ;;  %10945 = vmatprep.mubr.bf16.mxu1 %v9684_v29  ;;  %v14125_v32 = vld [vmem:[%s22195_s17 + $0x1c8] sm:$0xff]   ;;  %v9683_v49 = vpack.c.bf16 %v9491_v39, %v9475_v28  ;;  %v8548_v29 = vadd.f32 %v20397_v9, %v20521_v55 }
0x1bbe   : > { %v20714_v53 = vpop.f32.mrf.mxu0  ;;  %v20716_v15 = vpop.f32.mrf.mxu1  ;;  %13145 = vmatpush3.bf16.msra.mxu0 %v14118_v16  ;;  %13209 = vmatpush3.bf16.msra.mxu1 %v14119_v5  ;;  %v9506_v16 = vmax.f32 %v8550_v30, 0.0  ;;  %v9508_v5 = vmax.f32 %v8663_v60, 0.0  ;;  %v14127_v9 = vld [vmem:[%s22195_s17 + $0x188] sm:$0xff]   ;;  %v14129_v60 = vld [vmem:[%s22195_s17 + $0x1c0] sm:$0xff]  }
0x1bbf   : > { %13146 = vmatprep.subr.bf16.mxu0 %v14120_v12  ;;  %13210 = vmatprep.subr.bf16.mxu1 %v14121_v6  ;;  %v8661_v12 = vadd.f32 %v20399_v58, %v20526_v22  ;;  %v8564_v6 = vadd.f32 %v20492_v45, %v20485_v59  ;;  %v8677_v58 = vadd.f32 %v20494_v18, %v20490_v44  ;;  %v14128_v45 = vld [vmem:[%s22195_s17 + $0x140] sm:$0xff]   ;;  %v9521_v18 = vmax.f32 %v8552_v3, 0.0  ;;  %v14133_v3 = vld [vmem:[%s22195_s17 + $0x2f8] sm:$0xff]  }
0x1bc0   : > { %v20730_v50 = vpop.f32.mrf.mxu0  ;;  %v20732_v47 = vpop.f32.mrf.mxu1  ;;  %v9698_v33 = vpack.c.bf16 %v9522_v61, %v9506_v16  ;;  %v9700_v30 = vpack.c.bf16 %v9524_v1, %v9508_v5  ;;  %v8673_v61 = vadd.f32 %v20463_v7, %v20490_v44  ;;  %v14132_v5 = vld [vmem:[%s22195_s17 + $0x278] sm:$0xff]  }
0x1bc1   : > { %v9554_v1 = vmax.f32 %v8564_v6, 0.0  ;;  %v9507_v16 = vmax.f32 %v8661_v12, 0.0  ;;  %v9556_v7 = vmax.f32 %v8677_v58, 0.0  ;;  %v8562_v12 = vadd.f32 %v20473_v25, %v20521_v55 }
0x1bc2   : > { %v20744_v14 = vpop.f32.mrf.mxu0  ;;  %v20746_v39 = vpop.f32.mrf.mxu1  ;;  %13147 = vmatpush3.bf16.msra.mxu0 %v14122_v31  ;;  %13211 = vmatpush3.bf16.msra.mxu1 %v14123_v20  ;;  %v9523_v20 = vmax.f32 %v8665_v56, 0.0  ;;  %v9538_v56 = vmax.f32 %v8560_v52, 0.0  ;;  %v8675_v58 = vadd.f32 %v20475_v2, %v20526_v22  ;;  %v8574_v52 = vadd.f32 %v20536_v48, %v20485_v59  ;;  %v23151_v48 = vld [vmem:[#allocation38_spill] sm:$0xff] }
0x1bc3   : > { %13148 = vmatprep.subr.bf16.mxu0 %v14124_v4  ;;  %13212 = vmatprep.subr.bf16.mxu1 %v14125_v32  ;;  %v8558_v25 = vadd.f32 %v20457_v35, %v20521_v55  ;;  %v8671_v2 = vadd.f32 %v20459_v46, %v20526_v22 }
0x1bc4   : > { %v20764_v28 = vpop.f32.mrf.mxu0  ;;  %v20766_v31 = vpop.f32.mrf.mxu1  ;;  %10849 = vmatmul.mubr.bf16.gmra.mxu0 %v9681_v43  ;;  %10946 = vmatmul.mubr.bf16.gmra.mxu1 %v9683_v49  ;;  %v14131_v43 = vld [vmem:[%s22195_s17 + $0x180] sm:$0xff]   ;;  %v9505_v49 = vmax.f32 %v8548_v29, 0.0  ;;  %v9540_v29 = vmax.f32 %v8673_v61, 0.0  ;;  %v9586_v46 = vmax.f32 %v8574_v52, 0.0 }
0x1bc5   : > { %10856 = vmatprep.mubr.bf16.mxu0 %v9698_v33  ;;  %10953 = vmatprep.mubr.bf16.mxu1 %v9700_v30  ;;  %v9699_v33 = vpack.c.bf16 %v9523_v20, %v9507_v16  ;;  %v9555_v16 = vmax.f32 %v8675_v58, 0.0  ;;  %v23154_v58 = vld [vmem:[#allocation37_spill] sm:$0xff] }
0x1bc6   : > { %v20770_v4 = vpop.f32.mrf.mxu0  ;;  %v20772_v32 = vpop.f32.mrf.mxu1  ;;  %13149 = vmatpush3.bf16.msra.mxu0 %v14126_v54  ;;  %13213 = vmatpush3.bf16.msra.mxu1 %v14127_v9  ;;  %v9697_v9 = vpack.c.bf16 %v9521_v18, %v9505_v49  ;;  %v8687_v18 = vadd.f32 %v20538_v36, %v20490_v44  ;;  %v9716_v20 = vpack.c.bf16 %v9556_v7, %v9540_v29  ;;  %v23152_v36 = vld [vmem:[#allocation35_spill] sm:$0xff]  ;;  %v9553_v49 = vmax.f32 %v8562_v12, 0.0 }
0x1bc7   : > { %13150 = vmatprep.subr.bf16.mxu0 %v14128_v45  ;;  %13214 = vmatprep.subr.bf16.mxu1 %v14129_v60  ;;  %v9714_v60 = vpack.c.bf16 %v9554_v1, %v9538_v56  ;;  %v9539_v56 = vmax.f32 %v8671_v2, 0.0 }
0x1bc8   : > { %v20786_v6 = vpop.f32.mrf.mxu0  ;;  %v20788_v54 = vpop.f32.mrf.mxu1 }
0x1bca   : > { %v20794_v30 = vpop.f32.mrf.mxu0  ;;  %v20796_v45 = vpop.f32.mrf.mxu1  ;;  %13151 = vmatpush3.bf16.msra.mxu0 %v14130_v27  ;;  %13215 = vmatpush3.bf16.msra.mxu1 %v14131_v43  ;;  %v8570_v27 = vadd.f32 %v23151_v48, %v20485_v59  ;;  %v8683_v43 = vadd.f32 %v23152_v36, %v20490_v44  ;;  %v9715_v36 = vpack.c.bf16 %v9555_v16, %v9539_v56  ;;  %v23156_v16 = vld [vmem:[#allocation28_spill] sm:$0xff] }
0x1bcb   : > { %13264 = vmatprep.subr.bf16.mxu0 %v14132_v5  ;;  %13328 = vmatprep.subr.bf16.mxu1 %v14133_v3  ;;  %v9588_v5 = vmax.f32 %v8687_v18, 0.0  ;;  %v9537_v3 = vmax.f32 %v8558_v25, 0.0  ;;  %v8584_v18 = vadd.f32 %v20574_v21, %v20485_v59  ;;  %v8697_v25 = vadd.f32 %v20576_v40, %v20490_v44 }
0x1bcc   : > { %v20806_v61 = vpop.f32.mrf.mxu0  ;;  %v20808_v1 = vpop.f32.mrf.mxu1  ;;  %10857 = vmatmul.mubr.bf16.gmra.mxu0 %v9697_v9  ;;  %10954 = vmatmul.mubr.bf16.gmra.mxu1 %v9699_v33  ;;  %v9570_v29 = vmax.f32 %v8570_v27, 0.0  ;;  %v9572_v48 = vmax.f32 %v8683_v43, 0.0  ;;  %v23155_v43 = vld [vmem:[#allocation29_spill] sm:$0xff]  ;;  %v8580_v21 = vadd.f32 %v20558_v37, %v20485_v59  ;;  %v8693_v40 = vadd.f32 %v20560_v38, %v20490_v44 }
0x1bcd   : > { %23149 = vst [vmem:[#allocation58_spill] sm:$0xff] %v20806_v61  ;;  %23150 = vst [vmem:[#allocation49_spill] sm:$0xff] %v20808_v1  ;;  %10864 = vmatprep.mubr.bf16.mxu0 %v9714_v60  ;;  %10961 = vmatprep.mubr.bf16.mxu1 %v9716_v20  ;;  %v9713_v1 = vpack.c.bf16 %v9553_v49, %v9537_v3  ;;  %v23153_v60 = vld [vmem:[#allocation69_spill] sm:$0xff]  ;;  %v8685_v20 = vadd.f32 %v23154_v58, %v20526_v22 }
0x1bce   : > { %v20814_v35 = vpop.f32.mrf.mxu0  ;;  %v20816_v7 = vpop.f32.mrf.mxu1  ;;  %v8572_v12 = vadd.f32 %v23153_v60, %v20521_v55  ;;  %v9730_v2 = vpack.c.bf16 %v9586_v46, %v9570_v29  ;;  %v9732_v27 = vpack.c.bf16 %v9588_v5, %v9572_v48  ;;  %v8568_v49 = vadd.f32 %v23155_v43, %v20521_v55  ;;  %v23159_v46 = vld [vmem:[#allocation22_spill] sm:$0xff] }
0x1bcf   : > { %v8681_v3 = vadd.f32 %v23156_v16, %v20526_v22  ;;  %v22497_v5 = vsub.s32 5, %v23159_v46  ;;  %v22498_v29 = vsub.s32 7, %v23159_v46  ;;  %v9587_v58 = vmax.f32 %v8685_v20, 0.0 }
0x1bd0   : > { %v20818_v9 = vpop.f32.mrf.mxu0  ;;  %v20820_v33 = vpop.f32.mrf.mxu1  ;;  %v9585_v48 = vmax.f32 %v8572_v12, 0.0  ;;  %v9602_v44 = vmax.f32 %v8580_v21, 0.0  ;;  %v9604_v38 = vmax.f32 %v8693_v40, 0.0 }
0x1bd2   : > { %v20826_v61 = vpop.f32.mrf.mxu0  ;;  %v20828_v52 = vpop.f32.mrf.mxu1 }
0x1bd4   : > { %v20838_v56 = vpop.f32.mrf.mxu0  ;;  %v20840_v60 = vpop.f32.mrf.mxu1  ;;  %10865 = vmatmul.mubr.bf16.gmra.mxu0 %v9713_v1  ;;  %10962 = vmatmul.mubr.bf16.gmra.mxu1 %v9715_v36  ;;  %v9618_v1 = vmax.f32 %v8584_v18, 0.0  ;;  %v9620_v36 = vmax.f32 %v8697_v25, 0.0  ;;  %v23165_v25 = vld [vmem:[#allocation24_spill] sm:$0xff] }
0x1bd5   : > { %23157 = vst [vmem:[#allocation61_spill] sm:$0xff] %v20838_v56  ;;  %23158 = vst [vmem:[#allocation51_spill] sm:$0xff] %v20840_v60  ;;  %10872 = vmatprep.mubr.bf16.mxu0 %v9730_v2  ;;  %10969 = vmatprep.mubr.bf16.mxu1 %v9732_v27  ;;  %v9569_v60 = vmax.f32 %v8568_v49, 0.0  ;;  %v9571_v56 = vmax.f32 %v8681_v3, 0.0  ;;  %v23164_v2 = vld [vmem:[#allocation40_spill] sm:$0xff]  ;;  %v8582_v49 = vadd.f32 %v23165_v25, %v20521_v55  ;;  %v22500_v25 = vsub.s32 4, %v23159_v46 }
0x1bd6   : > { %v20848_v43 = vpop.f32.mrf.mxu0  ;;  %v20850_v16 = vpop.f32.mrf.mxu1  ;;  %v20859_v27 = vrot.slane %v23164_v2, %v22497_v5  ;;  %v20864_v12 = vrot.slane %v23164_v2, %v22498_v29  ;;  %v23166_v3 = vld [vmem:[#allocation88_spill] sm:$0xff]  ;;  %v9746_v29 = vpack.c.bf16 %v9618_v1, %v9602_v44 }
0x1bd7   : > { %23160 = vst [vmem:[#allocation46_spill] sm:$0xff] %v20848_v43  ;;  %23161 = vst [vmem:[#allocation62_spill] sm:$0xff] %v20850_v16  ;;  %v9729_v20 = vpack.c.bf16 %v9585_v48, %v9569_v60  ;;  %v9731_v18 = vpack.c.bf16 %v9587_v58, %v9571_v56  ;;  %v9748_v16 = vpack.c.bf16 %v9620_v36, %v9604_v38  ;;  %v23168_v56 = vld [vmem:[#allocation39_spill] sm:$0xff] }
0x1bd8   : > { %v20852_v59 = vpop.f32.mrf.mxu0  ;;  %v20854_v37 = vpop.f32.mrf.mxu1  ;;  %v8740_v5 = vadd.f32 %v20632_v23, %v20859_v27  ;;  %v8578_v60 = vadd.f32 %v23168_v56, %v20521_v55  ;;  %v23169_v48 = vld [vmem:[#allocation47_spill] sm:$0xff]  ;;  %v8736_v23 = vadd.f32 %v20602_v26, %v20859_v27  ;;  %v9617_v55 = vmax.f32 %v8582_v49, 0.0 }
0x1bd9   : > { %23162 = vst [vmem:[#allocation52_spill] sm:$0xff] %v20852_v59  ;;  %23163 = vst [vmem:[#allocation53_spill] sm:$0xff] %v20854_v37  ;;  %v8695_v37 = vadd.f32 %v23166_v3, %v20526_v22  ;;  %v8853_v59 = vadd.f32 %v20634_v57, %v20864_v12  ;;  %v8691_v58 = vadd.f32 %v23169_v48, %v20526_v22  ;;  %v22499_v3 = vsub.s32 6, %v23159_v46 }
0x1bda   : > { %v20870_v21 = vpop.f32.mrf.mxu0  ;;  %v20872_v40 = vpop.f32.mrf.mxu1  ;;  %v8849_v57 = vadd.f32 %v20604_v11, %v20864_v12  ;;  %v9398_v44 = vmax.f32 %v8740_v5, 0.0  ;;  %v9601_v56 = vmax.f32 %v8578_v60, 0.0 }
0x1bdb   : > { %23167 = vst [vmem:[#allocation65_spill] sm:$0xff] %v20872_v40  ;;  %v9619_v22 = vmax.f32 %v8695_v37, 0.0  ;;  %v9400_v38 = vmax.f32 %v8853_v59, 0.0  ;;  %v9603_v48 = vmax.f32 %v8691_v58, 0.0  ;;  %v20904_v26 = vrot.slane %v23164_v2, %v22499_v3 }
0x1bdc   : > { %v20884_v43 = vpop.f32.mrf.mxu0  ;;  %v20886_v40 = vpop.f32.mrf.mxu1  ;;  %10873 = vmatmul.mubr.bf16.gmra.mxu0 %v9729_v20  ;;  %10970 = vmatmul.mubr.bf16.gmra.mxu1 %v9731_v18  ;;  %v20899_v20 = vrot.slane %v23164_v2, %v22500_v25  ;;  %v9384_v37 = vmax.f32 %v8849_v57, 0.0  ;;  %v9745_v5 = vpack.c.bf16 %v9617_v55, %v9601_v56  ;;  %v8750_v2 = vadd.f32 %v20686_v62, %v20859_v27 }
0x1bdd   : > { %10880 = vmatprep.mubr.bf16.mxu0 %v9746_v29  ;;  %10977 = vmatprep.mubr.bf16.mxu1 %v9748_v16  ;;  %v9382_v16 = vmax.f32 %v8736_v23, 0.0  ;;  %v9747_v59 = vpack.c.bf16 %v9619_v22, %v9603_v48  ;;  %v8851_v49 = vadd.f32 %v20620_v24, %v20904_v26  ;;  %v8863_v3 = vadd.f32 %v20688_v0, %v20864_v12 }
0x1bde   : > { %v20892_v1 = vpop.f32.mrf.mxu0  ;;  %v20894_v36 = vpop.f32.mrf.mxu1  ;;  %v8738_v18 = vadd.f32 %v20618_v42, %v20899_v20  ;;  %v9640_v57 = vpack.c.bf16 %v9400_v38, %v9384_v37  ;;  %v8734_v55 = vadd.f32 %v20594_v41, %v20899_v20  ;;  %v8847_v42 = vadd.f32 %v20596_v34, %v20904_v26 }
0x1bdf   : > { %v9638_v23 = vpack.c.bf16 %v9398_v44, %v9382_v16  ;;  %v8746_v62 = vadd.f32 %v20658_v19, %v20859_v27  ;;  %v8859_v0 = vadd.f32 %v20660_v10, %v20864_v12  ;;  %v9399_v38 = vmax.f32 %v8851_v49, 0.0 }
0x1be0   : > { %v20906_v11 = vpop.f32.mrf.mxu0  ;;  %v20908_v29 = vpop.f32.mrf.mxu1  ;;  %v9397_v44 = vmax.f32 %v8738_v18, 0.0  ;;  %v9430_v34 = vmax.f32 %v8750_v2, 0.0  ;;  %v9432_v48 = vmax.f32 %v8863_v3, 0.0  ;;  %v9381_v16 = vmax.f32 %v8734_v55, 0.0  ;;  %v23172_v3 = vld [vmem:[#allocation48_spill] sm:$0xff] }
0x1be1   : > { %v9383_v37 = vmax.f32 %v8847_v42, 0.0  ;;  %v8861_v19 = vadd.f32 %v20680_v8, %v20904_v26  ;;  %v9414_v18 = vmax.f32 %v8746_v62, 0.0  ;;  %v9416_v49 = vmax.f32 %v8859_v0, 0.0  ;;  %v14134_v8 = vld [vmem:[%s22195_s17 + $0x238] sm:$0xff]  }
0x1be2   : > { %v20914_v60 = vpop.f32.mrf.mxu0  ;;  %v20916_v58 = vpop.f32.mrf.mxu1  ;;  %v8744_v2 = vadd.f32 %v20652_v51, %v20899_v20  ;;  %v8857_v55 = vadd.f32 %v23172_v3, %v20904_v26  ;;  %v14135_v62 = vld [vmem:[%s22195_s17 + $0x2b8] sm:$0xff]   ;;  %v8760_v0 = vadd.f32 %v20744_v14, %v20859_v27  ;;  %v8873_v51 = vadd.f32 %v20746_v39, %v20864_v12 }
0x1be3   : > { %v9431_v25 = vmax.f32 %v8861_v19, 0.0  ;;  %v8756_v14 = vadd.f32 %v20714_v53, %v20859_v27  ;;  %v8869_v39 = vadd.f32 %v20716_v15, %v20864_v12  ;;  %v14138_v19 = vld [vmem:[%s22195_s17 + $0x230] sm:$0xff]  }
0x1be4   : > { %v20926_v22 = vpop.f32.mrf.mxu0  ;;  %v20928_v24 = vpop.f32.mrf.mxu1  ;;  %10881 = vmatmul.mubr.bf16.gmra.mxu0 %v9745_v5  ;;  %10978 = vmatmul.mubr.bf16.gmra.mxu1 %v9747_v59  ;;  %v8748_v5 = vadd.f32 %v20678_v17, %v20899_v20  ;;  %v14139_v53 = vld [vmem:[%s22195_s17 + $0x2b0] sm:$0xff]   ;;  %v9464_v15 = vmax.f32 %v8873_v51, 0.0  ;;  %v8871_v51 = vadd.f32 %v20732_v47, %v20904_v26 }
0x1be5   : > { %23170 = vst [vmem:[#allocation63_spill] sm:$0xff] %v20926_v22  ;;  %23171 = vst [vmem:[#allocation12_spill] sm:$0xff] %v20928_v24  ;;  %11018 = vmatprep.mubr.bf16.mxu0 %v9638_v23  ;;  %11115 = vmatprep.mubr.bf16.mxu1 %v9640_v57  ;;  %v9637_v23 = vpack.c.bf16 %v9397_v44, %v9381_v16  ;;  %v9639_v57 = vpack.c.bf16 %v9399_v38, %v9383_v37  ;;  %v14136_v16 = vld [vmem:[%s22195_s17 + $0x270] sm:$0xff]  }
0x1be6   : > { %v20934_v41 = vpop.f32.mrf.mxu0  ;;  %v20936_v56 = vpop.f32.mrf.mxu1  ;;  %v9654_v44 = vpack.c.bf16 %v9430_v34, %v9414_v18  ;;  %v9656_v38 = vpack.c.bf16 %v9432_v48, %v9416_v49  ;;  %v14137_v37 = vld [vmem:[%s22195_s17 + $0x2f0] sm:$0xff]   ;;  %v9429_v3 = vmax.f32 %v8748_v5, 0.0  ;;  %v9413_v34 = vmax.f32 %v8744_v2, 0.0 }
0x1be7   : > { %v9415_v48 = vmax.f32 %v8857_v55, 0.0  ;;  %v9462_v49 = vmax.f32 %v8760_v0, 0.0  ;;  %v8758_v0 = vadd.f32 %v20730_v50, %v20899_v20  ;;  %v14142_v50 = vld [vmem:[%s22195_s17 + $0x228] sm:$0xff]  }
0x1be8   : > { %v20942_v59 = vpop.f32.mrf.mxu0  ;;  %v20944_v10 = vpop.f32.mrf.mxu1  ;;  %v9653_v2 = vpack.c.bf16 %v9429_v3, %v9413_v34 }
0x1be9   : > { %v9655_v55 = vpack.c.bf16 %v9431_v25, %v9415_v48  ;;  %v8770_v25 = vadd.f32 %v20794_v30, %v20859_v27  ;;  %v14144_v30 = vld [vmem:[%s22195_s17 + $0x260] sm:$0xff]   ;;  %v8766_v48 = vadd.f32 %v20770_v4, %v20859_v27 }
0x1bea   : > { %v20950_v42 = vpop.f32.mrf.mxu0  ;;  %v20952_v17 = vpop.f32.mrf.mxu1  ;;  %v14146_v4 = vld [vmem:[%s22195_s17 + $0x220] sm:$0xff]  }
0x1bec   : > { %v20970_v24 = vpop.f32.mrf.mxu0  ;;  %v20972_v22 = vpop.f32.mrf.mxu1  ;;  %11019 = vmatmul.mubr.bf16.vlgmr.msra.gmra.mxu0 %v9637_v23  ;;  %11116 = vmatmul.mubr.bf16.vlgmr.msra.gmra.mxu1 %v9639_v57  ;;  %v14140_v23 = vld [vmem:[%s22195_s17 + $0x268] sm:$0xff]  }
0x1bed   : > { %11026 = vmatprep.mubr.bf16.mxu0 %v9654_v44  ;;  %11123 = vmatprep.mubr.bf16.mxu1 %v9656_v38  ;;  %v14141_v57 = vld [vmem:[%s22195_s17 + $0x2e8] sm:$0xff]   ;;  %v9446_v44 = vmax.f32 %v8756_v14, 0.0  ;;  %v9448_v38 = vmax.f32 %v8869_v39, 0.0  ;;  %v14145_v39 = vld [vmem:[%s22195_s17 + $0x2e0] sm:$0xff]  }
0x1bee   : > { %v20978_v18 = vpop.f32.mrf.mxu0  ;;  %v20980_v5 = vpop.f32.mrf.mxu1  ;;  %13265 = vmatpush3.bf16.msra.mxu0 %v14134_v8  ;;  %13329 = vmatpush3.bf16.msra.mxu1 %v14135_v62 }
0x1bef   : > { %13266 = vmatprep.subr.bf16.mxu0 %v14136_v16  ;;  %13330 = vmatprep.subr.bf16.mxu1 %v14137_v37  ;;  %v8754_v16 = vadd.f32 %v20706_v63, %v20899_v20  ;;  %v8867_v37 = vadd.f32 %v20708_v13, %v20904_v26  ;;  %v14143_v63 = vld [vmem:[%s22195_s17 + $0x2a8] sm:$0xff]   ;;  %v8883_v13 = vadd.f32 %v20796_v45, %v20864_v12  ;;  %v9461_v45 = vmax.f32 %v8758_v0, 0.0  ;;  %v14148_v0 = vld [vmem:[%s22195_s17 + $0x258] sm:$0xff]  }
0x1bf0   : > { %v20994_v8 = vpop.f32.mrf.mxu0  ;;  %v20996_v62 = vpop.f32.mrf.mxu1  ;;  %v9670_v47 = vpack.c.bf16 %v9462_v49, %v9446_v44  ;;  %v9672_v14 = vpack.c.bf16 %v9464_v15, %v9448_v38  ;;  %v9463_v49 = vmax.f32 %v8871_v51, 0.0  ;;  %v8879_v15 = vadd.f32 %v20772_v32, %v20864_v12  ;;  %v14149_v51 = vld [vmem:[%s22195_s17 + $0x2d8] sm:$0xff]  }
0x1bf1   : > { %v9447_v38 = vmax.f32 %v8867_v37, 0.0  ;;  %v9496_v32 = vmax.f32 %v8883_v13, 0.0 }
0x1bf2   : > { %v21008_v3 = vpop.f32.mrf.mxu0  ;;  %v21010_v34 = vpop.f32.mrf.mxu1  ;;  %13267 = vmatpush3.bf16.msra.mxu0 %v14138_v19  ;;  %13331 = vmatpush3.bf16.msra.mxu1 %v14139_v53 }
0x1bf3   : > { %13268 = vmatprep.subr.bf16.mxu0 %v14140_v23  ;;  %13332 = vmatprep.subr.bf16.mxu1 %v14141_v57  ;;  %v9494_v23 = vmax.f32 %v8770_v25, 0.0  ;;  %v9478_v25 = vmax.f32 %v8766_v48, 0.0 }
0x1bf4   : > { %v21028_v19 = vpop.f32.mrf.mxu0  ;;  %v21030_v53 = vpop.f32.mrf.mxu1  ;;  %11027 = vmatmul.mubr.bf16.gmra.mxu0 %v9653_v2  ;;  %11124 = vmatmul.mubr.bf16.gmra.mxu1 %v9655_v55  ;;  %v14147_v2 = vld [vmem:[%s22195_s17 + $0x2a0] sm:$0xff]   ;;  %v9445_v55 = vmax.f32 %v8754_v16, 0.0 }
0x1bf5   : > { %23173 = vst [vmem:[#allocation54_spill] sm:$0xff] %v21030_v53  ;;  %11034 = vmatprep.mubr.bf16.mxu0 %v9670_v47  ;;  %11131 = vmatprep.mubr.bf16.mxu1 %v9672_v14  ;;  %v9671_v47 = vpack.c.bf16 %v9463_v49, %v9447_v38  ;;  %v9480_v14 = vmax.f32 %v8879_v15, 0.0  ;;  %v14152_v15 = vld [vmem:[%s22195_s17 + $0x250] sm:$0xff]  }
0x1bf6   : > { %v21034_v57 = vpop.f32.mrf.mxu0  ;;  %v21036_v44 = vpop.f32.mrf.mxu1  ;;  %13269 = vmatpush3.bf16.msra.mxu0 %v14142_v50  ;;  %13333 = vmatpush3.bf16.msra.mxu1 %v14143_v63  ;;  %v8768_v50 = vadd.f32 %v20786_v6, %v20899_v20  ;;  %v8881_v63 = vadd.f32 %v20788_v54, %v20904_v26  ;;  %v9669_v13 = vpack.c.bf16 %v9461_v45, %v9445_v55  ;;  %v14150_v54 = vld [vmem:[%s22195_s17 + $0x218] sm:$0xff]  }
0x1bf7   : > { %13270 = vmatprep.subr.bf16.mxu0 %v14144_v30  ;;  %13334 = vmatprep.subr.bf16.mxu1 %v14145_v39  ;;  %v8764_v30 = vadd.f32 %v20764_v28, %v20899_v20  ;;  %v8877_v39 = vadd.f32 %v20766_v31, %v20904_v26  ;;  %v9686_v6 = vpack.c.bf16 %v9494_v23, %v9478_v25  ;;  %v14151_v45 = vld [vmem:[%s22195_s17 + $0x298] sm:$0xff]   ;;  %v14153_v23 = vld [vmem:[%s22195_s17 + $0x2d0] sm:$0xff]  }
0x1bf8   : > { %v21054_v16 = vpop.f32.mrf.mxu0  ;;  %v21056_v37 = vpop.f32.mrf.mxu1  ;;  %v8780_v28 = vadd.f32 %v20826_v61, %v20859_v27  ;;  %v8893_v31 = vadd.f32 %v20828_v52, %v20864_v12  ;;  %v9688_v49 = vpack.c.bf16 %v9496_v32, %v9480_v14  ;;  %v8776_v61 = vadd.f32 %v20814_v35, %v20859_v27  ;;  %v14155_v35 = vld [vmem:[%s22195_s17 + $0x290] sm:$0xff]  }
0x1bf9   : > { %v8889_v52 = vadd.f32 %v20816_v7, %v20864_v12  ;;  %v9477_v32 = vmax.f32 %v8764_v30, 0.0 }
0x1bfa   : > { %v21062_v48 = vpop.f32.mrf.mxu0  ;;  %v21064_v53 = vpop.f32.mrf.mxu1  ;;  %13271 = vmatpush3.bf16.msra.mxu0 %v14146_v4  ;;  %13335 = vmatpush3.bf16.msra.mxu1 %v14147_v2  ;;  %v9493_v4 = vmax.f32 %v8768_v50, 0.0  ;;  %v9495_v2 = vmax.f32 %v8881_v63, 0.0  ;;  %v14154_v50 = vld [vmem:[%s22195_s17 + $0x210] sm:$0xff]   ;;  %v9526_v63 = vmax.f32 %v8780_v28, 0.0  ;;  %v9528_v7 = vmax.f32 %v8893_v31, 0.0 }
0x1bfb   : > { %13272 = vmatprep.subr.bf16.mxu0 %v14148_v0  ;;  %13336 = vmatprep.subr.bf16.mxu1 %v14149_v51  ;;  %v9479_v0 = vmax.f32 %v8877_v39, 0.0  ;;  %v8778_v28 = vadd.f32 %v20818_v9, %v20899_v20  ;;  %v8891_v31 = vadd.f32 %v20820_v33, %v20904_v26  ;;  %v14158_v9 = vld [vmem:[%s22195_s17 + $0x208] sm:$0xff]  }
0x1bfc   : > { %v21082_v55 = vpop.f32.mrf.mxu0  ;;  %v21084_v38 = vpop.f32.mrf.mxu1  ;;  %11035 = vmatmul.mubr.bf16.gmra.mxu0 %v9669_v13  ;;  %11132 = vmatmul.mubr.bf16.gmra.mxu1 %v9671_v47  ;;  %v14156_v13 = vld [vmem:[%s22195_s17 + $0x248] sm:$0xff]   ;;  %v9685_v14 = vpack.c.bf16 %v9493_v4, %v9477_v32  ;;  %v8790_v4 = vadd.f32 %v20870_v21, %v20859_v27  ;;  %v14160_v21 = vld [vmem:[%s22195_s17 + $0x240] sm:$0xff]  }
0x1bfd   : > { %23174 = vst [vmem:[#allocation17_spill] sm:$0xff] %v21082_v55  ;;  %23175 = vst [vmem:[#allocation20_spill] sm:$0xff] %v21084_v38  ;;  %11042 = vmatprep.mubr.bf16.mxu0 %v9686_v6  ;;  %11139 = vmatprep.mubr.bf16.mxu1 %v9688_v49  ;;  %v14157_v47 = vld [vmem:[%s22195_s17 + $0x2c8] sm:$0xff]   ;;  %v9687_v30 = vpack.c.bf16 %v9495_v2, %v9479_v0  ;;  %v23177_v49 = vld [vmem:[#allocation58_spill] sm:$0xff] }
0x1bfe   : > { %v21090_v51 = vpop.f32.mrf.mxu0  ;;  %v21092_v25 = vpop.f32.mrf.mxu1  ;;  %13273 = vmatpush3.bf16.msra.mxu0 %v14150_v54  ;;  %13337 = vmatpush3.bf16.msra.mxu1 %v14151_v45  ;;  %v9510_v54 = vmax.f32 %v8776_v61, 0.0  ;;  %v9512_v45 = vmax.f32 %v8889_v52, 0.0  ;;  %v14159_v33 = vld [vmem:[%s22195_s17 + $0x288] sm:$0xff]   ;;  %v23179_v61 = vld [vmem:[#allocation65_spill] sm:$0xff] }
0x1bff   : > { %13274 = vmatprep.subr.bf16.mxu0 %v14152_v15  ;;  %13338 = vmatprep.subr.bf16.mxu1 %v14153_v23  ;;  %v8774_v15 = vadd.f32 %v23177_v49, %v20899_v20  ;;  %v23178_v23 = vld [vmem:[#allocation49_spill] sm:$0xff]  ;;  %v8903_v52 = vadd.f32 %v23179_v61, %v20864_v12 }
0x1c00   : > { %v21106_v39 = vpop.f32.mrf.mxu0  ;;  %v21108_v6 = vpop.f32.mrf.mxu1  ;;  %v8887_v38 = vadd.f32 %v23178_v23, %v20904_v26  ;;  %v9702_v0 = vpack.c.bf16 %v9526_v63, %v9510_v54  ;;  %v9704_v49 = vpack.c.bf16 %v9528_v7, %v9512_v45  ;;  %v9525_v63 = vmax.f32 %v8778_v28, 0.0 }
0x1c01   : > { %23176 = vst [vmem:[#allocation72_spill] sm:$0xff] %v21108_v6  ;;  %v9527_v7 = vmax.f32 %v8891_v31, 0.0  ;;  %v9558_v54 = vmax.f32 %v8790_v4, 0.0  ;;  %v9560_v31 = vmax.f32 %v8903_v52, 0.0  ;;  %v14164_v4 = vld [vmem:[%s22195_s17 + $0x378] sm:$0xff]  }
0x1c02   : > { %v21120_v2 = vpop.f32.mrf.mxu0  ;;  %v21122_v32 = vpop.f32.mrf.mxu1  ;;  %13275 = vmatpush3.bf16.msra.mxu0 %v14154_v50  ;;  %13339 = vmatpush3.bf16.msra.mxu1 %v14155_v35  ;;  %v14161_v50 = vld [vmem:[%s22195_s17 + $0x2c0] sm:$0xff]   ;;  %v9511_v28 = vmax.f32 %v8887_v38, 0.0  ;;  %v23186_v38 = vld [vmem:[#allocation52_spill] sm:$0xff] }
0x1c03   : > { %13276 = vmatprep.subr.bf16.mxu0 %v14156_v13  ;;  %13340 = vmatprep.subr.bf16.mxu1 %v14157_v47  ;;  %v23180_v35 = vld [vmem:[#allocation46_spill] sm:$0xff]  ;;  %v8788_v52 = vadd.f32 %v23186_v38, %v20899_v20 }
0x1c04   : > { %v8786_v23 = vadd.f32 %v23180_v35, %v20859_v27  ;;  %v21140_v55 = vpop.f32.mrf.mxu0  ;;  %v21142_v6 = vpop.f32.mrf.mxu1  ;;  %11043 = vmatmul.mubr.bf16.gmra.mxu0 %v9685_v14  ;;  %11140 = vmatmul.mubr.bf16.gmra.mxu1 %v9687_v30  ;;  %v23183_v13 = vld [vmem:[#allocation62_spill] sm:$0xff]  ;;  %v9509_v30 = vmax.f32 %v8774_v15, 0.0 }
0x1c05   : > { %23181 = vst [vmem:[#allocation25_spill] sm:$0xff] %v21140_v55  ;;  %23182 = vst [vmem:[#allocation55_spill] sm:$0xff] %v21142_v6  ;;  %v8899_v47 = vadd.f32 %v23183_v13, %v20864_v12  ;;  %11050 = vmatprep.mubr.bf16.mxu0 %v9702_v0  ;;  %11147 = vmatprep.mubr.bf16.mxu1 %v9704_v49  ;;  %v14162_v35 = vld [vmem:[%s22195_s17 + $0x200] sm:$0xff]   ;;  %v9703_v6 = vpack.c.bf16 %v9527_v7, %v9511_v28  ;;  %v23189_v28 = vld [vmem:[#allocation51_spill] sm:$0xff] }
0x1c06   : > { %v21146_v45 = vpop.f32.mrf.mxu0  ;;  %v21148_v61 = vpop.f32.mrf.mxu1  ;;  %13277 = vmatpush3.bf16.msra.mxu0 %v14158_v9  ;;  %13341 = vmatpush3.bf16.msra.mxu1 %v14159_v33  ;;  %v14163_v14 = vld [vmem:[%s22195_s17 + $0x280] sm:$0xff]   ;;  %v14165_v9 = vld [vmem:[%s22195_s17 + $0x3f8] sm:$0xff]   ;;  %v9542_v33 = vmax.f32 %v8786_v23, 0.0  ;;  %v9701_v13 = vpack.c.bf16 %v9525_v63, %v9509_v30  ;;  %v8800_v23 = vadd.f32 %v20914_v60, %v20859_v27  ;;  %v8913_v63 = vadd.f32 %v20916_v58, %v20864_v12 }
0x1c07   : > { %23184 = vst [vmem:[#allocation73_spill] sm:$0xff] %v21146_v45  ;;  %23185 = vst [vmem:[#allocation75_spill] sm:$0xff] %v21148_v61  ;;  %13278 = vmatprep.subr.bf16.mxu0 %v14160_v21  ;;  %13342 = vmatprep.subr.bf16.mxu1 %v14161_v50  ;;  %v9544_v15 = vmax.f32 %v8899_v47, 0.0  ;;  %v23187_v21 = vld [vmem:[#allocation53_spill] sm:$0xff]  ;;  %v8897_v38 = vadd.f32 %v23189_v28, %v20904_v26  ;;  %v8796_v60 = vadd.f32 %v20892_v1, %v20859_v27 }
0x1c08   : > { %v21162_v0 = vpop.f32.mrf.mxu0  ;;  %v21164_v49 = vpop.f32.mrf.mxu1  ;;  %v8901_v50 = vadd.f32 %v23187_v21, %v20904_v26  ;;  %v9718_v45 = vpack.c.bf16 %v9558_v54, %v9542_v33  ;;  %v23188_v47 = vld [vmem:[#allocation61_spill] sm:$0xff]  ;;  %v8909_v58 = vadd.f32 %v20894_v36, %v20864_v12  ;;  %v9592_v33 = vmax.f32 %v8913_v63, 0.0 }
0x1c09   : > { %v9720_v7 = vpack.c.bf16 %v9560_v31, %v9544_v15  ;;  %v8784_v30 = vadd.f32 %v23188_v47, %v20899_v20  ;;  %v9543_v47 = vmax.f32 %v8897_v38, 0.0  ;;  %v9574_v1 = vmax.f32 %v8796_v60, 0.0 }
0x1c0a   : > { %v21170_v55 = vpop.f32.mrf.mxu0  ;;  %v21172_v61 = vpop.f32.mrf.mxu1  ;;  %13279 = vmatpush3.bf16.msra.mxu0 %v14162_v35  ;;  %13343 = vmatpush3.bf16.msra.mxu1 %v14163_v14  ;;  %v9557_v35 = vmax.f32 %v8788_v52, 0.0  ;;  %v9559_v14 = vmax.f32 %v8901_v50, 0.0  ;;  %v9576_v28 = vmax.f32 %v8909_v58, 0.0  ;;  %v8911_v52 = vadd.f32 %v20908_v29, %v20904_v26 }
0x1c0b   : > { %13392 = vmatprep.subr.bf16.mxu0 %v14164_v4  ;;  %13456 = vmatprep.subr.bf16.mxu1 %v14165_v9  ;;  %v9590_v9 = vmax.f32 %v8800_v23, 0.0  ;;  %v9541_v15 = vmax.f32 %v8784_v30, 0.0  ;;  %v8810_v63 = vadd.f32 %v20950_v42, %v20859_v27  ;;  %v8794_v60 = vadd.f32 %v20884_v43, %v20899_v20 }
0x1c0c   : > { %v21182_v21 = vpop.f32.mrf.mxu0  ;;  %v21184_v54 = vpop.f32.mrf.mxu1  ;;  %11051 = vmatmul.mubr.bf16.gmra.mxu0 %v9701_v13  ;;  %11148 = vmatmul.mubr.bf16.gmra.mxu1 %v9703_v6  ;;  %v9719_v36 = vpack.c.bf16 %v9559_v14, %v9543_v47  ;;  %v9736_v38 = vpack.c.bf16 %v9592_v33, %v9576_v28  ;;  %v8806_v42 = vadd.f32 %v20934_v41, %v20859_v27  ;;  %v9591_v14 = vmax.f32 %v8911_v52, 0.0 }
0x1c0d   : > { %23190 = vst [vmem:[#allocation23_spill] sm:$0xff] %v21184_v54  ;;  %11058 = vmatprep.mubr.bf16.mxu0 %v9718_v45  ;;  %11155 = vmatprep.mubr.bf16.mxu1 %v9720_v7  ;;  %v9717_v54 = vpack.c.bf16 %v9557_v35, %v9541_v15  ;;  %v8798_v45 = vadd.f32 %v20906_v11, %v20899_v20  ;;  %v9573_v15 = vmax.f32 %v8794_v60, 0.0 }
0x1c0e   : > { %v21190_v31 = vpop.f32.mrf.mxu0  ;;  %v21192_v4 = vpop.f32.mrf.mxu1  ;;  %v8923_v7 = vadd.f32 %v20952_v17, %v20864_v12  ;;  %v9734_v30 = vpack.c.bf16 %v9590_v9, %v9574_v1  ;;  %v8907_v11 = vadd.f32 %v20886_v40, %v20904_v26  ;;  %v8919_v17 = vadd.f32 %v20936_v56, %v20864_v12 }
0x1c0f   : > { %v9589_v35 = vmax.f32 %v8798_v45, 0.0  ;;  %v9622_v40 = vmax.f32 %v8810_v63, 0.0  ;;  %v9606_v41 = vmax.f32 %v8806_v42, 0.0  ;;  %v23192_v1 = vsub.s32 1, %v23159_v46 }
0x1c10   : > { %v21194_v13 = vpop.f32.mrf.mxu0  ;;  %v21196_v6 = vpop.f32.mrf.mxu1  ;;  %v9624_v33 = vmax.f32 %v8923_v7, 0.0  ;;  %v9575_v47 = vmax.f32 %v8907_v11, 0.0  ;;  %v9608_v56 = vmax.f32 %v8919_v17, 0.0  ;;  %v8808_v7 = vadd.f32 %v20942_v59, %v20899_v20  ;;  %v23195_v59 = vld [vmem:[#allocation12_spill] sm:$0xff] }
0x1c11   : > { %v9733_v52 = vpack.c.bf16 %v9589_v35, %v9573_v15  ;;  %v9750_v17 = vpack.c.bf16 %v9622_v40, %v9606_v41  ;;  %v23194_v35 = vld [vmem:[#allocation63_spill] sm:$0xff]  ;;  %v8917_v15 = vadd.f32 %v23195_v59, %v20904_v26 }
0x1c12   : > { %v21202_v50 = vpop.f32.mrf.mxu0  ;;  %v21204_v23 = vpop.f32.mrf.mxu1  ;;  %v9735_v63 = vpack.c.bf16 %v9591_v14, %v9575_v47  ;;  %v8804_v14 = vadd.f32 %v23194_v35, %v20899_v20  ;;  %v9621_v40 = vmax.f32 %v8808_v7, 0.0 }
0x1c13   : > { %v9607_v35 = vmax.f32 %v8917_v15, 0.0 }
0x1c14   : > { %v21214_v58 = vpop.f32.mrf.mxu0  ;;  %v21216_v29 = vpop.f32.mrf.mxu1  ;;  %11059 = vmatmul.mubr.bf16.gmra.mxu0 %v9717_v54  ;;  %11156 = vmatmul.mubr.bf16.gmra.mxu1 %v9719_v36  ;;  %v21229_v54 = vld [vmem:[%s22194_s16 + $0x8] sm:$0xff]  ;;  %v23193_v36 = vsub.s32 3, %v23159_v46 }
0x1c15   : > { %11066 = vmatprep.mubr.bf16.mxu0 %v9734_v30  ;;  %11163 = vmatprep.mubr.bf16.mxu1 %v9736_v38  ;;  %23191 = vst [vmem:[#allocation56_spill] sm:$0xff] %v21229_v54  ;;  %v21238_v28 = vrot.slane %v21229_v54, %v23192_v1  ;;  %v8921_v30 = vadd.f32 %v20944_v10, %v20904_v26 }
0x1c16   : > { %v21222_v43 = vpop.f32.mrf.mxu0  ;;  %v21224_v9 = vpop.f32.mrf.mxu1  ;;  %v21243_v45 = vrot.slane %v21229_v54, %v23193_v36  ;;  %v9752_v1 = vpack.c.bf16 %v9624_v33, %v9608_v56  ;;  %v9605_v36 = vmax.f32 %v8804_v14, 0.0 }
0x1c17   : > { %v8966_v11 = vadd.f32 %v21008_v3, %v21238_v28  ;;  %v8962_v3 = vadd.f32 %v20978_v18, %v21238_v28  ;;  %v9623_v33 = vmax.f32 %v8921_v30, 0.0  ;;  %v23197_v18 = vsub.s32 2, %v23159_v46 }
0x1c18   : > { %v21231_v27 = vpop.f32.mrf.mxu0  ;;  %v21233_v12 = vpop.f32.mrf.mxu1  ;;  %v9079_v42 = vadd.f32 %v21010_v34, %v21243_v45  ;;  %v9075_v34 = vadd.f32 %v20980_v5, %v21243_v45 }
0x1c19   : > { %v9402_v26 = vmax.f32 %v8966_v11, 0.0  ;;  %v21281_v5 = vrot.slane %v21229_v54, %v23197_v18  ;;  %v9749_v11 = vpack.c.bf16 %v9621_v40, %v9605_v36  ;;  %v8976_v18 = vadd.f32 %v21062_v48, %v21238_v28 }
0x1c1a   : > { %v21249_v38 = vpop.f32.mrf.mxu0  ;;  %v21251_v60 = vpop.f32.mrf.mxu1  ;;  %v9404_v56 = vmax.f32 %v9079_v42, 0.0  ;;  %v9751_v42 = vpack.c.bf16 %v9623_v33, %v9607_v35  ;;  %v8972_v48 = vadd.f32 %v21034_v57, %v21238_v28 }
0x1c1b   : > { %v9077_v59 = vadd.f32 %v20996_v62, %v21281_v5 }
0x1c1c   : > { %v21261_v47 = vpop.f32.mrf.mxu0  ;;  %v21263_v10 = vpop.f32.mrf.mxu1  ;;  %11067 = vmatmul.mubr.bf16.gmra.mxu0 %v9733_v52  ;;  %11164 = vmatmul.mubr.bf16.gmra.mxu1 %v9735_v63  ;;  %v23196_v52 = vsub.s32 0, %v23159_v46  ;;  %v9418_v57 = vmax.f32 %v8972_v48, 0.0 }
0x1c1d   : > { %11074 = vmatprep.mubr.bf16.mxu0 %v9750_v17  ;;  %11171 = vmatprep.mubr.bf16.mxu1 %v9752_v1  ;;  %v9386_v17 = vmax.f32 %v8962_v3, 0.0  ;;  %v9388_v1 = vmax.f32 %v9075_v34, 0.0 }
0x1c1e   : > { %v21269_v20 = vpop.f32.mrf.mxu0  ;;  %v21271_v41 = vpop.f32.mrf.mxu1  ;;  %v21276_v63 = vrot.slane %v21229_v54, %v23196_v52  ;;  %v9089_v54 = vadd.f32 %v21064_v53, %v21243_v45  ;;  %v9085_v53 = vadd.f32 %v21036_v44, %v21243_v45 }
0x1c1f   : > { %v9642_v3 = vpack.c.bf16 %v9402_v26, %v9386_v17  ;;  %v9644_v34 = vpack.c.bf16 %v9404_v56, %v9388_v1  ;;  %v9403_v56 = vmax.f32 %v9077_v59, 0.0 }
0x1c20   : > { %v21283_v7 = vpop.f32.mrf.mxu0  ;;  %v21285_v30 = vpop.f32.mrf.mxu1  ;;  %v8964_v14 = vadd.f32 %v20994_v8, %v21276_v63  ;;  %v8960_v40 = vadd.f32 %v20970_v24, %v21276_v63  ;;  %v9073_v8 = vadd.f32 %v20972_v22, %v21281_v5  ;;  %v9434_v22 = vmax.f32 %v8976_v18, 0.0 }
0x1c21   : > { %v9436_v35 = vmax.f32 %v9089_v54, 0.0  ;;  %v8974_v44 = vadd.f32 %v21054_v16, %v21276_v63  ;;  %v8970_v18 = vadd.f32 %v21028_v19, %v21276_v63  ;;  %v8986_v54 = vadd.f32 %v21120_v2, %v21238_v28  ;;  %v14167_v16 = vld [vmem:[%s22195_s17 + $0x3b8] sm:$0xff]  }
0x1c22   : > { %v21291_v15 = vpop.f32.mrf.mxu0  ;;  %v21293_v52 = vpop.f32.mrf.mxu1  ;;  %v9401_v26 = vmax.f32 %v8964_v14, 0.0  ;;  %v9385_v17 = vmax.f32 %v8960_v40, 0.0  ;;  %v9387_v1 = vmax.f32 %v9073_v8, 0.0  ;;  %v9087_v14 = vadd.f32 %v21056_v37, %v21281_v5  ;;  %v14166_v8 = vld [vmem:[%s22195_s17 + $0x338] sm:$0xff]   ;;  %v23201_v37 = vld [vmem:[#allocation54_spill] sm:$0xff] }
0x1c23   : > { %v9083_v48 = vadd.f32 %v23201_v37, %v21281_v5  ;;  %v9099_v19 = vadd.f32 %v21122_v32, %v21243_v45  ;;  %v9433_v32 = vmax.f32 %v8974_v44, 0.0  ;;  %v14171_v44 = vld [vmem:[%s22195_s17 + $0x3b0] sm:$0xff]  }
0x1c24   : > { %v21303_v33 = vpop.f32.mrf.mxu0  ;;  %v21305_v62 = vpop.f32.mrf.mxu1  ;;  %11075 = vmatmul.mubr.bf16.gmra.mxu0 %v9749_v11  ;;  %11172 = vmatmul.mubr.bf16.gmra.mxu1 %v9751_v42  ;;  %v9641_v59 = vpack.c.bf16 %v9401_v26, %v9385_v17  ;;  %v14168_v26 = vld [vmem:[%s22195_s17 + $0x370] sm:$0xff]   ;;  %v8982_v17 = vadd.f32 %v21090_v51, %v21238_v28 }
0x1c25   : > { %23198 = vst [vmem:[#allocation15_spill] sm:$0xff] %v21303_v33  ;;  %23199 = vst [vmem:[#allocation76_spill] sm:$0xff] %v21305_v62  ;;  %11212 = vmatprep.mubr.bf16.mxu0 %v9642_v3  ;;  %11309 = vmatprep.mubr.bf16.mxu1 %v9644_v34  ;;  %v9420_v62 = vmax.f32 %v9085_v53, 0.0  ;;  %v9643_v3 = vpack.c.bf16 %v9403_v56, %v9387_v1  ;;  %v9658_v53 = vpack.c.bf16 %v9434_v22, %v9418_v57  ;;  %v14169_v56 = vld [vmem:[%s22195_s17 + $0x3f0] sm:$0xff]  }
0x1c26   : > { %v21311_v24 = vpop.f32.mrf.mxu0  ;;  %v21313_v36 = vpop.f32.mrf.mxu1  ;;  %v9435_v22 = vmax.f32 %v9087_v14, 0.0  ;;  %v14170_v51 = vld [vmem:[%s22195_s17 + $0x330] sm:$0xff]   ;;  %v9417_v14 = vmax.f32 %v8970_v18, 0.0 }
0x1c27   : > { %v9660_v2 = vpack.c.bf16 %v9436_v35, %v9420_v62  ;;  %v9095_v62 = vadd.f32 %v21092_v25, %v21243_v45  ;;  %v9466_v35 = vmax.f32 %v8986_v54, 0.0  ;;  %v9468_v25 = vmax.f32 %v9099_v19, 0.0  ;;  %v14173_v54 = vld [vmem:[%s22195_s17 + $0x3e8] sm:$0xff]  }
0x1c28   : > { %v21315_v11 = vpop.f32.mrf.mxu0  ;;  %v21317_v42 = vpop.f32.mrf.mxu1  ;;  %v9657_v19 = vpack.c.bf16 %v9433_v32, %v9417_v14  ;;  %v14175_v32 = vld [vmem:[%s22195_s17 + $0x3a8] sm:$0xff]  }
0x1c29   : > { %23200 = vst [vmem:[#allocation77_spill] sm:$0xff] %v21317_v42 }
0x1c2a   : > { %v21327_v34 = vpop.f32.mrf.mxu0  ;;  %v21329_v40 = vpop.f32.mrf.mxu1 }
0x1c2c   : > { %v21349_v1 = vpop.f32.mrf.mxu0  ;;  %v21351_v33 = vpop.f32.mrf.mxu1  ;;  %11213 = vmatmul.mubr.bf16.vlgmr.msra.gmra.mxu0 %v9641_v59  ;;  %11310 = vmatmul.mubr.bf16.vlgmr.msra.gmra.mxu1 %v9643_v3  ;;  %v9419_v59 = vmax.f32 %v9083_v48, 0.0  ;;  %v14172_v3 = vld [vmem:[%s22195_s17 + $0x368] sm:$0xff]  }
0x1c2d   : > { %23202 = vst [vmem:[#allocation16_spill] sm:$0xff] %v21349_v1  ;;  %23203 = vst [vmem:[#allocation19_spill] sm:$0xff] %v21351_v33  ;;  %11220 = vmatprep.mubr.bf16.mxu0 %v9658_v53  ;;  %11317 = vmatprep.mubr.bf16.mxu1 %v9660_v2  ;;  %v23206_v53 = vld [vmem:[#allocation72_spill] sm:$0xff]  ;;  %v23207_v33 = vld [vmem:[#allocation17_spill] sm:$0xff] }
0x1c2e   : > { %v21355_v57 = vpop.f32.mrf.mxu0  ;;  %v21357_v37 = vpop.f32.mrf.mxu1  ;;  %13393 = vmatpush3.bf16.msra.mxu0 %v14166_v8  ;;  %13457 = vmatpush3.bf16.msra.mxu1 %v14167_v16  ;;  %v9450_v8 = vmax.f32 %v8982_v17, 0.0  ;;  %v8984_v16 = vadd.f32 %v21106_v39, %v21276_v63  ;;  %v9097_v2 = vadd.f32 %v23206_v53, %v21281_v5  ;;  %v8980_v1 = vadd.f32 %v23207_v33, %v21276_v63  ;;  %v14174_v53 = vld [vmem:[%s22195_s17 + $0x328] sm:$0xff]  }
0x1c2f   : > { %23204 = vst [vmem:[#allocation59_spill] sm:$0xff] %v21355_v57  ;;  %23205 = vst [vmem:[#allocation13_spill] sm:$0xff] %v21357_v37  ;;  %13394 = vmatprep.subr.bf16.mxu0 %v14168_v26  ;;  %13458 = vmatprep.subr.bf16.mxu1 %v14169_v56  ;;  %v9659_v26 = vpack.c.bf16 %v9435_v22, %v9419_v59  ;;  %v9452_v56 = vmax.f32 %v9095_v62, 0.0  ;;  %v23208_v37 = vld [vmem:[#allocation20_spill] sm:$0xff]  ;;  %v8996_v33 = vadd.f32 %v21170_v55, %v21238_v28  ;;  %v23211_v55 = vld [vmem:[#allocation73_spill] sm:$0xff] }
0x1c30   : > { %v21375_v18 = vpop.f32.mrf.mxu0  ;;  %v21377_v48 = vpop.f32.mrf.mxu1  ;;  %v9093_v57 = vadd.f32 %v23208_v37, %v21281_v5  ;;  %v9674_v39 = vpack.c.bf16 %v9466_v35, %v9450_v8  ;;  %v9109_v22 = vadd.f32 %v21172_v61, %v21243_v45  ;;  %v14176_v35 = vld [vmem:[%s22195_s17 + $0x360] sm:$0xff]   ;;  %v8992_v61 = vadd.f32 %v23211_v55, %v21238_v28 }
0x1c31   : > { %v9676_v62 = vpack.c.bf16 %v9468_v25, %v9452_v56  ;;  %v14177_v37 = vld [vmem:[%s22195_s17 + $0x3e0] sm:$0xff]   ;;  %v23212_v25 = vld [vmem:[#allocation75_spill] sm:$0xff] }
0x1c32   : > { %v21383_v17 = vpop.f32.mrf.mxu0  ;;  %v21385_v42 = vpop.f32.mrf.mxu1  ;;  %13395 = vmatpush3.bf16.msra.mxu0 %v14170_v51  ;;  %13459 = vmatpush3.bf16.msra.mxu1 %v14171_v44  ;;  %v9465_v51 = vmax.f32 %v8984_v16, 0.0  ;;  %v9467_v44 = vmax.f32 %v9097_v2, 0.0  ;;  %v9451_v8 = vmax.f32 %v9093_v57, 0.0  ;;  %v14178_v2 = vld [vmem:[%s22195_s17 + $0x320] sm:$0xff]   ;;  %v9500_v55 = vmax.f32 %v9109_v22, 0.0  ;;  %v14181_v57 = vld [vmem:[%s22195_s17 + $0x3d8] sm:$0xff]  }
0x1c33   : > { %13396 = vmatprep.subr.bf16.mxu0 %v14172_v3  ;;  %13460 = vmatprep.subr.bf16.mxu1 %v14173_v54  ;;  %v9105_v3 = vadd.f32 %v23212_v25, %v21243_v45  ;;  %v9449_v54 = vmax.f32 %v8980_v1, 0.0  ;;  %v14180_v1 = vld [vmem:[%s22195_s17 + $0x358] sm:$0xff]   ;;  %v9482_v25 = vmax.f32 %v8992_v61, 0.0  ;;  %v9107_v22 = vadd.f32 %v21164_v49, %v21281_v5 }
0x1c34   : > { %v21403_v14 = vpop.f32.mrf.mxu0  ;;  %v21405_v59 = vpop.f32.mrf.mxu1  ;;  %11221 = vmatmul.mubr.bf16.gmra.mxu0 %v9657_v19  ;;  %11318 = vmatmul.mubr.bf16.gmra.mxu1 %v9659_v26  ;;  %v14179_v19 = vld [vmem:[%s22195_s17 + $0x3a0] sm:$0xff]   ;;  %v9498_v26 = vmax.f32 %v8996_v33, 0.0  ;;  %v8994_v33 = vadd.f32 %v21162_v0, %v21276_v63  ;;  %v14182_v0 = vld [vmem:[%s22195_s17 + $0x318] sm:$0xff]  }
0x1c35   : > { %23209 = vst [vmem:[#allocation81_spill] sm:$0xff] %v21403_v14  ;;  %23210 = vst [vmem:[#allocation70_spill] sm:$0xff] %v21405_v59  ;;  %11228 = vmatprep.mubr.bf16.mxu0 %v9674_v39  ;;  %11325 = vmatprep.mubr.bf16.mxu1 %v9676_v62  ;;  %v9673_v39 = vpack.c.bf16 %v9465_v51, %v9449_v54  ;;  %v9484_v59 = vmax.f32 %v9105_v3, 0.0  ;;  %v23215_v14 = vld [vmem:[#allocation55_spill] sm:$0xff]  ;;  %v9006_v51 = vadd.f32 %v21202_v50, %v21238_v28  ;;  %v14183_v49 = vld [vmem:[%s22195_s17 + $0x398] sm:$0xff]  }
0x1c36   : > { %v21411_v56 = vpop.f32.mrf.mxu0  ;;  %v21413_v16 = vpop.f32.mrf.mxu1  ;;  %13397 = vmatpush3.bf16.msra.mxu0 %v14174_v53  ;;  %13461 = vmatpush3.bf16.msra.mxu1 %v14175_v32  ;;  %v9675_v53 = vpack.c.bf16 %v9467_v44, %v9451_v8  ;;  %v9690_v61 = vpack.c.bf16 %v9498_v26, %v9482_v25  ;;  %v14184_v50 = vld [vmem:[%s22195_s17 + $0x350] sm:$0xff]   ;;  %v9115_v26 = vadd.f32 %v21192_v4, %v21243_v45 }
0x1c37   : > { %23213 = vst [vmem:[#allocation42_spill] sm:$0xff] %v21413_v16  ;;  %13398 = vmatprep.subr.bf16.mxu0 %v14176_v35  ;;  %13462 = vmatprep.subr.bf16.mxu1 %v14177_v37  ;;  %v23214_v35 = vld [vmem:[#allocation25_spill] sm:$0xff]  ;;  %v9103_v16 = vadd.f32 %v23215_v14, %v21281_v5  ;;  %v9119_v14 = vadd.f32 %v21204_v23, %v21243_v45  ;;  %v14185_v8 = vld [vmem:[%s22195_s17 + $0x3d0] sm:$0xff]   ;;  %v9497_v23 = vmax.f32 %v8994_v33, 0.0  ;;  %v14188_v33 = vld [vmem:[%s22195_s17 + $0x348] sm:$0xff]  }
0x1c38   : > { %v21427_v32 = vpop.f32.mrf.mxu0  ;;  %v21429_v62 = vpop.f32.mrf.mxu1  ;;  %v8990_v37 = vadd.f32 %v23214_v35, %v21276_v63  ;;  %v9692_v3 = vpack.c.bf16 %v9500_v55, %v9484_v59  ;;  %v9499_v59 = vmax.f32 %v9107_v22, 0.0  ;;  %v9530_v55 = vmax.f32 %v9006_v51, 0.0  ;;  %v14189_v22 = vld [vmem:[%s22195_s17 + $0x3c8] sm:$0xff]  }
0x1c39   : > { %v9483_v25 = vmax.f32 %v9103_v16, 0.0  ;;  %v9532_v4 = vmax.f32 %v9119_v14, 0.0  ;;  %v9004_v16 = vadd.f32 %v21194_v13, %v21276_v63  ;;  %v9000_v14 = vadd.f32 %v21182_v21, %v21276_v63  ;;  %v14191_v13 = vld [vmem:[%s22195_s17 + $0x388] sm:$0xff]  }
0x1c3a   : > { %v21441_v44 = vpop.f32.mrf.mxu0  ;;  %v21443_v54 = vpop.f32.mrf.mxu1  ;;  %13399 = vmatpush3.bf16.msra.mxu0 %v14178_v2  ;;  %13463 = vmatpush3.bf16.msra.mxu1 %v14179_v19  ;;  %v9002_v2 = vadd.f32 %v21190_v31, %v21238_v28  ;;  %v14186_v31 = vld [vmem:[%s22195_s17 + $0x310] sm:$0xff]   ;;  %v9016_v21 = vadd.f32 %v21249_v38, %v21238_v28 }
0x1c3b   : > { %13400 = vmatprep.subr.bf16.mxu0 %v14180_v1  ;;  %13464 = vmatprep.subr.bf16.mxu1 %v14181_v57 }
0x1c3c   : > { %v21461_v19 = vpop.f32.mrf.mxu0  ;;  %v21463_v35 = vpop.f32.mrf.mxu1  ;;  %11229 = vmatmul.mubr.bf16.gmra.mxu0 %v9673_v39  ;;  %11326 = vmatmul.mubr.bf16.gmra.mxu1 %v9675_v53  ;;  %v14187_v39 = vld [vmem:[%s22195_s17 + $0x390] sm:$0xff]   ;;  %v9481_v53 = vmax.f32 %v8990_v37, 0.0  ;;  %v9514_v51 = vmax.f32 %v9002_v2, 0.0  ;;  %v9516_v37 = vmax.f32 %v9115_v26, 0.0  ;;  %v14192_v26 = vld [vmem:[%s22195_s17 + $0x340] sm:$0xff]  }
0x1c3d   : > { %23216 = vst [vmem:[#allocation60_spill] sm:$0xff] %v21463_v35  ;;  %11236 = vmatprep.mubr.bf16.mxu0 %v9690_v61  ;;  %11333 = vmatprep.mubr.bf16.mxu1 %v9692_v3  ;;  %v9691_v3 = vpack.c.bf16 %v9499_v59, %v9483_v25  ;;  %v9012_v25 = vadd.f32 %v21222_v43, %v21238_v28  ;;  %v14195_v43 = vld [vmem:[%s22195_s17 + $0x380] sm:$0xff]  }
0x1c3e   : > { %v21467_v1 = vpop.f32.mrf.mxu0  ;;  %v21469_v57 = vpop.f32.mrf.mxu1  ;;  %13401 = vmatpush3.bf16.msra.mxu0 %v14182_v0  ;;  %13465 = vmatpush3.bf16.msra.mxu1 %v14183_v49  ;;  %v9689_v61 = vpack.c.bf16 %v9497_v23, %v9481_v53  ;;  %v9706_v2 = vpack.c.bf16 %v9530_v55, %v9514_v51  ;;  %v14190_v23 = vld [vmem:[%s22195_s17 + $0x308] sm:$0xff]   ;;  %v9708_v59 = vpack.c.bf16 %v9532_v4, %v9516_v37  ;;  %v14193_v55 = vld [vmem:[%s22195_s17 + $0x3c0] sm:$0xff]   ;;  %v9562_v37 = vmax.f32 %v9016_v21, 0.0 }
0x1c3f   : > { %13402 = vmatprep.subr.bf16.mxu0 %v14184_v50  ;;  %13466 = vmatprep.subr.bf16.mxu1 %v14185_v8  ;;  %v9117_v50 = vadd.f32 %v21196_v6, %v21281_v5  ;;  %v9129_v6 = vadd.f32 %v21251_v60, %v21243_v45  ;;  %v9529_v60 = vmax.f32 %v9004_v16, 0.0  ;;  %v9125_v4 = vadd.f32 %v21224_v9, %v21243_v45 }
0x1c40   : > { %v21483_v0 = vpop.f32.mrf.mxu0  ;;  %v21485_v49 = vpop.f32.mrf.mxu1 }
0x1c41   : > { %v9564_v9 = vmax.f32 %v9129_v6, 0.0  ;;  %v9026_v6 = vadd.f32 %v21291_v15, %v21238_v28  ;;  %v9022_v15 = vadd.f32 %v21269_v20, %v21238_v28 }
0x1c42   : > { %v21493_v8 = vpop.f32.mrf.mxu0  ;;  %v21495_v35 = vpop.f32.mrf.mxu1  ;;  %13403 = vmatpush3.bf16.msra.mxu0 %v14186_v31  ;;  %13467 = vmatpush3.bf16.msra.mxu1 %v14187_v39  ;;  %v23217_v31 = vld [vmem:[#allocation23_spill] sm:$0xff] }
0x1c43   : > { %13404 = vmatprep.subr.bf16.mxu0 %v14188_v33  ;;  %13468 = vmatprep.subr.bf16.mxu1 %v14189_v22  ;;  %v9113_v39 = vadd.f32 %v23217_v31, %v21281_v5  ;;  %v9531_v33 = vmax.f32 %v9117_v50, 0.0  ;;  %v9578_v20 = vmax.f32 %v9022_v15, 0.0 }
0x1c44   : > { %v21515_v53 = vpop.f32.mrf.mxu0  ;;  %v21517_v38 = vpop.f32.mrf.mxu1  ;;  %11237 = vmatmul.mubr.bf16.gmra.mxu0 %v9689_v61  ;;  %11334 = vmatmul.mubr.bf16.gmra.mxu1 %v9691_v3  ;;  %v14194_v61 = vld [vmem:[%s22195_s17 + $0x300] sm:$0xff]   ;;  %v9513_v3 = vmax.f32 %v9000_v14, 0.0 }
0x1c45   : > { %23218 = vst [vmem:[#allocation82_spill] sm:$0xff] %v21515_v53  ;;  %23219 = vst [vmem:[#allocation43_spill] sm:$0xff] %v21517_v38  ;;  %11244 = vmatprep.mubr.bf16.mxu0 %v9706_v2  ;;  %11341 = vmatprep.mubr.bf16.mxu1 %v9708_v59  ;;  %v9515_v16 = vmax.f32 %v9113_v39, 0.0  ;;  %v9548_v59 = vmax.f32 %v9125_v4, 0.0  ;;  %v9014_v38 = vadd.f32 %v21231_v27, %v21276_v63 }
0x1c46   : > { %v21523_v22 = vpop.f32.mrf.mxu0  ;;  %v21525_v51 = vpop.f32.mrf.mxu1  ;;  %13405 = vmatpush3.bf16.msra.mxu0 %v14190_v23  ;;  %13469 = vmatpush3.bf16.msra.mxu1 %v14191_v13  ;;  %v9705_v23 = vpack.c.bf16 %v9529_v60, %v9513_v3  ;;  %v9546_v13 = vmax.f32 %v9012_v25, 0.0  ;;  %v9127_v53 = vadd.f32 %v21233_v12, %v21281_v5  ;;  %v9010_v27 = vadd.f32 %v21214_v58, %v21276_v63 }
0x1c47   : > { %13406 = vmatprep.subr.bf16.mxu0 %v14192_v26  ;;  %13470 = vmatprep.subr.bf16.mxu1 %v14193_v55  ;;  %v9707_v31 = vpack.c.bf16 %v9531_v33, %v9515_v16  ;;  %v9139_v26 = vadd.f32 %v21293_v52, %v21243_v45  ;;  %v9724_v39 = vpack.c.bf16 %v9564_v9, %v9548_v59  ;;  %v9561_v4 = vmax.f32 %v9014_v38, 0.0 }
0x1c48   : > { %v21533_v50 = vpop.f32.mrf.mxu0  ;;  %v21535_v2 = vpop.f32.mrf.mxu1  ;;  %v9722_v55 = vpack.c.bf16 %v9562_v37, %v9546_v13  ;;  %v9123_v12 = vadd.f32 %v21216_v29, %v21281_v5  ;;  %v9135_v52 = vadd.f32 %v21271_v41, %v21243_v45  ;;  %v9563_v33 = vmax.f32 %v9127_v53, 0.0 }
0x1c49   : > { %v9594_v29 = vmax.f32 %v9026_v6, 0.0  ;;  %v9545_v3 = vmax.f32 %v9010_v27, 0.0  ;;  %v9024_v38 = vadd.f32 %v21283_v7, %v21276_v63  ;;  %v9137_v53 = vadd.f32 %v21285_v30, %v21281_v5 }
0x1c4a   : > { %v21541_v14 = vpop.f32.mrf.mxu0  ;;  %v21543_v21 = vpop.f32.mrf.mxu1  ;;  %13407 = vmatpush3.bf16.msra.mxu0 %v14194_v61  ;;  %13471 = vmatpush3.bf16.msra.mxu1 %v14195_v43  ;;  %v9596_v43 = vmax.f32 %v9139_v26, 0.0  ;;  %v9547_v37 = vmax.f32 %v9123_v12, 0.0  ;;  %v9036_v6 = vadd.f32 %v21327_v34, %v21238_v28  ;;  %v9149_v26 = vadd.f32 %v21329_v40, %v21243_v45 }
0x1c4b   : > { %v9721_v13 = vpack.c.bf16 %v9561_v4, %v9545_v3  ;;  %v9020_v27 = vadd.f32 %v21261_v47, %v21276_v63  ;;  %v9133_v7 = vadd.f32 %v21263_v10, %v21281_v5  ;;  %v9032_v34 = vadd.f32 %v21311_v24, %v21238_v28 }
0x1c4c   : > { %v21553_v60 = vpop.f32.mrf.mxu0  ;;  %v21555_v25 = vpop.f32.mrf.mxu1  ;;  %11245 = vmatmul.mubr.bf16.gmra.mxu0 %v9705_v23  ;;  %11342 = vmatmul.mubr.bf16.gmra.mxu1 %v9707_v31  ;;  %v9580_v23 = vmax.f32 %v9135_v52, 0.0  ;;  %v9723_v41 = vpack.c.bf16 %v9563_v33, %v9547_v37  ;;  %v9145_v40 = vadd.f32 %v21313_v36, %v21243_v45  ;;  %v9593_v15 = vmax.f32 %v9024_v38, 0.0  ;;  %v23221_v36 = vld [vmem:[#allocation56_spill] sm:$0xff] }
0x1c4d   : > { %11252 = vmatprep.mubr.bf16.mxu0 %v9722_v55  ;;  %11349 = vmatprep.mubr.bf16.mxu1 %v9724_v39  ;;  %v9738_v55 = vpack.c.bf16 %v9594_v29, %v9578_v20  ;;  %v9595_v52 = vmax.f32 %v9137_v53, 0.0  ;;  %v9626_v10 = vmax.f32 %v9036_v6, 0.0  ;;  %v9628_v33 = vmax.f32 %v9149_v26, 0.0  ;;  %v23223_v6 = vld [vmem:[#allocation77_spill] sm:$0xff] }
0x1c4e   : > { %v21561_v58 = vpop.f32.mrf.mxu0  ;;  %v21563_v61 = vpop.f32.mrf.mxu1  ;;  %v9740_v39 = vpack.c.bf16 %v9596_v43, %v9580_v23  ;;  %v9577_v29 = vmax.f32 %v9020_v27, 0.0  ;;  %v9579_v43 = vmax.f32 %v9133_v7, 0.0  ;;  %v9610_v28 = vmax.f32 %v9032_v34, 0.0 }
0x1c4f   : > { %v9612_v24 = vmax.f32 %v9145_v40, 0.0  ;;  %v23220_v45 = vsub.s32 5, %v23159_v46  ;;  %v23222_v23 = vsub.s32 7, %v23159_v46  ;;  %v9034_v53 = vadd.f32 %v21315_v11, %v21276_v63  ;;  %v23225_v11 = vld [vmem:[#allocation76_spill] sm:$0xff] }
0x1c50   : > { %v21565_v9 = vpop.f32.mrf.mxu0  ;;  %v21567_v16 = vpop.f32.mrf.mxu1  ;;  %v9739_v38 = vpack.c.bf16 %v9595_v52, %v9579_v43  ;;  %v9147_v26 = vadd.f32 %v23223_v6, %v21281_v5  ;;  %v9754_v34 = vpack.c.bf16 %v9626_v10, %v9610_v28  ;;  %v23228_v6 = vld [vmem:[#allocation13_spill] sm:$0xff] }
0x1c51   : > { %v21604_v20 = vrot.slane %v23221_v36, %v23220_v45  ;;  %v9756_v40 = vpack.c.bf16 %v9628_v33, %v9612_v24  ;;  %v9625_v10 = vmax.f32 %v9034_v53, 0.0 }
0x1c52   : > { %v21573_v59 = vpop.f32.mrf.mxu0  ;;  %v21575_v31 = vpop.f32.mrf.mxu1  ;;  %v9627_v33 = vmax.f32 %v9147_v26, 0.0 }
0x1c53   : > { %v9192_v27 = vadd.f32 %v21383_v17, %v21604_v20 }
0x1c54   : > { %v21585_v12 = vpop.f32.mrf.mxu0  ;;  %v21587_v30 = vpop.f32.mrf.mxu1  ;;  %11253 = vmatmul.mubr.bf16.gmra.mxu0 %v9721_v13  ;;  %11350 = vmatmul.mubr.bf16.gmra.mxu1 %v9723_v41  ;;  %v21609_v13 = vrot.slane %v23221_v36, %v23222_v23  ;;  %v9737_v41 = vpack.c.bf16 %v9593_v15, %v9577_v29  ;;  %v23224_v15 = vld [vmem:[#allocation15_spill] sm:$0xff]  ;;  %v9143_v29 = vadd.f32 %v23225_v11, %v21281_v5 }
0x1c55   : > { %11260 = vmatprep.mubr.bf16.mxu0 %v9738_v55  ;;  %11357 = vmatprep.mubr.bf16.mxu1 %v9740_v39  ;;  %v9030_v52 = vadd.f32 %v23224_v15, %v21276_v63  ;;  %v23227_v23 = vld [vmem:[#allocation59_spill] sm:$0xff]  ;;  %v9406_v5 = vmax.f32 %v9192_v27, 0.0 }
0x1c56   : > { %v21593_v47 = vpop.f32.mrf.mxu0  ;;  %v21595_v4 = vpop.f32.mrf.mxu1  ;;  %v9305_v7 = vadd.f32 %v21385_v42, %v21609_v13  ;;  %v9188_v17 = vadd.f32 %v23227_v23, %v21604_v20  ;;  %v9301_v42 = vadd.f32 %v23228_v6, %v21609_v13  ;;  %v9611_v11 = vmax.f32 %v9143_v29, 0.0 }
0x1c57   : > { %v9609_v15 = vmax.f32 %v9030_v52, 0.0  ;;  %v23230_v23 = vsub.s32 6, %v23159_v46 }
0x1c58   : > { %v21597_v3 = vpop.f32.mrf.mxu0  ;;  %v21599_v37 = vpop.f32.mrf.mxu1  ;;  %v9408_v24 = vmax.f32 %v9305_v7, 0.0  ;;  %v9392_v6 = vmax.f32 %v9301_v42, 0.0  ;;  %v9755_v7 = vpack.c.bf16 %v9627_v33, %v9611_v11 }
0x1c59   : > { %v9753_v27 = vpack.c.bf16 %v9625_v10, %v9609_v15  ;;  %v23232_v10 = vld [vmem:[#allocation16_spill] sm:$0xff] }
0x1c5a   : > { %v21615_v55 = vpop.f32.mrf.mxu0  ;;  %v21617_v39 = vpop.f32.mrf.mxu1  ;;  %v9648_v42 = vpack.c.bf16 %v9408_v24, %v9392_v6 }
0x1c5c   : > { %v21627_v43 = vpop.f32.mrf.mxu0  ;;  %v21629_v45 = vpop.f32.mrf.mxu1  ;;  %11261 = vmatmul.mubr.bf16.gmra.mxu0 %v9737_v41  ;;  %11358 = vmatmul.mubr.bf16.gmra.mxu1 %v9739_v38  ;;  %v23229_v41 = vsub.s32 4, %v23159_v46 }
0x1c5d   : > { %23226 = vst [vmem:[#allocation83_spill] sm:$0xff] %v21629_v45  ;;  %11268 = vmatprep.mubr.bf16.mxu0 %v9754_v34  ;;  %11365 = vmatprep.mubr.bf16.mxu1 %v9756_v40  ;;  %v21647_v34 = vrot.slane %v23221_v36, %v23230_v23  ;;  %v9390_v40 = vmax.f32 %v9188_v17, 0.0  ;;  %v9315_v23 = vadd.f32 %v21443_v54, %v21609_v13  ;;  %v23236_v45 = vld [vmem:[#allocation42_spill] sm:$0xff] }
0x1c5e   : > { %v21635_v63 = vpop.f32.mrf.mxu0  ;;  %v21637_v28 = vpop.f32.mrf.mxu1  ;;  %v21642_v38 = vrot.slane %v23221_v36, %v23229_v41  ;;  %v9202_v36 = vadd.f32 %v21441_v44, %v21604_v20  ;;  %v9198_v44 = vadd.f32 %v21411_v56, %v21604_v20  ;;  %v9311_v54 = vadd.f32 %v23236_v45, %v21609_v13 }
0x1c5f   : > { %v9303_v29 = vadd.f32 %v21377_v48, %v21647_v34  ;;  %v9646_v17 = vpack.c.bf16 %v9406_v5, %v9390_v40 }
0x1c60   : > { %v21649_v53 = vpop.f32.mrf.mxu0  ;;  %v21651_v26 = vpop.f32.mrf.mxu1  ;;  %v9190_v52 = vadd.f32 %v21375_v18, %v21642_v38  ;;  %v9186_v33 = vadd.f32 %v23232_v10, %v21642_v38  ;;  %v23233_v18 = vld [vmem:[#allocation19_spill] sm:$0xff]  ;;  %v9438_v10 = vmax.f32 %v9202_v36, 0.0  ;;  %v9422_v56 = vmax.f32 %v9198_v44, 0.0 }
0x1c61   : > { %23231 = vst [vmem:[#allocation84_spill] sm:$0xff] %v21651_v26  ;;  %v9299_v15 = vadd.f32 %v23233_v18, %v21647_v34  ;;  %v9407_v24 = vmax.f32 %v9303_v29, 0.0  ;;  %v9440_v18 = vmax.f32 %v9315_v23, 0.0  ;;  %v9424_v26 = vmax.f32 %v9311_v54, 0.0 }
0x1c62   : > { %v21657_v41 = vpop.f32.mrf.mxu0  ;;  %v21659_v46 = vpop.f32.mrf.mxu1  ;;  %v9405_v5 = vmax.f32 %v9190_v52, 0.0  ;;  %v9200_v45 = vadd.f32 %v21427_v32, %v21642_v38  ;;  %v9313_v52 = vadd.f32 %v21429_v62, %v21647_v34  ;;  %v9212_v36 = vadd.f32 %v21493_v8, %v21604_v20  ;;  %v23241_v32 = vld [vmem:[#allocation70_spill] sm:$0xff] }
0x1c63   : > { %v9325_v23 = vadd.f32 %v21495_v35, %v21609_v13  ;;  %v9309_v54 = vadd.f32 %v23241_v32, %v21647_v34  ;;  %v9664_v62 = vpack.c.bf16 %v9440_v18, %v9424_v26  ;;  %v9321_v8 = vadd.f32 %v21469_v57, %v21609_v13  ;;  %v21708_v26 = vld [vmem:[%s22196_s18] ss:$0 sm:$0xff] }
0x1c64   : > { %v21669_v11 = vpop.f32.mrf.mxu0  ;;  %v21671_v48 = vpop.f32.mrf.mxu1  ;;  %11269 = vmatmul.mubr.bf16.gmra.mxu0 %v9753_v27  ;;  %11366 = vmatmul.mubr.bf16.gmra.mxu1 %v9755_v7 }
0x1c65   : > { %23234 = vst [vmem:[#allocation85_spill] sm:$0xff] %v21669_v11  ;;  %23235 = vst [vmem:[#allocation57_spill] sm:$0xff] %v21671_v48  ;;  %11406 = vmatprep.mubr.bf16.mxu0 %v9646_v17  ;;  %11503 = vmatprep.mubr.bf16.mxu1 %v9648_v42  ;;  %v9389_v11 = vmax.f32 %v9186_v33, 0.0  ;;  %v9391_v48 = vmax.f32 %v9299_v15, 0.0  ;;  %v23240_v15 = vld [vmem:[#allocation81_spill] sm:$0xff] }
0x1c66   : > { %v21677_v40 = vpop.f32.mrf.mxu0  ;;  %v21679_v6 = vpop.f32.mrf.mxu1  ;;  %v9196_v44 = vadd.f32 %v23240_v15, %v21642_v38  ;;  %v9470_v15 = vmax.f32 %v9212_v36, 0.0 }
0x1c67   : > { %23237 = vst [vmem:[#allocation14_spill] sm:$0xff] %v21679_v6  ;;  %v9645_v29 = vpack.c.bf16 %v9405_v5, %v9389_v11  ;;  %v9647_v17 = vpack.c.bf16 %v9407_v24, %v9391_v48  ;;  %v9208_v11 = vadd.f32 %v21467_v1, %v21604_v20  ;;  %v9437_v5 = vmax.f32 %v9200_v45, 0.0 }
0x1c68   : > { %v21681_v27 = vpop.f32.mrf.mxu0  ;;  %v21683_v7 = vpop.f32.mrf.mxu1  ;;  %v9439_v24 = vmax.f32 %v9313_v52, 0.0  ;;  %v9421_v18 = vmax.f32 %v9196_v44, 0.0  ;;  %v9210_v45 = vadd.f32 %v21483_v0, %v21642_v38 }
0x1c69   : > { %23238 = vst [vmem:[#allocation44_spill] sm:$0xff] %v21681_v27  ;;  %23239 = vst [vmem:[#allocation50_spill] sm:$0xff] %v21683_v7  ;;  %v9662_v7 = vpack.c.bf16 %v9438_v10, %v9422_v56  ;;  %v9472_v27 = vmax.f32 %v9325_v23, 0.0  ;;  %v9423_v56 = vmax.f32 %v9309_v54, 0.0  ;;  %v9454_v6 = vmax.f32 %v9208_v11, 0.0  ;;  %v23242_v54 = vld [vmem:[#allocation60_spill] sm:$0xff] }
0x1c6a   : > { %v21693_v42 = vpop.f32.mrf.mxu0  ;;  %v21695_v33 = vpop.f32.mrf.mxu1  ;;  %v9661_v36 = vpack.c.bf16 %v9437_v5, %v9421_v18  ;;  %v9222_v11 = vadd.f32 %v21541_v14, %v21604_v20  ;;  %v9331_v14 = vadd.f32 %v21525_v51, %v21609_v13 }
0x1c6b   : > { %v9663_v23 = vpack.c.bf16 %v9439_v24, %v9423_v56  ;;  %v9218_v56 = vadd.f32 %v21523_v22, %v21604_v20 }
0x1c6c   : > { %v13024_v48 = vpop.f32.mrf.mxu0  ;;  %v13088_v35 = vpop.f32.mrf.mxu1  ;;  %11407 = vmatmul.mubr.bf16.vlgmr.msra.gmra.mxu0 %v9645_v29  ;;  %11504 = vmatmul.mubr.bf16.vlgmr.msra.gmra.mxu1 %v9647_v17  ;;  %v9456_v29 = vmax.f32 %v9321_v8, 0.0 }
0x1c6d   : > { %11414 = vmatprep.mubr.bf16.mxu0 %v9662_v7  ;;  %11511 = vmatprep.mubr.bf16.mxu1 %v9664_v62  ;;  %v9323_v7 = vadd.f32 %v21485_v49, %v21647_v34  ;;  %v9206_v62 = vadd.f32 %v21461_v19, %v21642_v38  ;;  %v9335_v49 = vadd.f32 %v21543_v21, %v21609_v13  ;;  %v9469_v19 = vmax.f32 %v9210_v45, 0.0 }
0x1c6e   : > { %v13025_v10 = vpop.f32.mrf.mxu0  ;;  %v13089_v1 = vpop.f32.mrf.mxu1  ;;  %v9486_v51 = vmax.f32 %v9218_v56, 0.0 }
0x1c6f   : > { %v13026_v57 = vadd.f32 %v13025_v10, %v13024_v48  ;;  %v13090_v32 = vadd.f32 %v13089_v1, %v13088_v35  ;;  %v9319_v48 = vadd.f32 %v23242_v54, %v21647_v34  ;;  %v9678_v35 = vpack.c.bf16 %v9470_v15, %v9454_v6 }
0x1c70   : > { %v13027_v52 = vpop.f32.mrf.mxu0  ;;  %v13091_v17 = vpop.f32.mrf.mxu1  ;;  %v9680_v10 = vpack.c.bf16 %v9472_v27, %v9456_v29  ;;  %v9471_v18 = vmax.f32 %v9323_v7, 0.0  ;;  %v9453_v21 = vmax.f32 %v9206_v62, 0.0  ;;  %v9502_v15 = vmax.f32 %v9222_v11, 0.0 }
0x1c71   : > { %v10827_v44 = vadd.f32 %v13026_v57, %v21708_v26  ;;  %v9455_v27 = vmax.f32 %v9319_v48, 0.0  ;;  %v9504_v45 = vmax.f32 %v9335_v49, 0.0  ;;  %v9220_v62 = vadd.f32 %v21533_v50, %v21642_v38 }
0x1c72   : > { %v13028_v8 = vpop.f32.mrf.mxu0  ;;  %v13092_v0 = vpop.f32.mrf.mxu1  ;;  %v9333_v48 = vadd.f32 %v21535_v2, %v21647_v34  ;;  %v9694_v56 = vpack.c.bf16 %v9502_v15, %v9486_v51  ;;  %v9228_v2 = vadd.f32 %v21561_v58, %v21604_v20 }
0x1c73   : > { %v21723_v5 = vadd.f32 %v13090_v32, %v10827_v44  ;;  %v13029_v24 = vadd.f32 %v13028_v8, %v13027_v52  ;;  %v13093_v1 = vadd.f32 %v13092_v0, %v13091_v17  ;;  %v9677_v17 = vpack.c.bf16 %v9469_v19, %v9453_v21 }
0x1c74   : > { %v13030_v57 = vpop.f32.mrf.mxu0  ;;  %v13094_v54 = vpop.f32.mrf.mxu1  ;;  %11415 = vmatmul.mubr.bf16.gmra.mxu0 %v9661_v36  ;;  %11512 = vmatmul.mubr.bf16.gmra.mxu1 %v9663_v23  ;;  %v9679_v36 = vpack.c.bf16 %v9471_v18, %v9455_v27  ;;  %v23243_v23 = vld [vmem:[#allocation82_spill] sm:$0xff] }
0x1c75   : > { %v10830_v6 = vadd.f32 %v13029_v24, %v21708_v26  ;;  %11422 = vmatprep.mubr.bf16.mxu0 %v9678_v35  ;;  %11519 = vmatprep.mubr.bf16.mxu1 %v9680_v10  ;;  %v9216_v44 = vadd.f32 %v23243_v23, %v21642_v38  ;;  %v9488_v35 = vmax.f32 %v9331_v14, 0.0  ;;  %v23244_v10 = vld [vmem:[#allocation43_spill] sm:$0xff]  ;;  %v9232_v24 = vadd.f32 %v21573_v59, %v21604_v20 }
0x1c76   : > { %v13031_v32 = vpop.f32.mrf.mxu0  ;;  %v13095_v29 = vpop.f32.mrf.mxu1  ;;  %v9329_v49 = vadd.f32 %v23244_v10, %v21647_v34  ;;  %v9501_v59 = vmax.f32 %v9220_v62, 0.0 }
0x1c77   : > { %v21730_v7 = vadd.f32 %v13093_v1, %v10830_v6  ;;  %v13032_v22 = vadd.f32 %v13031_v32, %v13030_v57  ;;  %v13096_v52 = vadd.f32 %v13095_v29, %v13094_v54  ;;  %v9345_v1 = vadd.f32 %v21575_v31, %v21609_v13 }
0x1c78   : > { %v13033_v8 = vpop.f32.mrf.mxu0  ;;  %v13097_v0 = vpop.f32.mrf.mxu1  ;;  %v9696_v14 = vpack.c.bf16 %v9504_v45, %v9488_v35  ;;  %v9341_v6 = vadd.f32 %v21563_v61, %v21609_v13  ;;  %v9503_v31 = vmax.f32 %v9333_v48, 0.0  ;;  %v9485_v15 = vmax.f32 %v9216_v44, 0.0 }
0x1c79   : > { %v10835_v11 = vadd.f32 %v13032_v22, %v21708_v26  ;;  %v9534_v29 = vmax.f32 %v9232_v24, 0.0  ;;  %v9536_v22 = vmax.f32 %v9345_v1, 0.0  ;;  %v9487_v23 = vmax.f32 %v9329_v49, 0.0 }
0x1c7a   : > { %v13034_v19 = vpop.f32.mrf.mxu0  ;;  %v13098_v18 = vpop.f32.mrf.mxu1  ;;  %v9693_v44 = vpack.c.bf16 %v9501_v59, %v9485_v15  ;;  %v9339_v49 = vadd.f32 %v21555_v25, %v21647_v34  ;;  %v9242_v24 = vadd.f32 %v21615_v55, %v21604_v20  ;;  %v9351_v55 = vadd.f32 %v21595_v4, %v21609_v13 }
0x1c7b   : > { %v21745_v57 = vadd.f32 %v13096_v52, %v10835_v11  ;;  %v13035_v50 = vadd.f32 %v13034_v19, %v13033_v8  ;;  %v13099_v54 = vadd.f32 %v13098_v18, %v13097_v0  ;;  %v9518_v8 = vmax.f32 %v9228_v2, 0.0 }
0x1c7c   : > { %v13036_v21 = vpop.f32.mrf.mxu0  ;;  %v13100_v27 = vpop.f32.mrf.mxu1  ;;  %11423 = vmatmul.mubr.bf16.gmra.mxu0 %v9677_v17  ;;  %11520 = vmatmul.mubr.bf16.gmra.mxu1 %v9679_v36  ;;  %v9520_v0 = vmax.f32 %v9341_v6, 0.0  ;;  %v9230_v17 = vadd.f32 %v21565_v9, %v21642_v38  ;;  %v9343_v36 = vadd.f32 %v21567_v16, %v21647_v34  ;;  %v9695_v48 = vpack.c.bf16 %v9503_v31, %v9487_v23 }
0x1c7d   : > { %v10838_v32 = vadd.f32 %v13035_v50, %v21708_v26  ;;  %11430 = vmatprep.mubr.bf16.mxu0 %v9694_v56  ;;  %11527 = vmatprep.mubr.bf16.mxu1 %v9696_v14  ;;  %v9226_v11 = vadd.f32 %v21553_v60, %v21642_v38  ;;  %v9710_v19 = vpack.c.bf16 %v9534_v29, %v9518_v8  ;;  %v9566_v59 = vmax.f32 %v9242_v24, 0.0 }
0x1c7e   : > { %v13037_v45 = vpop.f32.mrf.mxu0  ;;  %v13101_v52 = vpop.f32.mrf.mxu1  ;;  %v9712_v18 = vpack.c.bf16 %v9536_v22, %v9520_v0  ;;  %v9355_v16 = vadd.f32 %v21617_v39, %v21609_v13  ;;  %v9533_v60 = vmax.f32 %v9230_v17, 0.0  ;;  %v9535_v14 = vmax.f32 %v9343_v36, 0.0 }
0x1c7f   : > { %v21752_v58 = vadd.f32 %v13099_v54, %v10838_v32  ;;  %v13038_v51 = vadd.f32 %v13037_v45, %v13036_v21  ;;  %v13102_v61 = vadd.f32 %v13101_v52, %v13100_v27  ;;  %v9238_v2 = vadd.f32 %v21593_v47, %v21604_v20 }
0x1c80   : > { %v13039_v35 = vpop.f32.mrf.mxu0  ;;  %v13103_v62 = vpop.f32.mrf.mxu1  ;;  %v9517_v39 = vmax.f32 %v9226_v11, 0.0  ;;  %v9519_v27 = vmax.f32 %v9339_v49, 0.0  ;;  %v9568_v15 = vmax.f32 %v9355_v16, 0.0  ;;  %v9240_v4 = vadd.f32 %v21597_v3, %v21642_v38 }
0x1c81   : > { %v10843_v10 = vadd.f32 %v13038_v51, %v21708_v26  ;;  %v9550_v23 = vmax.f32 %v9238_v2, 0.0  ;;  %v9236_v8 = vadd.f32 %v21585_v12, %v21642_v38  ;;  %v9552_v0 = vmax.f32 %v9351_v55, 0.0 }
0x1c82   : > { %v13040_v1 = vpop.f32.mrf.mxu0  ;;  %v13104_v9 = vpop.f32.mrf.mxu1  ;;  %v9709_v45 = vpack.c.bf16 %v9533_v60, %v9517_v39  ;;  %v9711_v52 = vpack.c.bf16 %v9535_v14, %v9519_v27  ;;  %v9353_v17 = vadd.f32 %v21599_v37, %v21647_v34  ;;  %v9365_v3 = vadd.f32 %v21659_v46, %v21609_v13 }
0x1c83   : > { %v21767_v56 = vadd.f32 %v13102_v61, %v10843_v10  ;;  %v13041_v50 = vadd.f32 %v13040_v1, %v13039_v35  ;;  %v13105_v54 = vadd.f32 %v13104_v9, %v13103_v62  ;;  %v9349_v35 = vadd.f32 %v21587_v30, %v21647_v34 }
0x1c84   : > { %v13042_v25 = vpop.f32.mrf.mxu0  ;;  %v13106_v6 = vpop.f32.mrf.mxu1  ;;  %11431 = vmatmul.mubr.bf16.gmra.mxu0 %v9693_v44  ;;  %11528 = vmatmul.mubr.bf16.gmra.mxu1 %v9695_v48  ;;  %v9252_v62 = vadd.f32 %v21657_v41, %v21604_v20  ;;  %v9726_v11 = vpack.c.bf16 %v9566_v59, %v9550_v23  ;;  %v9728_v24 = vpack.c.bf16 %v9568_v15, %v9552_v0  ;;  %v9565_v37 = vmax.f32 %v9240_v4, 0.0  ;;  %v23245_v15 = vld [vmem:[#allocation84_spill] sm:$0xff] }
0x1c85   : > { %v10846_v21 = vadd.f32 %v13041_v50, %v21708_v26  ;;  %11438 = vmatprep.mubr.bf16.mxu0 %v9710_v19  ;;  %11535 = vmatprep.mubr.bf16.mxu1 %v9712_v18  ;;  %v9248_v1 = vadd.f32 %v21635_v63, %v21604_v20  ;;  %v9361_v30 = vadd.f32 %v21637_v28, %v21609_v13  ;;  %v9567_v46 = vmax.f32 %v9353_v17, 0.0 }
0x1c86   : > { %v13043_v31 = vpop.f32.mrf.mxu0  ;;  %v13107_v32 = vpop.f32.mrf.mxu1  ;;  %v9549_v18 = vmax.f32 %v9236_v8, 0.0  ;;  %v9598_v16 = vmax.f32 %v9252_v62, 0.0  ;;  %v9600_v50 = vmax.f32 %v9365_v3, 0.0  ;;  %v9551_v14 = vmax.f32 %v9349_v35, 0.0  ;;  %v23247_v62 = vld [vmem:[#allocation14_spill] sm:$0xff] }
0x1c87   : > { %v21774_v29 = vadd.f32 %v13105_v54, %v10846_v21  ;;  %v13044_v47 = vadd.f32 %v13043_v31, %v13042_v25  ;;  %v13108_v22 = vadd.f32 %v13107_v32, %v13106_v6  ;;  %v9582_v6 = vmax.f32 %v9248_v1, 0.0 }
0x1c88   : > { %v13045_v51 = vpop.f32.mrf.mxu0  ;;  %v13109_v61 = vpop.f32.mrf.mxu1  ;;  %v9725_v28 = vpack.c.bf16 %v9565_v37, %v9549_v18  ;;  %v9584_v55 = vmax.f32 %v9361_v30, 0.0  ;;  %v9727_v27 = vpack.c.bf16 %v9567_v46, %v9551_v14  ;;  %v9246_v59 = vadd.f32 %v21627_v43, %v21642_v38 }
0x1c89   : > { %v10851_v36 = vadd.f32 %v13044_v47, %v21708_v26  ;;  %v9250_v31 = vadd.f32 %v21649_v53, %v21642_v38  ;;  %v9363_v47 = vadd.f32 %v23245_v15, %v21647_v34  ;;  %v9742_v23 = vpack.c.bf16 %v9598_v16, %v9582_v6  ;;  %v23246_v53 = vld [vmem:[#allocation83_spill] sm:$0xff]  ;;  %v23248_v16 = vld [vmem:[#allocation44_spill] sm:$0xff] }
0x1c8a   : > { %v13046_v44 = vpop.f32.mrf.mxu0  ;;  %v13110_v48 = vpop.f32.mrf.mxu1  ;;  %v9744_v4 = vpack.c.bf16 %v9600_v50, %v9584_v55  ;;  %v9359_v0 = vadd.f32 %v23246_v53, %v21647_v34  ;;  %v9258_v17 = vadd.f32 %v21677_v40, %v21604_v20  ;;  %v9371_v3 = vadd.f32 %v23247_v62, %v21609_v13 }
0x1c8b   : > { %v21789_v10 = vadd.f32 %v13108_v22, %v10851_v36  ;;  %v13047_v12 = vadd.f32 %v13046_v44, %v13045_v51  ;;  %v13111_v49 = vadd.f32 %v13110_v48, %v13109_v61  ;;  %v9262_v22 = vadd.f32 %v21693_v42, %v21604_v20 }
0x1c8c   : > { %v13048_v9 = vpop.f32.mrf.mxu0  ;;  %v13112_v41 = vpop.f32.mrf.mxu1  ;;  %11439 = vmatmul.mubr.bf16.gmra.mxu0 %v9709_v45  ;;  %11536 = vmatmul.mubr.bf16.gmra.mxu1 %v9711_v52  ;;  %v9375_v51 = vadd.f32 %v21695_v33, %v21609_v13  ;;  %v9597_v42 = vmax.f32 %v9250_v31, 0.0  ;;  %v9581_v44 = vmax.f32 %v9246_v59, 0.0  ;;  %v9599_v48 = vmax.f32 %v9363_v47, 0.0  ;;  %v23251_v59 = vld [vmem:[#allocation57_spill] sm:$0xff] }
0x1c8d   : > { %v10854_v19 = vadd.f32 %v13047_v12, %v21708_v26  ;;  %11446 = vmatprep.mubr.bf16.mxu0 %v9726_v11  ;;  %11543 = vmatprep.mubr.bf16.mxu1 %v9728_v24  ;;  %v9630_v11 = vmax.f32 %v9262_v22, 0.0  ;;  %v9583_v1 = vmax.f32 %v9359_v0, 0.0  ;;  %v9614_v30 = vmax.f32 %v9258_v17, 0.0 }
0x1c8e   : > { %v13049_v54 = vpop.f32.mrf.mxu0  ;;  %v13113_v60 = vpop.f32.mrf.mxu1  ;;  %v9632_v24 = vmax.f32 %v9375_v51, 0.0  ;;  %v9741_v46 = vpack.c.bf16 %v9597_v42, %v9581_v44  ;;  %v9616_v13 = vmax.f32 %v9371_v3, 0.0  ;;  %v9260_v50 = vadd.f32 %v23248_v16, %v21642_v38 }
0x1c8f   : > { %v21796_v2 = vadd.f32 %v13111_v49, %v10854_v19  ;;  %v13050_v63 = vadd.f32 %v13049_v54, %v13048_v9  ;;  %v13114_v25 = vadd.f32 %v13113_v60, %v13112_v41  ;;  %v9743_v18 = vpack.c.bf16 %v9599_v48, %v9583_v1  ;;  %v23249_v54 = vld [vmem:[#allocation50_spill] sm:$0xff] }
0x1c90   : > { %v13051_v21 = vpop.f32.mrf.mxu0  ;;  %v13115_v39 = vpop.f32.mrf.mxu1  ;;  %v9373_v60 = vadd.f32 %v23249_v54, %v21647_v34  ;;  %v9369_v31 = vadd.f32 %v23251_v59, %v21647_v34  ;;  %v9629_v22 = vmax.f32 %v9260_v50, 0.0 }
0x1c91   : > { %v10859_v32 = vadd.f32 %v13050_v63, %v21708_v26 }
0x1c92   : > { %v13052_v45 = vpop.f32.mrf.mxu0  ;;  %v13116_v52 = vpop.f32.mrf.mxu1 }
0x1c93   : > { %v21809_v61 = vadd.f32 %v13114_v25, %v10859_v32  ;;  %v13053_v43 = vadd.f32 %v13052_v45, %v13051_v21  ;;  %v13117_v8 = vadd.f32 %v13116_v52, %v13115_v39  ;;  %v9758_v25 = vpack.c.bf16 %v9630_v11, %v9614_v30  ;;  %v23250_v39 = vld [vmem:[#allocation85_spill] sm:$0xff] }
0x1c94   : > { %v13054_v36 = vpop.f32.mrf.mxu0  ;;  %v13118_v35 = vpop.f32.mrf.mxu1  ;;  %11447 = vmatmul.mubr.bf16.gmra.mxu0 %v9725_v28  ;;  %11544 = vmatmul.mubr.bf16.gmra.mxu1 %v9727_v27  ;;  %v9760_v21 = vpack.c.bf16 %v9632_v24, %v9616_v13  ;;  %v9256_v27 = vadd.f32 %v23250_v39, %v21642_v38  ;;  %v9631_v45 = vmax.f32 %v9373_v60, 0.0 }
0x1c95   : > { %v10862_v33 = vadd.f32 %v13053_v43, %v21708_v26  ;;  %11454 = vmatprep.mubr.bf16.mxu0 %v9742_v23  ;;  %11551 = vmatprep.mubr.bf16.mxu1 %v9744_v4 }
0x1c96   : > { %v13055_v12 = vpop.f32.mrf.mxu0  ;;  %v13119_v49 = vpop.f32.mrf.mxu1  ;;  %v9613_v38 = vmax.f32 %v9256_v27, 0.0 }
0x1c97   : > { %v21818_v37 = vadd.f32 %v13117_v8, %v10862_v33  ;;  %v13056_v20 = vadd.f32 %v13055_v12, %v13054_v36  ;;  %v13120_v40 = vadd.f32 %v13119_v49, %v13118_v35  ;;  %v9615_v8 = vmax.f32 %v9369_v31, 0.0 }
0x1c98   : > { %v13057_v9 = vpop.f32.mrf.mxu0  ;;  %v13121_v41 = vpop.f32.mrf.mxu1  ;;  %v9757_v17 = vpack.c.bf16 %v9629_v22, %v9613_v38 }
0x1c99   : > { %v10867_v19 = vadd.f32 %v13056_v20, %v21708_v26  ;;  %v9759_v36 = vpack.c.bf16 %v9631_v45, %v9615_v8 }
0x1c9a   : > { %v13058_v14 = vpop.f32.mrf.mxu0  ;;  %v13122_v63 = vpop.f32.mrf.mxu1 }
0x1c9b   : > { %v21825_v28 = vadd.f32 %v13120_v40, %v10867_v19  ;;  %v13059_v6 = vadd.f32 %v13058_v14, %v13057_v9  ;;  %v13123_v55 = vadd.f32 %v13122_v63, %v13121_v41 }
0x1c9c   : > { %v13060_v32 = vpop.f32.mrf.mxu0  ;;  %v13124_v15 = vpop.f32.mrf.mxu1  ;;  %11455 = vmatmul.mubr.bf16.gmra.mxu0 %v9741_v46  ;;  %11552 = vmatmul.mubr.bf16.gmra.mxu1 %v9743_v18 }
0x1c9d   : > { %v10870_v47 = vadd.f32 %v13059_v6, %v21708_v26  ;;  %11462 = vmatprep.mubr.bf16.mxu0 %v9758_v25  ;;  %11559 = vmatprep.mubr.bf16.mxu1 %v9760_v21 }
0x1c9e   : > { %v13061_v52 = vpop.f32.mrf.mxu0  ;;  %v13125_v23 = vpop.f32.mrf.mxu1 }
0x1c9f   : > { %v21832_v4 = vadd.f32 %v13123_v55, %v10870_v47  ;;  %v13062_v51 = vadd.f32 %v13061_v52, %v13060_v32  ;;  %v13126_v43 = vadd.f32 %v13125_v23, %v13124_v15 }
0x1ca0   : > { %v13063_v53 = vpop.f32.mrf.mxu0  ;;  %v13127_v34 = vpop.f32.mrf.mxu1 }
0x1ca1   : > { %v10875_v0 = vadd.f32 %v13062_v51, %v21708_v26 }
0x1ca2   : > { %v13064_v35 = vpop.f32.mrf.mxu0  ;;  %v13128_v42 = vpop.f32.mrf.mxu1 }
0x1ca3   : > { %v21835_v62 = vadd.f32 %v13126_v43, %v10875_v0  ;;  %v13065_v3 = vadd.f32 %v13064_v35, %v13063_v53  ;;  %v13129_v33 = vadd.f32 %v13128_v42, %v13127_v34 }
0x1ca4   : > { %v13066_v44 = vpop.f32.mrf.mxu0  ;;  %v13130_v48 = vpop.f32.mrf.mxu1  ;;  %11463 = vmatmul.mubr.bf16.gmra.mxu0 %v9757_v17  ;;  %11560 = vmatmul.mubr.bf16.gmra.mxu1 %v9759_v36 }
0x1ca5   : > { %v10878_v11 = vadd.f32 %v13065_v3, %v21708_v26 }
0x1ca6   : > { %v13067_v12 = vpop.f32.mrf.mxu0  ;;  %v13131_v49 = vpop.f32.mrf.mxu1 }
0x1ca7   : > { %v21838_v24 = vadd.f32 %v13129_v33, %v10878_v11  ;;  %v13068_v20 = vadd.f32 %v13067_v12, %v13066_v44  ;;  %v13132_v40 = vadd.f32 %v13131_v49, %v13130_v48 }
0x1ca8   : > { %v13069_v1 = vpop.f32.mrf.mxu0  ;;  %v13133_v30 = vpop.f32.mrf.mxu1 }
0x1ca9   : > { %v10883_v9 = vadd.f32 %v13068_v20, %v21708_v26 }
0x1caa   : > { %v13070_v41 = vpop.f32.mrf.mxu0  ;;  %v13134_v46 = vpop.f32.mrf.mxu1 }
0x1cab   : > { %v21841_v13 = vadd.f32 %v13132_v40, %v10883_v9  ;;  %v13071_v19 = vadd.f32 %v13070_v41, %v13069_v1  ;;  %v13135_v18 = vadd.f32 %v13134_v46, %v13133_v30 }
0x1cac   : > { %v13152_v16 = vpop.f32.mrf.mxu0  ;;  %v13216_v50 = vpop.f32.mrf.mxu1 }
0x1cad   : > { %v10886_v54 = vadd.f32 %v13071_v19, %v21708_v26 }
0x1cae   : > { %v13153_v60 = vpop.f32.mrf.mxu0  ;;  %v13217_v14 = vpop.f32.mrf.mxu1 }
0x1caf   : > { %v21844_v63 = vadd.f32 %v13135_v18, %v10886_v54  ;;  %v13154_v25 = vadd.f32 %v13153_v60, %v13152_v16  ;;  %v13218_v6 = vadd.f32 %v13217_v14, %v13216_v50 }
0x1cb0   : > { %v13155_v55 = vpop.f32.mrf.mxu0  ;;  %v13219_v21 = vpop.f32.mrf.mxu1 }
0x1cb1   : > { %v11021_v39 = vadd.f32 %v13154_v25, %v21723_v5 }
0x1cb2   : > { %v13156_v27 = vpop.f32.mrf.mxu0  ;;  %v13220_v59 = vpop.f32.mrf.mxu1 }
0x1cb3   : > { %v21847_v31 = vadd.f32 %v13218_v6, %v11021_v39  ;;  %v13157_v32 = vadd.f32 %v13156_v27, %v13155_v55  ;;  %v13221_v15 = vadd.f32 %v13220_v59, %v13219_v21 }
0x1cb4   : > { %v13158_v47 = vpop.f32.mrf.mxu0  ;;  %v13222_v22 = vpop.f32.mrf.mxu1 }
0x1cb5   : > { %v11024_v26 = vadd.f32 %v13157_v32, %v21730_v7 }
0x1cb6   : > { %v13159_v45 = vpop.f32.mrf.mxu0  ;;  %v13223_v52 = vpop.f32.mrf.mxu1 }
0x1cb7   : > { %v21850_v23 = vadd.f32 %v13221_v15, %v11024_v26  ;;  %v13160_v51 = vadd.f32 %v13159_v45, %v13158_v47  ;;  %v13224_v43 = vadd.f32 %v13223_v52, %v13222_v22 }
0x1cb8   : > { %v13161_v38 = vpop.f32.mrf.mxu0  ;;  %v13225_v8 = vpop.f32.mrf.mxu1 }
0x1cb9   : > { %v11029_v5 = vadd.f32 %v13160_v51, %v21745_v57 }
0x1cba   : > { %v13162_v53 = vpop.f32.mrf.mxu0  ;;  %v13226_v34 = vpop.f32.mrf.mxu1 }
0x1cbb   : > { %v21853_v0 = vadd.f32 %v13224_v43, %v11029_v5  ;;  %v13163_v17 = vadd.f32 %v13162_v53, %v13161_v38  ;;  %v13227_v36 = vadd.f32 %v13226_v34, %v13225_v8 }
0x1cbc   : > { %v13164_v35 = vpop.f32.mrf.mxu0  ;;  %v13228_v42 = vpop.f32.mrf.mxu1 }
0x1cbd   : > { %v11032_v7 = vadd.f32 %v13163_v17, %v21752_v58 }
0x1cbe   : > { %v13165_v3 = vpop.f32.mrf.mxu0  ;;  %v13229_v33 = vpop.f32.mrf.mxu1 }
0x1cbf   : > { %v21856_v44 = vadd.f32 %v13227_v36, %v11032_v7  ;;  %v13166_v48 = vadd.f32 %v13165_v3, %v13164_v35  ;;  %v13230_v11 = vadd.f32 %v13229_v33, %v13228_v42 }
0x1cc0   : > { %v13167_v12 = vpop.f32.mrf.mxu0  ;;  %v13231_v49 = vpop.f32.mrf.mxu1 }
0x1cc1   : > { %v11037_v57 = vadd.f32 %v13166_v48, %v21767_v56 }
0x1cc2   : > { %v13168_v20 = vpop.f32.mrf.mxu0  ;;  %v13232_v40 = vpop.f32.mrf.mxu1 }
0x1cc3   : > { %v21859_v1 = vadd.f32 %v13230_v11, %v11037_v57  ;;  %v13169_v30 = vadd.f32 %v13168_v20, %v13167_v12  ;;  %v13233_v9 = vadd.f32 %v13232_v40, %v13231_v49 }
0x1cc4   : > { %v13170_v41 = vpop.f32.mrf.mxu0  ;;  %v13234_v46 = vpop.f32.mrf.mxu1 }
0x1cc5   : > { %v11040_v58 = vadd.f32 %v13169_v30, %v21774_v29 }
0x1cc6   : > { %v13171_v19 = vpop.f32.mrf.mxu0  ;;  %v13235_v18 = vpop.f32.mrf.mxu1 }
0x1cc7   : > { %v21862_v16 = vadd.f32 %v13233_v9, %v11040_v58  ;;  %v13172_v50 = vadd.f32 %v13171_v19, %v13170_v41  ;;  %v13236_v54 = vadd.f32 %v13235_v18, %v13234_v46 }
0x1cc8   : > { %v13173_v60 = vpop.f32.mrf.mxu0  ;;  %v13237_v14 = vpop.f32.mrf.mxu1 }
0x1cc9   : > { %v11045_v56 = vadd.f32 %v13172_v50, %v21789_v10 }
0x1cca   : > { %v13174_v25 = vpop.f32.mrf.mxu0  ;;  %v13238_v6 = vpop.f32.mrf.mxu1 }
0x1ccb   : > { %v21865_v55 = vadd.f32 %v13236_v54, %v11045_v56  ;;  %v13175_v21 = vadd.f32 %v13174_v25, %v13173_v60  ;;  %v13239_v39 = vadd.f32 %v13238_v6, %v13237_v14 }
0x1ccc   : > { %v13176_v27 = vpop.f32.mrf.mxu0  ;;  %v13240_v59 = vpop.f32.mrf.mxu1 }
0x1ccd   : > { %v11048_v29 = vadd.f32 %v13175_v21, %v21796_v2 }
0x1cce   : > { %v13177_v32 = vpop.f32.mrf.mxu0  ;;  %v13241_v15 = vpop.f32.mrf.mxu1 }
0x1ccf   : > { %v21868_v47 = vadd.f32 %v13239_v39, %v11048_v29  ;;  %v13178_v22 = vadd.f32 %v13177_v32, %v13176_v27  ;;  %v13242_v26 = vadd.f32 %v13241_v15, %v13240_v59 }
0x1cd0   : > { %v13179_v45 = vpop.f32.mrf.mxu0  ;;  %v13243_v52 = vpop.f32.mrf.mxu1 }
0x1cd1   : > { %v11053_v10 = vadd.f32 %v13178_v22, %v21809_v61 }
0x1cd2   : > { %v13180_v51 = vpop.f32.mrf.mxu0  ;;  %v13244_v43 = vpop.f32.mrf.mxu1 }
0x1cd3   : > { %v21871_v38 = vadd.f32 %v13242_v26, %v11053_v10  ;;  %v13181_v8 = vadd.f32 %v13180_v51, %v13179_v45  ;;  %v13245_v5 = vadd.f32 %v13244_v43, %v13243_v52 }
0x1cd4   : > { %v13182_v53 = vpop.f32.mrf.mxu0  ;;  %v13246_v34 = vpop.f32.mrf.mxu1 }
0x1cd5   : > { %v11056_v2 = vadd.f32 %v13181_v8, %v21818_v37 }
0x1cd6   : > { %v13183_v17 = vpop.f32.mrf.mxu0  ;;  %v13247_v36 = vpop.f32.mrf.mxu1 }
0x1cd7   : > { %v21874_v35 = vadd.f32 %v13245_v5, %v11056_v2  ;;  %v13184_v42 = vadd.f32 %v13183_v17, %v13182_v53  ;;  %v13248_v7 = vadd.f32 %v13247_v36, %v13246_v34 }
0x1cd8   : > { %v13185_v3 = vpop.f32.mrf.mxu0  ;;  %v13249_v33 = vpop.f32.mrf.mxu1 }
0x1cd9   : > { %v11061_v61 = vadd.f32 %v13184_v42, %v21825_v28 }
0x1cda   : > { %v13186_v48 = vpop.f32.mrf.mxu0  ;;  %v13250_v11 = vpop.f32.mrf.mxu1 }
0x1cdb   : > { %v21877_v12 = vadd.f32 %v13248_v7, %v11061_v61  ;;  %v13187_v49 = vadd.f32 %v13186_v48, %v13185_v3  ;;  %v13251_v57 = vadd.f32 %v13250_v11, %v13249_v33 }
0x1cdc   : > { %v13188_v20 = vpop.f32.mrf.mxu0  ;;  %v13252_v40 = vpop.f32.mrf.mxu1 }
0x1cdd   : > { %23252 = vst [vmem:[#allocation71_spill] sm:$0xff] %v21877_v12  ;;  %v11064_v37 = vadd.f32 %v13187_v49, %v21832_v4 }
0x1cde   : > { %v13189_v30 = vpop.f32.mrf.mxu0  ;;  %v13253_v9 = vpop.f32.mrf.mxu1 }
0x1cdf   : > { %v21880_v41 = vadd.f32 %v13251_v57, %v11064_v37  ;;  %v13190_v46 = vadd.f32 %v13189_v30, %v13188_v20  ;;  %v13254_v58 = vadd.f32 %v13253_v9, %v13252_v40 }
0x1ce0   : > { %v13191_v19 = vpop.f32.mrf.mxu0  ;;  %v13255_v18 = vpop.f32.mrf.mxu1 }
0x1ce1   : > { %23253 = vst [vmem:[#allocation74_spill] sm:$0xff] %v21880_v41  ;;  %v11069_v28 = vadd.f32 %v13190_v46, %v21835_v62 }
0x1ce2   : > { %v13192_v50 = vpop.f32.mrf.mxu0  ;;  %v13256_v54 = vpop.f32.mrf.mxu1 }
0x1ce3   : > { %v21883_v60 = vadd.f32 %v13254_v58, %v11069_v28  ;;  %v13193_v14 = vadd.f32 %v13192_v50, %v13191_v19  ;;  %v13257_v56 = vadd.f32 %v13256_v54, %v13255_v18 }
0x1ce4   : > { %v13194_v25 = vpop.f32.mrf.mxu0  ;;  %v13258_v6 = vpop.f32.mrf.mxu1 }
0x1ce5   : > { %23254 = vst [vmem:[#allocation31_spill] sm:$0xff] %v21883_v60  ;;  %v11072_v4 = vadd.f32 %v13193_v14, %v21838_v24 }
0x1ce6   : > { %v13195_v21 = vpop.f32.mrf.mxu0  ;;  %v13259_v39 = vpop.f32.mrf.mxu1 }
0x1ce7   : > { %v21886_v27 = vadd.f32 %v13257_v56, %v11072_v4  ;;  %v13196_v59 = vadd.f32 %v13195_v21, %v13194_v25  ;;  %v13260_v29 = vadd.f32 %v13259_v39, %v13258_v6 }
0x1ce8   : > { %v13197_v32 = vpop.f32.mrf.mxu0  ;;  %v13261_v15 = vpop.f32.mrf.mxu1 }
0x1ce9   : > { %23255 = vst [vmem:[#allocation30_spill] sm:$0xff] %v21886_v27  ;;  %v11077_v62 = vadd.f32 %v13196_v59, %v21841_v13 }
0x1cea   : > { %v13198_v22 = vpop.f32.mrf.mxu0  ;;  %v13262_v26 = vpop.f32.mrf.mxu1 }
0x1ceb   : > { %v21889_v45 = vadd.f32 %v13260_v29, %v11077_v62  ;;  %v13199_v52 = vadd.f32 %v13198_v22, %v13197_v32  ;;  %v13263_v10 = vadd.f32 %v13262_v26, %v13261_v15 }
0x1cec   : > { %v13280_v51 = vpop.f32.mrf.mxu0  ;;  %v21891_v43 = vpop.f32.mrf.mxu1 }
0x1ced   : > { %23256 = vst [vmem:[#allocation78_spill] sm:$0xff] %v21889_v45  ;;  %v11080_v24 = vadd.f32 %v13199_v52, %v21844_v63 }
0x1cee   : > { %v13281_v8 = vpop.f32.mrf.mxu0  ;;  %v21894_v5 = vpop.f32.mrf.mxu1 }
0x1cef   : > { %v21896_v53 = vadd.f32 %v13263_v10, %v11080_v24 }
0x1cf0   : > { %v13283_v34 = vpop.f32.mrf.mxu0  ;;  %v21898_v2 = vpop.f32.mrf.mxu1 }
0x1cf1   : > { %23257 = vst [vmem:[#allocation86_spill] sm:$0xff] %v21896_v53 }
0x1cf2   : > { %v13284_v13 = vpop.f32.mrf.mxu0  ;;  %v21900_v17 = vpop.f32.mrf.mxu1 }
0x1cf4   : > { %v21902_v36 = vpop.f32.mrf.mxu0  ;;  %v21904_v42 = vpop.f32.mrf.mxu1 }
0x1cf6   : > { %v21906_v7 = vpop.f32.mrf.mxu0  ;;  %v21908_v3 = vpop.f32.mrf.mxu1 }
0x1cf8   : > { %v21910_v63 = vpop.f32.mrf.mxu0  ;;  %v21912_v33 = vpop.f32.mrf.mxu1 }
0x1cfa   : > { %v21914_v61 = vpop.f32.mrf.mxu0  ;;  %v21916_v48 = vpop.f32.mrf.mxu1 }
0x1cfc   : > { %v21918_v11 = vpop.f32.mrf.mxu0  ;;  %v21920_v49 = vpop.f32.mrf.mxu1 }
0x1cfe   : > { %v21922_v57 = vpop.f32.mrf.mxu0  ;;  %v21924_v20 = vpop.f32.mrf.mxu1 }
0x1d00   : > { %v21926_v40 = vpop.f32.mrf.mxu0  ;;  %v21928_v37 = vpop.f32.mrf.mxu1 }
0x1d02   : > { %v21930_v30 = vpop.f32.mrf.mxu0  ;;  %v21932_v9 = vpop.f32.mrf.mxu1 }
0x1d04   : > { %v21934_v46 = vpop.f32.mrf.mxu0  ;;  %v21936_v58 = vpop.f32.mrf.mxu1 }
0x1d06   : > { %v21938_v19 = vpop.f32.mrf.mxu0  ;;  %v21940_v18 = vpop.f32.mrf.mxu1 }
0x1d08   : > { %v21942_v28 = vpop.f32.mrf.mxu0  ;;  %v21944_v50 = vpop.f32.mrf.mxu1 }
0x1d0a   : > { %v21946_v54 = vpop.f32.mrf.mxu0  ;;  %v21948_v14 = vpop.f32.mrf.mxu1 }
0x1d0c   : > { %v21950_v56 = vpop.f32.mrf.mxu0  ;;  %v21952_v25 = vpop.f32.mrf.mxu1 }
0x1d0e   : > { %v21954_v6 = vpop.f32.mrf.mxu0  ;;  %v21956_v4 = vpop.f32.mrf.mxu1 }
0x1d10   : > { %v21958_v21 = vpop.f32.mrf.mxu0  ;;  %v21960_v39 = vpop.f32.mrf.mxu1 }
0x1d12   : > { %v21962_v59 = vpop.f32.mrf.mxu0  ;;  %v21964_v29 = vpop.f32.mrf.mxu1 }
0x1d14   : > { %v21966_v32 = vpop.f32.mrf.mxu0  ;;  %v21968_v15 = vpop.f32.mrf.mxu1 }
0x1d15   : > { %23258 = vst [vmem:[#allocation64_spill] sm:$0xff] %v21968_v15 }
0x1d16   : > { %v21970_v62 = vpop.f32.mrf.mxu0  ;;  %v21972_v22 = vpop.f32.mrf.mxu1 }
0x1d17   : > { %23259 = vst [vmem:[#allocation45_spill] sm:$0xff] %v21972_v22 }
0x1d18   : > { %v21974_v26 = vpop.f32.mrf.mxu0  ;;  %v21976_v52 = vpop.f32.mrf.mxu1 }
0x1d19   : > { %23260 = vst [vmem:[#allocation87_spill] sm:$0xff] %v21974_v26  ;;  %23261 = vst [vmem:[#allocation89_spill] sm:$0xff] %v21976_v52 }
0x1d1a   : > { %v21978_v10 = vpop.f32.mrf.mxu0  ;;  %v21980_v24 = vpop.f32.mrf.mxu1 }
0x1d1b   : > { %23262 = vst [vmem:[#allocation11_spill] sm:$0xff] %v21978_v10  ;;  %23263 = vst [vmem:[#allocation38_spill] sm:$0xff] %v21980_v24 }
0x1d1c   : > { %v21982_v53 = vpop.f32.mrf.mxu0  ;;  %v21984_v45 = vpop.f32.mrf.mxu1 }
0x1d1d   : > { %23264 = vst [vmem:[#allocation35_spill] sm:$0xff] %v21982_v53  ;;  %23265 = vst [vmem:[#allocation69_spill] sm:$0xff] %v21984_v45 }
0x1d1e   : > { %v21986_v27 = vpop.f32.mrf.mxu0  ;;  %v21988_v60 = vpop.f32.mrf.mxu1 }
0x1d1f   : > { %23266 = vst [vmem:[#allocation37_spill] sm:$0xff] %v21986_v27  ;;  %23267 = vst [vmem:[#allocation29_spill] sm:$0xff] %v21988_v60  ;;  %v13282_v27 = vadd.f32 %v13281_v8, %v13280_v51 }
0x1d20   : > { %v21990_v41 = vpop.f32.mrf.mxu0  ;;  %v21992_v15 = vpop.f32.mrf.mxu1 }
0x1d21   : > { %23268 = vst [vmem:[#allocation28_spill] sm:$0xff] %v21990_v41  ;;  %23269 = vst [vmem:[#allocation22_spill] sm:$0xff] %v21992_v15  ;;  %v13285_v41 = vadd.f32 %v13284_v13, %v13283_v34  ;;  %v13288_v34 = vadd.f32 %v21906_v7, %v21902_v36 }
0x1d22   : > { %v21994_v22 = vpop.f32.mrf.mxu0  ;;  %v21996_v26 = vpop.f32.mrf.mxu1 }
0x1d23   : > { %23270 = vst [vmem:[#allocation40_spill] sm:$0xff] %v21994_v22  ;;  %23271 = vst [vmem:[#allocation24_spill] sm:$0xff] %v21996_v26  ;;  %v11215_v26 = vadd.f32 %v13282_v27, %v21847_v31 }
0x1d24   : > { %v21998_v52 = vpop.f32.mrf.mxu0  ;;  %v22000_v24 = vpop.f32.mrf.mxu1 }
0x1d25   : > { %23272 = vst [vmem:[#allocation88_spill] sm:$0xff] %v21998_v52  ;;  %23273 = vst [vmem:[#allocation39_spill] sm:$0xff] %v22000_v24  ;;  %v13346_v24 = vadd.f32 %v21894_v5, %v21891_v43 }
0x1d26   : > { %v22002_v53 = vpop.f32.mrf.mxu0  ;;  %v22004_v45 = vpop.f32.mrf.mxu1 }
0x1d27   : > { %23274 = vst [vmem:[#allocation47_spill] sm:$0xff] %v22004_v45  ;;  %v11218_v45 = vadd.f32 %v13285_v41, %v21850_v23  ;;  %v11223_v41 = vadd.f32 %v13288_v34, %v21853_v0 }
0x1d28   : > { %v22006_v10 = vpop.f32.mrf.mxu0  ;;  %v22008_v60 = vpop.f32.mrf.mxu1 }
0x1d29   : > { %23275 = vst [vmem:[#allocation48_spill] sm:$0xff] %v22006_v10  ;;  %23276 = vst [vmem:[#allocation58_spill] sm:$0xff] %v22008_v60  ;;  %v11312_v10 = vadd.f32 %v13346_v24, %v11215_v26  ;;  %v13291_v26 = vadd.f32 %v21914_v61, %v21910_v63  ;;  %v13355_v61 = vadd.f32 %v21916_v48, %v21912_v33 }
0x1d2a   : > { %v22010_v15 = vpop.f32.mrf.mxu0  ;;  %v22012_v22 = vpop.f32.mrf.mxu1 }
0x1d2b   : > { %23277 = vst [vmem:[#allocation49_spill] sm:$0xff] %v22010_v15  ;;  %23278 = vst [vmem:[#allocation65_spill] sm:$0xff] %v22012_v22  ;;  %v13349_v22 = vadd.f32 %v21900_v17, %v21898_v2  ;;  %v13352_v2 = vadd.f32 %v21908_v3, %v21904_v42  ;;  %v23279_v17 = vld [vmem:[#allocation10_spill] sm:$0xff] }
0x1d2c   : > { %v13408_v52 = vpop.f32.mrf.mxu0  ;;  %v13472_v12 = vpop.f32.mrf.mxu1 }
0x1d2d   : > { %v11315_v43 = vadd.f32 %v13349_v22, %v11218_v45  ;;  %v11320_v0 = vadd.f32 %v13352_v2, %v11223_v41 }
0x1d2e   : > { %v13409_v51 = vpop.f32.mrf.mxu0  ;;  %v13473_v8 = vpop.f32.mrf.mxu1 }
0x1d2f   : > { %v13410_v13 = vadd.f32 %v13409_v51, %v13408_v52  ;;  %v13474_v15 = vadd.f32 %v13473_v8, %v13472_v12  ;;  %v13294_v12 = vadd.f32 %v21922_v57, %v21918_v11  ;;  %v11226_v8 = vadd.f32 %v13291_v26, %v21856_v44 }
0x1d30   : > { %v13411_v60 = vpop.f32.mrf.mxu0  ;;  %v13475_v31 = vpop.f32.mrf.mxu1  ;;  %v13358_v26 = vadd.f32 %v21924_v20, %v21920_v49  ;;  %v13361_v20 = vadd.f32 %v21932_v9, %v21928_v37  ;;  %v13364_v37 = vadd.f32 %v21940_v18, %v21936_v58  ;;  %v23283_v9 = vld [vmem:[#allocation27_spill] sm:$0xff] }
0x1d31   : > { %v11409_v27 = vadd.f32 %v13410_v13, %v11312_v10 }
0x1d32   : > { %v13412_v5 = vpop.f32.mrf.mxu0  ;;  %v13476_v23 = vpop.f32.mrf.mxu1 }
0x1d33   : > { %v11506_v24 = vadd.f32 %v13474_v15, %v11409_v27  ;;  %v13413_v36 = vadd.f32 %v13412_v5, %v13411_v60  ;;  %v13477_v13 = vadd.f32 %v13476_v23, %v13475_v31  ;;  %v23280_v15 = vld [vmem:[#allocation90_spill] sm:$0xff]  ;;  %v11231_v31 = vadd.f32 %v13294_v12, %v21859_v1  ;;  %v23282_v12 = vld [vmem:[#allocation68_spill] sm:$0xff] }
0x1d34   : > { %v13414_v7 = vpop.f32.mrf.mxu0  ;;  %v13478_v52 = vpop.f32.mrf.mxu1  ;;  %v13297_v5 = vadd.f32 %v21930_v30, %v21926_v40  ;;  %v13300_v40 = vadd.f32 %v21938_v19, %v21934_v46 }
0x1d35   : > { %v11568_v10 = vadd.f32 %v11506_v24, %v23279_v17  ;;  %v11412_v51 = vadd.f32 %v13413_v36, %v11315_v43  ;;  %v11323_v43 = vadd.f32 %v13355_v61, %v11226_v8  ;;  %v23281_v24 = vld [vmem:[#allocation79_spill] sm:$0xff]  ;;  %v11328_v1 = vadd.f32 %v13358_v26, %v11231_v31 }
0x1d36   : > { %v13415_v45 = vpop.f32.mrf.mxu0  ;;  %v13479_v22 = vpop.f32.mrf.mxu1  ;;  %v13303_v8 = vadd.f32 %v21946_v54, %v21942_v28  ;;  %v11239_v46 = vadd.f32 %v13300_v40, %v21865_v55  ;;  %v13306_v55 = vadd.f32 %v21954_v6, %v21950_v56  ;;  %v13309_v56 = vadd.f32 %v21962_v59, %v21958_v21 }
0x1d37   : > { %11584 = vst [vmem:[%s22034_s28] sm:$0xff] %v11568_v10  ;;  %v11509_v60 = vadd.f32 %v13477_v13, %v11412_v51  ;;  %v13416_v63 = vadd.f32 %v13415_v45, %v13414_v7  ;;  %v13480_v57 = vadd.f32 %v13479_v22, %v13478_v52  ;;  %v11234_v10 = vadd.f32 %v13297_v5, %v21862_v16  ;;  %v23284_v5 = vld [vmem:[#allocation21_spill] sm:$0xff] }
0x1d38   : > { %v13417_v42 = vpop.f32.mrf.mxu0  ;;  %v13481_v3 = vpop.f32.mrf.mxu1  ;;  %v11242_v28 = vadd.f32 %v13303_v8, %v21868_v47  ;;  %v11336_v31 = vadd.f32 %v13364_v37, %v11239_v46  ;;  %v11250_v21 = vadd.f32 %v13309_v56, %v21874_v35  ;;  %v23300_v56 = vld [vmem:[#allocation40_spill] sm:$0xff] }
0x1d39   : > { %v11569_v34 = vadd.f32 %v11509_v60, %v23280_v15  ;;  %v11417_v11 = vadd.f32 %v13416_v63, %v11320_v0  ;;  %v11331_v63 = vadd.f32 %v13361_v20, %v11234_v10  ;;  %v13312_v10 = vadd.f32 %v21970_v62, %v21966_v32 }
0x1d3a   : > { %v13418_v27 = vpop.f32.mrf.mxu0  ;;  %v13482_v44 = vpop.f32.mrf.mxu1 }
0x1d3b   : > { %11585 = vst [vmem:[%s22034_s28 + $0x8] sm:$0xff] %v11569_v34  ;;  %v11514_v23 = vadd.f32 %v13480_v57, %v11417_v11  ;;  %v13419_v41 = vadd.f32 %v13418_v27, %v13417_v42  ;;  %v13483_v52 = vadd.f32 %v13482_v44, %v13481_v3 }
0x1d3c   : > { %v13420_v33 = vpop.f32.mrf.mxu0  ;;  %v13484_v48 = vpop.f32.mrf.mxu1 }
0x1d3d   : > { %v11570_v36 = vadd.f32 %v11514_v23, %v23281_v24  ;;  %v11420_v7 = vadd.f32 %v13419_v41, %v11323_v43  ;;  %v13367_v43 = vadd.f32 %v21948_v14, %v21944_v50  ;;  %v11247_v24 = vadd.f32 %v13306_v55, %v21871_v38  ;;  %v23295_v55 = vld [vmem:[#allocation37_spill] sm:$0xff] }
0x1d3e   : > { %v13421_v2 = vpop.f32.mrf.mxu0  ;;  %v13485_v17 = vpop.f32.mrf.mxu1  ;;  %v13370_v14 = vadd.f32 %v21956_v4, %v21952_v25  ;;  %v13373_v25 = vadd.f32 %v21964_v29, %v21960_v39  ;;  %v23286_v4 = vld [vmem:[#allocation80_spill] sm:$0xff] }
0x1d3f   : > { %11586 = vst [vmem:[%s22034_s28 + $0x10] sm:$0xff] %v11570_v36  ;;  %v11517_v30 = vadd.f32 %v13483_v52, %v11420_v7  ;;  %v13422_v51 = vadd.f32 %v13421_v2, %v13420_v33  ;;  %v13486_v0 = vadd.f32 %v13485_v17, %v13484_v48  ;;  %v11339_v47 = vadd.f32 %v13367_v43, %v11242_v28  ;;  %v23285_v52 = vld [vmem:[#allocation26_spill] sm:$0xff] }
0x1d40   : > { %v13423_v13 = vpop.f32.mrf.mxu0  ;;  %v13487_v49 = vpop.f32.mrf.mxu1  ;;  %v11347_v8 = vadd.f32 %v13373_v25, %v11250_v21  ;;  %v23304_v21 = vld [vmem:[#allocation67_spill] sm:$0xff] }
0x1d41   : > { %v11571_v45 = vadd.f32 %v11517_v30, %v23282_v12  ;;  %v11425_v22 = vadd.f32 %v13422_v51, %v11328_v1  ;;  %v11344_v30 = vadd.f32 %v13370_v14, %v11247_v24  ;;  %v23299_v24 = vld [vmem:[#allocation28_spill] sm:$0xff]  ;;  %v23301_v14 = vld [vmem:[#allocation31_spill] sm:$0xff] }
0x1d42   : > { %v13424_v16 = vpop.f32.mrf.mxu0  ;;  %v13488_v60 = vpop.f32.mrf.mxu1 }
0x1d43   : > { %11587 = vst [vmem:[%s22034_s28 + $0x18] sm:$0xff] %v11571_v45  ;;  %v11522_v19 = vadd.f32 %v13486_v0, %v11425_v22  ;;  %v13425_v42 = vadd.f32 %v13424_v16, %v13423_v13  ;;  %v13489_v11 = vadd.f32 %v13488_v60, %v13487_v49  ;;  %v23287_v22 = vld [vmem:[#allocation71_spill] sm:$0xff] }
0x1d44   : > { %v13426_v3 = vpop.f32.mrf.mxu0  ;;  %v13490_v61 = vpop.f32.mrf.mxu1  ;;  %v11255_v32 = vadd.f32 %v13312_v10, %v23287_v22  ;;  %v23288_v16 = vld [vmem:[#allocation87_spill] sm:$0xff] }
0x1d45   : > { %v11572_v15 = vadd.f32 %v11522_v19, %v23283_v9  ;;  %v11428_v34 = vadd.f32 %v13425_v42, %v11331_v63  ;;  %v23289_v60 = vld [vmem:[#allocation11_spill] sm:$0xff]  ;;  %v23290_v19 = vld [vmem:[#allocation64_spill] sm:$0xff]  ;;  %v23291_v42 = vld [vmem:[#allocation45_spill] sm:$0xff] }
0x1d46   : > { %v13427_v54 = vpop.f32.mrf.mxu0  ;;  %v13491_v57 = vpop.f32.mrf.mxu1  ;;  %v13315_v35 = vadd.f32 %v23289_v60, %v23288_v16 }
0x1d47   : > { %11588 = vst [vmem:[%s22034_s28 + $0x20] sm:$0xff] %v11572_v15  ;;  %v11525_v27 = vadd.f32 %v13489_v11, %v11428_v34  ;;  %v13428_v44 = vadd.f32 %v13427_v54, %v13426_v3  ;;  %v13492_v26 = vadd.f32 %v13491_v57, %v13490_v61  ;;  %v13376_v3 = vadd.f32 %v23291_v42, %v23290_v19  ;;  %v23292_v61 = vld [vmem:[#allocation66_spill] sm:$0xff] }
0x1d48   : > { %v13429_v58 = vpop.f32.mrf.mxu0  ;;  %v13493_v18 = vpop.f32.mrf.mxu1  ;;  %v23293_v54 = vld [vmem:[#allocation74_spill] sm:$0xff] }
0x1d49   : > { %v11573_v23 = vadd.f32 %v11525_v27, %v23284_v5  ;;  %v11433_v41 = vadd.f32 %v13428_v44, %v11336_v31  ;;  %v11352_v34 = vadd.f32 %v13376_v3, %v11255_v32  ;;  %v11258_v57 = vadd.f32 %v13315_v35, %v23293_v54  ;;  %v23294_v31 = vld [vmem:[#allocation35_spill] sm:$0xff]  ;;  %v23296_v5 = vld [vmem:[#allocation89_spill] sm:$0xff] }
0x1d4a   : > { %v13430_v33 = vpop.f32.mrf.mxu0  ;;  %v13494_v48 = vpop.f32.mrf.mxu1  ;;  %v13318_v27 = vadd.f32 %v23295_v55, %v23294_v31  ;;  %v23314_v31 = vld [vmem:[#allocation47_spill] sm:$0xff] }
0x1d4b   : > { %11589 = vst [vmem:[%s22034_s28 + $0x28] sm:$0xff] %v11573_v23  ;;  %v11530_v6 = vadd.f32 %v13492_v26, %v11433_v41  ;;  %v13431_v36 = vadd.f32 %v13430_v33, %v13429_v58  ;;  %v13495_v17 = vadd.f32 %v13494_v48, %v13493_v18  ;;  %v23297_v23 = vld [vmem:[#allocation38_spill] sm:$0xff]  ;;  %v23298_v26 = vld [vmem:[#allocation41_spill] sm:$0xff] }
0x1d4c   : > { %v13432_v7 = vpop.f32.mrf.mxu0  ;;  %v13496_v50 = vpop.f32.mrf.mxu1  ;;  %v13379_v41 = vadd.f32 %v23297_v23, %v23296_v5 }
0x1d4d   : > { %v11574_v1 = vadd.f32 %v11530_v6, %v23285_v52  ;;  %v11436_v2 = vadd.f32 %v13431_v36, %v11339_v47  ;;  %v13321_v6 = vadd.f32 %v23300_v56, %v23299_v24  ;;  %v11263_v52 = vadd.f32 %v13318_v27, %v23301_v14  ;;  %v23315_v27 = vld [vmem:[#allocation34_spill] sm:$0xff] }
0x1d4e   : > { %v13433_v38 = vpop.f32.mrf.mxu0  ;;  %v13497_v40 = vpop.f32.mrf.mxu1  ;;  %v23317_v56 = vld [vmem:[#allocation58_spill] sm:$0xff] }
0x1d4f   : > { %11590 = vst [vmem:[%s22034_s28 + $0x30] sm:$0xff] %v11574_v1  ;;  %v11533_v59 = vadd.f32 %v13495_v17, %v11436_v2  ;;  %v13434_v51 = vadd.f32 %v13433_v38, %v13432_v7  ;;  %v13498_v45 = vadd.f32 %v13497_v40, %v13496_v50  ;;  %v11355_v50 = vadd.f32 %v13379_v41, %v11258_v57  ;;  %v23302_v38 = vld [vmem:[#allocation69_spill] sm:$0xff]  ;;  %v23313_v57 = vld [vmem:[#allocation39_spill] sm:$0xff]  ;;  %v23316_v41 = vld [vmem:[#allocation86_spill] sm:$0xff] }
0x1d50   : > { %v13435_v13 = vpop.f32.mrf.mxu0  ;;  %v13499_v49 = vpop.f32.mrf.mxu1  ;;  %v23303_v40 = vld [vmem:[#allocation29_spill] sm:$0xff]  ;;  %v13388_v55 = vadd.f32 %v23314_v31, %v23313_v57 }
0x1d51   : > { %v11575_v20 = vadd.f32 %v11533_v59, %v23286_v4  ;;  %v11441_v12 = vadd.f32 %v13434_v51, %v11344_v30  ;;  %v13382_v30 = vadd.f32 %v23303_v40, %v23302_v38  ;;  %v23320_v40 = vld [vmem:[#allocation36_spill] sm:$0xff] }
0x1d52   : > { %v13436_v62 = vpop.f32.mrf.mxu0  ;;  %v13500_v0 = vpop.f32.mrf.mxu1 }
0x1d53   : > { %11591 = vst [vmem:[%s22034_s28 + $0x38] sm:$0xff] %v11575_v20  ;;  %v11538_v63 = vadd.f32 %v13498_v45, %v11441_v12  ;;  %v13437_v46 = vadd.f32 %v13436_v62, %v13435_v13  ;;  %v13501_v15 = vadd.f32 %v13500_v0, %v13499_v49  ;;  %v23305_v49 = vld [vmem:[#allocation30_spill] sm:$0xff]  ;;  %v11360_v12 = vadd.f32 %v13382_v30, %v11263_v52  ;;  %v23306_v45 = vld [vmem:[#allocation88_spill] sm:$0xff] }
0x1d54   : > { %v13438_v39 = vpop.f32.mrf.mxu0  ;;  %v13502_v29 = vpop.f32.mrf.mxu1  ;;  %v11266_v25 = vadd.f32 %v13321_v6, %v23305_v49  ;;  %v13324_v22 = vadd.f32 %v22002_v53, %v23306_v45  ;;  %v23307_v0 = vld [vmem:[#allocation22_spill] sm:$0xff]  ;;  %v23312_v53 = vld [vmem:[#allocation49_spill] sm:$0xff] }
0x1d55   : > { %v11576_v37 = vadd.f32 %v11538_v63, %v23292_v61  ;;  %v11444_v9 = vadd.f32 %v13437_v46, %v11347_v8  ;;  %v23308_v8 = vld [vmem:[#allocation24_spill] sm:$0xff]  ;;  %v23309_v63 = vld [vmem:[#allocation33_spill] sm:$0xff]  ;;  %v23310_v61 = vld [vmem:[#allocation78_spill] sm:$0xff] }
0x1d56   : > { %v13439_v11 = vpop.f32.mrf.mxu0  ;;  %v13503_v28 = vpop.f32.mrf.mxu1  ;;  %v13385_v16 = vadd.f32 %v23308_v8, %v23307_v0  ;;  %v23318_v6 = vld [vmem:[#allocation65_spill] sm:$0xff] }
0x1d57   : > { %11592 = vst [vmem:[%s22034_s28 + $0x40] sm:$0xff] %v11576_v37  ;;  %v11541_v44 = vadd.f32 %v13501_v15, %v11444_v9  ;;  %v13440_v43 = vadd.f32 %v13439_v11, %v13438_v39  ;;  %v13504_v48 = vadd.f32 %v13503_v28, %v13502_v29  ;;  %v11271_v37 = vadd.f32 %v13324_v22, %v23310_v61  ;;  %v23311_v9 = vld [vmem:[#allocation48_spill] sm:$0xff] }
0x1d58   : > { %v13441_v58 = vpop.f32.mrf.mxu0  ;;  %v13505_v18 = vpop.f32.mrf.mxu1  ;;  %v11363_v3 = vadd.f32 %v13385_v16, %v11266_v25  ;;  %v13327_v15 = vadd.f32 %v23312_v53, %v23311_v9 }
0x1d59   : > { %v11577_v47 = vadd.f32 %v11541_v44, %v23298_v26  ;;  %v11449_v33 = vadd.f32 %v13440_v43, %v11352_v34  ;;  %v11368_v23 = vadd.f32 %v13388_v55, %v11271_v37 }
0x1d5a   : > { %v13442_v36 = vpop.f32.mrf.mxu0  ;;  %v13506_v7 = vpop.f32.mrf.mxu1  ;;  %v11274_v26 = vadd.f32 %v13327_v15, %v23316_v41 }
0x1d5b   : > { %11593 = vst [vmem:[%s22034_s28 + $0x48] sm:$0xff] %v11577_v47  ;;  %v11546_v1 = vadd.f32 %v13504_v48, %v11449_v33  ;;  %v13443_v2 = vadd.f32 %v13442_v36, %v13441_v58  ;;  %v13507_v13 = vadd.f32 %v13506_v7, %v13505_v18  ;;  %v13391_v36 = vadd.f32 %v23318_v6, %v23317_v56  ;;  %v23319_v7 = vld [vmem:[#allocation32_spill] sm:$0xff] }
0x1d5c   : > { %v13444_v17 = vpop.f32.mrf.mxu0  ;;  %v13508_v10 = vpop.f32.mrf.mxu1 }
0x1d5d   : > { %v11578_v59 = vadd.f32 %v11546_v1, %v23304_v21  ;;  %v11452_v51 = vadd.f32 %v13443_v2, %v11355_v50 }
0x1d5e   : > { %v13445_v4 = vpop.f32.mrf.mxu0  ;;  %v13509_v20 = vpop.f32.mrf.mxu1 }
0x1d5f   : > { %11594 = vst [vmem:[%s22034_s28 + $0x50] sm:$0xff] %v11578_v59  ;;  %v11549_v32 = vadd.f32 %v13507_v13, %v11452_v51  ;;  %v13446_v62 = vadd.f32 %v13445_v4, %v13444_v17  ;;  %v13510_v42 = vadd.f32 %v13509_v20, %v13508_v10  ;;  %v11371_v17 = vadd.f32 %v13391_v36, %v11274_v26  ;;  %v23321_v13 = vld [vmem:[#allocation18_spill] sm:$0xff] }
0x1d60   : > { %v13447_v60 = vpop.f32.mrf.mxu0  ;;  %v13511_v35 = vpop.f32.mrf.mxu1 }
0x1d61   : > { %v11579_v46 = vadd.f32 %v11549_v32, %v23309_v63  ;;  %v11457_v19 = vadd.f32 %v13446_v62, %v11360_v12 }
0x1d62   : > { %v13448_v39 = vpop.f32.mrf.mxu0  ;;  %v13512_v29 = vpop.f32.mrf.mxu1 }
0x1d63   : > { %11595 = vst [vmem:[%s22034_s28 + $0x58] sm:$0xff] %v11579_v46  ;;  %v11554_v34 = vadd.f32 %v13510_v42, %v11457_v19  ;;  %v13449_v11 = vadd.f32 %v13448_v39, %v13447_v60  ;;  %v13513_v58 = vadd.f32 %v13512_v29, %v13511_v35 }
0x1d64   : > { %v13450_v28 = vpop.f32.mrf.mxu0  ;;  %v13514_v54 = vpop.f32.mrf.mxu1 }
0x1d65   : > { %v11580_v44 = vadd.f32 %v11554_v34, %v23315_v27  ;;  %v11460_v43 = vadd.f32 %v13449_v11, %v11363_v3 }
0x1d66   : > { %v13451_v18 = vpop.f32.mrf.mxu0  ;;  %v13515_v5 = vpop.f32.mrf.mxu1 }
0x1d67   : > { %11596 = vst [vmem:[%s22034_s28 + $0x60] sm:$0xff] %v11580_v44  ;;  %v11557_v47 = vadd.f32 %v13513_v58, %v11460_v43  ;;  %v13452_v33 = vadd.f32 %v13451_v18, %v13450_v28  ;;  %v13516_v52 = vadd.f32 %v13515_v5, %v13514_v54 }
0x1d68   : > { %v13453_v48 = vpop.f32.mrf.mxu0  ;;  %v13517_v24 = vpop.f32.mrf.mxu1 }
0x1d69   : > { %v11581_v50 = vadd.f32 %v11557_v47, %v23319_v7  ;;  %v11465_v14 = vadd.f32 %v13452_v33, %v11368_v23 }
0x1d6a   : > { %v13454_v1 = vpop.f32.mrf.mxu0  ;;  %v13518_v2 = vpop.f32.mrf.mxu1 }
0x1d6b   : > { %11597 = vst [vmem:[%s22034_s28 + $0x68] sm:$0xff] %v11581_v50  ;;  %v11562_v10 = vadd.f32 %v13516_v52, %v11465_v14  ;;  %v13455_v38 = vadd.f32 %v13454_v1, %v13453_v48  ;;  %v13519_v59 = vadd.f32 %v13518_v2, %v13517_v24 }
0x1d6d   : > { %v11582_v30 = vadd.f32 %v11562_v10, %v23320_v40  ;;  %v11468_v21 = vadd.f32 %v13455_v38, %v11371_v17 }
0x1d6f   : > { %11598 = vst [vmem:[%s22034_s28 + $0x70] sm:$0xff] %v11582_v30  ;;  %v11565_v51 = vadd.f32 %v13519_v59, %v11468_v21 }
0x1d71   : > { %v11583_v49 = vadd.f32 %v11565_v51, %v23321_v13 }
0x1d73   : > { %11599 = vst [vmem:[%s22034_s28 + $0x78] sm:$0xff] %v11583_v49 }
0x1d74   : > { %14547 = shalt.err (!%p14544_p3)
}
0x1d75   : > { %s14548_s9 = scalar_lea.hbm %s22130_s2, 2048  ;;  %s14552_s10 = scalar_lea.hbm %s22197_s19, 4096 }
0x1d76   : > { %p14549_p4 = scmp.ne.s32.totalorder %s22130_s2, %s14548_s9  ;;  %p14553_p9 = scmp.lt.s32.totalorder %s22130_s2, %s22197_s19 }
0x1d77   : > { %p14554_p10 = scmp.lt.s32.totalorder %s14552_s10, %s14548_s9 }
0x1d78   : > { %p14550_p7 = pnand %p14549_p4, %p14745_p5 }
0x1d79   : > { %p14555_p11 = por %p14554_p10, %p14553_p9 }
0x1d7a   : > { %p14551_p8 = pneg %p14550_p7 }
0x1d7c   : > { %p14556_p12 = pnand %p14555_p11, %p14551_p8 }
0x1d7e   : > { %14559 = shalt.err (!%p14556_p12)
}
0x1d7f   : > { %s14605_s1 = smov 128   ;;  %s14606_s26 = smov 8  }
0x1d80   : > { %13912 = dma.vmem_to_hbm [thread:$0]  (%p14745_p5), %s22132_s27, 2048, %s22130_s2, %s22138_s24, %s14605_s1, %s14605_s1, %s14606_s26  }
0x1d81 PF: > { %p13918_p13 = scmp.ge.s32.totalorder %s14594_s21, 2  ;;  %s11629_s28 = sand.u32 1, %s14582_s0  }
0x1d82   : > { %s11630_s4 = scalar_lea.sflag [#allocation4], %s11629_s28 }
0x1d83   : > { %p13915_p0 = pnand %p13918_p13, %p14749_p6 }
0x1d85   : > { %p13916_p1 = pneg %p13915_p0 }
0x1d87   : > { %14577 = dma.done.wait (%p13916_p1), %s11630_s4, 2048  }
0x1d88   : > { %14579 = vsyncadd (%p13916_p1), %s11630_s4, 4294965248  ;;  %s23323_s21 = sld [smem:[#allocation7_spill]]  ;;  %s23326_s0 = smov %s14586_s30 }
0x1d89   : > { %s23324_s9 = sld [smem:[#allocation6_spill]] }
0x1d8a   : > { %s23325_s20 = sld [smem:[#allocation8_spill]] }
0x1d8e   : > { %p29_p2 = scmp.ge.s32.totalorder %s23323_s21, 4  }
0x1d8f   : > { %s23327_s30 = smov %s23324_s9 }
0x1d90   :  { %31 = sbr.rel (!%p29_p2) target bundleno = 12 (0xc), region = 131 }
0x1d95   :  { %11635 = vsyncpa [#allocation4], 1 }
0x1d96   :  { %11637 = vsyncpa [#allocation4 + $0x1], 1 }

</bundles_post_ra>
